<compile_context>
chip_gen: v7x
topology: tpu7x:2x2x1
jax: 0.10.0
libtpu: 0.0.40
codegen_flags: <defaults>
</compile_context>

<pallas_src>
import functools

import jax
import jax.numpy as jnp
from jax.experimental import pallas as pl
from jax.experimental.pallas import tpu as pltpu


def _round_up(x, m):
    return (x + m - 1) // m * m


# ---------------------------------------------------------------- matmul (+bias+ReLU)
def _matmul_bias_kernel(x_ref, w_ref, b_ref, o_ref, *, relu):
    acc = jnp.dot(x_ref[...], w_ref[...], preferred_element_type=jnp.float32)
    acc = acc + b_ref[...]
    if relu:
        acc = jnp.maximum(acc, 0.0)
    o_ref[...] = acc.astype(o_ref.dtype)


def matmul_bias(x, w, b, *, relu, tm=512):
    """(M,K) @ (K,N) + b with optional fused ReLU.  M tiled; K, N whole per block."""
    m, k = x.shape
    n = w.shape[1]
    tm = min(tm, _round_up(m, 8))          # small layers: single block, zero padding
    mp = _round_up(m, tm)
    if mp != m:
        x = jnp.pad(x, ((0, mp - m), (0, 0)))          # zero rows; sliced off below
    out = pl.pallas_call(
        functools.partial(_matmul_bias_kernel, relu=relu),
        out_shape=jax.ShapeDtypeStruct((mp, n), jnp.float32),
        grid=(mp // tm,),
        in_specs=[
            pl.BlockSpec((tm, k), lambda i: (i, 0)),
            pl.BlockSpec((k, n), lambda i: (0, 0)),     # grid-invariant weights
            pl.BlockSpec((1, n), lambda i: (0, 0)),
        ],
        out_specs=pl.BlockSpec((tm, n), lambda i: (i, 0)),
        compiler_params=pltpu.CompilerParams(
            dimension_semantics=("parallel",)),
    )(x, w, b.reshape(1, n))
    return out[:m] if mp != m else out


# ------------------------------------------------------------------------------ conv
def conv3x3(x_nhwc, w, b, *, relu=True, lane_pad=True):
    """3x3 valid conv, stride 1: wrapper-side im2col + one fused MXU matmul.

    If the input carries more channels than the weights (zero lane padding from the
    previous layer), the weight Cin is zero-padded to match (exact).  If lane_pad and
    Cout < 128, weights/bias Cout are zero-padded to 128 for lane-dense stores (exact).
    """
    bsz, h, wd, cx = x_nhwc.shape
    _, _, cw, cout = w.shape
    if cx > cw:
        w = jnp.pad(w, ((0, 0), (0, 0), (0, cx - cw), (0, 0)))
    if lane_pad and cout < 128:
        pad = 128 - cout
        w = jnp.pad(w, ((0, 0), (0, 0), (0, 0), (0, pad)))
        b = jnp.pad(b, ((0, pad),))
        cout = 128
    cin = cx
    ho, wo = h - 2, wd - 2

    # im2col: 9 shifted views concatenated on the channel (lane) axis -> (M, 9*Cin).
    cols = [x_nhwc[:, dh:dh + ho, dw:dw + wo, :]
            for dh in range(3) for dw in range(3)]
    lhs = jnp.concatenate(cols, axis=-1).reshape(bsz * ho * wo, 9 * cin)
    rhs = w.reshape(9 * cin, cout)                      # (dh, dw, cin) order matches

    out = matmul_bias(lhs, rhs, b, relu=relu)
    return out.reshape(bsz, ho, wo, cout)


# --------------------------------------------------------------------------- maxpool
def _maxpool2x2_kernel(x_ref, o_ref, *, c):
    x = x_ref[...]                                      # (1, H, Wh, 2C)
    m = jnp.maximum(x[..., :c], x[..., c:])             # W pairs (lane-aligned halves)
    _, hh, wh, _ = o_ref.shape
    m = m.reshape(1, hh, 2, wh, c)                      # regroups leading dims only
    o_ref[...] = jnp.maximum(m[:, :, 0], m[:, :, 1])    # H pairs (leading-dim halves)


def maxpool2x2(x_nhwc):
    bsz, h, wd, c = x_nhwc.shape
    hh, wh = h // 2, wd // 2
    x_pairs = x_nhwc.reshape(bsz, h, wh, 2 * c)         # free row-major regroup
    return pl.pallas_call(
        functools.partial(_maxpool2x2_kernel, c=c),
        out_shape=jax.ShapeDtypeStruct((bsz, hh, wh, c), x_nhwc.dtype),
        grid=(bsz,),
        in_specs=[pl.BlockSpec((1, h, wh, 2 * c), lambda i: (i, 0, 0, 0))],
        out_specs=pl.BlockSpec((1, hh, wh, c), lambda i: (i, 0, 0, 0)),
        compiler_params=pltpu.CompilerParams(
            dimension_semantics=("parallel",)),
    )(x_pairs)


# ----------------------------------------------------- fused fc1+ReLU+fc2+log_softmax
def _head_kernel(x_ref, w1_ref, b1_ref, w2_ref, b2_ref, o_ref):
    h = jnp.dot(x_ref[...], w1_ref[...], preferred_element_type=jnp.float32)
    h = jnp.maximum(h + b1_ref[...], 0.0)
    z = jnp.dot(h, w2_ref[...], preferred_element_type=jnp.float32) + b2_ref[...]
    zmax = jnp.max(z, axis=-1, keepdims=True)
    s = z - zmax
    lse = jnp.log(jnp.sum(jnp.exp(s), axis=-1, keepdims=True))
    o_ref[...] = (s - lse).astype(o_ref.dtype)


def mlp_head(x, w1, b1, w2, b2):
    bsz = x.shape[0]
    n1, n2 = w1.shape[1], w2.shape[1]
    return pl.pallas_call(
        _head_kernel,
        out_shape=jax.ShapeDtypeStruct((bsz, n2), jnp.float32),
    )(x, w1, b1.reshape(1, n1), w2, b2.reshape(1, n2))


# ------------------------------------------------------------------------- parameters
def init_params(key):
    keys = jax.random.split(key, 12)

    def conv_init(kw, kb, cin, cout):
        scale = (2.0 / (9 * cin)) ** 0.5
        w = jax.random.normal(kw, (3, 3, cin, cout), jnp.float32) * scale
        b = jax.random.normal(kb, (cout,), jnp.float32) * 0.01
        return w, b

    p = {
        "conv1": conv_init(keys[0], keys[1], 1, 32),
        "conv2": conv_init(keys[2], keys[3], 32, 64),
        "conv3": conv_init(keys[4], keys[5], 64, 128),
        "conv4": conv_init(keys[6], keys[7], 128, 256),
    }
    # fc1 generated in PyTorch layout (out=50, in=4096 flattened as (C,H,W)), then the
    # input axis is permuted to this implementation's NHWC flatten order (H,W,C).
    w_fc1_pt = jax.random.normal(keys[8], (50, 4096), jnp.float32) * (2.0 / 4096) ** 0.5
    w_fc1 = w_fc1_pt.reshape(50, 256, 4, 4).transpose(2, 3, 1, 0).reshape(4096, 50)
    b_fc1 = jax.random.normal(keys[9], (50,), jnp.float32) * 0.01
    w_fc2 = jax.random.normal(keys[10], (50, 10), jnp.float32) * (2.0 / 50) ** 0.5
    b_fc2 = jax.random.normal(keys[11], (10,), jnp.float32) * 0.01
    p["fc1"] = (w_fc1, b_fc1)
    p["fc2"] = (w_fc2, b_fc2)
    return p


# ----------------------------------------------------------------------------- forward
def session5_model_forward(x_nchw, params):
    """x_nchw: (B, 1, 28, 28) float32 (PyTorch NCHW).  Returns (B, 10) log-probs."""
    x = jnp.transpose(x_nchw, (0, 2, 3, 1))              # NCHW -> NHWC, once
    w1, b1 = params["conv1"]
    w2, b2 = params["conv2"]
    w3, b3 = params["conv3"]
    w4, b4 = params["conv4"]
    wf1, bf1 = params["fc1"]
    wf2, bf2 = params["fc2"]

    x = conv3x3(x, w1, b1, relu=True)                    # (B,26,26,128) [real Cout 32]
    x = conv3x3(x, w2, b2, relu=True)                    # (B,24,24,128) [real Cout 64]
    x = maxpool2x2(x)                                    # (B,12,12,128)  pool∘relu == relu∘pool
    x = conv3x3(x, w3, b3, relu=True)                    # (B,10,10,128)
    x = conv3x3(x, w4, b4, relu=True)                    # (B, 8, 8,256)
    x = maxpool2x2(x)                                    # (B, 4, 4,256)

    x = x.reshape(x.shape[0], -1)                        # (B,4096) NHWC flatten (fc1 rows permuted)
    return mlp_head(x, wf1, bf1, wf2, bf2)               # fc1+ReLU+fc2+log_softmax fused


# -------------------------------------------------------------------------------- main
if __name__ == "__main__":
    key = jax.random.PRNGKey(0)
    kx, kp = jax.random.split(key)

    # Architecture implies 28x28x1 input (fc1 expects 4096 = 256*4*4).
    x = jax.random.normal(kx, (2, 1, 28, 28), jnp.float32)
    params = init_params(kp)

    fwd = jax.jit(session5_model_forward)
    out = jax.block_until_ready(fwd(x, params))

    assert out.shape == (2, 10), out.shape
    # log-softmax rows must exponentiate-sum to 1
    assert jnp.allclose(jnp.exp(out).sum(axis=-1), 1.0, atol=1e-4)
    print("KERNEL_OK")
</pallas_src>

<mosaic_0001>
module attributes {stable_mosaic.version = 11 : i64} {
  func.func @_matmul_bias_kernel(%arg0: i32, %arg1: memref<512x9xf32, #tpu.memory_space<vmem>>, %arg2: memref<9x128xf32, #tpu.memory_space<vmem>>, %arg3: memref<1x128xf32, #tpu.memory_space<vmem>>, %arg4: memref<512x128xf32, #tpu.memory_space<vmem>>) attributes {dimension_semantics = [#tpu.dimension_semantics<parallel>], iteration_bounds = array<i64: 3>, scalar_prefetch = 0 : i64, scratch_operands = 0 : i64, tpu.core_type = #tpu.core_type<tc>, window_params = [{transform_indices = @transform_0, window_bounds = array<i64: 512, 9>}, {pipeline_mode = #tpu.pipeline_mode<synchronous>, transform_indices = @transform_1, window_bounds = array<i64: 9, 128>}, {pipeline_mode = #tpu.pipeline_mode<synchronous>, transform_indices = @transform_2, window_bounds = array<i64: 1, 128>}, {transform_indices = @transform_3, window_bounds = array<i64: 512, 128>}]} {
    %c0 = arith.constant 0 : index
    %c0_0 = arith.constant 0 : index
    %0 = vector.load %arg1[%c0, %c0_0] : memref<512x9xf32, #tpu.memory_space<vmem>>, vector<512x9xf32>
    %c0_1 = arith.constant 0 : index
    %c0_2 = arith.constant 0 : index
    %1 = vector.load %arg2[%c0_1, %c0_2] : memref<9x128xf32, #tpu.memory_space<vmem>>, vector<9x128xf32>
    %cst = arith.constant dense<0.000000e+00> : vector<512x128xf32>
    %2 = tpu.matmul %0, %1, %cst {dimension_numbers = #tpu.dot_dimension_numbers<[1], [0], [0], [1], [0, 0, 1, 1], [], []>} : vector<512x9xf32>, vector<9x128xf32>, vector<512x128xf32> -> vector<512x128xf32>
    %c0_3 = arith.constant 0 : index
    %c0_4 = arith.constant 0 : index
    %3 = vector.load %arg3[%c0_3, %c0_4] : memref<1x128xf32, #tpu.memory_space<vmem>>, vector<1x128xf32>
    %4 = vector.broadcast %3 : vector<1x128xf32> to vector<512x128xf32>
    %5 = arith.addf %2, %4 : vector<512x128xf32>
    %cst_5 = arith.constant 0.000000e+00 : f32
    %6 = vector.broadcast %cst_5 : f32 to vector<512x128xf32>
    %7 = arith.maximumf %5, %6 : vector<512x128xf32>
    %c0_6 = arith.constant 0 : index
    %c0_7 = arith.constant 0 : index
    %8 = vector.load %arg4[%c0_6, %c0_7] : memref<512x128xf32, #tpu.memory_space<vmem>>, vector<512x128xf32>
    tpu.vector_store %arg4[%c0_6, %c0_7], %7 {strides = array<i32>} : memref<512x128xf32, #tpu.memory_space<vmem>>, vector<512x128xf32>,
    return
  }
  func.func @transform_0(%arg0: i32) -> (i32, i32) {
    %c0_i32 = arith.constant 0 : i32
    %c0_i32_0 = arith.constant 0 : i32
    return %arg0, %c0_i32 : i32, i32
  }
  func.func @transform_1(%arg0: i32) -> (i32, i32) {
    %c0_i32 = arith.constant 0 : i32
    %c0_i32_0 = arith.constant 0 : i32
    %c0_i32_1 = arith.constant 0 : i32
    return %c0_i32, %c0_i32_0 : i32, i32
  }
  func.func @transform_2(%arg0: i32) -> (i32, i32) {
    %c0_i32 = arith.constant 0 : i32
    %c0_i32_0 = arith.constant 0 : i32
    %c0_i32_1 = arith.constant 0 : i32
    return %c0_i32, %c0_i32_0 : i32, i32
  }
  func.func @transform_3(%arg0: i32) -> (i32, i32) {
    %c0_i32 = arith.constant 0 : i32
    %c0_i32_0 = arith.constant 0 : i32
    return %arg0, %c0_i32 : i32, i32
  }
}

module attributes {stable_mosaic.version = 11 : i64} {
  func.func @_matmul_bias_kernel(%arg0: i32, %arg1: memref<512x1152xf32, #tpu.memory_space<vmem>>, %arg2: memref<1152x128xf32, #tpu.memory_space<vmem>>, %arg3: memref<1x128xf32, #tpu.memory_space<vmem>>, %arg4: memref<512x128xf32, #tpu.memory_space<vmem>>) attributes {dimension_semantics = [#tpu.dimension_semantics<parallel>], iteration_bounds = array<i64: 3>, scalar_prefetch = 0 : i64, scratch_operands = 0 : i64, tpu.core_type = #tpu.core_type<tc>, window_params = [{transform_indices = @transform_0, window_bounds = array<i64: 512, 1152>}, {pipeline_mode = #tpu.pipeline_mode<synchronous>, transform_indices = @transform_1, window_bounds = array<i64: 1152, 128>}, {pipeline_mode = #tpu.pipeline_mode<synchronous>, transform_indices = @transform_2, window_bounds = array<i64: 1, 128>}, {transform_indices = @transform_3, window_bounds = array<i64: 512, 128>}]} {
    %c0 = arith.constant 0 : index
    %c0_0 = arith.constant 0 : index
    %0 = vector.load %arg1[%c0, %c0_0] : memref<512x1152xf32, #tpu.memory_space<vmem>>, vector<512x1152xf32>
    %c0_1 = arith.constant 0 : index
    %c0_2 = arith.constant 0 : index
    %1 = vector.load %arg2[%c0_1, %c0_2] : memref<1152x128xf32, #tpu.memory_space<vmem>>, vector<1152x128xf32>
    %cst = arith.constant dense<0.000000e+00> : vector<512x128xf32>
    %2 = tpu.matmul %0, %1, %cst {dimension_numbers = #tpu.dot_dimension_numbers<[1], [0], [0], [1], [0, 0, 1, 1], [], []>} : vector<512x1152xf32>, vector<1152x128xf32>, vector<512x128xf32> -> vector<512x128xf32>
    %c0_3 = arith.constant 0 : index
    %c0_4 = arith.constant 0 : index
    %3 = vector.load %arg3[%c0_3, %c0_4] : memref<1x128xf32, #tpu.memory_space<vmem>>, vector<1x128xf32>
    %4 = vector.broadcast %3 : vector<1x128xf32> to vector<512x128xf32>
    %5 = arith.addf %2, %4 : vector<512x128xf32>
    %cst_5 = arith.constant 0.000000e+00 : f32
    %6 = vector.broadcast %cst_5 : f32 to vector<512x128xf32>
    %7 = arith.maximumf %5, %6 : vector<512x128xf32>
    %c0_6 = arith.constant 0 : index
    %c0_7 = arith.constant 0 : index
    %8 = vector.load %arg4[%c0_6, %c0_7] : memref<512x128xf32, #tpu.memory_space<vmem>>, vector<512x128xf32>
    tpu.vector_store %arg4[%c0_6, %c0_7], %7 {strides = array<i32>} : memref<512x128xf32, #tpu.memory_space<vmem>>, vector<512x128xf32>,
    return
  }
  func.func @transform_0(%arg0: i32) -> (i32, i32) {
    %c0_i32 = arith.constant 0 : i32
    %c0_i32_0 = arith.constant 0 : i32
    return %arg0, %c0_i32 : i32, i32
  }
  func.func @transform_1(%arg0: i32) -> (i32, i32) {
    %c0_i32 = arith.constant 0 : i32
    %c0_i32_0 = arith.constant 0 : i32
    %c0_i32_1 = arith.constant 0 : i32
    return %c0_i32, %c0_i32_0 : i32, i32
  }
  func.func @transform_2(%arg0: i32) -> (i32, i32) {
    %c0_i32 = arith.constant 0 : i32
    %c0_i32_0 = arith.constant 0 : i32
    %c0_i32_1 = arith.constant 0 : i32
    return %c0_i32, %c0_i32_0 : i32, i32
  }
  func.func @transform_3(%arg0: i32) -> (i32, i32) {
    %c0_i32 = arith.constant 0 : i32
    %c0_i32_0 = arith.constant 0 : i32
    return %arg0, %c0_i32 : i32, i32
  }
}

module attributes {stable_mosaic.version = 11 : i64} {
  func.func @_maxpool2x2_kernel(%arg0: i32, %arg1: memref<1x24x12x256xf32, #tpu.memory_space<vmem>>, %arg2: memref<1x12x12x128xf32, #tpu.memory_space<vmem>>) attributes {dimension_semantics = [#tpu.dimension_semantics<parallel>], iteration_bounds = array<i64: 2>, scalar_prefetch = 0 : i64, scratch_operands = 0 : i64, tpu.core_type = #tpu.core_type<tc>, window_params = [{transform_indices = @transform_0, window_bounds = array<i64: 1, 24, 12, 256>}, {transform_indices = @transform_1, window_bounds = array<i64: 1, 12, 12, 128>}]} {
    %c0 = arith.constant 0 : index
    %c0_0 = arith.constant 0 : index
    %c0_1 = arith.constant 0 : index
    %c0_2 = arith.constant 0 : index
    %0 = vector.load %arg1[%c0, %c0_0, %c0_1, %c0_2] : memref<1x24x12x256xf32, #tpu.memory_space<vmem>>, vector<1x24x12x256xf32>
    %1 = vector.extract_strided_slice %0 {offsets = [0, 0, 0, 0], sizes = [1, 24, 12, 128], strides = [1, 1, 1, 1]} : vector<1x24x12x256xf32> to vector<1x24x12x128xf32>
    %2 = vector.extract_strided_slice %0 {offsets = [0, 0, 0, 128], sizes = [1, 24, 12, 128], strides = [1, 1, 1, 1]} : vector<1x24x12x256xf32> to vector<1x24x12x128xf32>
    %3 = arith.maximumf %1, %2 : vector<1x24x12x128xf32>
    %4 = vector.shape_cast %3 : vector<1x24x12x128xf32> to vector<1x12x2x12x128xf32>
    %5 = vector.extract_strided_slice %4 {offsets = [0, 0, 0, 0, 0], sizes = [1, 12, 1, 12, 128], strides = [1, 1, 1, 1, 1]} : vector<1x12x2x12x128xf32> to vector<1x12x1x12x128xf32>
    %6 = vector.shape_cast %5 : vector<1x12x1x12x128xf32> to vector<1x12x12x128xf32>
    %7 = vector.extract_strided_slice %4 {offsets = [0, 0, 1, 0, 0], sizes = [1, 12, 1, 12, 128], strides = [1, 1, 1, 1, 1]} : vector<1x12x2x12x128xf32> to vector<1x12x1x12x128xf32>
    %8 = vector.shape_cast %7 : vector<1x12x1x12x128xf32> to vector<1x12x12x128xf32>
    %9 = arith.maximumf %6, %8 : vector<1x12x12x128xf32>
    %c0_3 = arith.constant 0 : index
    %c0_4 = arith.constant 0 : index
    %c0_5 = arith.constant 0 : index
    %c0_6 = arith.constant 0 : index
    %10 = vector.load %arg2[%c0_3, %c0_4, %c0_5, %c0_6] : memref<1x12x12x128xf32, #tpu.memory_space<vmem>>, vector<1x12x12x128xf32>
    tpu.vector_store %arg2[%c0_3, %c0_4, %c0_5, %c0_6], %9 {strides = array<i32>} : memref<1x12x12x128xf32, #tpu.memory_space<vmem>>, vector<1x12x12x128xf32>,
    return
  }
  func.func @transform_0(%arg0: i32) -> (i32, i32, i32, i32) {
    %c0_i32 = arith.constant 0 : i32
    %c0_i32_0 = arith.constant 0 : i32
    %c0_i32_1 = arith.constant 0 : i32
    %c0_i32_2 = arith.constant 0 : i32
    return %arg0, %c0_i32, %c0_i32_0, %c0_i32_1 : i32, i32, i32, i32
  }
  func.func @transform_1(%arg0: i32) -> (i32, i32, i32, i32) {
    %c0_i32 = arith.constant 0 : i32
    %c0_i32_0 = arith.constant 0 : i32
    %c0_i32_1 = arith.constant 0 : i32
    %c0_i32_2 = arith.constant 0 : i32
    return %arg0, %c0_i32, %c0_i32_0, %c0_i32_1 : i32, i32, i32, i32
  }
}

module attributes {stable_mosaic.version = 11 : i64} {
  func.func @_matmul_bias_kernel(%arg0: i32, %arg1: memref<200x1152xf32, #tpu.memory_space<vmem>>, %arg2: memref<1152x128xf32, #tpu.memory_space<vmem>>, %arg3: memref<1x128xf32, #tpu.memory_space<vmem>>, %arg4: memref<200x128xf32, #tpu.memory_space<vmem>>) attributes {dimension_semantics = [#tpu.dimension_semantics<parallel>], iteration_bounds = array<i64: 1>, scalar_prefetch = 0 : i64, scratch_operands = 0 : i64, tpu.core_type = #tpu.core_type<tc>, window_params = [{transform_indices = @transform_0, window_bounds = array<i64: 200, 1152>}, {pipeline_mode = #tpu.pipeline_mode<synchronous>, transform_indices = @transform_1, window_bounds = array<i64: 1152, 128>}, {pipeline_mode = #tpu.pipeline_mode<synchronous>, transform_indices = @transform_2, window_bounds = array<i64: 1, 128>}, {transform_indices = @transform_3, window_bounds = array<i64: 200, 128>}]} {
    %c0 = arith.constant 0 : index
    %c0_0 = arith.constant 0 : index
    %0 = vector.load %arg1[%c0, %c0_0] : memref<200x1152xf32, #tpu.memory_space<vmem>>, vector<200x1152xf32>
    %c0_1 = arith.constant 0 : index
    %c0_2 = arith.constant 0 : index
    %1 = vector.load %arg2[%c0_1, %c0_2] : memref<1152x128xf32, #tpu.memory_space<vmem>>, vector<1152x128xf32>
    %cst = arith.constant dense<0.000000e+00> : vector<200x128xf32>
    %2 = tpu.matmul %0, %1, %cst {dimension_numbers = #tpu.dot_dimension_numbers<[1], [0], [0], [1], [0, 0, 1, 1], [], []>} : vector<200x1152xf32>, vector<1152x128xf32>, vector<200x128xf32> -> vector<200x128xf32>
    %c0_3 = arith.constant 0 : index
    %c0_4 = arith.constant 0 : index
    %3 = vector.load %arg3[%c0_3, %c0_4] : memref<1x128xf32, #tpu.memory_space<vmem>>, vector<1x128xf32>
    %4 = vector.broadcast %3 : vector<1x128xf32> to vector<200x128xf32>
    %5 = arith.addf %2, %4 : vector<200x128xf32>
    %cst_5 = arith.constant 0.000000e+00 : f32
    %6 = vector.broadcast %cst_5 : f32 to vector<200x128xf32>
    %7 = arith.maximumf %5, %6 : vector<200x128xf32>
    %c0_6 = arith.constant 0 : index
    %c0_7 = arith.constant 0 : index
    %8 = vector.load %arg4[%c0_6, %c0_7] : memref<200x128xf32, #tpu.memory_space<vmem>>, vector<200x128xf32>
    tpu.vector_store %arg4[%c0_6, %c0_7], %7 {strides = array<i32>} : memref<200x128xf32, #tpu.memory_space<vmem>>, vector<200x128xf32>,
    return
  }
  func.func @transform_0(%arg0: i32) -> (i32, i32) {
    %c0_i32 = arith.constant 0 : i32
    %c0_i32_0 = arith.constant 0 : i32
    return %arg0, %c0_i32 : i32, i32
  }
  func.func @transform_1(%arg0: i32) -> (i32, i32) {
    %c0_i32 = arith.constant 0 : i32
    %c0_i32_0 = arith.constant 0 : i32
    %c0_i32_1 = arith.constant 0 : i32
    return %c0_i32, %c0_i32_0 : i32, i32
  }
  func.func @transform_2(%arg0: i32) -> (i32, i32) {
    %c0_i32 = arith.constant 0 : i32
    %c0_i32_0 = arith.constant 0 : i32
    %c0_i32_1 = arith.constant 0 : i32
    return %c0_i32, %c0_i32_0 : i32, i32
  }
  func.func @transform_3(%arg0: i32) -> (i32, i32) {
    %c0_i32 = arith.constant 0 : i32
    %c0_i32_0 = arith.constant 0 : i32
    return %arg0, %c0_i32 : i32, i32
  }
}

module attributes {stable_mosaic.version = 11 : i64} {
  func.func @_matmul_bias_kernel(%arg0: i32, %arg1: memref<128x1152xf32, #tpu.memory_space<vmem>>, %arg2: memref<1152x256xf32, #tpu.memory_space<vmem>>, %arg3: memref<1x256xf32, #tpu.memory_space<vmem>>, %arg4: memref<128x256xf32, #tpu.memory_space<vmem>>) attributes {dimension_semantics = [#tpu.dimension_semantics<parallel>], iteration_bounds = array<i64: 1>, scalar_prefetch = 0 : i64, scratch_operands = 0 : i64, tpu.core_type = #tpu.core_type<tc>, window_params = [{transform_indices = @transform_0, window_bounds = array<i64: 128, 1152>}, {pipeline_mode = #tpu.pipeline_mode<synchronous>, transform_indices = @transform_1, window_bounds = array<i64: 1152, 256>}, {pipeline_mode = #tpu.pipeline_mode<synchronous>, transform_indices = @transform_2, window_bounds = array<i64: 1, 256>}, {transform_indices = @transform_3, window_bounds = array<i64: 128, 256>}]} {
    %c0 = arith.constant 0 : index
    %c0_0 = arith.constant 0 : index
    %0 = vector.load %arg1[%c0, %c0_0] : memref<128x1152xf32, #tpu.memory_space<vmem>>, vector<128x1152xf32>
    %c0_1 = arith.constant 0 : index
    %c0_2 = arith.constant 0 : index
    %1 = vector.load %arg2[%c0_1, %c0_2] : memref<1152x256xf32, #tpu.memory_space<vmem>>, vector<1152x256xf32>
    %cst = arith.constant dense<0.000000e+00> : vector<128x256xf32>
    %2 = tpu.matmul %0, %1, %cst {dimension_numbers = #tpu.dot_dimension_numbers<[1], [0], [0], [1], [0, 0, 1, 1], [], []>} : vector<128x1152xf32>, vector<1152x256xf32>, vector<128x256xf32> -> vector<128x256xf32>
    %c0_3 = arith.constant 0 : index
    %c0_4 = arith.constant 0 : index
    %3 = vector.load %arg3[%c0_3, %c0_4] : memref<1x256xf32, #tpu.memory_space<vmem>>, vector<1x256xf32>
    %4 = vector.broadcast %3 : vector<1x256xf32> to vector<128x256xf32>
    %5 = arith.addf %2, %4 : vector<128x256xf32>
    %cst_5 = arith.constant 0.000000e+00 : f32
    %6 = vector.broadcast %cst_5 : f32 to vector<128x256xf32>
    %7 = arith.maximumf %5, %6 : vector<128x256xf32>
    %c0_6 = arith.constant 0 : index
    %c0_7 = arith.constant 0 : index
    %8 = vector.load %arg4[%c0_6, %c0_7] : memref<128x256xf32, #tpu.memory_space<vmem>>, vector<128x256xf32>
    tpu.vector_store %arg4[%c0_6, %c0_7], %7 {strides = array<i32>} : memref<128x256xf32, #tpu.memory_space<vmem>>, vector<128x256xf32>,
    return
  }
  func.func @transform_0(%arg0: i32) -> (i32, i32) {
    %c0_i32 = arith.constant 0 : i32
    %c0_i32_0 = arith.constant 0 : i32
    return %arg0, %c0_i32 : i32, i32
  }
  func.func @transform_1(%arg0: i32) -> (i32, i32) {
    %c0_i32 = arith.constant 0 : i32
    %c0_i32_0 = arith.constant 0 : i32
    %c0_i32_1 = arith.constant 0 : i32
    return %c0_i32, %c0_i32_0 : i32, i32
  }
  func.func @transform_2(%arg0: i32) -> (i32, i32) {
    %c0_i32 = arith.constant 0 : i32
    %c0_i32_0 = arith.constant 0 : i32
    %c0_i32_1 = arith.constant 0 : i32
    return %c0_i32, %c0_i32_0 : i32, i32
  }
  func.func @transform_3(%arg0: i32) -> (i32, i32) {
    %c0_i32 = arith.constant 0 : i32
    %c0_i32_0 = arith.constant 0 : i32
    return %arg0, %c0_i32 : i32, i32
  }
}

module attributes {stable_mosaic.version = 11 : i64} {
  func.func @_maxpool2x2_kernel(%arg0: i32, %arg1: memref<1x8x4x512xf32, #tpu.memory_space<vmem>>, %arg2: memref<1x4x4x256xf32, #tpu.memory_space<vmem>>) attributes {dimension_semantics = [#tpu.dimension_semantics<parallel>], iteration_bounds = array<i64: 2>, scalar_prefetch = 0 : i64, scratch_operands = 0 : i64, tpu.core_type = #tpu.core_type<tc>, window_params = [{transform_indices = @transform_0, window_bounds = array<i64: 1, 8, 4, 512>}, {transform_indices = @transform_1, window_bounds = array<i64: 1, 4, 4, 256>}]} {
    %c0 = arith.constant 0 : index
    %c0_0 = arith.constant 0 : index
    %c0_1 = arith.constant 0 : index
    %c0_2 = arith.constant 0 : index
    %0 = vector.load %arg1[%c0, %c0_0, %c0_1, %c0_2] : memref<1x8x4x512xf32, #tpu.memory_space<vmem>>, vector<1x8x4x512xf32>
    %1 = vector.extract_strided_slice %0 {offsets = [0, 0, 0, 0], sizes = [1, 8, 4, 256], strides = [1, 1, 1, 1]} : vector<1x8x4x512xf32> to vector<1x8x4x256xf32>
    %2 = vector.extract_strided_slice %0 {offsets = [0, 0, 0, 256], sizes = [1, 8, 4, 256], strides = [1, 1, 1, 1]} : vector<1x8x4x512xf32> to vector<1x8x4x256xf32>
    %3 = arith.maximumf %1, %2 : vector<1x8x4x256xf32>
    %4 = vector.shape_cast %3 : vector<1x8x4x256xf32> to vector<1x4x2x4x256xf32>
    %5 = vector.extract_strided_slice %4 {offsets = [0, 0, 0, 0, 0], sizes = [1, 4, 1, 4, 256], strides = [1, 1, 1, 1, 1]} : vector<1x4x2x4x256xf32> to vector<1x4x1x4x256xf32>
    %6 = vector.shape_cast %5 : vector<1x4x1x4x256xf32> to vector<1x4x4x256xf32>
    %7 = vector.extract_strided_slice %4 {offsets = [0, 0, 1, 0, 0], sizes = [1, 4, 1, 4, 256], strides = [1, 1, 1, 1, 1]} : vector<1x4x2x4x256xf32> to vector<1x4x1x4x256xf32>
    %8 = vector.shape_cast %7 : vector<1x4x1x4x256xf32> to vector<1x4x4x256xf32>
    %9 = arith.maximumf %6, %8 : vector<1x4x4x256xf32>
    %c0_3 = arith.constant 0 : index
    %c0_4 = arith.constant 0 : index
    %c0_5 = arith.constant 0 : index
    %c0_6 = arith.constant 0 : index
    %10 = vector.load %arg2[%c0_3, %c0_4, %c0_5, %c0_6] : memref<1x4x4x256xf32, #tpu.memory_space<vmem>>, vector<1x4x4x256xf32>
    tpu.vector_store %arg2[%c0_3, %c0_4, %c0_5, %c0_6], %9 {strides = array<i32>} : memref<1x4x4x256xf32, #tpu.memory_space<vmem>>, vector<1x4x4x256xf32>,
    return
  }
  func.func @transform_0(%arg0: i32) -> (i32, i32, i32, i32) {
    %c0_i32 = arith.constant 0 : i32
    %c0_i32_0 = arith.constant 0 : i32
    %c0_i32_1 = arith.constant 0 : i32
    %c0_i32_2 = arith.constant 0 : i32
    return %arg0, %c0_i32, %c0_i32_0, %c0_i32_1 : i32, i32, i32, i32
  }
  func.func @transform_1(%arg0: i32) -> (i32, i32, i32, i32) {
    %c0_i32 = arith.constant 0 : i32
    %c0_i32_0 = arith.constant 0 : i32
    %c0_i32_1 = arith.constant 0 : i32
    %c0_i32_2 = arith.constant 0 : i32
    return %arg0, %c0_i32, %c0_i32_0, %c0_i32_1 : i32, i32, i32, i32
  }
}

module attributes {stable_mosaic.version = 11 : i64} {
  func.func @_head_kernel(%arg0: memref<2x4096xf32, #tpu.memory_space<vmem>>, %arg1: memref<4096x50xf32, #tpu.memory_space<vmem>>, %arg2: memref<1x50xf32, #tpu.memory_space<vmem>>, %arg3: memref<50x10xf32, #tpu.memory_space<vmem>>, %arg4: memref<1x10xf32, #tpu.memory_space<vmem>>, %arg5: memref<2x10xf32, #tpu.memory_space<vmem>>) attributes {dimension_semantics = [], scalar_prefetch = 0 : i64, scratch_operands = 0 : i64, tpu.core_type = #tpu.core_type<tc>} {
    %c0 = arith.constant 0 : index
    %c0_0 = arith.constant 0 : index
    %0 = vector.load %arg0[%c0, %c0_0] : memref<2x4096xf32, #tpu.memory_space<vmem>>, vector<2x4096xf32>
    %c0_1 = arith.constant 0 : index
    %c0_2 = arith.constant 0 : index
    %1 = vector.load %arg1[%c0_1, %c0_2] : memref<4096x50xf32, #tpu.memory_space<vmem>>, vector<4096x50xf32>
    %cst = arith.constant dense<0.000000e+00> : vector<2x50xf32>
    %2 = tpu.matmul %0, %1, %cst {dimension_numbers = #tpu.dot_dimension_numbers<[1], [0], [0], [1], [0, 0, 1, 1], [], []>} : vector<2x4096xf32>, vector<4096x50xf32>, vector<2x50xf32> -> vector<2x50xf32>
    %c0_3 = arith.constant 0 : index
    %c0_4 = arith.constant 0 : index
    %3 = vector.load %arg2[%c0_3, %c0_4] : memref<1x50xf32, #tpu.memory_space<vmem>>, vector<1x50xf32>
    %4 = vector.broadcast %3 : vector<1x50xf32> to vector<2x50xf32>
    %5 = arith.addf %2, %4 : vector<2x50xf32>
    %cst_5 = arith.constant 0.000000e+00 : f32
    %6 = vector.broadcast %cst_5 : f32 to vector<2x50xf32>
    %7 = arith.maximumf %5, %6 : vector<2x50xf32>
    %c0_6 = arith.constant 0 : index
    %c0_7 = arith.constant 0 : index
    %8 = vector.load %arg3[%c0_6, %c0_7] : memref<50x10xf32, #tpu.memory_space<vmem>>, vector<50x10xf32>
    %cst_8 = arith.constant dense<0.000000e+00> : vector<2x10xf32>
    %9 = tpu.matmul %7, %8, %cst_8 {dimension_numbers = #tpu.dot_dimension_numbers<[1], [0], [0], [1], [0, 0, 1, 1], [], []>} : vector<2x50xf32>, vector<50x10xf32>, vector<2x10xf32> -> vector<2x10xf32>
    %c0_9 = arith.constant 0 : index
    %c0_10 = arith.constant 0 : index
    %10 = vector.load %arg4[%c0_9, %c0_10] : memref<1x10xf32, #tpu.memory_space<vmem>>, vector<1x10xf32>
    %11 = vector.broadcast %10 : vector<1x10xf32> to vector<2x10xf32>
    %12 = arith.addf %9, %11 : vector<2x10xf32>
    %cst_11 = arith.constant dense<0xFF800000> : vector<2xf32>
    %13 = vector.multi_reduction <maximumf>, %12, %cst_11 [1] : vector<2x10xf32> to vector<2xf32>
    %14 = vector.shape_cast %13 : vector<2xf32> to vector<2x1xf32>
    %15 = vector.broadcast %14 : vector<2x1xf32> to vector<2x10xf32>
    %16 = arith.subf %12, %15 : vector<2x10xf32>
    %17 = math.exp %16 : vector<2x10xf32>
    %cst_12 = arith.constant dense<0.000000e+00> : vector<2xf32>
    %18 = vector.multi_reduction <add>, %17, %cst_12 [1] : vector<2x10xf32> to vector<2xf32>
    %19 = vector.shape_cast %18 : vector<2xf32> to vector<2x1xf32>
    %20 = math.log %19 : vector<2x1xf32>
    %21 = vector.broadcast %20 : vector<2x1xf32> to vector<2x10xf32>
    %22 = arith.subf %16, %21 : vector<2x10xf32>
    %c0_13 = arith.constant 0 : index
    %c0_14 = arith.constant 0 : index
    %23 = vector.load %arg5[%c0_13, %c0_14] : memref<2x10xf32, #tpu.memory_space<vmem>>, vector<2x10xf32>
    tpu.vector_store %arg5[%c0_13, %c0_14], %22 {strides = array<i32>} : memref<2x10xf32, #tpu.memory_space<vmem>>, vector<2x10xf32>,
    return
  }
}

</mosaic_0001>

<bundles_post_ra>
// kernel: session5_model_forward.7
= control target key start
LH: loop header
LB: loop body
LE: loop exit
PB: predicated region body
PF: predicated region fallthrough
CT: control target
= control target key end

     0   :  { %s1302_s12 = smov 0   ;;  %s1597_s0 = inlined_call_operand.vmem [shape: f32[1536,9], index: 0, kind: input, shape index: {}]   ;;  %s1598_s1 = inlined_call_operand.vmem [shape: f32[9,128], index: 1, kind: input, shape index: {}]   ;;  %s1599_s2 = inlined_call_operand.vmem [shape: f32[1,128], index: 2, kind: input, shape index: {}]   ;;  %s1600_s3 = inlined_call_operand.vmem [shape: f32[1536,128], index: 3, kind: output, shape index: {}]  }
   0x1 LB: > { %s1013_s13 = sadd.s32 4294967295, %s1279_s12   ;;  %p1017_p0 = scmp.ge.s32.totalorder %s1279_s12, 1  ;;  %s1279_s12 = sphi %s1302_s12, %s13_s12  }
   0x2   : > { %p138_p1 = scmp.lt.s32.totalorder %s1279_s12, 4 }
   0x4   : > { %p139_p2 = pnand %p1017_p0, %p138_p1 }
   0x5   : > { %v238_v0 = vld [vmem:[%s1598_s1] sm:$0xff] (!%p139_p2)  ;;  %v239_v1 = vld [vmem:[%s1598_s1 + $0x8] sm:$0x1] (!%p139_p2)  ;;  %vm440_vm0 = vcmask (!%p139_p2), 1040384   ;;  %s1018_s18 = sshll.u32 (!%p139_p2), %s1013_s13, 6  ;;  %vm1281_vm1 = vmmov (!%p139_p2), 1  }
   0x6   : > { %142 = sbr.rel (%p139_p2) target bundleno = 297 (0x129), region = 32  ;;  %v1256_v2 = vpack.c.bf16 (!%p139_p2), %v239_v1, %v238_v0  ;;  %vm1257_vm2 = vmpackc.low (!%p139_p2), %vm440_vm0, %vm1281_vm1  ;;  %p163_p3 = scmp.lt.s32.totalorder (!%p139_p2), %s1018_s18, 191  ;;  %vm247_vm3 = vcmask (!%p139_p2), 72704  }
   0x8   : > { %1258 = vmatprep.subr.msk.bf16.mxu0 (!%p139_p2), %vm1257_vm2, %v1256_v2  ;;  %1262 = vmatprep.subr.msk.bf16.mxu1 (!%p139_p2), %vm1257_vm2, %v1256_v2 }
   0x9   : > { %1261 = vmatpush3.bf16.msk.msra.mxu0 (!%p139_p2), %vm1257_vm2, %v1256_v2  ;;  %1263 = vmatpush3.bf16.msk.msra.mxu1 (!%p139_p2), %vm1257_vm2, %v1256_v2 }
   0xd   : > { %s1602_s18 = smov (!%p163_p3, %s1018_s18), 191 }
   0xe   : > { %s1019_s19 = sshll.u32 %s1602_s18, 3 }
   0xf   : > { %s1324_s22 = scalar_lea.vmem %s1597_s0, %s1019_s19  ;;  %s1466_s27 = scalar_lea.vmem %s1600_s3, %s1019_s19 }
  0x10   : > { %v174_v3 = vld [vmem:[%s1324_s22] sm:$0xff]  ;;  %v175_v5 = vld [vmem:[%s1324_s22 + $0x8] sm:$0xff]  ;;  %v176_v7 = vld [vmem:[%s1324_s22 + $0x10] sm:$0xff] }
  0x11   : > { %v206_v4 = vld [vmem:[%s1324_s22 + $0x100] sm:$0xff]  ;;  %1160 = vmatprep.mubr.msk.f32.mxu0 %vm247_vm3, %v174_v3  ;;  %v207_v6 = vld [vmem:[%s1324_s22 + $0x108] sm:$0xff]  ;;  %v208_v8 = vld [vmem:[%s1324_s22 + $0x110] sm:$0xff] }
  0x12   : > { %1208 = vmatprep.mubr.msk.f32.mxu1 %vm247_vm3, %v206_v4  ;;  %1161 = vmatmul.mubr.msk.f32.vlgmr.msra.gmra.mrb[0].mxu0 %vm247_vm3, %v175_v5  ;;  %v177_v9 = vld [vmem:[%s1324_s22 + $0x18] sm:$0xff]  ;;  %v178_v11 = vld [vmem:[%s1324_s22 + $0x20] sm:$0xff]  ;;  %v179_v13 = vld [vmem:[%s1324_s22 + $0x28] sm:$0xff] }
  0x13   : > { %1209 = vmatmul.mubr.msk.f32.vlgmr.msra.gmra.mrb[0].mxu1 %vm247_vm3, %v207_v6  ;;  %1163 = vmatprep.mubr.msk.f32.mxu0 %vm247_vm3, %v176_v7  ;;  %v209_v10 = vld [vmem:[%s1324_s22 + $0x118] sm:$0xff]  ;;  %v210_v12 = vld [vmem:[%s1324_s22 + $0x120] sm:$0xff]  ;;  %v211_v14 = vld [vmem:[%s1324_s22 + $0x128] sm:$0xff] }
  0x14   : > { %1211 = vmatprep.mubr.msk.f32.mxu1 %vm247_vm3, %v208_v8  ;;  %v180_v15 = vld [vmem:[%s1324_s22 + $0x30] sm:$0xff]  ;;  %v181_v17 = vld [vmem:[%s1324_s22 + $0x38] sm:$0xff]  ;;  %v182_v19 = vld [vmem:[%s1324_s22 + $0x40] sm:$0xff] }
  0x15   : > { %v212_v16 = vld [vmem:[%s1324_s22 + $0x130] sm:$0xff]  ;;  %v213_v18 = vld [vmem:[%s1324_s22 + $0x138] sm:$0xff]  ;;  %v214_v20 = vld [vmem:[%s1324_s22 + $0x140] sm:$0xff] }
  0x16   : > { %1164 = vmatmul.mubr.msk.f32.gmra.mrb[2].mxu0 %vm247_vm3, %v177_v9  ;;  %v183_v21 = vld [vmem:[%s1324_s22 + $0x48] sm:$0xff]  ;;  %v184_v23 = vld [vmem:[%s1324_s22 + $0x50] sm:$0xff]  ;;  %v185_v25 = vld [vmem:[%s1324_s22 + $0x58] sm:$0xff] }
  0x17   : > { %1212 = vmatmul.mubr.msk.f32.gmra.mrb[2].mxu1 %vm247_vm3, %v209_v10  ;;  %1166 = vmatprep.mubr.msk.f32.mxu0 %vm247_vm3, %v178_v11  ;;  %v215_v22 = vld [vmem:[%s1324_s22 + $0x148] sm:$0xff]  ;;  %v216_v24 = vld [vmem:[%s1324_s22 + $0x150] sm:$0xff]  ;;  %v217_v26 = vld [vmem:[%s1324_s22 + $0x158] sm:$0xff] }
  0x18   : > { %1214 = vmatprep.mubr.msk.f32.mxu1 %vm247_vm3, %v210_v12  ;;  %v186_v27 = vld [vmem:[%s1324_s22 + $0x60] sm:$0xff]  ;;  %v187_v29 = vld [vmem:[%s1324_s22 + $0x68] sm:$0xff]  ;;  %v188_v31 = vld [vmem:[%s1324_s22 + $0x70] sm:$0xff] }
  0x19   : > { %v218_v28 = vld [vmem:[%s1324_s22 + $0x160] sm:$0xff]  ;;  %v219_v30 = vld [vmem:[%s1324_s22 + $0x168] sm:$0xff]  ;;  %v220_v32 = vld [vmem:[%s1324_s22 + $0x170] sm:$0xff] }
  0x1a   : > { %1167 = vmatmul.mubr.msk.f32.gmra.mrb[4].mxu0 %vm247_vm3, %v179_v13  ;;  %v189_v33 = vld [vmem:[%s1324_s22 + $0x78] sm:$0xff]  ;;  %v190_v35 = vld [vmem:[%s1324_s22 + $0x80] sm:$0xff]  ;;  %v191_v37 = vld [vmem:[%s1324_s22 + $0x88] sm:$0xff] }
  0x1b   : > { %1215 = vmatmul.mubr.msk.f32.gmra.mrb[4].mxu1 %vm247_vm3, %v211_v14  ;;  %1169 = vmatprep.mubr.msk.f32.mxu0 %vm247_vm3, %v180_v15  ;;  %v221_v34 = vld [vmem:[%s1324_s22 + $0x178] sm:$0xff]  ;;  %v222_v36 = vld [vmem:[%s1324_s22 + $0x180] sm:$0xff]  ;;  %v223_v38 = vld [vmem:[%s1324_s22 + $0x188] sm:$0xff] }
  0x1c   : > { %1217 = vmatprep.mubr.msk.f32.mxu1 %vm247_vm3, %v212_v16  ;;  %v192_v39 = vld [vmem:[%s1324_s22 + $0x90] sm:$0xff]  ;;  %v193_v41 = vld [vmem:[%s1324_s22 + $0x98] sm:$0xff]  ;;  %v194_v43 = vld [vmem:[%s1324_s22 + $0xa0] sm:$0xff] }
  0x1d   : > { %v224_v40 = vld [vmem:[%s1324_s22 + $0x190] sm:$0xff]  ;;  %v225_v42 = vld [vmem:[%s1324_s22 + $0x198] sm:$0xff]  ;;  %v226_v44 = vld [vmem:[%s1324_s22 + $0x1a0] sm:$0xff] }
  0x1e   : > { %1170 = vmatmul.mubr.msk.f32.gmra.mrb[6].mxu0 %vm247_vm3, %v181_v17  ;;  %v195_v45 = vld [vmem:[%s1324_s22 + $0xa8] sm:$0xff]  ;;  %v196_v47 = vld [vmem:[%s1324_s22 + $0xb0] sm:$0xff]  ;;  %v197_v49 = vld [vmem:[%s1324_s22 + $0xb8] sm:$0xff] }
  0x1f   : > { %1218 = vmatmul.mubr.msk.f32.gmra.mrb[6].mxu1 %vm247_vm3, %v213_v18  ;;  %1172 = vmatprep.mubr.msk.f32.mxu0 %vm247_vm3, %v182_v19  ;;  %v227_v46 = vld [vmem:[%s1324_s22 + $0x1a8] sm:$0xff]  ;;  %v228_v48 = vld [vmem:[%s1324_s22 + $0x1b0] sm:$0xff]  ;;  %v229_v50 = vld [vmem:[%s1324_s22 + $0x1b8] sm:$0xff] }
  0x20   : > { %1220 = vmatprep.mubr.msk.f32.mxu1 %vm247_vm3, %v214_v20  ;;  %v198_v51 = vld [vmem:[%s1324_s22 + $0xc0] sm:$0xff]  ;;  %v199_v53 = vld [vmem:[%s1324_s22 + $0xc8] sm:$0xff]  ;;  %v200_v55 = vld [vmem:[%s1324_s22 + $0xd0] sm:$0xff] }
  0x21   : > { %v230_v52 = vld [vmem:[%s1324_s22 + $0x1c0] sm:$0xff]  ;;  %v231_v54 = vld [vmem:[%s1324_s22 + $0x1c8] sm:$0xff]  ;;  %v232_v56 = vld [vmem:[%s1324_s22 + $0x1d0] sm:$0xff] }
  0x22   : > { %1173 = vmatmul.mubr.msk.f32.gmra.mrb[8].mxu0 %vm247_vm3, %v183_v21  ;;  %v201_v57 = vld [vmem:[%s1324_s22 + $0xd8] sm:$0xff]  ;;  %v202_v59 = vld [vmem:[%s1324_s22 + $0xe0] sm:$0xff]  ;;  %v203_v61 = vld [vmem:[%s1324_s22 + $0xe8] sm:$0xff] }
  0x23   : > { %1221 = vmatmul.mubr.msk.f32.gmra.mrb[8].mxu1 %vm247_vm3, %v215_v22  ;;  %1175 = vmatprep.mubr.msk.f32.mxu0 %vm247_vm3, %v184_v23  ;;  %v233_v58 = vld [vmem:[%s1324_s22 + $0x1d8] sm:$0xff]  ;;  %v234_v60 = vld [vmem:[%s1324_s22 + $0x1e0] sm:$0xff]  ;;  %v235_v62 = vld [vmem:[%s1324_s22 + $0x1e8] sm:$0xff] }
  0x24   : > { %1223 = vmatprep.mubr.msk.f32.mxu1 %vm247_vm3, %v216_v24  ;;  %v204_v63 = vld [vmem:[%s1324_s22 + $0xf0] sm:$0xff]  ;;  %v205_v1 = vld [vmem:[%s1324_s22 + $0xf8] sm:$0xff]  ;;  %v1457_v3 = vld [vmem:[%s1599_s2] ss:$0 sm:$0xff] }
  0x25   : > { %v236_v0 = vld [vmem:[%s1324_s22 + $0x1f0] sm:$0xff]  ;;  %v237_v2 = vld [vmem:[%s1324_s22 + $0x1f8] sm:$0xff] }
  0x26   : > { %1176 = vmatmul.mubr.msk.f32.gmra.mrb[10].mxu0 %vm247_vm3, %v185_v25 }
  0x27   : > { %1224 = vmatmul.mubr.msk.f32.gmra.mrb[10].mxu1 %vm247_vm3, %v217_v26  ;;  %1178 = vmatprep.mubr.msk.f32.mxu0 %vm247_vm3, %v186_v27 }
  0x28   : > { %1226 = vmatprep.mubr.msk.f32.mxu1 %vm247_vm3, %v218_v28 }
  0x2a   : > { %1179 = vmatmul.mubr.msk.f32.gmra.mrb[12].mxu0 %vm247_vm3, %v187_v29 }
  0x2b   : > { %1227 = vmatmul.mubr.msk.f32.gmra.mrb[12].mxu1 %vm247_vm3, %v219_v30  ;;  %1181 = vmatprep.mubr.msk.f32.mxu0 %vm247_vm3, %v188_v31 }
  0x2c   : > { %1229 = vmatprep.mubr.msk.f32.mxu1 %vm247_vm3, %v220_v32 }
  0x2e   : > { %1182 = vmatmul.mubr.msk.f32.gmra.mrb[14].mxu0 %vm247_vm3, %v189_v33 }
  0x2f   : > { %1230 = vmatmul.mubr.msk.f32.gmra.mrb[14].mxu1 %vm247_vm3, %v221_v34  ;;  %1184 = vmatprep.mubr.msk.f32.mxu0 %vm247_vm3, %v190_v35 }
  0x30   : > { %1232 = vmatprep.mubr.msk.f32.mxu1 %vm247_vm3, %v222_v36 }
  0x32   : > { %1185 = vmatmul.mubr.msk.f32.gmra.mrb[16].mxu0 %vm247_vm3, %v191_v37 }
  0x33   : > { %1233 = vmatmul.mubr.msk.f32.gmra.mrb[16].mxu1 %vm247_vm3, %v223_v38  ;;  %1187 = vmatprep.mubr.msk.f32.mxu0 %vm247_vm3, %v192_v39 }
  0x34   : > { %1235 = vmatprep.mubr.msk.f32.mxu1 %vm247_vm3, %v224_v40 }
  0x36   : > { %1188 = vmatmul.mubr.msk.f32.gmra.mrb[18].mxu0 %vm247_vm3, %v193_v41 }
  0x37   : > { %1236 = vmatmul.mubr.msk.f32.gmra.mrb[18].mxu1 %vm247_vm3, %v225_v42  ;;  %1190 = vmatprep.mubr.msk.f32.mxu0 %vm247_vm3, %v194_v43 }
  0x38   : > { %1238 = vmatprep.mubr.msk.f32.mxu1 %vm247_vm3, %v226_v44 }
  0x3a   : > { %1191 = vmatmul.mubr.msk.f32.gmra.mrb[20].mxu0 %vm247_vm3, %v195_v45 }
  0x3b   : > { %1239 = vmatmul.mubr.msk.f32.gmra.mrb[20].mxu1 %vm247_vm3, %v227_v46  ;;  %1193 = vmatprep.mubr.msk.f32.mxu0 %vm247_vm3, %v196_v47 }
  0x3c   : > { %1241 = vmatprep.mubr.msk.f32.mxu1 %vm247_vm3, %v228_v48 }
  0x3e   : > { %1194 = vmatmul.mubr.msk.f32.gmra.mrb[22].mxu0 %vm247_vm3, %v197_v49 }
  0x3f   : > { %1242 = vmatmul.mubr.msk.f32.gmra.mrb[22].mxu1 %vm247_vm3, %v229_v50  ;;  %1196 = vmatprep.mubr.msk.f32.mxu0 %vm247_vm3, %v198_v51 }
  0x40   : > { %1244 = vmatprep.mubr.msk.f32.mxu1 %vm247_vm3, %v230_v52 }
  0x42   : > { %1197 = vmatmul.mubr.msk.f32.gmra.mrb[24].mxu0 %vm247_vm3, %v199_v53 }
  0x43   : > { %1245 = vmatmul.mubr.msk.f32.gmra.mrb[24].mxu1 %vm247_vm3, %v231_v54  ;;  %1199 = vmatprep.mubr.msk.f32.mxu0 %vm247_vm3, %v200_v55 }
  0x44   : > { %1247 = vmatprep.mubr.msk.f32.mxu1 %vm247_vm3, %v232_v56 }
  0x46   : > { %1200 = vmatmul.mubr.msk.f32.gmra.mrb[26].mxu0 %vm247_vm3, %v201_v57 }
  0x47   : > { %1248 = vmatmul.mubr.msk.f32.gmra.mrb[26].mxu1 %vm247_vm3, %v233_v58  ;;  %1202 = vmatprep.mubr.msk.f32.mxu0 %vm247_vm3, %v202_v59 }
  0x48   : > { %1250 = vmatprep.mubr.msk.f32.mxu1 %vm247_vm3, %v234_v60 }
  0x4a   : > { %1203 = vmatmul.mubr.msk.f32.gmra.mrb[28].mxu0 %vm247_vm3, %v203_v61 }
  0x4b   : > { %1251 = vmatmul.mubr.msk.f32.gmra.mrb[28].mxu1 %vm247_vm3, %v235_v62  ;;  %1205 = vmatprep.mubr.msk.f32.mxu0 %vm247_vm3, %v204_v63 }
  0x4c   : > { %1253 = vmatprep.mubr.msk.f32.mxu1 %vm247_vm3, %v236_v0 }
  0x4e   : > { %1206 = vmatmul.mubr.msk.f32.gmra.mrb[30].mxu0 %vm247_vm3, %v205_v1 }
  0x4f   : > { %1254 = vmatmul.mubr.msk.f32.gmra.mrb[30].mxu1 %vm247_vm3, %v237_v2 }
  0xe5   : > { %v1162_v4 = vpop.f32.mrb[0].mxu0 }
  0xe6   : > { %v1210_v5 = vpop.f32.mrb[0].mxu1  ;;  %v516_v6 = vadd.f32 %v1162_v4, %v1457_v3  ;;  %v510_v8 = vpop.f32.mrb[1].mxu0 }
  0xe7   : > { %v676_v7 = vadd.f32 %v1210_v5, %v1457_v3  ;;  %v670_v9 = vpop.f32.mrb[1].mxu1  ;;  %v511_v10 = vadd.f32 %v1457_v3, %v510_v8 }
  0xe8   : > { %v671_v11 = vadd.f32 %v1457_v3, %v670_v9  ;;  %v830_v12 = vmax.f32 %v516_v6, 0.0 }
  0xe9   : > { %v862_v13 = vmax.f32 %v676_v7, 0.0  ;;  %v829_v14 = vmax.f32 %v511_v10, 0.0  ;;  %v1165_v16 = vpop.f32.mrb[2].mxu0 }
  0xea   : > { %v861_v15 = vmax.f32 %v671_v11, 0.0  ;;  %v1213_v17 = vpop.f32.mrb[2].mxu1  ;;  %894 = vst [vmem:[%s1466_s27 + $0x8] sm:$0xff] %v830_v12  ;;  %v526_v18 = vadd.f32 %v1165_v16, %v1457_v3  ;;  %v520_v20 = vpop.f32.mrb[3].mxu0 }
  0xeb   : > { %926 = vst [vmem:[%s1466_s27 + $0x108] sm:$0xff] %v862_v13  ;;  %v686_v19 = vadd.f32 %v1213_v17, %v1457_v3  ;;  %v680_v21 = vpop.f32.mrb[3].mxu1  ;;  %893 = vst [vmem:[%s1466_s27] sm:$0xff] %v829_v14  ;;  %v521_v22 = vadd.f32 %v1457_v3, %v520_v20 }
  0xec   : > { %925 = vst [vmem:[%s1466_s27 + $0x100] sm:$0xff] %v861_v15  ;;  %v681_v23 = vadd.f32 %v1457_v3, %v680_v21  ;;  %v832_v24 = vmax.f32 %v526_v18, 0.0 }
  0xed   : > { %v864_v25 = vmax.f32 %v686_v19, 0.0  ;;  %v831_v26 = vmax.f32 %v521_v22, 0.0  ;;  %v1168_v28 = vpop.f32.mrb[4].mxu0 }
  0xee   : > { %v863_v27 = vmax.f32 %v681_v23, 0.0  ;;  %v1216_v29 = vpop.f32.mrb[4].mxu1  ;;  %896 = vst [vmem:[%s1466_s27 + $0x18] sm:$0xff] %v832_v24  ;;  %v536_v30 = vadd.f32 %v1168_v28, %v1457_v3  ;;  %v530_v32 = vpop.f32.mrb[5].mxu0 }
  0xef   : > { %928 = vst [vmem:[%s1466_s27 + $0x118] sm:$0xff] %v864_v25  ;;  %v696_v31 = vadd.f32 %v1216_v29, %v1457_v3  ;;  %v690_v33 = vpop.f32.mrb[5].mxu1  ;;  %895 = vst [vmem:[%s1466_s27 + $0x10] sm:$0xff] %v831_v26  ;;  %v531_v34 = vadd.f32 %v1457_v3, %v530_v32 }
  0xf0   : > { %927 = vst [vmem:[%s1466_s27 + $0x110] sm:$0xff] %v863_v27  ;;  %v691_v35 = vadd.f32 %v1457_v3, %v690_v33  ;;  %v834_v36 = vmax.f32 %v536_v30, 0.0 }
  0xf1   : > { %v866_v37 = vmax.f32 %v696_v31, 0.0  ;;  %v833_v38 = vmax.f32 %v531_v34, 0.0  ;;  %v1171_v40 = vpop.f32.mrb[6].mxu0 }
  0xf2   : > { %v865_v39 = vmax.f32 %v691_v35, 0.0  ;;  %v1219_v41 = vpop.f32.mrb[6].mxu1  ;;  %898 = vst [vmem:[%s1466_s27 + $0x28] sm:$0xff] %v834_v36  ;;  %v546_v42 = vadd.f32 %v1171_v40, %v1457_v3  ;;  %v540_v44 = vpop.f32.mrb[7].mxu0 }
  0xf3   : > { %930 = vst [vmem:[%s1466_s27 + $0x128] sm:$0xff] %v866_v37  ;;  %v706_v43 = vadd.f32 %v1219_v41, %v1457_v3  ;;  %v700_v45 = vpop.f32.mrb[7].mxu1  ;;  %897 = vst [vmem:[%s1466_s27 + $0x20] sm:$0xff] %v833_v38  ;;  %v541_v46 = vadd.f32 %v1457_v3, %v540_v44 }
  0xf4   : > { %929 = vst [vmem:[%s1466_s27 + $0x120] sm:$0xff] %v865_v39  ;;  %v701_v47 = vadd.f32 %v1457_v3, %v700_v45  ;;  %v836_v48 = vmax.f32 %v546_v42, 0.0 }
  0xf5   : > { %v868_v49 = vmax.f32 %v706_v43, 0.0  ;;  %v835_v50 = vmax.f32 %v541_v46, 0.0  ;;  %v1174_v52 = vpop.f32.mrb[8].mxu0 }
  0xf6   : > { %v867_v51 = vmax.f32 %v701_v47, 0.0  ;;  %v1222_v53 = vpop.f32.mrb[8].mxu1  ;;  %900 = vst [vmem:[%s1466_s27 + $0x38] sm:$0xff] %v836_v48  ;;  %v556_v54 = vadd.f32 %v1174_v52, %v1457_v3  ;;  %v550_v56 = vpop.f32.mrb[9].mxu0 }
  0xf7   : > { %932 = vst [vmem:[%s1466_s27 + $0x138] sm:$0xff] %v868_v49  ;;  %v716_v55 = vadd.f32 %v1222_v53, %v1457_v3  ;;  %v710_v57 = vpop.f32.mrb[9].mxu1  ;;  %899 = vst [vmem:[%s1466_s27 + $0x30] sm:$0xff] %v835_v50  ;;  %v551_v58 = vadd.f32 %v1457_v3, %v550_v56 }
  0xf8   : > { %931 = vst [vmem:[%s1466_s27 + $0x130] sm:$0xff] %v867_v51  ;;  %v711_v59 = vadd.f32 %v1457_v3, %v710_v57  ;;  %v838_v60 = vmax.f32 %v556_v54, 0.0 }
  0xf9   : > { %v870_v61 = vmax.f32 %v716_v55, 0.0  ;;  %v837_v62 = vmax.f32 %v551_v58, 0.0  ;;  %v1177_v0 = vpop.f32.mrb[10].mxu0 }
  0xfa   : > { %v869_v63 = vmax.f32 %v711_v59, 0.0  ;;  %v1225_v1 = vpop.f32.mrb[10].mxu1  ;;  %902 = vst [vmem:[%s1466_s27 + $0x48] sm:$0xff] %v838_v60  ;;  %v566_v2 = vadd.f32 %v1177_v0, %v1457_v3  ;;  %v560_v5 = vpop.f32.mrb[11].mxu0 }
  0xfb   : > { %934 = vst [vmem:[%s1466_s27 + $0x148] sm:$0xff] %v870_v61  ;;  %v726_v4 = vadd.f32 %v1225_v1, %v1457_v3  ;;  %v720_v6 = vpop.f32.mrb[11].mxu1  ;;  %901 = vst [vmem:[%s1466_s27 + $0x40] sm:$0xff] %v837_v62  ;;  %v561_v7 = vadd.f32 %v1457_v3, %v560_v5 }
  0xfc   : > { %933 = vst [vmem:[%s1466_s27 + $0x140] sm:$0xff] %v869_v63  ;;  %v721_v8 = vadd.f32 %v1457_v3, %v720_v6  ;;  %v840_v9 = vmax.f32 %v566_v2, 0.0 }
  0xfd   : > { %v872_v10 = vmax.f32 %v726_v4, 0.0  ;;  %v839_v11 = vmax.f32 %v561_v7, 0.0  ;;  %v1180_v13 = vpop.f32.mrb[12].mxu0 }
  0xfe   : > { %v871_v12 = vmax.f32 %v721_v8, 0.0  ;;  %v1228_v14 = vpop.f32.mrb[12].mxu1  ;;  %904 = vst [vmem:[%s1466_s27 + $0x58] sm:$0xff] %v840_v9  ;;  %v576_v15 = vadd.f32 %v1180_v13, %v1457_v3  ;;  %v570_v17 = vpop.f32.mrb[13].mxu0 }
  0xff   : > { %936 = vst [vmem:[%s1466_s27 + $0x158] sm:$0xff] %v872_v10  ;;  %v736_v16 = vadd.f32 %v1228_v14, %v1457_v3  ;;  %v730_v18 = vpop.f32.mrb[13].mxu1  ;;  %903 = vst [vmem:[%s1466_s27 + $0x50] sm:$0xff] %v839_v11  ;;  %v571_v19 = vadd.f32 %v1457_v3, %v570_v17 }
 0x100   : > { %935 = vst [vmem:[%s1466_s27 + $0x150] sm:$0xff] %v871_v12  ;;  %v731_v20 = vadd.f32 %v1457_v3, %v730_v18  ;;  %v842_v21 = vmax.f32 %v576_v15, 0.0 }
 0x101   : > { %v874_v22 = vmax.f32 %v736_v16, 0.0  ;;  %v841_v23 = vmax.f32 %v571_v19, 0.0  ;;  %v1183_v25 = vpop.f32.mrb[14].mxu0 }
 0x102   : > { %v873_v24 = vmax.f32 %v731_v20, 0.0  ;;  %v1231_v26 = vpop.f32.mrb[14].mxu1  ;;  %906 = vst [vmem:[%s1466_s27 + $0x68] sm:$0xff] %v842_v21  ;;  %v586_v27 = vadd.f32 %v1183_v25, %v1457_v3  ;;  %v580_v29 = vpop.f32.mrb[15].mxu0 }
 0x103   : > { %938 = vst [vmem:[%s1466_s27 + $0x168] sm:$0xff] %v874_v22  ;;  %v746_v28 = vadd.f32 %v1231_v26, %v1457_v3  ;;  %v740_v30 = vpop.f32.mrb[15].mxu1  ;;  %905 = vst [vmem:[%s1466_s27 + $0x60] sm:$0xff] %v841_v23  ;;  %v581_v31 = vadd.f32 %v1457_v3, %v580_v29 }
 0x104   : > { %937 = vst [vmem:[%s1466_s27 + $0x160] sm:$0xff] %v873_v24  ;;  %v741_v32 = vadd.f32 %v1457_v3, %v740_v30  ;;  %v844_v33 = vmax.f32 %v586_v27, 0.0 }
 0x105   : > { %v876_v34 = vmax.f32 %v746_v28, 0.0  ;;  %v843_v35 = vmax.f32 %v581_v31, 0.0  ;;  %v1186_v37 = vpop.f32.mrb[16].mxu0 }
 0x106   : > { %v875_v36 = vmax.f32 %v741_v32, 0.0  ;;  %v1234_v38 = vpop.f32.mrb[16].mxu1  ;;  %908 = vst [vmem:[%s1466_s27 + $0x78] sm:$0xff] %v844_v33  ;;  %v596_v39 = vadd.f32 %v1186_v37, %v1457_v3  ;;  %v590_v41 = vpop.f32.mrb[17].mxu0 }
 0x107   : > { %940 = vst [vmem:[%s1466_s27 + $0x178] sm:$0xff] %v876_v34  ;;  %v756_v40 = vadd.f32 %v1234_v38, %v1457_v3  ;;  %v750_v42 = vpop.f32.mrb[17].mxu1  ;;  %907 = vst [vmem:[%s1466_s27 + $0x70] sm:$0xff] %v843_v35  ;;  %v591_v43 = vadd.f32 %v1457_v3, %v590_v41 }
 0x108   : > { %939 = vst [vmem:[%s1466_s27 + $0x170] sm:$0xff] %v875_v36  ;;  %v751_v44 = vadd.f32 %v1457_v3, %v750_v42  ;;  %v846_v45 = vmax.f32 %v596_v39, 0.0 }
 0x109   : > { %v878_v46 = vmax.f32 %v756_v40, 0.0  ;;  %v845_v47 = vmax.f32 %v591_v43, 0.0  ;;  %v1189_v49 = vpop.f32.mrb[18].mxu0 }
 0x10a   : > { %v877_v48 = vmax.f32 %v751_v44, 0.0  ;;  %v1237_v50 = vpop.f32.mrb[18].mxu1  ;;  %910 = vst [vmem:[%s1466_s27 + $0x88] sm:$0xff] %v846_v45  ;;  %v606_v51 = vadd.f32 %v1189_v49, %v1457_v3  ;;  %v600_v53 = vpop.f32.mrb[19].mxu0 }
 0x10b   : > { %942 = vst [vmem:[%s1466_s27 + $0x188] sm:$0xff] %v878_v46  ;;  %v766_v52 = vadd.f32 %v1237_v50, %v1457_v3  ;;  %v760_v54 = vpop.f32.mrb[19].mxu1  ;;  %909 = vst [vmem:[%s1466_s27 + $0x80] sm:$0xff] %v845_v47  ;;  %v601_v55 = vadd.f32 %v1457_v3, %v600_v53 }
 0x10c   : > { %941 = vst [vmem:[%s1466_s27 + $0x180] sm:$0xff] %v877_v48  ;;  %v761_v56 = vadd.f32 %v1457_v3, %v760_v54  ;;  %v848_v57 = vmax.f32 %v606_v51, 0.0 }
 0x10d   : > { %v880_v58 = vmax.f32 %v766_v52, 0.0  ;;  %v847_v59 = vmax.f32 %v601_v55, 0.0  ;;  %v1192_v61 = vpop.f32.mrb[20].mxu0 }
 0x10e   : > { %v879_v60 = vmax.f32 %v761_v56, 0.0  ;;  %v1240_v62 = vpop.f32.mrb[20].mxu1  ;;  %912 = vst [vmem:[%s1466_s27 + $0x98] sm:$0xff] %v848_v57  ;;  %v616_v63 = vadd.f32 %v1192_v61, %v1457_v3  ;;  %v610_v1 = vpop.f32.mrb[21].mxu0 }
 0x10f   : > { %944 = vst [vmem:[%s1466_s27 + $0x198] sm:$0xff] %v880_v58  ;;  %v776_v0 = vadd.f32 %v1240_v62, %v1457_v3  ;;  %v770_v2 = vpop.f32.mrb[21].mxu1  ;;  %911 = vst [vmem:[%s1466_s27 + $0x90] sm:$0xff] %v847_v59  ;;  %v611_v4 = vadd.f32 %v1457_v3, %v610_v1 }
 0x110   : > { %943 = vst [vmem:[%s1466_s27 + $0x190] sm:$0xff] %v879_v60  ;;  %v771_v5 = vadd.f32 %v1457_v3, %v770_v2  ;;  %v850_v6 = vmax.f32 %v616_v63, 0.0 }
 0x111   : > { %v882_v7 = vmax.f32 %v776_v0, 0.0  ;;  %v849_v8 = vmax.f32 %v611_v4, 0.0  ;;  %v1195_v10 = vpop.f32.mrb[22].mxu0 }
 0x112   : > { %v881_v9 = vmax.f32 %v771_v5, 0.0  ;;  %v1243_v11 = vpop.f32.mrb[22].mxu1  ;;  %914 = vst [vmem:[%s1466_s27 + $0xa8] sm:$0xff] %v850_v6  ;;  %v626_v12 = vadd.f32 %v1195_v10, %v1457_v3  ;;  %v620_v14 = vpop.f32.mrb[23].mxu0 }
 0x113   : > { %946 = vst [vmem:[%s1466_s27 + $0x1a8] sm:$0xff] %v882_v7  ;;  %v786_v13 = vadd.f32 %v1243_v11, %v1457_v3  ;;  %v780_v15 = vpop.f32.mrb[23].mxu1  ;;  %913 = vst [vmem:[%s1466_s27 + $0xa0] sm:$0xff] %v849_v8  ;;  %v621_v16 = vadd.f32 %v1457_v3, %v620_v14 }
 0x114   : > { %945 = vst [vmem:[%s1466_s27 + $0x1a0] sm:$0xff] %v881_v9  ;;  %v781_v17 = vadd.f32 %v1457_v3, %v780_v15  ;;  %v852_v18 = vmax.f32 %v626_v12, 0.0 }
 0x115   : > { %v884_v19 = vmax.f32 %v786_v13, 0.0  ;;  %v851_v20 = vmax.f32 %v621_v16, 0.0  ;;  %v1198_v22 = vpop.f32.mrb[24].mxu0 }
 0x116   : > { %v883_v21 = vmax.f32 %v781_v17, 0.0  ;;  %v1246_v23 = vpop.f32.mrb[24].mxu1  ;;  %916 = vst [vmem:[%s1466_s27 + $0xb8] sm:$0xff] %v852_v18  ;;  %v636_v24 = vadd.f32 %v1198_v22, %v1457_v3  ;;  %v630_v26 = vpop.f32.mrb[25].mxu0 }
 0x117   : > { %948 = vst [vmem:[%s1466_s27 + $0x1b8] sm:$0xff] %v884_v19  ;;  %v796_v25 = vadd.f32 %v1246_v23, %v1457_v3  ;;  %v790_v27 = vpop.f32.mrb[25].mxu1  ;;  %915 = vst [vmem:[%s1466_s27 + $0xb0] sm:$0xff] %v851_v20  ;;  %v631_v28 = vadd.f32 %v1457_v3, %v630_v26 }
 0x118   : > { %947 = vst [vmem:[%s1466_s27 + $0x1b0] sm:$0xff] %v883_v21  ;;  %v791_v29 = vadd.f32 %v1457_v3, %v790_v27  ;;  %v854_v30 = vmax.f32 %v636_v24, 0.0 }
 0x119   : > { %v886_v31 = vmax.f32 %v796_v25, 0.0  ;;  %v853_v32 = vmax.f32 %v631_v28, 0.0  ;;  %v1201_v34 = vpop.f32.mrb[26].mxu0 }
 0x11a   : > { %v885_v33 = vmax.f32 %v791_v29, 0.0  ;;  %v1249_v35 = vpop.f32.mrb[26].mxu1  ;;  %918 = vst [vmem:[%s1466_s27 + $0xc8] sm:$0xff] %v854_v30  ;;  %v646_v36 = vadd.f32 %v1201_v34, %v1457_v3  ;;  %v640_v38 = vpop.f32.mrb[27].mxu0 }
 0x11b   : > { %950 = vst [vmem:[%s1466_s27 + $0x1c8] sm:$0xff] %v886_v31  ;;  %v806_v37 = vadd.f32 %v1249_v35, %v1457_v3  ;;  %v800_v39 = vpop.f32.mrb[27].mxu1  ;;  %917 = vst [vmem:[%s1466_s27 + $0xc0] sm:$0xff] %v853_v32  ;;  %v641_v40 = vadd.f32 %v1457_v3, %v640_v38 }
 0x11c   : > { %949 = vst [vmem:[%s1466_s27 + $0x1c0] sm:$0xff] %v885_v33  ;;  %v801_v41 = vadd.f32 %v1457_v3, %v800_v39  ;;  %v856_v42 = vmax.f32 %v646_v36, 0.0 }
 0x11d   : > { %v888_v43 = vmax.f32 %v806_v37, 0.0  ;;  %v855_v44 = vmax.f32 %v641_v40, 0.0  ;;  %v1204_v46 = vpop.f32.mrb[28].mxu0 }
 0x11e   : > { %v887_v45 = vmax.f32 %v801_v41, 0.0  ;;  %v1252_v47 = vpop.f32.mrb[28].mxu1  ;;  %920 = vst [vmem:[%s1466_s27 + $0xd8] sm:$0xff] %v856_v42  ;;  %v656_v48 = vadd.f32 %v1204_v46, %v1457_v3  ;;  %v650_v50 = vpop.f32.mrb[29].mxu0 }
 0x11f   : > { %952 = vst [vmem:[%s1466_s27 + $0x1d8] sm:$0xff] %v888_v43  ;;  %v816_v49 = vadd.f32 %v1252_v47, %v1457_v3  ;;  %v810_v51 = vpop.f32.mrb[29].mxu1  ;;  %919 = vst [vmem:[%s1466_s27 + $0xd0] sm:$0xff] %v855_v44  ;;  %v651_v52 = vadd.f32 %v1457_v3, %v650_v50 }
 0x120   : > { %951 = vst [vmem:[%s1466_s27 + $0x1d0] sm:$0xff] %v887_v45  ;;  %v811_v53 = vadd.f32 %v1457_v3, %v810_v51  ;;  %v858_v54 = vmax.f32 %v656_v48, 0.0 }
 0x121   : > { %v890_v55 = vmax.f32 %v816_v49, 0.0  ;;  %v857_v56 = vmax.f32 %v651_v52, 0.0  ;;  %v1207_v58 = vpop.f32.mrb[30].mxu0 }
 0x122   : > { %v889_v57 = vmax.f32 %v811_v53, 0.0  ;;  %v1255_v59 = vpop.f32.mrb[30].mxu1  ;;  %922 = vst [vmem:[%s1466_s27 + $0xe8] sm:$0xff] %v858_v54  ;;  %v666_v60 = vadd.f32 %v1207_v58, %v1457_v3  ;;  %v660_v62 = vpop.f32.mrb[31].mxu0 }
 0x123   : > { %954 = vst [vmem:[%s1466_s27 + $0x1e8] sm:$0xff] %v890_v55  ;;  %v826_v61 = vadd.f32 %v1255_v59, %v1457_v3  ;;  %v820_v63 = vpop.f32.mrb[31].mxu1  ;;  %921 = vst [vmem:[%s1466_s27 + $0xe0] sm:$0xff] %v857_v56  ;;  %v661_v0 = vadd.f32 %v1457_v3, %v660_v62 }
 0x124   : > { %953 = vst [vmem:[%s1466_s27 + $0x1e0] sm:$0xff] %v889_v57  ;;  %v821_v1 = vadd.f32 %v1457_v3, %v820_v63  ;;  %v860_v2 = vmax.f32 %v666_v60, 0.0 }
 0x125   : > { %v892_v4 = vmax.f32 %v826_v61, 0.0  ;;  %v859_v5 = vmax.f32 %v661_v0, 0.0 }
 0x126   : > { %v891_v6 = vmax.f32 %v821_v1, 0.0  ;;  %924 = vst [vmem:[%s1466_s27 + $0xf8] sm:$0xff] %v860_v2 }
 0x127   : > { %956 = vst [vmem:[%s1466_s27 + $0x1f8] sm:$0xff] %v892_v4  ;;  %923 = vst [vmem:[%s1466_s27 + $0xf0] sm:$0xff] %v859_v5 }
 0x128   : > { %955 = vst [vmem:[%s1466_s27 + $0x1f0] sm:$0xff] %v891_v6 }
 0x129 PF: > { %s13_s12 = sadd.s32 1, %s1279_s12  }
 0x12a   : > { %p10_p4 = scmp.ge.s32.totalorder %s13_s12, 5  }
 0x12c   :  { %12 = sbr.rel (!%p10_p4) target bundleno = 1 (0x1), region = 62 }

// kernel: session5_model_forward.9
= control target key start
LH: loop header
LB: loop body
LE: loop exit
PB: predicated region body
PF: predicated region fallthrough
CT: control target
= control target key end

     0   :  { %s401_s6 = smov 0   ;;  %s542_s0 = inlined_call_operand.vmem [shape: f32[2,24,12,256], index: 0, kind: input, shape index: {}]   ;;  %s543_s1 = inlined_call_operand.vmem [shape: f32[2,12,12,128], index: 1, kind: output, shape index: {}]  }
   0x1 LB: > { %s364_s7 = sadd.s32 4294967295, %s389_s6   ;;  %p368_p0 = scmp.ge.s32.totalorder %s389_s6, 1  ;;  %s389_s6 = sphi %s401_s6, %s11_s6  }
   0x2   : > { %p87_p1 = scmp.lt.s32.totalorder %s389_s6, 3 }
   0x4   : > { %p88_p2 = pnand %p368_p0, %p87_p1 }
   0x5   : > { %p107_p3 = scmp.lt.s32.totalorder (!%p88_p2), %s364_s7, 1 }
   0x6   : > { %91 = sbr.rel (%p88_p2) target bundleno = 58 (0x3a), region = 24 }
   0xd   : > { %s545_s7 = smov (!%p107_p3, %s364_s7), 1 }
   0xe   : > { %s373_s8 = smul.u32 768, %s545_s7 }
   0xf   : > { %s374_s12 = smul.u32 192, %s545_s7 }
  0x10   : > { %s412_s11 = scalar_lea.vmem %s542_s0, %s373_s8 }
  0x11   : > { %v117_v0 = vld [vmem:[%s412_s11] sm:$0xff]  ;;  %v118_v1 = vld [vmem:[%s412_s11 + $0x8] sm:$0xff]  ;;  %v119_v5 = vld [vmem:[%s412_s11 + $0x10] sm:$0xf]  ;;  %s426_s15 = scalar_lea.vmem %s543_s1, %s374_s12 }
  0x12   : > { %v121_v2 = vld [vmem:[%s412_s11 + $0x20] sm:$0xff]  ;;  %v122_v3 = vld [vmem:[%s412_s11 + $0x28] sm:$0xff]  ;;  %v213_v4 = vmax.f32 %v117_v0, %v118_v1  ;;  %v120_v6 = vld [vmem:[%s412_s11 + $0x18] sm:$0xf] }
  0x13   : > { %v215_v7 = vmax.f32 %v121_v2, %v122_v3  ;;  %v123_v8 = vld [vmem:[%s412_s11 + $0x30] sm:$0xf]  ;;  %v124_v9 = vld [vmem:[%s412_s11 + $0x38] sm:$0xf]  ;;  %v214_v10 = vmax.f32 %v119_v5, %v120_v6  ;;  %v125_v11 = vld [vmem:[%s412_s11 + $0x40] sm:$0xff] }
  0x14   : > { %v216_v12 = vmax.f32 %v123_v8, %v124_v9  ;;  %v126_v13 = vld [vmem:[%s412_s11 + $0x48] sm:$0xff]  ;;  %v129_v14 = vld [vmem:[%s412_s11 + $0x60] sm:$0xff]  ;;  %v127_v19 = vld [vmem:[%s412_s11 + $0x50] sm:$0xf] }
  0x15   : > { %v130_v15 = vld [vmem:[%s412_s11 + $0x68] sm:$0xff]  ;;  %v261_v16 = vmax.f32 %v213_v4, %v215_v7  ;;  %v217_v17 = vmax.f32 %v125_v11, %v126_v13  ;;  %v128_v20 = vld [vmem:[%s412_s11 + $0x58] sm:$0xf]  ;;  %v131_v21 = vld [vmem:[%s412_s11 + $0x70] sm:$0xf] }
  0x16   : > { %v219_v18 = vmax.f32 %v129_v14, %v130_v15  ;;  %v262_v22 = vmax.f32 %v214_v10, %v216_v12  ;;  %v132_v23 = vld [vmem:[%s412_s11 + $0x78] sm:$0xf]  ;;  %v218_v24 = vmax.f32 %v127_v19, %v128_v20  ;;  %v133_v25 = vld [vmem:[%s412_s11 + $0x80] sm:$0xff]  ;;  %v134_v26 = vld [vmem:[%s412_s11 + $0x88] sm:$0xff] }
  0x17   : > { %285 = vst [vmem:[%s426_s15] sm:$0xff] %v261_v16  ;;  %v220_v28 = vmax.f32 %v131_v21, %v132_v23  ;;  %v137_v29 = vld [vmem:[%s412_s11 + $0xa0] sm:$0xff]  ;;  %v138_v30 = vld [vmem:[%s412_s11 + $0xa8] sm:$0xff]  ;;  %v221_v31 = vmax.f32 %v133_v25, %v134_v26  ;;  %v135_v32 = vld [vmem:[%s412_s11 + $0x90] sm:$0xf] }
  0x18   : > { %v263_v27 = vmax.f32 %v217_v17, %v219_v18  ;;  %286 = vst [vmem:[%s426_s15 + $0x8] sm:$0xf] %v262_v22  ;;  %v223_v33 = vmax.f32 %v137_v29, %v138_v30  ;;  %v136_v34 = vld [vmem:[%s412_s11 + $0x98] sm:$0xf]  ;;  %v139_v35 = vld [vmem:[%s412_s11 + $0xb0] sm:$0xf] }
  0x19   : > { %v140_v36 = vld [vmem:[%s412_s11 + $0xb8] sm:$0xf]  ;;  %v264_v37 = vmax.f32 %v218_v24, %v220_v28  ;;  %v222_v38 = vmax.f32 %v135_v32, %v136_v34  ;;  %v141_v40 = vld [vmem:[%s412_s11 + $0xc0] sm:$0xff]  ;;  %v142_v41 = vld [vmem:[%s412_s11 + $0xc8] sm:$0xff] }
  0x1a   : > { %287 = vst [vmem:[%s426_s15 + $0x10] sm:$0xff] %v263_v27  ;;  %v224_v39 = vmax.f32 %v139_v35, %v140_v36  ;;  %v145_v42 = vld [vmem:[%s412_s11 + $0xe0] sm:$0xff]  ;;  %v265_v43 = vmax.f32 %v221_v31, %v223_v33  ;;  %v146_v44 = vld [vmem:[%s412_s11 + $0xe8] sm:$0xff]  ;;  %v225_v45 = vmax.f32 %v141_v40, %v142_v41  ;;  %v143_v46 = vld [vmem:[%s412_s11 + $0xd0] sm:$0xf] }
  0x1b   : > { %v144_v47 = vld [vmem:[%s412_s11 + $0xd8] sm:$0xf]  ;;  %288 = vst [vmem:[%s426_s15 + $0x18] sm:$0xf] %v264_v37  ;;  %v227_v49 = vmax.f32 %v145_v42, %v146_v44  ;;  %v147_v50 = vld [vmem:[%s412_s11 + $0xf0] sm:$0xf] }
  0x1c   : > { %v266_v48 = vmax.f32 %v222_v38, %v224_v39  ;;  %v148_v51 = vld [vmem:[%s412_s11 + $0xf8] sm:$0xf]  ;;  %v226_v52 = vmax.f32 %v143_v46, %v144_v47  ;;  %v149_v53 = vld [vmem:[%s412_s11 + $0x100] sm:$0xff]  ;;  %289 = vst [vmem:[%s426_s15 + $0x20] sm:$0xff] %v265_v43  ;;  %v150_v55 = vld [vmem:[%s412_s11 + $0x108] sm:$0xff] }
  0x1d   : > { %v228_v54 = vmax.f32 %v147_v50, %v148_v51  ;;  %v153_v56 = vld [vmem:[%s412_s11 + $0x120] sm:$0xff]  ;;  %v154_v57 = vld [vmem:[%s412_s11 + $0x128] sm:$0xff]  ;;  %v267_v58 = vmax.f32 %v225_v45, %v227_v49  ;;  %v229_v59 = vmax.f32 %v149_v53, %v150_v55  ;;  %v151_v61 = vld [vmem:[%s412_s11 + $0x110] sm:$0xf] }
  0x1e   : > { %290 = vst [vmem:[%s426_s15 + $0x28] sm:$0xf] %v266_v48  ;;  %v231_v60 = vmax.f32 %v153_v56, %v154_v57  ;;  %v152_v62 = vld [vmem:[%s412_s11 + $0x118] sm:$0xf]  ;;  %v155_v63 = vld [vmem:[%s412_s11 + $0x130] sm:$0xf] }
  0x1f   : > { %v268_v0 = vmax.f32 %v226_v52, %v228_v54  ;;  %v156_v1 = vld [vmem:[%s412_s11 + $0x138] sm:$0xf]  ;;  %v230_v2 = vmax.f32 %v151_v61, %v152_v62  ;;  %v157_v3 = vld [vmem:[%s412_s11 + $0x140] sm:$0xff]  ;;  %v158_v4 = vld [vmem:[%s412_s11 + $0x148] sm:$0xff]  ;;  %291 = vst [vmem:[%s426_s15 + $0x30] sm:$0xff] %v267_v58 }
  0x20   : > { %v269_v5 = vmax.f32 %v229_v59, %v231_v60  ;;  %v232_v6 = vmax.f32 %v155_v63, %v156_v1  ;;  %v161_v7 = vld [vmem:[%s412_s11 + $0x160] sm:$0xff]  ;;  %v162_v8 = vld [vmem:[%s412_s11 + $0x168] sm:$0xff]  ;;  %v233_v9 = vmax.f32 %v157_v3, %v158_v4  ;;  %v159_v10 = vld [vmem:[%s412_s11 + $0x150] sm:$0xf] }
  0x21   : > { %292 = vst [vmem:[%s426_s15 + $0x38] sm:$0xf] %v268_v0  ;;  %v235_v11 = vmax.f32 %v161_v7, %v162_v8  ;;  %v160_v12 = vld [vmem:[%s412_s11 + $0x158] sm:$0xf]  ;;  %v163_v13 = vld [vmem:[%s412_s11 + $0x170] sm:$0xf] }
  0x22   : > { %v164_v14 = vld [vmem:[%s412_s11 + $0x178] sm:$0xf]  ;;  %293 = vst [vmem:[%s426_s15 + $0x40] sm:$0xff] %v269_v5  ;;  %v270_v15 = vmax.f32 %v230_v2, %v232_v6  ;;  %v234_v16 = vmax.f32 %v159_v10, %v160_v12  ;;  %v165_v18 = vld [vmem:[%s412_s11 + $0x180] sm:$0xff]  ;;  %v166_v19 = vld [vmem:[%s412_s11 + $0x188] sm:$0xff] }
  0x23   : > { %v236_v17 = vmax.f32 %v163_v13, %v164_v14  ;;  %v169_v20 = vld [vmem:[%s412_s11 + $0x1a0] sm:$0xff]  ;;  %v271_v21 = vmax.f32 %v233_v9, %v235_v11  ;;  %v170_v22 = vld [vmem:[%s412_s11 + $0x1a8] sm:$0xff]  ;;  %v237_v23 = vmax.f32 %v165_v18, %v166_v19  ;;  %v167_v24 = vld [vmem:[%s412_s11 + $0x190] sm:$0xf] }
  0x24   : > { %v168_v25 = vld [vmem:[%s412_s11 + $0x198] sm:$0xf]  ;;  %294 = vst [vmem:[%s426_s15 + $0x48] sm:$0xf] %v270_v15  ;;  %v239_v27 = vmax.f32 %v169_v20, %v170_v22  ;;  %v171_v28 = vld [vmem:[%s412_s11 + $0x1b0] sm:$0xf] }
  0x25   : > { %v272_v26 = vmax.f32 %v234_v16, %v236_v17  ;;  %v172_v29 = vld [vmem:[%s412_s11 + $0x1b8] sm:$0xf]  ;;  %v238_v30 = vmax.f32 %v167_v24, %v168_v25  ;;  %v173_v31 = vld [vmem:[%s412_s11 + $0x1c0] sm:$0xff]  ;;  %295 = vst [vmem:[%s426_s15 + $0x50] sm:$0xff] %v271_v21  ;;  %v174_v33 = vld [vmem:[%s412_s11 + $0x1c8] sm:$0xff] }
  0x26   : > { %v240_v32 = vmax.f32 %v171_v28, %v172_v29  ;;  %v177_v34 = vld [vmem:[%s412_s11 + $0x1e0] sm:$0xff]  ;;  %v178_v35 = vld [vmem:[%s412_s11 + $0x1e8] sm:$0xff]  ;;  %v273_v36 = vmax.f32 %v237_v23, %v239_v27  ;;  %v241_v37 = vmax.f32 %v173_v31, %v174_v33  ;;  %v175_v39 = vld [vmem:[%s412_s11 + $0x1d0] sm:$0xf] }
  0x27   : > { %296 = vst [vmem:[%s426_s15 + $0x58] sm:$0xf] %v272_v26  ;;  %v243_v38 = vmax.f32 %v177_v34, %v178_v35  ;;  %v176_v40 = vld [vmem:[%s412_s11 + $0x1d8] sm:$0xf]  ;;  %v179_v41 = vld [vmem:[%s412_s11 + $0x1f0] sm:$0xf] }
  0x28   : > { %v274_v42 = vmax.f32 %v238_v30, %v240_v32  ;;  %v180_v43 = vld [vmem:[%s412_s11 + $0x1f8] sm:$0xf]  ;;  %v242_v44 = vmax.f32 %v175_v39, %v176_v40  ;;  %v181_v45 = vld [vmem:[%s412_s11 + $0x200] sm:$0xff]  ;;  %v182_v46 = vld [vmem:[%s412_s11 + $0x208] sm:$0xff]  ;;  %297 = vst [vmem:[%s426_s15 + $0x60] sm:$0xff] %v273_v36 }
  0x29   : > { %v275_v47 = vmax.f32 %v241_v37, %v243_v38  ;;  %v244_v48 = vmax.f32 %v179_v41, %v180_v43  ;;  %v185_v49 = vld [vmem:[%s412_s11 + $0x220] sm:$0xff]  ;;  %v186_v50 = vld [vmem:[%s412_s11 + $0x228] sm:$0xff]  ;;  %v245_v51 = vmax.f32 %v181_v45, %v182_v46  ;;  %v183_v52 = vld [vmem:[%s412_s11 + $0x210] sm:$0xf] }
  0x2a   : > { %298 = vst [vmem:[%s426_s15 + $0x68] sm:$0xf] %v274_v42  ;;  %v247_v53 = vmax.f32 %v185_v49, %v186_v50  ;;  %v184_v54 = vld [vmem:[%s412_s11 + $0x218] sm:$0xf]  ;;  %v187_v55 = vld [vmem:[%s412_s11 + $0x230] sm:$0xf] }
  0x2b   : > { %v188_v56 = vld [vmem:[%s412_s11 + $0x238] sm:$0xf]  ;;  %299 = vst [vmem:[%s426_s15 + $0x70] sm:$0xff] %v275_v47  ;;  %v276_v57 = vmax.f32 %v242_v44, %v244_v48  ;;  %v246_v58 = vmax.f32 %v183_v52, %v184_v54  ;;  %v189_v60 = vld [vmem:[%s412_s11 + $0x240] sm:$0xff]  ;;  %v190_v61 = vld [vmem:[%s412_s11 + $0x248] sm:$0xff] }
  0x2c   : > { %v248_v59 = vmax.f32 %v187_v55, %v188_v56  ;;  %v193_v62 = vld [vmem:[%s412_s11 + $0x260] sm:$0xff]  ;;  %v277_v63 = vmax.f32 %v245_v51, %v247_v53  ;;  %v194_v0 = vld [vmem:[%s412_s11 + $0x268] sm:$0xff]  ;;  %v249_v1 = vmax.f32 %v189_v60, %v190_v61  ;;  %v191_v2 = vld [vmem:[%s412_s11 + $0x250] sm:$0xf] }
  0x2d   : > { %v192_v3 = vld [vmem:[%s412_s11 + $0x258] sm:$0xf]  ;;  %300 = vst [vmem:[%s426_s15 + $0x78] sm:$0xf] %v276_v57  ;;  %v251_v5 = vmax.f32 %v193_v62, %v194_v0  ;;  %v195_v6 = vld [vmem:[%s412_s11 + $0x270] sm:$0xf] }
  0x2e   : > { %v278_v4 = vmax.f32 %v246_v58, %v248_v59  ;;  %v196_v7 = vld [vmem:[%s412_s11 + $0x278] sm:$0xf]  ;;  %v250_v8 = vmax.f32 %v191_v2, %v192_v3  ;;  %v197_v9 = vld [vmem:[%s412_s11 + $0x280] sm:$0xff]  ;;  %301 = vst [vmem:[%s426_s15 + $0x80] sm:$0xff] %v277_v63  ;;  %v198_v11 = vld [vmem:[%s412_s11 + $0x288] sm:$0xff] }
  0x2f   : > { %v252_v10 = vmax.f32 %v195_v6, %v196_v7  ;;  %v201_v12 = vld [vmem:[%s412_s11 + $0x2a0] sm:$0xff]  ;;  %v202_v13 = vld [vmem:[%s412_s11 + $0x2a8] sm:$0xff]  ;;  %v279_v14 = vmax.f32 %v249_v1, %v251_v5  ;;  %v253_v15 = vmax.f32 %v197_v9, %v198_v11  ;;  %v199_v17 = vld [vmem:[%s412_s11 + $0x290] sm:$0xf] }
  0x30   : > { %302 = vst [vmem:[%s426_s15 + $0x88] sm:$0xf] %v278_v4  ;;  %v255_v16 = vmax.f32 %v201_v12, %v202_v13  ;;  %v200_v18 = vld [vmem:[%s412_s11 + $0x298] sm:$0xf]  ;;  %v203_v19 = vld [vmem:[%s412_s11 + $0x2b0] sm:$0xf] }
  0x31   : > { %v280_v20 = vmax.f32 %v250_v8, %v252_v10  ;;  %v204_v21 = vld [vmem:[%s412_s11 + $0x2b8] sm:$0xf]  ;;  %v254_v22 = vmax.f32 %v199_v17, %v200_v18  ;;  %v205_v23 = vld [vmem:[%s412_s11 + $0x2c0] sm:$0xff]  ;;  %v206_v24 = vld [vmem:[%s412_s11 + $0x2c8] sm:$0xff]  ;;  %303 = vst [vmem:[%s426_s15 + $0x90] sm:$0xff] %v279_v14 }
  0x32   : > { %v281_v25 = vmax.f32 %v253_v15, %v255_v16  ;;  %v256_v26 = vmax.f32 %v203_v19, %v204_v21  ;;  %v209_v27 = vld [vmem:[%s412_s11 + $0x2e0] sm:$0xff]  ;;  %v210_v28 = vld [vmem:[%s412_s11 + $0x2e8] sm:$0xff]  ;;  %v257_v29 = vmax.f32 %v205_v23, %v206_v24  ;;  %v207_v30 = vld [vmem:[%s412_s11 + $0x2d0] sm:$0xf] }
  0x33   : > { %304 = vst [vmem:[%s426_s15 + $0x98] sm:$0xf] %v280_v20  ;;  %v259_v31 = vmax.f32 %v209_v27, %v210_v28  ;;  %v208_v32 = vld [vmem:[%s412_s11 + $0x2d8] sm:$0xf]  ;;  %v211_v33 = vld [vmem:[%s412_s11 + $0x2f0] sm:$0xf] }
  0x34   : > { %v212_v34 = vld [vmem:[%s412_s11 + $0x2f8] sm:$0xf]  ;;  %305 = vst [vmem:[%s426_s15 + $0xa0] sm:$0xff] %v281_v25  ;;  %v282_v35 = vmax.f32 %v254_v22, %v256_v26  ;;  %v258_v36 = vmax.f32 %v207_v30, %v208_v32 }
  0x35   : > { %v260_v37 = vmax.f32 %v211_v33, %v212_v34  ;;  %v283_v38 = vmax.f32 %v257_v29, %v259_v31 }
  0x36   : > { %306 = vst [vmem:[%s426_s15 + $0xa8] sm:$0xf] %v282_v35 }
  0x37   : > { %v284_v39 = vmax.f32 %v258_v36, %v260_v37  ;;  %307 = vst [vmem:[%s426_s15 + $0xb0] sm:$0xff] %v283_v38 }
  0x39   : > { %308 = vst [vmem:[%s426_s15 + $0xb8] sm:$0xf] %v284_v39 }
  0x3a PF: > { %s11_s6 = sadd.s32 1, %s389_s6  }
  0x3b   : > { %p8_p4 = scmp.ge.s32.totalorder %s11_s6, 4  }
  0x3d   :  { %10 = sbr.rel (!%p8_p4) target bundleno = 1 (0x1), region = 54 }

// kernel: session5_model_forward.8
= control target key start
LH: loop header
LB: loop body
LE: loop exit
PB: predicated region body
PF: predicated region fallthrough
CT: control target
= control target key end

     0   :  { %s3913_s12 = smov 0   ;;  %s5583_s0 = inlined_call_operand.vmem [shape: f32[1536,1152], index: 0, kind: input, shape index: {}]   ;;  %s5584_s1 = inlined_call_operand.vmem [shape: f32[1152,128], index: 1, kind: input, shape index: {}]   ;;  %s5585_s2 = inlined_call_operand.vmem [shape: f32[1,128], index: 2, kind: input, shape index: {}]   ;;  %s5586_s3 = inlined_call_operand.vmem [shape: f32[1536,128], index: 3, kind: output, shape index: {}]  }
   0x1 LB: > { %s3013_s13 = sadd.s32 4294967295, %s3890_s12   ;;  %p3017_p0 = scmp.ge.s32.totalorder %s3890_s12, 1  ;;  %s3890_s12 = sphi %s3913_s12, %s13_s12  }
   0x2   : > { %p139_p1 = scmp.lt.s32.totalorder %s3890_s12, 4 }
   0x4   : > { %p140_p2 = pnand %p3017_p0, %p139_p1 }
   0x6   : > { %143 = sbr.rel (%p140_p2) target bundleno = 871 (0x367), region = 32 }
   0xd   : > { %v753_v0 = vld [vmem:[%s5584_s1] sm:$0xff]  ;;  %v754_v1 = vld [vmem:[%s5584_s1 + $0x8] sm:$0xff]  ;;  %v3892_v3 = vmov 0.0|0.0   ;;  %v755_v6 = vld [vmem:[%s5584_s1 + $0x10] sm:$0xff]  ;;  %s3018_s30 = sshll.u32 %s3013_s13, 6 }
   0xe   : > { %v785_v2 = vld [vmem:[%s5584_s1 + $0x100] sm:$0xff]  ;;  %3233 = vmatprep.subr.bf16.mxu1 %v3892_v3  ;;  %3281 = vmatprep.subr.bf16.mxu0 %v3892_v3  ;;  %v3234_v4 = vpack.c.bf16 %v754_v1, %v753_v0  ;;  %v786_v5 = vld [vmem:[%s5584_s1 + $0x108] sm:$0xff]  ;;  %v756_v7 = vld [vmem:[%s5584_s1 + $0x18] sm:$0xff]  ;;  %p165_p3 = scmp.lt.s32.totalorder %s3018_s30, 191 }
   0xf   : > { %v3941_v8 = vpack.c.bf16 %v786_v5, %v785_v2  ;;  %v787_v9 = vld [vmem:[%s5584_s1 + $0x110] sm:$0xff]  ;;  %v788_v10 = vld [vmem:[%s5584_s1 + $0x118] sm:$0xff]  ;;  %v3237_v11 = vpack.c.bf16 %v756_v7, %v755_v6  ;;  %v757_v13 = vld [vmem:[%s5584_s1 + $0x20] sm:$0xff] }
  0x10   : > { %3235 = vmatpush1.bf16.msra.mxu1 %v3234_v4  ;;  %v3951_v12 = vpack.c.bf16 %v788_v10, %v787_v9  ;;  %v758_v14 = vld [vmem:[%s5584_s1 + $0x28] sm:$0xff]  ;;  %v789_v15 = vld [vmem:[%s5584_s1 + $0x120] sm:$0xff]  ;;  %v759_v19 = vld [vmem:[%s5584_s1 + $0x30] sm:$0xff]  ;;  %s5614_s30 = smov (!%p165_p3, %s3018_s30), 191 }
  0x11   : > { %3283 = vmatpush1.bf16.msra.mxu0 %v3941_v8  ;;  %3236 = vmatprep.subr.bf16.mxu1 %v3892_v3  ;;  %v790_v16 = vld [vmem:[%s5584_s1 + $0x128] sm:$0xff]  ;;  %v3240_v17 = vpack.c.bf16 %v758_v14, %v757_v13  ;;  %v760_v20 = vld [vmem:[%s5584_s1 + $0x38] sm:$0xff]  ;;  %v791_v21 = vld [vmem:[%s5584_s1 + $0x130] sm:$0xff]  ;;  %s3873_s29 = smul.u32 72, %s5614_s30 }
  0x12   : > { %3284 = vmatprep.subr.bf16.mxu0 %v3892_v3  ;;  %v3968_v18 = vpack.c.bf16 %v790_v16, %v789_v15  ;;  %v792_v22 = vld [vmem:[%s5584_s1 + $0x138] sm:$0xff]  ;;  %v3243_v23 = vpack.c.bf16 %v760_v20, %v759_v19  ;;  %v761_v25 = vld [vmem:[%s5584_s1 + $0x40] sm:$0xff]  ;;  %v762_v26 = vld [vmem:[%s5584_s1 + $0x48] sm:$0xff] }
  0x13   : > { %v3987_v24 = vpack.c.bf16 %v792_v22, %v791_v21  ;;  %v793_v27 = vld [vmem:[%s5584_s1 + $0x140] sm:$0xff]  ;;  %v794_v28 = vld [vmem:[%s5584_s1 + $0x148] sm:$0xff]  ;;  %v3246_v29 = vpack.c.bf16 %v762_v26, %v761_v25  ;;  %v763_v31 = vld [vmem:[%s5584_s1 + $0x50] sm:$0xff]  ;;  %s4023_s15 = scalar_lea.vmem %s5583_s0, %s3873_s29 }
  0x14   : > { %3238 = vmatpush1.bf16.msra.mxu1 %v3237_v11  ;;  %v4005_v30 = vpack.c.bf16 %v794_v28, %v793_v27  ;;  %v764_v32 = vld [vmem:[%s5584_s1 + $0x58] sm:$0xff]  ;;  %v795_v33 = vld [vmem:[%s5584_s1 + $0x150] sm:$0xff]  ;;  %v765_v37 = vld [vmem:[%s5584_s1 + $0x60] sm:$0xff] }
  0x15   : > { %3286 = vmatpush1.bf16.msra.mxu0 %v3951_v12  ;;  %3239 = vmatprep.subr.bf16.mxu1 %v3892_v3  ;;  %v796_v34 = vld [vmem:[%s5584_s1 + $0x158] sm:$0xff]  ;;  %v3249_v35 = vpack.c.bf16 %v764_v32, %v763_v31  ;;  %v766_v38 = vld [vmem:[%s5584_s1 + $0x68] sm:$0xff]  ;;  %v797_v39 = vld [vmem:[%s5584_s1 + $0x160] sm:$0xff] }
  0x16   : > { %3287 = vmatprep.subr.bf16.mxu0 %v3892_v3  ;;  %v4027_v36 = vpack.c.bf16 %v796_v34, %v795_v33  ;;  %v798_v40 = vld [vmem:[%s5584_s1 + $0x168] sm:$0xff]  ;;  %v180_v42 = vld [vmem:[%s4023_s15 + $0x18] sm:$0xff]  ;;  %v3252_v43 = vpack.c.bf16 %v766_v38, %v765_v37  ;;  %v767_v45 = vld [vmem:[%s5584_s1 + $0x70] sm:$0xff] }
  0x17   : > { %v178_v41 = vld [vmem:[%s4023_s15 + $0x8] sm:$0xff]  ;;  %1353 = vmatprep.mubr.f32.mxu0 %v180_v42  ;;  %v4046_v44 = vpack.c.bf16 %v798_v40, %v797_v39  ;;  %v768_v46 = vld [vmem:[%s5584_s1 + $0x78] sm:$0xff]  ;;  %v799_v47 = vld [vmem:[%s5584_s1 + $0x170] sm:$0xff] }
  0x18   : > { %3241 = vmatpush1.bf16.msra.mxu1 %v3240_v17  ;;  %968 = vmatprep.mubr.f32.mxu1 %v178_v41  ;;  %v800_v48 = vld [vmem:[%s5584_s1 + $0x178] sm:$0xff]  ;;  %v3255_v49 = vpack.c.bf16 %v768_v46, %v767_v45  ;;  %v769_v51 = vld [vmem:[%s5584_s1 + $0x80] sm:$0xff]  ;;  %v770_v52 = vld [vmem:[%s5584_s1 + $0x88] sm:$0xff] }
  0x19   : > { %3289 = vmatpush1.bf16.msra.mxu0 %v3968_v18  ;;  %3242 = vmatprep.subr.bf16.mxu1 %v3892_v3  ;;  %v4063_v50 = vpack.c.bf16 %v800_v48, %v799_v47  ;;  %v801_v53 = vld [vmem:[%s5584_s1 + $0x180] sm:$0xff]  ;;  %v802_v54 = vld [vmem:[%s5584_s1 + $0x188] sm:$0xff]  ;;  %v3258_v55 = vpack.c.bf16 %v770_v52, %v769_v51  ;;  %v771_v57 = vld [vmem:[%s5584_s1 + $0x90] sm:$0xff] }
  0x1a   : > { %3290 = vmatprep.subr.bf16.mxu0 %v3892_v3  ;;  %v4080_v56 = vpack.c.bf16 %v802_v54, %v801_v53  ;;  %v772_v58 = vld [vmem:[%s5584_s1 + $0x98] sm:$0xff]  ;;  %v803_v59 = vld [vmem:[%s5584_s1 + $0x190] sm:$0xff]  ;;  %v773_v63 = vld [vmem:[%s5584_s1 + $0xa0] sm:$0xff] }
  0x1b   : > { %v804_v60 = vld [vmem:[%s5584_s1 + $0x198] sm:$0xff]  ;;  %v3261_v61 = vpack.c.bf16 %v772_v58, %v771_v57  ;;  %v774_v0 = vld [vmem:[%s5584_s1 + $0xa8] sm:$0xff]  ;;  %v805_v1 = vld [vmem:[%s5584_s1 + $0x1a0] sm:$0xff] }
  0x1c   : > { %3244 = vmatpush1.bf16.msra.mxu1 %v3243_v23  ;;  %v4097_v62 = vpack.c.bf16 %v804_v60, %v803_v59  ;;  %v806_v2 = vld [vmem:[%s5584_s1 + $0x1a8] sm:$0xff]  ;;  %v3264_v4 = vpack.c.bf16 %v774_v0, %v773_v63  ;;  %v775_v6 = vld [vmem:[%s5584_s1 + $0xb0] sm:$0xff]  ;;  %v776_v7 = vld [vmem:[%s5584_s1 + $0xb8] sm:$0xff] }
  0x1d   : > { %3292 = vmatpush1.bf16.msra.mxu0 %v3987_v24  ;;  %3245 = vmatprep.subr.bf16.mxu1 %v3892_v3  ;;  %v4114_v5 = vpack.c.bf16 %v806_v2, %v805_v1  ;;  %v807_v9 = vld [vmem:[%s5584_s1 + $0x1b0] sm:$0xff]  ;;  %v808_v10 = vld [vmem:[%s5584_s1 + $0x1b8] sm:$0xff]  ;;  %v3267_v11 = vpack.c.bf16 %v776_v7, %v775_v6  ;;  %v777_v14 = vld [vmem:[%s5584_s1 + $0xc0] sm:$0xff] }
  0x1e   : > { %3293 = vmatprep.subr.bf16.mxu0 %v3892_v3  ;;  %v4131_v13 = vpack.c.bf16 %v808_v10, %v807_v9  ;;  %v778_v15 = vld [vmem:[%s5584_s1 + $0xc8] sm:$0xff]  ;;  %v809_v16 = vld [vmem:[%s5584_s1 + $0x1c0] sm:$0xff]  ;;  %v779_v21 = vld [vmem:[%s5584_s1 + $0xd0] sm:$0xff] }
  0x1f   : > { %v810_v17 = vld [vmem:[%s5584_s1 + $0x1c8] sm:$0xff]  ;;  %v3270_v19 = vpack.c.bf16 %v778_v15, %v777_v14  ;;  %v780_v22 = vld [vmem:[%s5584_s1 + $0xd8] sm:$0xff]  ;;  %v811_v23 = vld [vmem:[%s5584_s1 + $0x1d0] sm:$0xff] }
  0x20   : > { %3247 = vmatpush1.bf16.msra.mxu1 %v3246_v29  ;;  %v4148_v20 = vpack.c.bf16 %v810_v17, %v809_v16  ;;  %v812_v25 = vld [vmem:[%s5584_s1 + $0x1d8] sm:$0xff]  ;;  %v3273_v26 = vpack.c.bf16 %v780_v22, %v779_v21  ;;  %v781_v28 = vld [vmem:[%s5584_s1 + $0xe0] sm:$0xff]  ;;  %v782_v29 = vld [vmem:[%s5584_s1 + $0xe8] sm:$0xff] }
  0x21   : > { %3295 = vmatpush1.bf16.msra.mxu0 %v4005_v30  ;;  %3248 = vmatprep.subr.bf16.mxu1 %v3892_v3  ;;  %v4165_v27 = vpack.c.bf16 %v812_v25, %v811_v23  ;;  %v813_v31 = vld [vmem:[%s5584_s1 + $0x1e0] sm:$0xff]  ;;  %v814_v32 = vld [vmem:[%s5584_s1 + $0x1e8] sm:$0xff]  ;;  %v3276_v33 = vpack.c.bf16 %v782_v29, %v781_v28  ;;  %v784_v37 = vld [vmem:[%s5584_s1 + $0xf8] sm:$0xff] }
  0x22   : > { %3296 = vmatprep.subr.bf16.mxu0 %v3892_v3  ;;  %v4182_v34 = vpack.c.bf16 %v814_v32, %v813_v31  ;;  %v815_v38 = vld [vmem:[%s5584_s1 + $0x1f0] sm:$0xff]  ;;  %v816_v39 = vld [vmem:[%s5584_s1 + $0x1f8] sm:$0xff]  ;;  %v817_v42 = vld [vmem:[%s5584_s1 + $0x200] sm:$0xff] }
  0x23   : > { %v4199_v41 = vpack.c.bf16 %v816_v39, %v815_v38  ;;  %v177_v45 = vld [vmem:[%s4023_s15] sm:$0xff]  ;;  %v179_v46 = vld [vmem:[%s4023_s15 + $0x10] sm:$0xff]  ;;  %v820_v51 = vld [vmem:[%s5584_s1 + $0x218] sm:$0xff] }
  0x24   : > { %3250 = vmatpush1.bf16.msra.mxu1 %v3249_v35  ;;  %v783_v35 = vld [vmem:[%s5584_s1 + $0xf0] sm:$0xff]  ;;  %v189_v52 = vld [vmem:[%s4023_s15 + $0x60] sm:$0xff]  ;;  %v186_v53 = vld [vmem:[%s4023_s15 + $0x48] sm:$0xff] }
  0x25   : > { %3298 = vmatpush1.bf16.msra.mxu0 %v4027_v36  ;;  %3251 = vmatprep.subr.bf16.mxu1 %v3892_v3  ;;  %v3279_v40 = vpack.c.bf16 %v784_v37, %v783_v35  ;;  %v187_v48 = vld [vmem:[%s4023_s15 + $0x50] sm:$0xff]  ;;  %v188_v54 = vld [vmem:[%s4023_s15 + $0x58] sm:$0xff]  ;;  %v198_v58 = vld [vmem:[%s4023_s15 + $0xa8] sm:$0xff] }
  0x26   : > { %3299 = vmatprep.subr.bf16.mxu0 %v3892_v3  ;;  %v196_v57 = vld [vmem:[%s4023_s15 + $0x98] sm:$0xff]  ;;  %v821_v59 = vld [vmem:[%s5584_s1 + $0x220] sm:$0xff]  ;;  %v195_v60 = vld [vmem:[%s4023_s15 + $0x90] sm:$0xff] }
  0x27   : > { %v205_v0 = vld [vmem:[%s4023_s15 + $0xe0] sm:$0xff]  ;;  %v207_v1 = vld [vmem:[%s4023_s15 + $0xf0] sm:$0xff]  ;;  %v204_v6 = vld [vmem:[%s4023_s15 + $0xd8] sm:$0xff] }
  0x28   : > { %3253 = vmatpush1.bf16.msra.mxu1 %v3252_v43  ;;  %v818_v43 = vld [vmem:[%s5584_s1 + $0x208] sm:$0xff]  ;;  %v823_v2 = vld [vmem:[%s5584_s1 + $0x230] sm:$0xff]  ;;  %v213_v15 = vld [vmem:[%s4023_s15 + $0x120] sm:$0xff] }
  0x29   : > { %3301 = vmatpush1.bf16.msra.mxu0 %v4046_v44  ;;  %3254 = vmatprep.subr.bf16.mxu1 %v3892_v3  ;;  %v3330_v47 = vpack.c.bf16 %v818_v43, %v817_v42  ;;  %v206_v7 = vld [vmem:[%s4023_s15 + $0xe8] sm:$0xff]  ;;  %v215_v16 = vld [vmem:[%s4023_s15 + $0x130] sm:$0xff]  ;;  %v225_v21 = vld [vmem:[%s4023_s15 + $0x180] sm:$0xff] }
  0x2a   : > { %3302 = vmatprep.subr.bf16.mxu0 %v3892_v3  ;;  %v214_v10 = vld [vmem:[%s4023_s15 + $0x128] sm:$0xff]  ;;  %v828_v22 = vld [vmem:[%s5584_s1 + $0x258] sm:$0xff]  ;;  %v231_v32 = vld [vmem:[%s4023_s15 + $0x1b0] sm:$0xff] }
  0x2b   : > { %v826_v14 = vld [vmem:[%s5584_s1 + $0x248] sm:$0xff]  ;;  %v224_v25 = vld [vmem:[%s4023_s15 + $0x178] sm:$0xff]  ;;  %v241_v37 = vld [vmem:[%s4023_s15 + $0x200] sm:$0xff] }
  0x2c   : > { %3256 = vmatpush1.bf16.msra.mxu1 %v3255_v49  ;;  %v819_v49 = vld [vmem:[%s5584_s1 + $0x210] sm:$0xff]  ;;  %v222_v23 = vld [vmem:[%s4023_s15 + $0x168] sm:$0xff]  ;;  %v232_v28 = vld [vmem:[%s4023_s15 + $0x1b8] sm:$0xff] }
  0x2d   : > { %3304 = vmatpush1.bf16.msra.mxu0 %v4063_v50  ;;  %3257 = vmatprep.subr.bf16.mxu1 %v3892_v3  ;;  %v234_v29 = vld [vmem:[%s4023_s15 + $0x1c8] sm:$0xff]  ;;  %v243_v38 = vld [vmem:[%s4023_s15 + $0x210] sm:$0xff]  ;;  %v832_v39 = vld [vmem:[%s5584_s1 + $0x278] sm:$0xff] }
  0x2e   : > { %3305 = vmatprep.subr.bf16.mxu0 %v3892_v3  ;;  %v830_v31 = vld [vmem:[%s5584_s1 + $0x268] sm:$0xff] }
  0x2f   : > { %v242_v42 = vld [vmem:[%s4023_s15 + $0x208] sm:$0xff] }
  0x30   : > { %3259 = vmatpush1.bf16.msra.mxu1 %v3258_v55  ;;  %v3333_v55 = vpack.c.bf16 %v820_v51, %v819_v49  ;;  %v251_v49 = vld [vmem:[%s4023_s15 + $0x250] sm:$0xff] }
  0x31   : > { %3307 = vmatpush1.bf16.msra.mxu0 %v4080_v56  ;;  %3260 = vmatprep.subr.bf16.mxu1 %v3892_v3 }
  0x32   : > { %3308 = vmatprep.subr.bf16.mxu0 %v3892_v3 }
  0x34   : > { %3262 = vmatpush1.bf16.msra.mxu1 %v3261_v61  ;;  %v197_v61 = vld [vmem:[%s4023_s15 + $0xa0] sm:$0xff] }
  0x35   : > { %3310 = vmatpush1.bf16.msra.mxu0 %v4097_v62  ;;  %3263 = vmatprep.subr.bf16.mxu1 %v3892_v3 }
  0x36   : > { %3311 = vmatprep.subr.bf16.mxu0 %v3892_v3 }
  0x38   : > { %3265 = vmatpush1.bf16.msra.mxu1 %v3264_v4  ;;  %v824_v4 = vld [vmem:[%s5584_s1 + $0x238] sm:$0xff] }
  0x39   : > { %3313 = vmatpush1.bf16.msra.mxu0 %v4114_v5  ;;  %3266 = vmatprep.subr.bf16.mxu1 %v3892_v3  ;;  %v3339_v9 = vpack.c.bf16 %v824_v4, %v823_v2  ;;  %v279_v2 = vld [vmem:[%s4023_s15 + $0x330] sm:$0xff]  ;;  %v840_v4 = vld [vmem:[%s5584_s1 + $0x2b8] sm:$0xff] }
  0x3a   : > { %3314 = vmatprep.subr.bf16.mxu0 %v3892_v3 }
  0x3c   : > { %3268 = vmatpush1.bf16.msra.mxu1 %v3267_v11  ;;  %v216_v11 = vld [vmem:[%s4023_s15 + $0x138] sm:$0xff] }
  0x3d   : > { %3316 = vmatpush1.bf16.msra.mxu0 %v4131_v13  ;;  %3269 = vmatprep.subr.bf16.mxu1 %v3892_v3 }
  0x3e   : > { %3317 = vmatprep.subr.bf16.mxu0 %v3892_v3 }
  0x40   : > { %3271 = vmatpush1.bf16.msra.mxu1 %v3270_v19  ;;  %v223_v19 = vld [vmem:[%s4023_s15 + $0x170] sm:$0xff] }
  0x41   : > { %3319 = vmatpush1.bf16.msra.mxu0 %v4148_v20  ;;  %3272 = vmatprep.subr.bf16.mxu1 %v3892_v3 }
  0x42   : > { %3320 = vmatprep.subr.bf16.mxu0 %v3892_v3 }
  0x44   : > { %3274 = vmatpush1.bf16.msra.mxu1 %v3273_v26 }
  0x45   : > { %3322 = vmatpush1.bf16.msra.mxu0 %v4165_v27  ;;  %3275 = vmatprep.subr.bf16.mxu1 %v3892_v3 }
  0x46   : > { %3323 = vmatprep.subr.bf16.mxu0 %v3892_v3 }
  0x48   : > { %3277 = vmatpush1.bf16.msra.mxu1 %v3276_v33  ;;  %v233_v33 = vld [vmem:[%s4023_s15 + $0x1c0] sm:$0xff] }
  0x49   : > { %3325 = vmatpush1.bf16.msra.mxu0 %v4182_v34  ;;  %3278 = vmatprep.subr.bf16.mxu1 %v3892_v3 }
  0x4a   : > { %3326 = vmatprep.subr.bf16.mxu0 %v3892_v3 }
  0x4c   : > { %3280 = vmatpush1.bf16.msra.mxu1 %v3279_v40  ;;  %v240_v40 = vld [vmem:[%s4023_s15 + $0x1f8] sm:$0xff] }
  0x4d   : > { %3328 = vmatpush1.bf16.msra.mxu0 %v4199_v41  ;;  %3457 = vmatprep.subr.bf16.mxu1 %v3892_v3 }
  0x4e   : > { %3329 = vmatprep.subr.bf16.mxu0 %v3892_v3 }
  0x4f   : > { %969 = vmatmul.mubr.f32.vlgmr.msra.gmra.mrb[0].mxu1 %v177_v45  ;;  %v250_v45 = vld [vmem:[%s4023_s15 + $0x248] sm:$0xff] }
  0x50   : > { %1354 = vmatmul.mubr.f32.vlgmr.msra.gmra.mrb[0].mxu0 %v179_v46  ;;  %3473 = vmatpush1.bf16.msra.mxu1 %v3941_v8  ;;  %v822_v8 = vld [vmem:[%s5584_s1 + $0x228] sm:$0xff]  ;;  %v252_v46 = vld [vmem:[%s4023_s15 + $0x258] sm:$0xff] }
  0x51   : > { %3331 = vmatpush1.bf16.msra.mxu0 %v3330_v47  ;;  %973 = vmatprep.mubr.f32.mxu1 %v187_v48  ;;  %v3336_v63 = vpack.c.bf16 %v822_v8, %v821_v59  ;;  %v834_v47 = vld [vmem:[%s5584_s1 + $0x288] sm:$0xff]  ;;  %v249_v48 = vld [vmem:[%s4023_s15 + $0x240] sm:$0xff]  ;;  %v268_v59 = vld [vmem:[%s4023_s15 + $0x2d8] sm:$0xff] }
  0x52   : > { %1358 = vmatprep.mubr.f32.mxu0 %v189_v52  ;;  %3332 = vmatprep.subr.bf16.mxu0 %v3892_v3  ;;  %v259_v52 = vld [vmem:[%s4023_s15 + $0x290] sm:$0xff]  ;;  %v270_v8 = vld [vmem:[%s4023_s15 + $0x2e8] sm:$0xff] }
  0x53   : > { %974 = vmatmul.mubr.f32.gmra.mrb[2].mxu1 %v186_v53  ;;  %3458 = vmatprep.subr.bf16.mxu1 %v3892_v3  ;;  %v261_v53 = vld [vmem:[%s4023_s15 + $0x2a0] sm:$0xff] }
  0x54   : > { %1359 = vmatmul.mubr.f32.gmra.mrb[2].mxu0 %v188_v54  ;;  %978 = vmatprep.mubr.f32.mxu1 %v196_v57  ;;  %v836_v54 = vld [vmem:[%s5584_s1 + $0x298] sm:$0xff] }
  0x55   : > { %3334 = vmatpush1.bf16.msra.mxu0 %v3333_v55  ;;  %1363 = vmatprep.mubr.f32.mxu0 %v198_v58  ;;  %v258_v55 = vld [vmem:[%s4023_s15 + $0x288] sm:$0xff]  ;;  %v260_v57 = vld [vmem:[%s4023_s15 + $0x298] sm:$0xff] }
  0x56   : > { %3335 = vmatprep.subr.bf16.mxu0 %v3892_v3  ;;  %3474 = vmatpush1.bf16.msra.mxu1 %v3951_v12  ;;  %v825_v12 = vld [vmem:[%s5584_s1 + $0x240] sm:$0xff] }
  0x57   : > { %979 = vmatmul.mubr.f32.gmra.mrb[4].mxu1 %v195_v60  ;;  %3459 = vmatprep.subr.bf16.mxu1 %v3892_v3  ;;  %v3342_v17 = vpack.c.bf16 %v826_v14, %v825_v12  ;;  %v838_v60 = vld [vmem:[%s5584_s1 + $0x2a8] sm:$0xff]  ;;  %v285_v14 = vld [vmem:[%s4023_s15 + $0x360] sm:$0xff] }
  0x58   : > { %1364 = vmatmul.mubr.f32.gmra.mrb[4].mxu0 %v197_v61  ;;  %983 = vmatprep.mubr.f32.mxu1 %v205_v0  ;;  %v267_v61 = vld [vmem:[%s4023_s15 + $0x2d0] sm:$0xff]  ;;  %v842_v12 = vld [vmem:[%s5584_s1 + $0x2c8] sm:$0xff] }
  0x59   : > { %3337 = vmatpush1.bf16.msra.mxu0 %v3336_v63  ;;  %1368 = vmatprep.mubr.f32.mxu0 %v207_v1  ;;  %v269_v63 = vld [vmem:[%s4023_s15 + $0x2e0] sm:$0xff] }
  0x5a   : > { %3338 = vmatprep.subr.bf16.mxu0 %v3892_v3  ;;  %3475 = vmatpush1.bf16.msra.mxu1 %v3968_v18  ;;  %v827_v18 = vld [vmem:[%s5584_s1 + $0x250] sm:$0xff]  ;;  %v277_v1 = vld [vmem:[%s4023_s15 + $0x320] sm:$0xff] }
  0x5b   : > { %984 = vmatmul.mubr.f32.gmra.mrb[6].mxu1 %v204_v6  ;;  %3460 = vmatprep.subr.bf16.mxu1 %v3892_v3  ;;  %v3345_v26 = vpack.c.bf16 %v828_v22, %v827_v18  ;;  %v276_v6 = vld [vmem:[%s4023_s15 + $0x318] sm:$0xff]  ;;  %v294_v18 = vld [vmem:[%s4023_s15 + $0x3a8] sm:$0xff] }
  0x5c   : > { %1369 = vmatmul.mubr.f32.gmra.mrb[6].mxu0 %v206_v7  ;;  %988 = vmatprep.mubr.f32.mxu1 %v214_v10  ;;  %v278_v7 = vld [vmem:[%s4023_s15 + $0x328] sm:$0xff]  ;;  %v296_v22 = vld [vmem:[%s4023_s15 + $0x3b8] sm:$0xff] }
  0x5d   : > { %3340 = vmatpush1.bf16.msra.mxu0 %v3339_v9  ;;  %1373 = vmatprep.mubr.f32.mxu0 %v216_v11  ;;  %v286_v10 = vld [vmem:[%s4023_s15 + $0x368] sm:$0xff]  ;;  %v288_v11 = vld [vmem:[%s4023_s15 + $0x378] sm:$0xff] }
  0x5e   : > { %3341 = vmatprep.subr.bf16.mxu0 %v3892_v3  ;;  %3476 = vmatpush1.bf16.msra.mxu1 %v3987_v24  ;;  %v829_v24 = vld [vmem:[%s5584_s1 + $0x260] sm:$0xff] }
  0x5f   : > { %989 = vmatmul.mubr.f32.gmra.mrb[8].mxu1 %v213_v15  ;;  %3461 = vmatprep.subr.bf16.mxu1 %v3892_v3  ;;  %v3348_v35 = vpack.c.bf16 %v830_v31, %v829_v24  ;;  %v287_v15 = vld [vmem:[%s4023_s15 + $0x370] sm:$0xff]  ;;  %v305_v24 = vld [vmem:[%s4023_s15 + $0x400] sm:$0xff] }
  0x60   : > { %1374 = vmatmul.mubr.f32.gmra.mrb[8].mxu0 %v215_v16  ;;  %993 = vmatprep.mubr.f32.mxu1 %v223_v19  ;;  %v297_v19 = vld [vmem:[%s4023_s15 + $0x3c0] sm:$0xff] }
  0x61   : > { %3343 = vmatpush1.bf16.msra.mxu0 %v3342_v17  ;;  %1378 = vmatprep.mubr.f32.mxu0 %v225_v21  ;;  %v295_v17 = vld [vmem:[%s4023_s15 + $0x3b0] sm:$0xff]  ;;  %v844_v21 = vld [vmem:[%s5584_s1 + $0x2d8] sm:$0xff] }
  0x62   : > { %3344 = vmatprep.subr.bf16.mxu0 %v3892_v3  ;;  %3477 = vmatpush1.bf16.msra.mxu1 %v4005_v30  ;;  %v831_v30 = vld [vmem:[%s5584_s1 + $0x270] sm:$0xff] }
  0x63   : > { %994 = vmatmul.mubr.f32.gmra.mrb[10].mxu1 %v222_v23  ;;  %3462 = vmatprep.subr.bf16.mxu1 %v3892_v3  ;;  %v3351_v43 = vpack.c.bf16 %v832_v39, %v831_v30  ;;  %v322_v39 = vld [vmem:[%s4023_s15 + $0x488] sm:$0xff] }
  0x64   : > { %1379 = vmatmul.mubr.f32.gmra.mrb[10].mxu0 %v224_v25  ;;  %998 = vmatprep.mubr.f32.mxu1 %v232_v28  ;;  %v304_v25 = vld [vmem:[%s4023_s15 + $0x3f8] sm:$0xff]  ;;  %v846_v28 = vld [vmem:[%s5584_s1 + $0x2e8] sm:$0xff] }
  0x65   : > { %3346 = vmatpush1.bf16.msra.mxu0 %v3345_v26  ;;  %1383 = vmatprep.mubr.f32.mxu0 %v234_v29  ;;  %v306_v26 = vld [vmem:[%s4023_s15 + $0x408] sm:$0xff]  ;;  %v303_v29 = vld [vmem:[%s4023_s15 + $0x3f0] sm:$0xff] }
  0x66   : > { %3347 = vmatprep.subr.bf16.mxu0 %v3892_v3  ;;  %3478 = vmatpush1.bf16.msra.mxu1 %v4027_v36  ;;  %v833_v36 = vld [vmem:[%s5584_s1 + $0x280] sm:$0xff] }
  0x67   : > { %999 = vmatmul.mubr.f32.gmra.mrb[12].mxu1 %v231_v32  ;;  %3463 = vmatprep.subr.bf16.mxu1 %v3892_v3  ;;  %v3354_v51 = vpack.c.bf16 %v834_v47, %v833_v36  ;;  %v313_v32 = vld [vmem:[%s4023_s15 + $0x440] sm:$0xff]  ;;  %v331_v36 = vld [vmem:[%s4023_s15 + $0x4d0] sm:$0xff] }
  0x68   : > { %1384 = vmatmul.mubr.f32.gmra.mrb[12].mxu0 %v233_v33  ;;  %1003 = vmatprep.mubr.f32.mxu1 %v241_v37  ;;  %v315_v33 = vld [vmem:[%s4023_s15 + $0x450] sm:$0xff]  ;;  %v312_v37 = vld [vmem:[%s4023_s15 + $0x438] sm:$0xff] }
  0x69   : > { %3349 = vmatpush1.bf16.msra.mxu0 %v3348_v35  ;;  %1388 = vmatprep.mubr.f32.mxu0 %v243_v38  ;;  %v848_v35 = vld [vmem:[%s5584_s1 + $0x2f8] sm:$0xff]  ;;  %v314_v38 = vld [vmem:[%s4023_s15 + $0x448] sm:$0xff]  ;;  %v191_v47 = vld [vmem:[%s4023_s15 + $0x70] sm:$0xff] }
  0x6a   : > { %3350 = vmatprep.subr.bf16.mxu0 %v3892_v3  ;;  %3479 = vmatpush1.bf16.msra.mxu1 %v4046_v44  ;;  %v835_v44 = vld [vmem:[%s5584_s1 + $0x290] sm:$0xff] }
  0x6b   : > { %1004 = vmatmul.mubr.f32.gmra.mrb[14].mxu1 %v240_v40  ;;  %3464 = vmatprep.subr.bf16.mxu1 %v3892_v3  ;;  %v3357_v58 = vpack.c.bf16 %v836_v54, %v835_v44  ;;  %v182_v40 = vld [vmem:[%s4023_s15 + $0x28] sm:$0xff]  ;;  %v200_v44 = vld [vmem:[%s4023_s15 + $0xb8] sm:$0xff] }
  0x6c   : > { %1389 = vmatmul.mubr.f32.gmra.mrb[14].mxu0 %v242_v42  ;;  %1008 = vmatprep.mubr.f32.mxu1 %v250_v45  ;;  %v850_v42 = vld [vmem:[%s5584_s1 + $0x308] sm:$0xff]  ;;  %v181_v45 = vld [vmem:[%s4023_s15 + $0x20] sm:$0xff] }
  0x6d   : > { %3352 = vmatpush1.bf16.msra.mxu0 %v3351_v43  ;;  %1393 = vmatprep.mubr.f32.mxu0 %v252_v46  ;;  %v321_v43 = vld [vmem:[%s4023_s15 + $0x480] sm:$0xff]  ;;  %v854_v54 = vld [vmem:[%s5584_s1 + $0x328] sm:$0xff] }
  0x6e   : > { %3353 = vmatprep.subr.bf16.mxu0 %v3892_v3  ;;  %3480 = vmatpush1.bf16.msra.mxu1 %v4063_v50  ;;  %v837_v50 = vld [vmem:[%s5584_s1 + $0x2a0] sm:$0xff] }
  0x6f   : > { %1009 = vmatmul.mubr.f32.gmra.mrb[16].mxu1 %v249_v48  ;;  %3465 = vmatprep.subr.bf16.mxu1 %v3892_v3  ;;  %v3360_v0 = vpack.c.bf16 %v838_v60, %v837_v50  ;;  %v852_v48 = vld [vmem:[%s5584_s1 + $0x318] sm:$0xff]  ;;  %v855_v50 = vld [vmem:[%s5584_s1 + $0x330] sm:$0xff] }
  0x70   : > { %1394 = vmatmul.mubr.f32.gmra.mrb[16].mxu0 %v251_v49  ;;  %1013 = vmatprep.mubr.f32.mxu1 %v259_v52  ;;  %v330_v49 = vld [vmem:[%s4023_s15 + $0x4c8] sm:$0xff]  ;;  %v340_v52 = vld [vmem:[%s4023_s15 + $0x518] sm:$0xff] }
  0x71   : > { %3355 = vmatpush1.bf16.msra.mxu0 %v3354_v51  ;;  %1398 = vmatprep.mubr.f32.mxu0 %v261_v53  ;;  %v190_v51 = vld [vmem:[%s4023_s15 + $0x68] sm:$0xff]  ;;  %v856_v60 = vld [vmem:[%s5584_s1 + $0x338] sm:$0xff] }
  0x72   : > { %3356 = vmatprep.subr.bf16.mxu0 %v3892_v3  ;;  %3481 = vmatpush1.bf16.msra.mxu1 %v4080_v56  ;;  %v839_v56 = vld [vmem:[%s5584_s1 + $0x2b0] sm:$0xff] }
  0x73   : > { %1014 = vmatmul.mubr.f32.gmra.mrb[18].mxu1 %v258_v55  ;;  %3466 = vmatprep.subr.bf16.mxu1 %v3892_v3  ;;  %v3363_v9 = vpack.c.bf16 %v840_v4, %v839_v56  ;;  %v339_v55 = vld [vmem:[%s4023_s15 + $0x510] sm:$0xff]  ;;  %v857_v56 = vld [vmem:[%s5584_s1 + $0x340] sm:$0xff]  ;;  %v858_v4 = vld [vmem:[%s5584_s1 + $0x348] sm:$0xff] }
  0x74   : > { %1399 = vmatmul.mubr.f32.gmra.mrb[18].mxu0 %v260_v57  ;;  %1018 = vmatprep.mubr.f32.mxu1 %v268_v59  ;;  %v199_v57 = vld [vmem:[%s4023_s15 + $0xb0] sm:$0xff] }
  0x75   : > { %3358 = vmatpush1.bf16.msra.mxu0 %v3357_v58  ;;  %1403 = vmatprep.mubr.f32.mxu0 %v270_v8  ;;  %v349_v58 = vld [vmem:[%s4023_s15 + $0x560] sm:$0xff] }
  0x76   : > { %3359 = vmatprep.subr.bf16.mxu0 %v3892_v3  ;;  %3482 = vmatpush1.bf16.msra.mxu1 %v4097_v62  ;;  %v841_v62 = vld [vmem:[%s5584_s1 + $0x2c0] sm:$0xff] }
  0x77   : > { %1019 = vmatmul.mubr.f32.gmra.mrb[20].mxu1 %v267_v61  ;;  %3467 = vmatprep.subr.bf16.mxu1 %v3892_v3  ;;  %v3366_v16 = vpack.c.bf16 %v842_v12, %v841_v62  ;;  %v209_v8 = vld [vmem:[%s4023_s15 + $0x100] sm:$0xff]  ;;  %v348_v61 = vld [vmem:[%s4023_s15 + $0x558] sm:$0xff]  ;;  %v859_v62 = vld [vmem:[%s5584_s1 + $0x350] sm:$0xff] }
  0x78   : > { %1404 = vmatmul.mubr.f32.gmra.mrb[20].mxu0 %v269_v63  ;;  %1023 = vmatprep.mubr.f32.mxu1 %v277_v1  ;;  %v208_v63 = vld [vmem:[%s4023_s15 + $0xf8] sm:$0xff]  ;;  %v3387_v1 = vpack.c.bf16 %v856_v60, %v855_v50  ;;  %v299_v50 = vld [vmem:[%s4023_s15 + $0x3d0] sm:$0xff]  ;;  %v438_v60 = vld [vmem:[%s4023_s15 + $0x828] sm:$0xff] }
  0x79   : > { %3361 = vmatpush1.bf16.msra.mxu0 %v3360_v0  ;;  %1408 = vmatprep.mubr.f32.mxu0 %v279_v2  ;;  %v358_v0 = vld [vmem:[%s4023_s15 + $0x5a8] sm:$0xff]  ;;  %v860_v12 = vld [vmem:[%s5584_s1 + $0x358] sm:$0xff] }
  0x7a   : > { %3362 = vmatprep.subr.bf16.mxu0 %v3892_v3  ;;  %3483 = vmatpush1.bf16.msra.mxu1 %v4114_v5  ;;  %v843_v5 = vld [vmem:[%s5584_s1 + $0x2d0] sm:$0xff]  ;;  %v218_v2 = vld [vmem:[%s4023_s15 + $0x148] sm:$0xff] }
  0x7b   : > { %1024 = vmatmul.mubr.f32.gmra.mrb[22].mxu1 %v276_v6  ;;  %3468 = vmatprep.subr.bf16.mxu1 %v3892_v3  ;;  %v3369_v23 = vpack.c.bf16 %v844_v21, %v843_v5  ;;  %v357_v6 = vld [vmem:[%s4023_s15 + $0x5a0] sm:$0xff]  ;;  %v862_v21 = vld [vmem:[%s5584_s1 + $0x368] sm:$0xff] }
  0x7c   : > { %1409 = vmatmul.mubr.f32.gmra.mrb[22].mxu0 %v278_v7  ;;  %1028 = vmatprep.mubr.f32.mxu1 %v286_v10  ;;  %v217_v7 = vld [vmem:[%s4023_s15 + $0x140] sm:$0xff]  ;;  %v3390_v10 = vpack.c.bf16 %v858_v4, %v857_v56  ;;  %v308_v56 = vld [vmem:[%s4023_s15 + $0x418] sm:$0xff]  ;;  %v447_v4 = vld [vmem:[%s4023_s15 + $0x870] sm:$0xff] }
  0x7d   : > { %3364 = vmatpush1.bf16.msra.mxu0 %v3363_v9  ;;  %1413 = vmatprep.mubr.f32.mxu0 %v288_v11  ;;  %v367_v9 = vld [vmem:[%s4023_s15 + $0x5f0] sm:$0xff]  ;;  %v861_v5 = vld [vmem:[%s5584_s1 + $0x360] sm:$0xff] }
  0x7e   : > { %3365 = vmatprep.subr.bf16.mxu0 %v3892_v3  ;;  %3484 = vmatpush1.bf16.msra.mxu1 %v4131_v13  ;;  %v845_v13 = vld [vmem:[%s5584_s1 + $0x2e0] sm:$0xff]  ;;  %v227_v11 = vld [vmem:[%s4023_s15 + $0x190] sm:$0xff] }
  0x7f   : > { %1029 = vmatmul.mubr.f32.gmra.mrb[24].mxu1 %v285_v14  ;;  %3469 = vmatprep.subr.bf16.mxu1 %v3892_v3  ;;  %v3372_v31 = vpack.c.bf16 %v846_v28, %v845_v13  ;;  %v366_v14 = vld [vmem:[%s4023_s15 + $0x5e8] sm:$0xff]  ;;  %v863_v13 = vld [vmem:[%s5584_s1 + $0x370] sm:$0xff]  ;;  %v864_v28 = vld [vmem:[%s5584_s1 + $0x378] sm:$0xff] }
  0x80   : > { %1414 = vmatmul.mubr.f32.gmra.mrb[24].mxu0 %v287_v15  ;;  %1033 = vmatprep.mubr.f32.mxu1 %v295_v17  ;;  %v226_v15 = vld [vmem:[%s4023_s15 + $0x188] sm:$0xff]  ;;  %v3393_v17 = vpack.c.bf16 %v860_v12, %v859_v62 }
  0x81   : > { %3367 = vmatpush1.bf16.msra.mxu0 %v3366_v16  ;;  %1418 = vmatprep.mubr.f32.mxu0 %v297_v19  ;;  %v376_v16 = vld [vmem:[%s4023_s15 + $0x638] sm:$0xff]  ;;  %v466_v62 = vld [vmem:[%s4023_s15 + $0x908] sm:$0xff] }
  0x82   : > { %3368 = vmatprep.subr.bf16.mxu0 %v3892_v3  ;;  %3485 = vmatpush1.bf16.msra.mxu1 %v4148_v20  ;;  %v847_v20 = vld [vmem:[%s5584_s1 + $0x2f0] sm:$0xff]  ;;  %v236_v19 = vld [vmem:[%s4023_s15 + $0x1d8] sm:$0xff]  ;;  %v326_v12 = vld [vmem:[%s4023_s15 + $0x4a8] sm:$0xff] }
  0x83   : > { %1034 = vmatmul.mubr.f32.gmra.mrb[26].mxu1 %v294_v18  ;;  %3470 = vmatprep.subr.bf16.mxu1 %v3892_v3  ;;  %v3375_v30 = vpack.c.bf16 %v848_v35, %v847_v20  ;;  %v375_v18 = vld [vmem:[%s4023_s15 + $0x630] sm:$0xff]  ;;  %v865_v20 = vld [vmem:[%s5584_s1 + $0x380] sm:$0xff]  ;;  %v866_v35 = vld [vmem:[%s5584_s1 + $0x388] sm:$0xff] }
  0x84   : > { %1419 = vmatmul.mubr.f32.gmra.mrb[26].mxu0 %v296_v22  ;;  %1038 = vmatprep.mubr.f32.mxu1 %v304_v25  ;;  %v235_v22 = vld [vmem:[%s4023_s15 + $0x1d0] sm:$0xff]  ;;  %v3396_v25 = vpack.c.bf16 %v862_v21, %v861_v5  ;;  %v873_v5 = vld [vmem:[%s5584_s1 + $0x3c0] sm:$0xff]  ;;  %v874_v21 = vld [vmem:[%s5584_s1 + $0x3c8] sm:$0xff] }
  0x85   : > { %3370 = vmatpush1.bf16.msra.mxu0 %v3369_v23  ;;  %1423 = vmatprep.mubr.f32.mxu0 %v306_v26  ;;  %v385_v23 = vld [vmem:[%s4023_s15 + $0x680] sm:$0xff] }
  0x86   : > { %3371 = vmatprep.subr.bf16.mxu0 %v3892_v3  ;;  %3486 = vmatpush1.bf16.msra.mxu1 %v4165_v27  ;;  %v849_v27 = vld [vmem:[%s5584_s1 + $0x300] sm:$0xff] }
  0x87   : > { %1039 = vmatmul.mubr.f32.gmra.mrb[28].mxu1 %v303_v29  ;;  %3471 = vmatprep.subr.bf16.mxu1 %v3892_v3  ;;  %v3378_v46 = vpack.c.bf16 %v850_v42, %v849_v27  ;;  %v245_v26 = vld [vmem:[%s4023_s15 + $0x220] sm:$0xff]  ;;  %v384_v29 = vld [vmem:[%s4023_s15 + $0x678] sm:$0xff]  ;;  %v867_v27 = vld [vmem:[%s5584_s1 + $0x390] sm:$0xff] }
  0x88   : > { %1424 = vmatmul.mubr.f32.gmra.mrb[28].mxu0 %v305_v24  ;;  %1043 = vmatprep.mubr.f32.mxu1 %v313_v32  ;;  %v244_v24 = vld [vmem:[%s4023_s15 + $0x218] sm:$0xff]  ;;  %v3399_v32 = vpack.c.bf16 %v864_v28, %v863_v13 }
  0x89   : > { %3373 = vmatpush1.bf16.msra.mxu0 %v3372_v31  ;;  %1428 = vmatprep.mubr.f32.mxu0 %v315_v33  ;;  %v394_v31 = vld [vmem:[%s4023_s15 + $0x6c8] sm:$0xff]  ;;  %v868_v42 = vld [vmem:[%s5584_s1 + $0x398] sm:$0xff] }
  0x8a   : > { %3374 = vmatprep.subr.bf16.mxu0 %v3892_v3  ;;  %3487 = vmatpush1.bf16.msra.mxu1 %v4182_v34  ;;  %v851_v34 = vld [vmem:[%s5584_s1 + $0x310] sm:$0xff]  ;;  %v254_v33 = vld [vmem:[%s4023_s15 + $0x268] sm:$0xff]  ;;  %v344_v13 = vld [vmem:[%s4023_s15 + $0x538] sm:$0xff] }
  0x8b   : > { %1044 = vmatmul.mubr.f32.gmra.mrb[30].mxu1 %v312_v37  ;;  %3472 = vmatprep.subr.bf16.mxu1 %v3892_v3  ;;  %v3381_v53 = vpack.c.bf16 %v852_v48, %v851_v34  ;;  %v393_v37 = vld [vmem:[%s4023_s15 + $0x6c0] sm:$0xff]  ;;  %v870_v48 = vld [vmem:[%s5584_s1 + $0x3a8] sm:$0xff] }
  0x8c   : > { %1429 = vmatmul.mubr.f32.gmra.mrb[30].mxu0 %v314_v38  ;;  %1048 = vmatprep.mubr.f32.mxu1 %v322_v39  ;;  %v253_v38 = vld [vmem:[%s4023_s15 + $0x260] sm:$0xff]  ;;  %v3402_v39 = vpack.c.bf16 %v866_v35, %v865_v20  ;;  %v352_v20 = vld [vmem:[%s4023_s15 + $0x578] sm:$0xff]  ;;  %v502_v35 = vld [vmem:[%s4023_s15 + $0xa28] sm:$0xff] }
  0x8d   : > { %3376 = vmatpush1.bf16.msra.mxu0 %v3375_v30  ;;  %1738 = vmatprep.mubr.f32.mxu0 %v182_v40  ;;  %v403_v30 = vld [vmem:[%s4023_s15 + $0x710] sm:$0xff]  ;;  %v869_v34 = vld [vmem:[%s5584_s1 + $0x3a0] sm:$0xff] }
  0x8e   : > { %3377 = vmatprep.subr.bf16.mxu0 %v3892_v3  ;;  %3488 = vmatpush1.bf16.msra.mxu1 %v4199_v41  ;;  %v853_v41 = vld [vmem:[%s5584_s1 + $0x320] sm:$0xff]  ;;  %v263_v40 = vld [vmem:[%s4023_s15 + $0x2b0] sm:$0xff] }
  0x8f   : > { %1049 = vmatmul.mubr.f32.gmra.mrb[32].mxu1 %v321_v43  ;;  %v3384_v59 = vpack.c.bf16 %v854_v54, %v853_v41  ;;  %v402_v43 = vld [vmem:[%s4023_s15 + $0x708] sm:$0xff]  ;;  %v420_v41 = vld [vmem:[%s4023_s15 + $0x798] sm:$0xff] }
  0x90   : > { %1739 = vmatmul.mubr.f32.vlgmr.msra.gmra.mrb[0].mxu0 %v181_v45  ;;  %1053 = vmatprep.mubr.f32.mxu1 %v331_v36  ;;  %v262_v45 = vld [vmem:[%s4023_s15 + $0x2a8] sm:$0xff]  ;;  %v3405_v36 = vpack.c.bf16 %v868_v42, %v867_v27  ;;  %v280_v54 = vld [vmem:[%s4023_s15 + $0x338] sm:$0xff]  ;;  %v875_v42 = vld [vmem:[%s5584_s1 + $0x3d0] sm:$0xff] }
  0x91   : > { %3379 = vmatpush1.bf16.msra.mxu0 %v3378_v46  ;;  %1743 = vmatprep.mubr.f32.mxu0 %v191_v47  ;;  %v412_v46 = vld [vmem:[%s4023_s15 + $0x758] sm:$0xff]  ;;  %v510_v27 = vld [vmem:[%s4023_s15 + $0xa68] sm:$0xff] }
  0x92   : > { %3380 = vmatprep.subr.bf16.mxu0 %v3892_v3  ;;  %v272_v47 = vld [vmem:[%s4023_s15 + $0x2f8] sm:$0xff] }
  0x93   : > { %1054 = vmatmul.mubr.f32.gmra.mrb[34].mxu1 %v330_v49  ;;  %v411_v49 = vld [vmem:[%s4023_s15 + $0x750] sm:$0xff] }
  0x94   : > { %1744 = vmatmul.mubr.f32.gmra.mrb[2].mxu0 %v190_v51  ;;  %1058 = vmatprep.mubr.f32.mxu1 %v340_v52  ;;  %v271_v51 = vld [vmem:[%s4023_s15 + $0x2f0] sm:$0xff]  ;;  %v421_v52 = vld [vmem:[%s4023_s15 + $0x7a0] sm:$0xff] }
  0x95   : > { %1748 = vmatprep.mubr.f32.mxu0 %v200_v44  ;;  %3382 = vmatpush1.bf16.msra.mxu0 %v3381_v53  ;;  %v3408_v53 = vpack.c.bf16 %v870_v48, %v869_v34  ;;  %v281_v44 = vld [vmem:[%s4023_s15 + $0x340] sm:$0xff]  ;;  %v519_v34 = vld [vmem:[%s4023_s15 + $0xab0] sm:$0xff] }
  0x96   : > { %3383 = vmatprep.subr.bf16.mxu0 %v3892_v3  ;;  %v379_v48 = vld [vmem:[%s4023_s15 + $0x650] sm:$0xff] }
  0x97   : > { %1059 = vmatmul.mubr.f32.gmra.mrb[36].mxu1 %v339_v55  ;;  %v430_v55 = vld [vmem:[%s4023_s15 + $0x7e8] sm:$0xff] }
  0x98   : > { %1749 = vmatmul.mubr.f32.gmra.mrb[4].mxu0 %v199_v57  ;;  %1063 = vmatprep.mubr.f32.mxu1 %v349_v58  ;;  %v290_v57 = vld [vmem:[%s4023_s15 + $0x388] sm:$0xff]  ;;  %v429_v58 = vld [vmem:[%s4023_s15 + $0x7e0] sm:$0xff] }
  0x99   : > { %1753 = vmatprep.mubr.f32.mxu0 %v209_v8  ;;  %3385 = vmatpush1.bf16.msra.mxu0 %v3384_v59  ;;  %v289_v59 = vld [vmem:[%s4023_s15 + $0x380] sm:$0xff]  ;;  %v439_v8 = vld [vmem:[%s4023_s15 + $0x830] sm:$0xff] }
  0x9a   : > { %3386 = vmatprep.subr.bf16.mxu0 %v3892_v3 }
  0x9b   : > { %1064 = vmatmul.mubr.f32.gmra.mrb[38].mxu1 %v348_v61  ;;  %v871_v61 = vld [vmem:[%s5584_s1 + $0x3b0] sm:$0xff] }
  0x9c   : > { %1754 = vmatmul.mubr.f32.gmra.mrb[6].mxu0 %v208_v63  ;;  %1068 = vmatprep.mubr.f32.mxu1 %v358_v0  ;;  %v872_v63 = vld [vmem:[%s5584_s1 + $0x3b8] sm:$0xff]  ;;  %v298_v0 = vld [vmem:[%s4023_s15 + $0x3c8] sm:$0xff] }
  0x9d   : > { %1758 = vmatprep.mubr.f32.mxu0 %v218_v2  ;;  %3388 = vmatpush1.bf16.msra.mxu0 %v3387_v1  ;;  %v448_v1 = vld [vmem:[%s4023_s15 + $0x878] sm:$0xff]  ;;  %v3411_v2 = vpack.c.bf16 %v872_v63, %v871_v61 }
  0x9e   : > { %3389 = vmatprep.subr.bf16.mxu0 %v3892_v3  ;;  %v556_v61 = vld [vmem:[%s4023_s15 + $0xbd8] sm:$0xff] }
  0x9f   : > { %1069 = vmatmul.mubr.f32.gmra.mrb[40].mxu1 %v357_v6  ;;  %v307_v6 = vld [vmem:[%s4023_s15 + $0x410] sm:$0xff] }
  0xa0   : > { %1759 = vmatmul.mubr.f32.gmra.mrb[8].mxu0 %v217_v7  ;;  %1073 = vmatprep.mubr.f32.mxu1 %v367_v9  ;;  %v457_v7 = vld [vmem:[%s4023_s15 + $0x8c0] sm:$0xff] }
  0xa1   : > { %1763 = vmatprep.mubr.f32.mxu0 %v227_v11  ;;  %3391 = vmatpush1.bf16.msra.mxu0 %v3390_v10  ;;  %v317_v9 = vld [vmem:[%s4023_s15 + $0x460] sm:$0xff]  ;;  %v456_v10 = vld [vmem:[%s4023_s15 + $0x8b8] sm:$0xff] }
  0xa2   : > { %3392 = vmatprep.subr.bf16.mxu0 %v3892_v3  ;;  %v316_v11 = vld [vmem:[%s4023_s15 + $0x458] sm:$0xff] }
  0xa3   : > { %1074 = vmatmul.mubr.f32.gmra.mrb[42].mxu1 %v366_v14  ;;  %v465_v14 = vld [vmem:[%s4023_s15 + $0x900] sm:$0xff] }
  0xa4   : > { %1764 = vmatmul.mubr.f32.gmra.mrb[10].mxu0 %v226_v15  ;;  %1078 = vmatprep.mubr.f32.mxu1 %v376_v16  ;;  %v325_v15 = vld [vmem:[%s4023_s15 + $0x4a0] sm:$0xff]  ;;  %v475_v16 = vld [vmem:[%s4023_s15 + $0x950] sm:$0xff] }
  0xa5   : > { %1768 = vmatprep.mubr.f32.mxu0 %v236_v19  ;;  %3394 = vmatpush1.bf16.msra.mxu0 %v3393_v17  ;;  %v335_v17 = vld [vmem:[%s4023_s15 + $0x4f0] sm:$0xff]  ;;  %v474_v19 = vld [vmem:[%s4023_s15 + $0x948] sm:$0xff] }
  0xa6   : > { %3395 = vmatprep.subr.bf16.mxu0 %v3892_v3 }
  0xa7   : > { %1079 = vmatmul.mubr.f32.gmra.mrb[44].mxu1 %v375_v18  ;;  %v881_v18 = vld [vmem:[%s5584_s1 + $0x400] sm:$0xff] }
  0xa8   : > { %1769 = vmatmul.mubr.f32.gmra.mrb[12].mxu0 %v235_v22  ;;  %1083 = vmatprep.mubr.f32.mxu1 %v385_v23  ;;  %v334_v22 = vld [vmem:[%s4023_s15 + $0x4e8] sm:$0xff]  ;;  %v484_v23 = vld [vmem:[%s4023_s15 + $0x998] sm:$0xff] }
  0xa9   : > { %1773 = vmatprep.mubr.f32.mxu0 %v245_v26  ;;  %3397 = vmatpush1.bf16.msra.mxu0 %v3396_v25  ;;  %v3414_v25 = vpack.c.bf16 %v874_v21, %v873_v5  ;;  %v882_v26 = vld [vmem:[%s5584_s1 + $0x408] sm:$0xff]  ;;  %v452_v21 = vld [vmem:[%s4023_s15 + $0x898] sm:$0xff] }
  0xaa   : > { %3398 = vmatprep.subr.bf16.mxu0 %v3892_v3  ;;  %v4580_v28 = vpack.c.bf16 %v882_v26, %v881_v18  ;;  %v591_v18 = vld [vmem:[%s4023_s15 + $0xcf0] sm:$0xff]  ;;  %v600_v26 = vld [vmem:[%s4023_s15 + $0xd38] sm:$0xff] }
  0xab   : > { %1084 = vmatmul.mubr.f32.gmra.mrb[46].mxu1 %v384_v29  ;;  %v483_v29 = vld [vmem:[%s4023_s15 + $0x990] sm:$0xff] }
  0xac   : > { %1774 = vmatmul.mubr.f32.gmra.mrb[14].mxu0 %v244_v24  ;;  %1088 = vmatprep.mubr.f32.mxu1 %v394_v31  ;;  %v343_v24 = vld [vmem:[%s4023_s15 + $0x530] sm:$0xff]  ;;  %v493_v31 = vld [vmem:[%s4023_s15 + $0x9e0] sm:$0xff] }
  0xad   : > { %1778 = vmatprep.mubr.f32.mxu0 %v254_v33  ;;  %3400 = vmatpush1.bf16.msra.mxu0 %v3399_v32  ;;  %v353_v32 = vld [vmem:[%s4023_s15 + $0x580] sm:$0xff]  ;;  %v492_v33 = vld [vmem:[%s4023_s15 + $0x9d8] sm:$0xff] }
  0xae   : > { %3401 = vmatprep.subr.bf16.mxu0 %v3892_v3  ;;  %3426 = vmatprep.subr.bf16.mxu1 %v4580_v28 }
  0xaf   : > { %1089 = vmatmul.mubr.f32.gmra.mrb[48].mxu1 %v393_v37  ;;  %v362_v37 = vld [vmem:[%s4023_s15 + $0x5c8] sm:$0xff] }
  0xb0   : > { %1779 = vmatmul.mubr.f32.gmra.mrb[16].mxu0 %v253_v38  ;;  %1093 = vmatprep.mubr.f32.mxu1 %v403_v30  ;;  %v501_v38 = vld [vmem:[%s4023_s15 + $0xa20] sm:$0xff] }
  0xb1   : > { %1783 = vmatprep.mubr.f32.mxu0 %v263_v40  ;;  %3403 = vmatpush1.bf16.msra.mxu0 %v3402_v39  ;;  %v361_v30 = vld [vmem:[%s4023_s15 + $0x5c0] sm:$0xff]  ;;  %v511_v39 = vld [vmem:[%s4023_s15 + $0xa70] sm:$0xff] }
  0xb2   : > { %3404 = vmatprep.subr.bf16.mxu0 %v3892_v3  ;;  %v371_v40 = vld [vmem:[%s4023_s15 + $0x610] sm:$0xff] }
  0xb3   : > { %1094 = vmatmul.mubr.f32.gmra.mrb[50].mxu1 %v402_v43  ;;  %v876_v43 = vld [vmem:[%s5584_s1 + $0x3d8] sm:$0xff] }
  0xb4   : > { %1784 = vmatmul.mubr.f32.gmra.mrb[18].mxu0 %v262_v45  ;;  %1098 = vmatprep.mubr.f32.mxu1 %v412_v46  ;;  %v370_v45 = vld [vmem:[%s4023_s15 + $0x608] sm:$0xff]  ;;  %v520_v46 = vld [vmem:[%s4023_s15 + $0xab8] sm:$0xff] }
  0xb5   : > { %1788 = vmatprep.mubr.f32.mxu0 %v272_v47  ;;  %3406 = vmatpush1.bf16.msra.mxu0 %v3405_v36  ;;  %v3417_v36 = vpack.c.bf16 %v876_v43, %v875_v42  ;;  %v380_v47 = vld [vmem:[%s4023_s15 + $0x658] sm:$0xff]  ;;  %v497_v42 = vld [vmem:[%s4023_s15 + $0xa00] sm:$0xff] }
  0xb6   : > { %3407 = vmatprep.subr.bf16.mxu0 %v3892_v3  ;;  %v636_v43 = vld [vmem:[%s4023_s15 + $0xe58] sm:$0xff] }
  0xb7   : > { %1099 = vmatmul.mubr.f32.gmra.mrb[52].mxu1 %v411_v49  ;;  %v529_v49 = vld [vmem:[%s4023_s15 + $0xb00] sm:$0xff] }
  0xb8   : > { %1789 = vmatmul.mubr.f32.gmra.mrb[20].mxu0 %v271_v51  ;;  %1103 = vmatprep.mubr.f32.mxu1 %v421_v52  ;;  %v389_v51 = vld [vmem:[%s4023_s15 + $0x6a0] sm:$0xff]  ;;  %v528_v52 = vld [vmem:[%s4023_s15 + $0xaf8] sm:$0xff] }
  0xb9   : > { %1793 = vmatprep.mubr.f32.mxu0 %v281_v44  ;;  %3409 = vmatpush1.bf16.msra.mxu0 %v3408_v53  ;;  %v388_v53 = vld [vmem:[%s4023_s15 + $0x698] sm:$0xff]  ;;  %v538_v44 = vld [vmem:[%s4023_s15 + $0xb48] sm:$0xff] }
  0xba   : > { %3410 = vmatprep.subr.bf16.mxu0 %v3892_v3 }
  0xbb   : > { %1104 = vmatmul.mubr.f32.gmra.mrb[54].mxu1 %v420_v41  ;;  %v398_v41 = vld [vmem:[%s4023_s15 + $0x6e8] sm:$0xff] }
  0xbc   : > { %1794 = vmatmul.mubr.f32.gmra.mrb[22].mxu0 %v280_v54  ;;  %1108 = vmatprep.mubr.f32.mxu1 %v430_v55  ;;  %v537_v54 = vld [vmem:[%s4023_s15 + $0xb40] sm:$0xff] }
  0xbd   : > { %1798 = vmatprep.mubr.f32.mxu0 %v290_v57  ;;  %3412 = vmatpush1.bf16.msra.mxu0 %v3411_v2  ;;  %v397_v55 = vld [vmem:[%s4023_s15 + $0x6e0] sm:$0xff]  ;;  %v547_v57 = vld [vmem:[%s4023_s15 + $0xb90] sm:$0xff] }
  0xbe   : > { %3413 = vmatprep.subr.bf16.mxu0 %v3892_v3  ;;  %v415_v2 = vld [vmem:[%s4023_s15 + $0x770] sm:$0xff] }
  0xbf   : > { %1109 = vmatmul.mubr.f32.gmra.mrb[56].mxu1 %v429_v58  ;;  %v407_v58 = vld [vmem:[%s4023_s15 + $0x730] sm:$0xff] }
  0xc0   : > { %1799 = vmatmul.mubr.f32.gmra.mrb[24].mxu0 %v289_v59  ;;  %1113 = vmatprep.mubr.f32.mxu1 %v439_v8  ;;  %v546_v59 = vld [vmem:[%s4023_s15 + $0xb88] sm:$0xff]  ;;  %v877_v8 = vld [vmem:[%s5584_s1 + $0x3e0] sm:$0xff] }
  0xc1   : > { %1803 = vmatprep.mubr.f32.mxu0 %v299_v50  ;;  %3415 = vmatpush1.bf16.msra.mxu0 %v3414_v25  ;;  %v878_v50 = vld [vmem:[%s5584_s1 + $0x3e8] sm:$0xff]  ;;  %v461_v25 = vld [vmem:[%s4023_s15 + $0x8e0] sm:$0xff] }
  0xc2   : > { %3416 = vmatprep.subr.bf16.mxu0 %v3892_v3  ;;  %v3420_v63 = vpack.c.bf16 %v878_v50, %v877_v8  ;;  %v533_v8 = vld [vmem:[%s4023_s15 + $0xb20] sm:$0xff] }
  0xc3   : > { %1114 = vmatmul.mubr.f32.gmra.mrb[58].mxu1 %v438_v60  ;;  %v406_v60 = vld [vmem:[%s4023_s15 + $0x728] sm:$0xff] }
  0xc4   : > { %1804 = vmatmul.mubr.f32.gmra.mrb[26].mxu0 %v298_v0  ;;  %1118 = vmatprep.mubr.f32.mxu1 %v448_v1  ;;  %v416_v0 = vld [vmem:[%s4023_s15 + $0x778] sm:$0xff]  ;;  %v555_v1 = vld [vmem:[%s4023_s15 + $0xbd0] sm:$0xff] }
  0xc5   : > { %1808 = vmatprep.mubr.f32.mxu0 %v308_v56  ;;  %3418 = vmatpush1.bf16.msra.mxu0 %v3417_v36  ;;  %v565_v56 = vld [vmem:[%s4023_s15 + $0xc20] sm:$0xff]  ;;  %v506_v36 = vld [vmem:[%s4023_s15 + $0xa48] sm:$0xff] }
  0xc6   : > { %3419 = vmatprep.subr.bf16.mxu0 %v3892_v3 }
  0xc7   : > { %1119 = vmatmul.mubr.f32.gmra.mrb[60].mxu1 %v447_v4  ;;  %v425_v4 = vld [vmem:[%s4023_s15 + $0x7c0] sm:$0xff] }
  0xc8   : > { %1809 = vmatmul.mubr.f32.gmra.mrb[28].mxu0 %v307_v6  ;;  %1123 = vmatprep.mubr.f32.mxu1 %v457_v7  ;;  %v564_v6 = vld [vmem:[%s4023_s15 + $0xc18] sm:$0xff] }
  0xc9   : > { %1813 = vmatprep.mubr.f32.mxu0 %v317_v9  ;;  %3421 = vmatpush1.bf16.msra.mxu0 %v3420_v63  ;;  %v424_v7 = vld [vmem:[%s4023_s15 + $0x7b8] sm:$0xff]  ;;  %v574_v9 = vld [vmem:[%s4023_s15 + $0xc68] sm:$0xff] }
  0xca   : > { %3422 = vmatprep.subr.bf16.mxu0 %v3892_v3  ;;  %v433_v3 = vld [vmem:[%s4023_s15 + $0x800] sm:$0xff]  ;;  %v682_v63 = vld [vmem:[%s4023_s15 + $0xfc8] sm:$0xff] }
  0xcb   : > { %1124 = vmatmul.mubr.f32.gmra.mrb[62].mxu1 %v456_v10  ;;  %v434_v10 = vld [vmem:[%s4023_s15 + $0x808] sm:$0xff] }
  0xcc   : > { %1814 = vmatmul.mubr.f32.gmra.mrb[30].mxu0 %v316_v11  ;;  %1128 = vmatprep.mubr.f32.mxu1 %v466_v62  ;;  %v573_v11 = vld [vmem:[%s4023_s15 + $0xc60] sm:$0xff]  ;;  %v583_v62 = vld [vmem:[%s4023_s15 + $0xcb0] sm:$0xff] }
  0xcd   : > { %1818 = vmatprep.mubr.f32.mxu0 %v326_v12  ;;  %v443_v12 = vld [vmem:[%s4023_s15 + $0x850] sm:$0xff] }
  0xcf   : > { %1129 = vmatmul.mubr.f32.gmra.mrb[64].mxu1 %v465_v14  ;;  %v582_v14 = vld [vmem:[%s4023_s15 + $0xca8] sm:$0xff] }
  0xd0   : > { %1819 = vmatmul.mubr.f32.gmra.mrb[32].mxu0 %v325_v15  ;;  %1133 = vmatprep.mubr.f32.mxu1 %v475_v16  ;;  %v879_v15 = vld [vmem:[%s5584_s1 + $0x3f0] sm:$0xff]  ;;  %v880_v16 = vld [vmem:[%s5584_s1 + $0x3f8] sm:$0xff] }
  0xd1   : > { %1823 = vmatprep.mubr.f32.mxu0 %v335_v17  ;;  %v442_v17 = vld [vmem:[%s4023_s15 + $0x848] sm:$0xff]  ;;  %v3423_v5 = vpack.c.bf16 %v880_v16, %v879_v15  ;;  %v699_v16 = vld [vmem:[%s4023_s15 + $0x1050] sm:$0xff] }
  0xd3   : > { %1134 = vmatmul.mubr.f32.gmra.mrb[66].mxu1 %v474_v19  ;;  %v592_v19 = vld [vmem:[%s4023_s15 + $0xcf8] sm:$0xff]  ;;  %3424 = vmatpush1.bf16.msra.mxu0 %v3423_v5 }
  0xd4   : > { %1824 = vmatmul.mubr.f32.gmra.mrb[34].mxu0 %v334_v22  ;;  %1138 = vmatprep.mubr.f32.mxu1 %v484_v23  ;;  %v451_v22 = vld [vmem:[%s4023_s15 + $0x890] sm:$0xff]  ;;  %v601_v23 = vld [vmem:[%s4023_s15 + $0xd40] sm:$0xff] }
  0xd5   : > { %1828 = vmatprep.mubr.f32.mxu0 %v344_v13  ;;  %v460_v13 = vld [vmem:[%s4023_s15 + $0x8d8] sm:$0xff] }
  0xd7   : > { %1139 = vmatmul.mubr.f32.gmra.mrb[68].mxu1 %v483_v29  ;;  %v610_v29 = vld [vmem:[%s4023_s15 + $0xd88] sm:$0xff] }
  0xd8   : > { %1829 = vmatmul.mubr.f32.gmra.mrb[36].mxu0 %v343_v24  ;;  %1143 = vmatprep.mubr.f32.mxu1 %v493_v31  ;;  %v470_v24 = vld [vmem:[%s4023_s15 + $0x928] sm:$0xff]  ;;  %v609_v31 = vld [vmem:[%s4023_s15 + $0xd80] sm:$0xff] }
  0xd9   : > { %1833 = vmatprep.mubr.f32.mxu0 %v353_v32  ;;  %v469_v32 = vld [vmem:[%s4023_s15 + $0x920] sm:$0xff] }
  0xdb   : > { %1144 = vmatmul.mubr.f32.gmra.mrb[70].mxu1 %v492_v33  ;;  %v619_v33 = vld [vmem:[%s4023_s15 + $0xdd0] sm:$0xff] }
  0xdc   : > { %1834 = vmatmul.mubr.f32.gmra.mrb[38].mxu0 %v352_v20  ;;  %1148 = vmatprep.mubr.f32.mxu1 %v502_v35  ;;  %v479_v20 = vld [vmem:[%s4023_s15 + $0x970] sm:$0xff]  ;;  %v618_v35 = vld [vmem:[%s4023_s15 + $0xdc8] sm:$0xff] }
  0xdd   : > { %1838 = vmatprep.mubr.f32.mxu0 %v362_v37  ;;  %v478_v37 = vld [vmem:[%s4023_s15 + $0x968] sm:$0xff] }
  0xdf   : > { %1149 = vmatmul.mubr.f32.gmra.mrb[72].mxu1 %v501_v38  ;;  %v628_v38 = vld [vmem:[%s4023_s15 + $0xe18] sm:$0xff] }
  0xe0   : > { %1839 = vmatmul.mubr.f32.gmra.mrb[40].mxu0 %v361_v30  ;;  %1153 = vmatprep.mubr.f32.mxu1 %v511_v39  ;;  %v488_v30 = vld [vmem:[%s4023_s15 + $0x9b8] sm:$0xff]  ;;  %v627_v39 = vld [vmem:[%s4023_s15 + $0xe10] sm:$0xff] }
  0xe1   : > { %1843 = vmatprep.mubr.f32.mxu0 %v371_v40  ;;  %v487_v40 = vld [vmem:[%s4023_s15 + $0x9b0] sm:$0xff] }
  0xe3   : > { %1154 = vmatmul.mubr.f32.gmra.mrb[74].mxu1 %v510_v27  ;;  %v637_v27 = vld [vmem:[%s4023_s15 + $0xe60] sm:$0xff] }
  0xe4   : > { %1844 = vmatmul.mubr.f32.gmra.mrb[42].mxu0 %v370_v45  ;;  %1158 = vmatprep.mubr.f32.mxu1 %v520_v46  ;;  %v496_v45 = vld [vmem:[%s4023_s15 + $0x9f8] sm:$0xff]  ;;  %v646_v46 = vld [vmem:[%s4023_s15 + $0xea8] sm:$0xff] }
  0xe5   : > { %1848 = vmatprep.mubr.f32.mxu0 %v380_v47  ;;  %v645_v47 = vld [vmem:[%s4023_s15 + $0xea0] sm:$0xff] }
  0xe7   : > { %1159 = vmatmul.mubr.f32.gmra.mrb[76].mxu1 %v519_v34  ;;  %v505_v34 = vld [vmem:[%s4023_s15 + $0xa40] sm:$0xff] }
  0xe8   : > { %1849 = vmatmul.mubr.f32.gmra.mrb[44].mxu0 %v379_v48  ;;  %1163 = vmatprep.mubr.f32.mxu1 %v529_v49  ;;  %v655_v48 = vld [vmem:[%s4023_s15 + $0xef0] sm:$0xff] }
  0xe9   : > { %1853 = vmatprep.mubr.f32.mxu0 %v389_v51  ;;  %v515_v49 = vld [vmem:[%s4023_s15 + $0xa90] sm:$0xff]  ;;  %v654_v51 = vld [vmem:[%s4023_s15 + $0xee8] sm:$0xff] }
  0xeb   : > { %1164 = vmatmul.mubr.f32.gmra.mrb[78].mxu1 %v528_v52  ;;  %v514_v52 = vld [vmem:[%s4023_s15 + $0xa88] sm:$0xff] }
  0xec   : > { %1854 = vmatmul.mubr.f32.gmra.mrb[46].mxu0 %v388_v53  ;;  %1168 = vmatprep.mubr.f32.mxu1 %v538_v44  ;;  %v664_v53 = vld [vmem:[%s4023_s15 + $0xf38] sm:$0xff] }
  0xed   : > { %1858 = vmatprep.mubr.f32.mxu0 %v398_v41  ;;  %v524_v41 = vld [vmem:[%s4023_s15 + $0xad8] sm:$0xff] }
  0xef   : > { %1169 = vmatmul.mubr.f32.gmra.mrb[80].mxu1 %v537_v54 }
  0xf0   : > { %1859 = vmatmul.mubr.f32.gmra.mrb[48].mxu0 %v397_v55  ;;  %1173 = vmatprep.mubr.f32.mxu1 %v547_v57  ;;  %v663_v55 = vld [vmem:[%s4023_s15 + $0xf30] sm:$0xff] }
  0xf1   : > { %1863 = vmatprep.mubr.f32.mxu0 %v407_v58  ;;  %v523_v57 = vld [vmem:[%s4023_s15 + $0xad0] sm:$0xff]  ;;  %v673_v58 = vld [vmem:[%s4023_s15 + $0xf80] sm:$0xff] }
  0xf3   : > { %1174 = vmatmul.mubr.f32.gmra.mrb[82].mxu1 %v546_v59 }
  0xf4   : > { %1864 = vmatmul.mubr.f32.gmra.mrb[50].mxu0 %v406_v60  ;;  %1178 = vmatprep.mubr.f32.mxu1 %v556_v61  ;;  %v672_v60 = vld [vmem:[%s4023_s15 + $0xf78] sm:$0xff] }
  0xf5   : > { %1868 = vmatprep.mubr.f32.mxu0 %v416_v0  ;;  %v532_v61 = vld [vmem:[%s4023_s15 + $0xb18] sm:$0xff] }
  0xf7   : > { %1179 = vmatmul.mubr.f32.gmra.mrb[84].mxu1 %v555_v1  ;;  %v542_v1 = vld [vmem:[%s4023_s15 + $0xb68] sm:$0xff] }
  0xf8   : > { %1869 = vmatmul.mubr.f32.gmra.mrb[52].mxu0 %v415_v2  ;;  %1183 = vmatprep.mubr.f32.mxu1 %v565_v56  ;;  %v681_v56 = vld [vmem:[%s4023_s15 + $0xfc0] sm:$0xff] }
  0xf9   : > { %1873 = vmatprep.mubr.f32.mxu0 %v425_v4  ;;  %v541_v4 = vld [vmem:[%s4023_s15 + $0xb60] sm:$0xff] }
  0xfb   : > { %1184 = vmatmul.mubr.f32.gmra.mrb[86].mxu1 %v564_v6  ;;  %v691_v6 = vld [vmem:[%s4023_s15 + $0x1010] sm:$0xff] }
  0xfc   : > { %1874 = vmatmul.mubr.f32.gmra.mrb[54].mxu0 %v424_v7  ;;  %1188 = vmatprep.mubr.f32.mxu1 %v574_v9  ;;  %v551_v9 = vld [vmem:[%s4023_s15 + $0xbb0] sm:$0xff] }
  0xfd   : > { %1878 = vmatprep.mubr.f32.mxu0 %v434_v10 }
  0xff   : > { %1189 = vmatmul.mubr.f32.gmra.mrb[88].mxu1 %v573_v11  ;;  %v690_v11 = vld [vmem:[%s4023_s15 + $0x1008] sm:$0xff] }
 0x100   : > { %1879 = vmatmul.mubr.f32.gmra.mrb[56].mxu0 %v433_v3  ;;  %1193 = vmatprep.mubr.f32.mxu1 %v583_v62  ;;  %v550_v3 = vld [vmem:[%s4023_s15 + $0xba8] sm:$0xff]  ;;  %v700_v62 = vld [vmem:[%s4023_s15 + $0x1058] sm:$0xff] }
 0x101   : > { %1883 = vmatprep.mubr.f32.mxu0 %v443_v12 }
 0x103   : > { %1194 = vmatmul.mubr.f32.gmra.mrb[90].mxu1 %v582_v14  ;;  %v560_v14 = vld [vmem:[%s4023_s15 + $0xbf8] sm:$0xff] }
 0x104   : > { %1884 = vmatmul.mubr.f32.gmra.mrb[58].mxu0 %v442_v17  ;;  %1198 = vmatprep.mubr.f32.mxu1 %v592_v19  ;;  %v559_v17 = vld [vmem:[%s4023_s15 + $0xbf0] sm:$0xff]  ;;  %v709_v19 = vld [vmem:[%s4023_s15 + $0x10a0] sm:$0xff] }
 0x105   : > { %1888 = vmatprep.mubr.f32.mxu0 %v452_v21  ;;  %v569_v21 = vld [vmem:[%s4023_s15 + $0xc40] sm:$0xff] }
 0x107   : > { %1199 = vmatmul.mubr.f32.gmra.mrb[92].mxu1 %v591_v18 }
 0x108   : > { %1889 = vmatmul.mubr.f32.gmra.mrb[60].mxu0 %v451_v22  ;;  %1203 = vmatprep.mubr.f32.mxu1 %v601_v23  ;;  %v708_v22 = vld [vmem:[%s4023_s15 + $0x1098] sm:$0xff] }
 0x109   : > { %1893 = vmatprep.mubr.f32.mxu0 %v461_v25  ;;  %v568_v23 = vld [vmem:[%s4023_s15 + $0xc38] sm:$0xff]  ;;  %v718_v25 = vld [vmem:[%s4023_s15 + $0x10e8] sm:$0xff] }
 0x10b   : > { %1204 = vmatmul.mubr.f32.gmra.mrb[94].mxu1 %v600_v26 }
 0x10c   : > { %1894 = vmatmul.mubr.f32.gmra.mrb[62].mxu0 %v460_v13  ;;  %1208 = vmatprep.mubr.f32.mxu1 %v610_v29  ;;  %v578_v13 = vld [vmem:[%s4023_s15 + $0xc88] sm:$0xff] }
 0x10d   : > { %1898 = vmatprep.mubr.f32.mxu0 %v470_v24  ;;  %v717_v24 = vld [vmem:[%s4023_s15 + $0x10e0] sm:$0xff] }
 0x10f   : > { %1209 = vmatmul.mubr.f32.gmra.mrb[96].mxu1 %v609_v31  ;;  %v577_v31 = vld [vmem:[%s4023_s15 + $0xc80] sm:$0xff] }
 0x110   : > { %1899 = vmatmul.mubr.f32.gmra.mrb[64].mxu0 %v469_v32  ;;  %1213 = vmatprep.mubr.f32.mxu1 %v619_v33  ;;  %v727_v32 = vld [vmem:[%s4023_s15 + $0x1130] sm:$0xff] }
 0x111   : > { %1903 = vmatprep.mubr.f32.mxu0 %v479_v20  ;;  %v587_v20 = vld [vmem:[%s4023_s15 + $0xcd0] sm:$0xff] }
 0x113   : > { %1214 = vmatmul.mubr.f32.gmra.mrb[98].mxu1 %v618_v35 }
 0x114   : > { %1904 = vmatmul.mubr.f32.gmra.mrb[66].mxu0 %v478_v37  ;;  %1218 = vmatprep.mubr.f32.mxu1 %v628_v38  ;;  %v726_v37 = vld [vmem:[%s4023_s15 + $0x1128] sm:$0xff] }
 0x115   : > { %1908 = vmatprep.mubr.f32.mxu0 %v488_v30  ;;  %v586_v38 = vld [vmem:[%s4023_s15 + $0xcc8] sm:$0xff]  ;;  %v736_v30 = vld [vmem:[%s4023_s15 + $0x1178] sm:$0xff] }
 0x117   : > { %1219 = vmatmul.mubr.f32.gmra.mrb[100].mxu1 %v627_v39 }
 0x118   : > { %1909 = vmatmul.mubr.f32.gmra.mrb[68].mxu0 %v487_v40  ;;  %1223 = vmatprep.mubr.f32.mxu1 %v637_v27  ;;  %v596_v40 = vld [vmem:[%s4023_s15 + $0xd18] sm:$0xff] }
 0x119   : > { %1913 = vmatprep.mubr.f32.mxu0 %v497_v42  ;;  %v735_v42 = vld [vmem:[%s4023_s15 + $0x1170] sm:$0xff] }
 0x11b   : > { %1224 = vmatmul.mubr.f32.gmra.mrb[102].mxu1 %v636_v43  ;;  %v595_v43 = vld [vmem:[%s4023_s15 + $0xd10] sm:$0xff] }
 0x11c   : > { %1914 = vmatmul.mubr.f32.gmra.mrb[70].mxu0 %v496_v45  ;;  %1228 = vmatprep.mubr.f32.mxu1 %v646_v46  ;;  %v745_v45 = vld [vmem:[%s4023_s15 + $0x11c0] sm:$0xff] }
 0x11d   : > { %1918 = vmatprep.mubr.f32.mxu0 %v506_v36  ;;  %v605_v36 = vld [vmem:[%s4023_s15 + $0xd60] sm:$0xff] }
 0x11f   : > { %1229 = vmatmul.mubr.f32.gmra.mrb[104].mxu1 %v645_v47 }
 0x120   : > { %1919 = vmatmul.mubr.f32.gmra.mrb[72].mxu0 %v505_v34  ;;  %1233 = vmatprep.mubr.f32.mxu1 %v655_v48  ;;  %v744_v34 = vld [vmem:[%s4023_s15 + $0x11b8] sm:$0xff] }
 0x121   : > { %1923 = vmatprep.mubr.f32.mxu0 %v515_v49  ;;  %v604_v48 = vld [vmem:[%s4023_s15 + $0xd58] sm:$0xff] }
 0x122   : > { %v4683_v44 = vpop.f32.mrb[0].mxu1  ;;  %v324_v49 = vld [vmem:[%s4023_s15 + $0x498] sm:$0xff] }
 0x123   : > { %1234 = vmatmul.mubr.f32.gmra.mrb[106].mxu1 %v654_v51  ;;  %v972_v54 = vpop.f32.mrb[1].mxu1 }
 0x124   : > { %1924 = vmatmul.mubr.f32.gmra.mrb[74].mxu0 %v514_v52  ;;  %1238 = vmatprep.mubr.f32.mxu1 %v664_v53  ;;  %v614_v52 = vld [vmem:[%s4023_s15 + $0xda8] sm:$0xff]  ;;  %v884_v54 = vld [vmem:[%s5584_s1 + $0x418] sm:$0xff] }
 0x125   : > { %1928 = vmatprep.mubr.f32.mxu0 %v524_v41  ;;  %v883_v41 = vld [vmem:[%s5584_s1 + $0x410] sm:$0xff] }
 0x126   : > { %v4689_v59 = vpop.f32.mrb[2].mxu1 }
 0x127   : > { %1239 = vmatmul.mubr.f32.gmra.mrb[108].mxu1 %v663_v55  ;;  %v977_v50 = vpop.f32.mrb[3].mxu1  ;;  %v323_v55 = vld [vmem:[%s4023_s15 + $0x490] sm:$0xff] }
 0x128   : > { %1929 = vmatmul.mubr.f32.gmra.mrb[76].mxu0 %v523_v57  ;;  %1243 = vmatprep.mubr.f32.mxu1 %v673_v58  ;;  %v613_v57 = vld [vmem:[%s4023_s15 + $0xda0] sm:$0xff]  ;;  %v623_v50 = vld [vmem:[%s4023_s15 + $0xdf0] sm:$0xff] }
 0x129   : > { %1933 = vmatprep.mubr.f32.mxu0 %v533_v8  ;;  %v333_v8 = vld [vmem:[%s4023_s15 + $0x4e0] sm:$0xff] }
 0x12a   : > { %v4695_v0 = vpop.f32.mrb[4].mxu1 }
 0x12b   : > { %1244 = vmatmul.mubr.f32.gmra.mrb[110].mxu1 %v672_v60  ;;  %v982_v2 = vpop.f32.mrb[5].mxu1  ;;  %v3429_v60 = vpack.c.bf16 %v884_v54, %v883_v41  ;;  %v667_v41 = vld [vmem:[%s4023_s15 + $0xf50] sm:$0xff] }
 0x12c   : > { %1934 = vmatmul.mubr.f32.gmra.mrb[78].mxu0 %v532_v61  ;;  %1248 = vmatprep.mubr.f32.mxu1 %v682_v63  ;;  %v885_v63 = vld [vmem:[%s5584_s1 + $0x420] sm:$0xff]  ;;  %v332_v2 = vld [vmem:[%s4023_s15 + $0x4d8] sm:$0xff]  ;;  %v387_v54 = vld [vmem:[%s4023_s15 + $0x690] sm:$0xff] }
 0x12d   : > { %1938 = vmatprep.mubr.f32.mxu0 %v542_v1  ;;  %v886_v1 = vld [vmem:[%s5584_s1 + $0x428] sm:$0xff] }
 0x12e   : > { %v4701_v7 = vpop.f32.mrb[6].mxu1 }
 0x12f   : > { %1249 = vmatmul.mubr.f32.gmra.mrb[112].mxu1 %v681_v56  ;;  %v987_v10 = vpop.f32.mrb[7].mxu1  ;;  %v622_v56 = vld [vmem:[%s4023_s15 + $0xde8] sm:$0xff] }
 0x130   : > { %1939 = vmatmul.mubr.f32.gmra.mrb[80].mxu0 %v541_v4  ;;  %1253 = vmatprep.mubr.f32.mxu1 %v691_v6  ;;  %v342_v4 = vld [vmem:[%s4023_s15 + $0x528] sm:$0xff]  ;;  %v3433_v10 = vpack.c.bf16 %v886_v1, %v885_v63  ;;  %v685_v63 = vld [vmem:[%s4023_s15 + $0xfe0] sm:$0xff] }
 0x131   : > { %1943 = vmatprep.mubr.f32.mxu0 %v551_v9  ;;  %v632_v9 = vld [vmem:[%s4023_s15 + $0xe38] sm:$0xff]  ;;  %v405_v1 = vld [vmem:[%s4023_s15 + $0x720] sm:$0xff] }
 0x132   : > { %v4707_v12 = vpop.f32.mrb[8].mxu1 }
 0x133   : > { %1254 = vmatmul.mubr.f32.gmra.mrb[114].mxu1 %v690_v11  ;;  %v992_v15 = vpop.f32.mrb[9].mxu1 }
 0x134   : > { %1944 = vmatmul.mubr.f32.gmra.mrb[82].mxu0 %v550_v3  ;;  %1258 = vmatprep.mubr.f32.mxu1 %v700_v62  ;;  %v888_v3 = vld [vmem:[%s5584_s1 + $0x438] sm:$0xff]  ;;  %v341_v62 = vld [vmem:[%s4023_s15 + $0x520] sm:$0xff]  ;;  %v351_v15 = vld [vmem:[%s4023_s15 + $0x570] sm:$0xff] }
 0x135   : > { %1948 = vmatprep.mubr.f32.mxu0 %v560_v14  ;;  %v631_v14 = vld [vmem:[%s4023_s15 + $0xe30] sm:$0xff] }
 0x136   : > { %v4713_v5 = vpop.f32.mrb[10].mxu1 }
 0x137   : > { %1259 = vmatmul.mubr.f32.gmra.mrb[116].mxu1 %v699_v16  ;;  %v997_v18 = vpop.f32.mrb[11].mxu1 }
 0x138   : > { %1949 = vmatmul.mubr.f32.gmra.mrb[84].mxu0 %v559_v17  ;;  %1263 = vmatprep.mubr.f32.mxu1 %v709_v19  ;;  %v641_v17 = vld [vmem:[%s4023_s15 + $0xe80] sm:$0xff] }
 0x139   : > { %1953 = vmatprep.mubr.f32.mxu0 %v569_v21  ;;  %v889_v18 = vld [vmem:[%s5584_s1 + $0x440] sm:$0xff] }
 0x13a   : > { %v4719_v26 = vpop.f32.mrb[12].mxu1 }
 0x13b   : > { %1264 = vmatmul.mubr.f32.gmra.mrb[118].mxu1 %v708_v22  ;;  %v1002_v29 = vpop.f32.mrb[13].mxu1  ;;  %v890_v22 = vld [vmem:[%s5584_s1 + $0x448] sm:$0xff] }
 0x13c   : > { %1954 = vmatmul.mubr.f32.gmra.mrb[86].mxu0 %v568_v23  ;;  %1268 = vmatprep.mubr.f32.mxu1 %v718_v25  ;;  %v350_v23 = vld [vmem:[%s4023_s15 + $0x568] sm:$0xff]  ;;  %v640_v25 = vld [vmem:[%s4023_s15 + $0xe78] sm:$0xff] }
 0x13d   : > { %1958 = vmatprep.mubr.f32.mxu0 %v578_v13  ;;  %v360_v13 = vld [vmem:[%s4023_s15 + $0x5b8] sm:$0xff] }
 0x13e   : > { %v4725_v33 = vpop.f32.mrb[14].mxu1 }
 0x13f   : > { %1269 = vmatmul.mubr.f32.gmra.mrb[120].mxu1 %v717_v24  ;;  %v1007_v35 = vpop.f32.mrb[15].mxu1  ;;  %v650_v24 = vld [vmem:[%s4023_s15 + $0xec8] sm:$0xff] }
 0x140   : > { %1959 = vmatmul.mubr.f32.gmra.mrb[88].mxu0 %v577_v31  ;;  %1273 = vmatprep.mubr.f32.mxu1 %v727_v32  ;;  %v3441_v31 = vpack.c.bf16 %v890_v22, %v889_v18  ;;  %v892_v35 = vld [vmem:[%s5584_s1 + $0x458] sm:$0xff]  ;;  %v722_v22 = vld [vmem:[%s4023_s15 + $0x1108] sm:$0xff] }
 0x141   : > { %1963 = vmatprep.mubr.f32.mxu0 %v587_v20  ;;  %v891_v20 = vld [vmem:[%s5584_s1 + $0x450] sm:$0xff] }
 0x142   : > { %v4731_v39 = vpop.f32.mrb[16].mxu1 }
 0x143   : > { %1274 = vmatmul.mubr.f32.gmra.mrb[122].mxu1 %v726_v37  ;;  %v1012_v27 = vpop.f32.mrb[17].mxu1  ;;  %v359_v37 = vld [vmem:[%s4023_s15 + $0x5b0] sm:$0xff] }
 0x144   : > { %1964 = vmatmul.mubr.f32.gmra.mrb[90].mxu0 %v586_v38  ;;  %1278 = vmatprep.mubr.f32.mxu1 %v736_v30  ;;  %v649_v38 = vld [vmem:[%s4023_s15 + $0xec0] sm:$0xff]  ;;  %v659_v27 = vld [vmem:[%s4023_s15 + $0xf10] sm:$0xff] }
 0x145   : > { %1968 = vmatprep.mubr.f32.mxu0 %v596_v40  ;;  %v369_v30 = vld [vmem:[%s4023_s15 + $0x600] sm:$0xff] }
 0x146   : > { %v4737_v46 = vpop.f32.mrb[18].mxu1 }
 0x147   : > { %1279 = vmatmul.mubr.f32.gmra.mrb[124].mxu1 %v735_v42  ;;  %v1017_v47 = vpop.f32.mrb[19].mxu1  ;;  %v3445_v42 = vpack.c.bf16 %v892_v35, %v891_v20  ;;  %v450_v20 = vld [vmem:[%s4023_s15 + $0x888] sm:$0xff]  ;;  %v740_v35 = vld [vmem:[%s4023_s15 + $0x1198] sm:$0xff] }
 0x148   : > { %1969 = vmatmul.mubr.f32.gmra.mrb[92].mxu0 %v595_v43  ;;  %1283 = vmatprep.mubr.f32.mxu1 %v745_v45  ;;  %v368_v45 = vld [vmem:[%s4023_s15 + $0x5f8] sm:$0xff]  ;;  %v894_v47 = vld [vmem:[%s5584_s1 + $0x468] sm:$0xff] }
 0x149   : > { %1973 = vmatprep.mubr.f32.mxu0 %v605_v36  ;;  %v893_v36 = vld [vmem:[%s5584_s1 + $0x460] sm:$0xff] }
 0x14a   : > { %v4743_v51 = vpop.f32.mrb[20].mxu1 }
 0x14b   : > { %1284 = vmatmul.mubr.f32.gmra.mrb[126].mxu1 %v744_v34  ;;  %v1022_v53 = vpop.f32.mrb[21].mxu1  ;;  %v658_v34 = vld [vmem:[%s4023_s15 + $0xf08] sm:$0xff] }
 0x14c   : > { %1974 = vmatmul.mubr.f32.gmra.mrb[94].mxu0 %v604_v48  ;;  %1433 = vmatprep.mubr.f32.mxu1 %v324_v49  ;;  %v378_v48 = vld [vmem:[%s4023_s15 + $0x648] sm:$0xff]  ;;  %v668_v49 = vld [vmem:[%s4023_s15 + $0xf58] sm:$0xff]  ;;  %v377_v53 = vld [vmem:[%s4023_s15 + $0x640] sm:$0xff] }
 0x14d   : > { %1978 = vmatprep.mubr.f32.mxu0 %v614_v52  ;;  %v3449_v52 = vpack.c.bf16 %v894_v47, %v893_v36  ;;  %v184_v36 = vld [vmem:[%s4023_s15 + $0x38] sm:$0xff]  ;;  %v467_v47 = vld [vmem:[%s4023_s15 + $0x910] sm:$0xff] }
 0x14e   : > { %v4754_v58 = vpop.f32.mrb[22].mxu1 }
 0x14f   : > { %1434 = vmatmul.mubr.f32.vlgmr.msra.gmra.mrb[32].mxu1 %v323_v55  ;;  %v1027_v61 = vpop.f32.mrb[23].mxu1  ;;  %v677_v55 = vld [vmem:[%s4023_s15 + $0xfa0] sm:$0xff] }
 0x150   : > { %1979 = vmatmul.mubr.f32.gmra.mrb[96].mxu0 %v613_v57  ;;  %3428 = vmatpush3.bf16.msra.mxu1 %v4580_v28  ;;  %v887_v28 = vld [vmem:[%s5584_s1 + $0x430] sm:$0xff]  ;;  %v386_v57 = vld [vmem:[%s4023_s15 + $0x688] sm:$0xff] }
 0x151   : > { %1438 = vmatprep.mubr.f32.mxu1 %v333_v8  ;;  %1983 = vmatprep.mubr.f32.mxu0 %v623_v50  ;;  %v3437_v19 = vpack.c.bf16 %v888_v3, %v887_v28  ;;  %v676_v8 = vld [vmem:[%s4023_s15 + $0xf98] sm:$0xff]  ;;  %v395_v61 = vld [vmem:[%s4023_s15 + $0x6d0] sm:$0xff] }
 0x152   : > { %v4768_v6 = vpop.f32.mrb[24].mxu1  ;;  %3430 = vmatprep.subr.bf16.mxu1 %v3429_v60  ;;  %v396_v50 = vld [vmem:[%s4023_s15 + $0x6d8] sm:$0xff]  ;;  %v703_v28 = vld [vmem:[%s4023_s15 + $0x1070] sm:$0xff] }
 0x153   : > { %1439 = vmatmul.mubr.f32.gmra.mrb[34].mxu1 %v332_v2  ;;  %v1032_v11 = vpop.f32.mrb[25].mxu1  ;;  %v695_v2 = vld [vmem:[%s4023_s15 + $0x1030] sm:$0xff] }
 0x154   : > { %1984 = vmatmul.mubr.f32.gmra.mrb[98].mxu0 %v622_v56  ;;  %1443 = vmatprep.mubr.f32.mxu1 %v342_v4  ;;  %v404_v56 = vld [vmem:[%s4023_s15 + $0x718] sm:$0xff]  ;;  %v694_v4 = vld [vmem:[%s4023_s15 + $0x1028] sm:$0xff]  ;;  %v413_v11 = vld [vmem:[%s4023_s15 + $0x760] sm:$0xff] }
 0x155   : > { %1988 = vmatprep.mubr.f32.mxu0 %v632_v9  ;;  %3432 = vmatpush3.bf16.msra.mxu1 %v3429_v60  ;;  %v686_v60 = vld [vmem:[%s4023_s15 + $0xfe8] sm:$0xff]  ;;  %v423_v3 = vld [vmem:[%s4023_s15 + $0x7b0] sm:$0xff] }
 0x156   : > { %v4780_v16 = vpop.f32.mrb[26].mxu1  ;;  %3434 = vmatprep.subr.bf16.mxu1 %v3433_v10  ;;  %v414_v9 = vld [vmem:[%s4023_s15 + $0x768] sm:$0xff] }
 0x157   : > { %1444 = vmatmul.mubr.f32.gmra.mrb[36].mxu1 %v341_v62  ;;  %v1037_v21 = vpop.f32.mrb[27].mxu1  ;;  %v713_v62 = vld [vmem:[%s4023_s15 + $0x10c0] sm:$0xff] }
 0x158   : > { %1989 = vmatmul.mubr.f32.gmra.mrb[100].mxu0 %v631_v14  ;;  %1448 = vmatprep.mubr.f32.mxu1 %v351_v15  ;;  %v422_v14 = vld [vmem:[%s4023_s15 + $0x7a8] sm:$0xff]  ;;  %v895_v15 = vld [vmem:[%s5584_s1 + $0x470] sm:$0xff]  ;;  %v432_v21 = vld [vmem:[%s4023_s15 + $0x7f8] sm:$0xff] }
 0x159   : > { %1993 = vmatprep.mubr.f32.mxu0 %v641_v17  ;;  %3436 = vmatpush3.bf16.msra.mxu1 %v3433_v10  ;;  %v704_v10 = vld [vmem:[%s4023_s15 + $0x1078] sm:$0xff] }
 0x15a   : > { %v4792_v29 = vpop.f32.mrb[28].mxu1  ;;  %3438 = vmatprep.subr.bf16.mxu1 %v3437_v19  ;;  %v896_v17 = vld [vmem:[%s5584_s1 + $0x478] sm:$0xff] }
 0x15b   : > { %1449 = vmatmul.mubr.f32.gmra.mrb[38].mxu1 %v350_v23  ;;  %v1042_v32 = vpop.f32.mrb[29].mxu1  ;;  %v3453_v18 = vpack.c.bf16 %v896_v17, %v895_v15  ;;  %v431_v23 = vld [vmem:[%s4023_s15 + $0x7f0] sm:$0xff] }
 0x15c   : > { %1994 = vmatmul.mubr.f32.gmra.mrb[102].mxu0 %v640_v25  ;;  %1453 = vmatprep.mubr.f32.mxu1 %v360_v13  ;;  %v721_v25 = vld [vmem:[%s4023_s15 + $0x1100] sm:$0xff]  ;;  %v730_v32 = vld [vmem:[%s4023_s15 + $0x1148] sm:$0xff]  ;;  %v531_v15 = vld [vmem:[%s4023_s15 + $0xb10] sm:$0xff] }
 0x15d   : > { %1998 = vmatprep.mubr.f32.mxu0 %v650_v24  ;;  %3440 = vmatpush3.bf16.msra.mxu1 %v3437_v19  ;;  %v712_v19 = vld [vmem:[%s4023_s15 + $0x10b8] sm:$0xff]  ;;  %v441_v13 = vld [vmem:[%s4023_s15 + $0x840] sm:$0xff]  ;;  %v731_v24 = vld [vmem:[%s4023_s15 + $0x1150] sm:$0xff] }
 0x15e   : > { %v4804_v40 = vpop.f32.mrb[30].mxu1  ;;  %3442 = vmatprep.subr.bf16.mxu1 %v3441_v31  ;;  %v247_v17 = vld [vmem:[%s4023_s15 + $0x230] sm:$0xff] }
 0x15f   : > { %1454 = vmatmul.mubr.f32.gmra.mrb[40].mxu1 %v359_v37  ;;  %v1047_v43 = vpop.f32.mrb[31].mxu1  ;;  %v449_v37 = vld [vmem:[%s4023_s15 + $0x880] sm:$0xff] }
 0x160   : > { %1999 = vmatmul.mubr.f32.gmra.mrb[104].mxu0 %v649_v38  ;;  %1458 = vmatprep.mubr.f32.mxu1 %v369_v30  ;;  %v739_v38 = vld [vmem:[%s4023_s15 + $0x1190] sm:$0xff]  ;;  %v748_v43 = vld [vmem:[%s4023_s15 + $0x11d8] sm:$0xff] }
 0x161   : > { %2003 = vmatprep.mubr.f32.mxu0 %v659_v27  ;;  %3444 = vmatpush3.bf16.msra.mxu1 %v3441_v31  ;;  %v440_v31 = vld [vmem:[%s4023_s15 + $0x838] sm:$0xff]  ;;  %v459_v30 = vld [vmem:[%s4023_s15 + $0x8d0] sm:$0xff]  ;;  %v749_v27 = vld [vmem:[%s4023_s15 + $0x11e0] sm:$0xff] }
 0x162   : > { %3446 = vmatprep.subr.bf16.mxu1 %v3445_v42 }
 0x163   : > { %1459 = vmatmul.mubr.f32.gmra.mrb[42].mxu1 %v368_v45  ;;  %v468_v45 = vld [vmem:[%s4023_s15 + $0x918] sm:$0xff] }
 0x164   : > { %2004 = vmatmul.mubr.f32.gmra.mrb[106].mxu0 %v658_v34  ;;  %1463 = vmatprep.mubr.f32.mxu1 %v378_v48  ;;  %v183_v34 = vld [vmem:[%s4023_s15 + $0x30] sm:$0xff]  ;;  %v477_v48 = vld [vmem:[%s4023_s15 + $0x960] sm:$0xff] }
 0x165   : > { %2008 = vmatprep.mubr.f32.mxu0 %v668_v49  ;;  %3448 = vmatpush3.bf16.msra.mxu1 %v3445_v42  ;;  %v458_v42 = vld [vmem:[%s4023_s15 + $0x8c8] sm:$0xff]  ;;  %v193_v49 = vld [vmem:[%s4023_s15 + $0x80] sm:$0xff] }
 0x166   : > { %3450 = vmatprep.subr.bf16.mxu1 %v3449_v52 }
 0x167   : > { %1464 = vmatmul.mubr.f32.gmra.mrb[44].mxu1 %v377_v53  ;;  %v192_v53 = vld [vmem:[%s4023_s15 + $0x78] sm:$0xff] }
 0x168   : > { %2009 = vmatmul.mubr.f32.gmra.mrb[108].mxu0 %v667_v41  ;;  %1468 = vmatprep.mubr.f32.mxu1 %v387_v54  ;;  %v486_v41 = vld [vmem:[%s4023_s15 + $0x9a8] sm:$0xff] }
 0x169   : > { %2013 = vmatprep.mubr.f32.mxu0 %v677_v55  ;;  %3452 = vmatpush3.bf16.msra.mxu1 %v3449_v52  ;;  %v476_v52 = vld [vmem:[%s4023_s15 + $0x958] sm:$0xff]  ;;  %v202_v54 = vld [vmem:[%s4023_s15 + $0xc8] sm:$0xff]  ;;  %v485_v55 = vld [vmem:[%s4023_s15 + $0x9a0] sm:$0xff] }
 0x16a   : > { %3454 = vmatprep.subr.bf16.mxu1 %v3453_v18 }
 0x16b   : > { %1469 = vmatmul.mubr.f32.gmra.mrb[46].mxu1 %v386_v57  ;;  %v201_v57 = vld [vmem:[%s4023_s15 + $0xc0] sm:$0xff] }
 0x16c   : > { %2014 = vmatmul.mubr.f32.gmra.mrb[110].mxu0 %v676_v8  ;;  %1473 = vmatprep.mubr.f32.mxu1 %v396_v50  ;;  %v495_v8 = vld [vmem:[%s4023_s15 + $0x9f0] sm:$0xff] }
 0x16d   : > { %2018 = vmatprep.mubr.f32.mxu0 %v686_v60  ;;  %3456 = vmatpush3.bf16.msra.mxu1 %v3453_v18  ;;  %v211_v50 = vld [vmem:[%s4023_s15 + $0x110] sm:$0xff]  ;;  %v494_v60 = vld [vmem:[%s4023_s15 + $0x9e8] sm:$0xff]  ;;  %v540_v18 = vld [vmem:[%s4023_s15 + $0xb58] sm:$0xff] }
 0x16f   : > { %1474 = vmatmul.mubr.f32.gmra.mrb[48].mxu1 %v395_v61  ;;  %v210_v61 = vld [vmem:[%s4023_s15 + $0x108] sm:$0xff] }
 0x170   : > { %2019 = vmatmul.mubr.f32.gmra.mrb[112].mxu0 %v685_v63  ;;  %1478 = vmatprep.mubr.f32.mxu1 %v405_v1  ;;  %v504_v63 = vld [vmem:[%s4023_s15 + $0xa38] sm:$0xff] }
 0x171   : > { %2023 = vmatprep.mubr.f32.mxu0 %v695_v2  ;;  %v220_v1 = vld [vmem:[%s4023_s15 + $0x158] sm:$0xff]  ;;  %v503_v2 = vld [vmem:[%s4023_s15 + $0xa30] sm:$0xff] }
 0x173   : > { %1479 = vmatmul.mubr.f32.gmra.mrb[50].mxu1 %v404_v56  ;;  %v219_v56 = vld [vmem:[%s4023_s15 + $0x150] sm:$0xff] }
 0x174   : > { %2024 = vmatmul.mubr.f32.gmra.mrb[114].mxu0 %v694_v4  ;;  %1483 = vmatprep.mubr.f32.mxu1 %v414_v9  ;;  %v513_v4 = vld [vmem:[%s4023_s15 + $0xa80] sm:$0xff] }
 0x175   : > { %2028 = vmatprep.mubr.f32.mxu0 %v704_v10  ;;  %v229_v9 = vld [vmem:[%s4023_s15 + $0x1a0] sm:$0xff]  ;;  %v512_v10 = vld [vmem:[%s4023_s15 + $0xa78] sm:$0xff] }
 0x177   : > { %1484 = vmatmul.mubr.f32.gmra.mrb[52].mxu1 %v413_v11  ;;  %v228_v11 = vld [vmem:[%s4023_s15 + $0x198] sm:$0xff] }
 0x178   : > { %2029 = vmatmul.mubr.f32.gmra.mrb[116].mxu0 %v703_v28  ;;  %1488 = vmatprep.mubr.f32.mxu1 %v423_v3  ;;  %v522_v28 = vld [vmem:[%s4023_s15 + $0xac8] sm:$0xff] }
 0x179   : > { %2033 = vmatprep.mubr.f32.mxu0 %v713_v62  ;;  %v238_v3 = vld [vmem:[%s4023_s15 + $0x1e8] sm:$0xff]  ;;  %v521_v62 = vld [vmem:[%s4023_s15 + $0xac0] sm:$0xff] }
 0x17b   : > { %1489 = vmatmul.mubr.f32.gmra.mrb[54].mxu1 %v422_v14  ;;  %v237_v14 = vld [vmem:[%s4023_s15 + $0x1e0] sm:$0xff] }
 0x17c   : > { %2034 = vmatmul.mubr.f32.gmra.mrb[118].mxu0 %v712_v19  ;;  %1493 = vmatprep.mubr.f32.mxu1 %v432_v21  ;;  %v530_v19 = vld [vmem:[%s4023_s15 + $0xb08] sm:$0xff] }
 0x17d   : > { %2038 = vmatprep.mubr.f32.mxu0 %v722_v22  ;;  %v246_v21 = vld [vmem:[%s4023_s15 + $0x228] sm:$0xff]  ;;  %v256_v22 = vld [vmem:[%s4023_s15 + $0x278] sm:$0xff] }
 0x17f   : > { %1494 = vmatmul.mubr.f32.gmra.mrb[56].mxu1 %v431_v23  ;;  %v539_v23 = vld [vmem:[%s4023_s15 + $0xb50] sm:$0xff] }
 0x180   : > { %2039 = vmatmul.mubr.f32.gmra.mrb[120].mxu0 %v721_v25  ;;  %1498 = vmatprep.mubr.f32.mxu1 %v441_v13  ;;  %v255_v25 = vld [vmem:[%s4023_s15 + $0x270] sm:$0xff]  ;;  %v549_v13 = vld [vmem:[%s4023_s15 + $0xba0] sm:$0xff] }
 0x181   : > { %2043 = vmatprep.mubr.f32.mxu0 %v731_v24  ;;  %v265_v24 = vld [vmem:[%s4023_s15 + $0x2c0] sm:$0xff] }
 0x183   : > { %1499 = vmatmul.mubr.f32.gmra.mrb[58].mxu1 %v440_v31  ;;  %v548_v31 = vld [vmem:[%s4023_s15 + $0xb98] sm:$0xff] }
 0x184   : > { %2044 = vmatmul.mubr.f32.gmra.mrb[122].mxu0 %v730_v32  ;;  %1503 = vmatprep.mubr.f32.mxu1 %v450_v20  ;;  %v264_v32 = vld [vmem:[%s4023_s15 + $0x2b8] sm:$0xff]  ;;  %v558_v20 = vld [vmem:[%s4023_s15 + $0xbe8] sm:$0xff] }
 0x185   : > { %2048 = vmatprep.mubr.f32.mxu0 %v740_v35  ;;  %v274_v35 = vld [vmem:[%s4023_s15 + $0x308] sm:$0xff] }
 0x187   : > { %1504 = vmatmul.mubr.f32.gmra.mrb[60].mxu1 %v449_v37  ;;  %v557_v37 = vld [vmem:[%s4023_s15 + $0xbe0] sm:$0xff] }
 0x188   : > { %2049 = vmatmul.mubr.f32.gmra.mrb[124].mxu0 %v739_v38  ;;  %1508 = vmatprep.mubr.f32.mxu1 %v459_v30  ;;  %v273_v38 = vld [vmem:[%s4023_s15 + $0x300] sm:$0xff]  ;;  %v567_v30 = vld [vmem:[%s4023_s15 + $0xc30] sm:$0xff] }
 0x189   : > { %2053 = vmatprep.mubr.f32.mxu0 %v749_v27  ;;  %v283_v27 = vld [vmem:[%s4023_s15 + $0x350] sm:$0xff] }
 0x18b   : > { %1509 = vmatmul.mubr.f32.gmra.mrb[62].mxu1 %v458_v42  ;;  %v566_v42 = vld [vmem:[%s4023_s15 + $0xc28] sm:$0xff] }
 0x18c   : > { %2054 = vmatmul.mubr.f32.gmra.mrb[126].mxu0 %v748_v43  ;;  %1513 = vmatprep.mubr.f32.mxu1 %v468_v45  ;;  %v282_v43 = vld [vmem:[%s4023_s15 + $0x348] sm:$0xff]  ;;  %v576_v45 = vld [vmem:[%s4023_s15 + $0xc78] sm:$0xff] }
 0x18d   : > { %2123 = vmatprep.mubr.f32.mxu0 %v184_v36  ;;  %v292_v36 = vld [vmem:[%s4023_s15 + $0x398] sm:$0xff] }
 0x18f   : > { %1514 = vmatmul.mubr.f32.gmra.mrb[64].mxu1 %v467_v47  ;;  %v575_v47 = vld [vmem:[%s4023_s15 + $0xc70] sm:$0xff] }
 0x190   : > { %2124 = vmatmul.mubr.f32.vlgmr.msra.gmra.mrb[0].mxu0 %v183_v34  ;;  %1518 = vmatprep.mubr.f32.mxu1 %v477_v48  ;;  %v291_v34 = vld [vmem:[%s4023_s15 + $0x390] sm:$0xff]  ;;  %v585_v48 = vld [vmem:[%s4023_s15 + $0xcc0] sm:$0xff] }
 0x191   : > { %2128 = vmatprep.mubr.f32.mxu0 %v193_v49  ;;  %v301_v49 = vld [vmem:[%s4023_s15 + $0x3e0] sm:$0xff] }
 0x193   : > { %1519 = vmatmul.mubr.f32.gmra.mrb[66].mxu1 %v476_v52  ;;  %v584_v52 = vld [vmem:[%s4023_s15 + $0xcb8] sm:$0xff] }
 0x194   : > { %2129 = vmatmul.mubr.f32.gmra.mrb[2].mxu0 %v192_v53  ;;  %1523 = vmatprep.mubr.f32.mxu1 %v486_v41  ;;  %v300_v53 = vld [vmem:[%s4023_s15 + $0x3d8] sm:$0xff]  ;;  %v594_v41 = vld [vmem:[%s4023_s15 + $0xd08] sm:$0xff] }
 0x195   : > { %2133 = vmatprep.mubr.f32.mxu0 %v202_v54  ;;  %v310_v54 = vld [vmem:[%s4023_s15 + $0x428] sm:$0xff] }
 0x197   : > { %1524 = vmatmul.mubr.f32.gmra.mrb[68].mxu1 %v485_v55  ;;  %v593_v55 = vld [vmem:[%s4023_s15 + $0xd00] sm:$0xff] }
 0x198   : > { %2134 = vmatmul.mubr.f32.gmra.mrb[4].mxu0 %v201_v57  ;;  %1528 = vmatprep.mubr.f32.mxu1 %v495_v8  ;;  %v309_v57 = vld [vmem:[%s4023_s15 + $0x420] sm:$0xff]  ;;  %v603_v8 = vld [vmem:[%s4023_s15 + $0xd50] sm:$0xff] }
 0x199   : > { %2138 = vmatprep.mubr.f32.mxu0 %v211_v50  ;;  %v319_v50 = vld [vmem:[%s4023_s15 + $0x470] sm:$0xff] }
 0x19b   : > { %1529 = vmatmul.mubr.f32.gmra.mrb[70].mxu1 %v494_v60  ;;  %v602_v60 = vld [vmem:[%s4023_s15 + $0xd48] sm:$0xff] }
 0x19c   : > { %2139 = vmatmul.mubr.f32.gmra.mrb[6].mxu0 %v210_v61  ;;  %1533 = vmatprep.mubr.f32.mxu1 %v504_v63  ;;  %v318_v61 = vld [vmem:[%s4023_s15 + $0x468] sm:$0xff]  ;;  %v612_v63 = vld [vmem:[%s4023_s15 + $0xd98] sm:$0xff] }
 0x19d   : > { %2143 = vmatprep.mubr.f32.mxu0 %v220_v1  ;;  %v328_v1 = vld [vmem:[%s4023_s15 + $0x4b8] sm:$0xff] }
 0x19f   : > { %1534 = vmatmul.mubr.f32.gmra.mrb[72].mxu1 %v503_v2  ;;  %v611_v2 = vld [vmem:[%s4023_s15 + $0xd90] sm:$0xff] }
 0x1a0   : > { %2144 = vmatmul.mubr.f32.gmra.mrb[8].mxu0 %v219_v56  ;;  %1538 = vmatprep.mubr.f32.mxu1 %v513_v4  ;;  %v327_v56 = vld [vmem:[%s4023_s15 + $0x4b0] sm:$0xff]  ;;  %v621_v4 = vld [vmem:[%s4023_s15 + $0xde0] sm:$0xff] }
 0x1a1   : > { %2148 = vmatprep.mubr.f32.mxu0 %v229_v9  ;;  %v337_v9 = vld [vmem:[%s4023_s15 + $0x500] sm:$0xff] }
 0x1a3   : > { %1539 = vmatmul.mubr.f32.gmra.mrb[74].mxu1 %v512_v10  ;;  %v620_v10 = vld [vmem:[%s4023_s15 + $0xdd8] sm:$0xff] }
 0x1a4   : > { %2149 = vmatmul.mubr.f32.gmra.mrb[10].mxu0 %v228_v11  ;;  %1543 = vmatprep.mubr.f32.mxu1 %v522_v28  ;;  %v336_v11 = vld [vmem:[%s4023_s15 + $0x4f8] sm:$0xff]  ;;  %v630_v28 = vld [vmem:[%s4023_s15 + $0xe28] sm:$0xff] }
 0x1a5   : > { %2153 = vmatprep.mubr.f32.mxu0 %v238_v3  ;;  %v346_v3 = vld [vmem:[%s4023_s15 + $0x548] sm:$0xff] }
 0x1a7   : > { %1544 = vmatmul.mubr.f32.gmra.mrb[76].mxu1 %v521_v62  ;;  %v629_v62 = vld [vmem:[%s4023_s15 + $0xe20] sm:$0xff] }
 0x1a8   : > { %2154 = vmatmul.mubr.f32.gmra.mrb[12].mxu0 %v237_v14  ;;  %1548 = vmatprep.mubr.f32.mxu1 %v531_v15  ;;  %v345_v14 = vld [vmem:[%s4023_s15 + $0x540] sm:$0xff]  ;;  %v639_v15 = vld [vmem:[%s4023_s15 + $0xe70] sm:$0xff] }
 0x1a9   : > { %2158 = vmatprep.mubr.f32.mxu0 %v247_v17  ;;  %v355_v17 = vld [vmem:[%s4023_s15 + $0x590] sm:$0xff] }
 0x1ab   : > { %1549 = vmatmul.mubr.f32.gmra.mrb[78].mxu1 %v530_v19  ;;  %v638_v19 = vld [vmem:[%s4023_s15 + $0xe68] sm:$0xff] }
 0x1ac   : > { %2159 = vmatmul.mubr.f32.gmra.mrb[14].mxu0 %v246_v21  ;;  %1553 = vmatprep.mubr.f32.mxu1 %v540_v18  ;;  %v354_v21 = vld [vmem:[%s4023_s15 + $0x588] sm:$0xff]  ;;  %v648_v18 = vld [vmem:[%s4023_s15 + $0xeb8] sm:$0xff] }
 0x1ad   : > { %2163 = vmatprep.mubr.f32.mxu0 %v256_v22  ;;  %v364_v22 = vld [vmem:[%s4023_s15 + $0x5d8] sm:$0xff] }
 0x1af   : > { %1554 = vmatmul.mubr.f32.gmra.mrb[80].mxu1 %v539_v23  ;;  %v647_v23 = vld [vmem:[%s4023_s15 + $0xeb0] sm:$0xff] }
 0x1b0   : > { %2164 = vmatmul.mubr.f32.gmra.mrb[16].mxu0 %v255_v25  ;;  %1558 = vmatprep.mubr.f32.mxu1 %v549_v13  ;;  %v363_v25 = vld [vmem:[%s4023_s15 + $0x5d0] sm:$0xff]  ;;  %v657_v13 = vld [vmem:[%s4023_s15 + $0xf00] sm:$0xff] }
 0x1b1   : > { %2168 = vmatprep.mubr.f32.mxu0 %v265_v24  ;;  %v373_v24 = vld [vmem:[%s4023_s15 + $0x620] sm:$0xff] }
 0x1b3   : > { %1559 = vmatmul.mubr.f32.gmra.mrb[82].mxu1 %v548_v31  ;;  %v656_v31 = vld [vmem:[%s4023_s15 + $0xef8] sm:$0xff] }
 0x1b4   : > { %2169 = vmatmul.mubr.f32.gmra.mrb[18].mxu0 %v264_v32  ;;  %1563 = vmatprep.mubr.f32.mxu1 %v558_v20  ;;  %v372_v32 = vld [vmem:[%s4023_s15 + $0x618] sm:$0xff]  ;;  %v666_v20 = vld [vmem:[%s4023_s15 + $0xf48] sm:$0xff] }
 0x1b5   : > { %2173 = vmatprep.mubr.f32.mxu0 %v274_v35  ;;  %v382_v35 = vld [vmem:[%s4023_s15 + $0x668] sm:$0xff] }
 0x1b7   : > { %1564 = vmatmul.mubr.f32.gmra.mrb[84].mxu1 %v557_v37  ;;  %v665_v37 = vld [vmem:[%s4023_s15 + $0xf40] sm:$0xff] }
 0x1b8   : > { %2174 = vmatmul.mubr.f32.gmra.mrb[20].mxu0 %v273_v38  ;;  %1568 = vmatprep.mubr.f32.mxu1 %v567_v30  ;;  %v381_v38 = vld [vmem:[%s4023_s15 + $0x660] sm:$0xff]  ;;  %v675_v30 = vld [vmem:[%s4023_s15 + $0xf90] sm:$0xff] }
 0x1b9   : > { %2178 = vmatprep.mubr.f32.mxu0 %v283_v27  ;;  %v391_v27 = vld [vmem:[%s4023_s15 + $0x6b0] sm:$0xff] }
 0x1bb   : > { %1569 = vmatmul.mubr.f32.gmra.mrb[86].mxu1 %v566_v42  ;;  %v674_v42 = vld [vmem:[%s4023_s15 + $0xf88] sm:$0xff] }
 0x1bc   : > { %2179 = vmatmul.mubr.f32.gmra.mrb[22].mxu0 %v282_v43  ;;  %1573 = vmatprep.mubr.f32.mxu1 %v576_v45  ;;  %v390_v43 = vld [vmem:[%s4023_s15 + $0x6a8] sm:$0xff]  ;;  %v684_v45 = vld [vmem:[%s4023_s15 + $0xfd8] sm:$0xff] }
 0x1bd   : > { %2183 = vmatprep.mubr.f32.mxu0 %v292_v36  ;;  %v400_v36 = vld [vmem:[%s4023_s15 + $0x6f8] sm:$0xff] }
 0x1bf   : > { %1574 = vmatmul.mubr.f32.gmra.mrb[88].mxu1 %v575_v47  ;;  %v683_v47 = vld [vmem:[%s4023_s15 + $0xfd0] sm:$0xff] }
 0x1c0   : > { %2184 = vmatmul.mubr.f32.gmra.mrb[24].mxu0 %v291_v34  ;;  %1578 = vmatprep.mubr.f32.mxu1 %v585_v48  ;;  %v399_v34 = vld [vmem:[%s4023_s15 + $0x6f0] sm:$0xff]  ;;  %v693_v48 = vld [vmem:[%s4023_s15 + $0x1020] sm:$0xff] }
 0x1c1   : > { %2188 = vmatprep.mubr.f32.mxu0 %v301_v49  ;;  %v409_v49 = vld [vmem:[%s4023_s15 + $0x740] sm:$0xff] }
 0x1c3   : > { %1579 = vmatmul.mubr.f32.gmra.mrb[90].mxu1 %v584_v52  ;;  %v692_v52 = vld [vmem:[%s4023_s15 + $0x1018] sm:$0xff] }
 0x1c4   : > { %2189 = vmatmul.mubr.f32.gmra.mrb[26].mxu0 %v300_v53  ;;  %1583 = vmatprep.mubr.f32.mxu1 %v594_v41  ;;  %v408_v53 = vld [vmem:[%s4023_s15 + $0x738] sm:$0xff]  ;;  %v702_v41 = vld [vmem:[%s4023_s15 + $0x1068] sm:$0xff] }
 0x1c5   : > { %2193 = vmatprep.mubr.f32.mxu0 %v310_v54  ;;  %v418_v54 = vld [vmem:[%s4023_s15 + $0x788] sm:$0xff] }
 0x1c7   : > { %1584 = vmatmul.mubr.f32.gmra.mrb[92].mxu1 %v593_v55  ;;  %v701_v55 = vld [vmem:[%s4023_s15 + $0x1060] sm:$0xff] }
 0x1c8   : > { %2194 = vmatmul.mubr.f32.gmra.mrb[28].mxu0 %v309_v57  ;;  %1588 = vmatprep.mubr.f32.mxu1 %v603_v8  ;;  %v417_v57 = vld [vmem:[%s4023_s15 + $0x780] sm:$0xff]  ;;  %v711_v8 = vld [vmem:[%s4023_s15 + $0x10b0] sm:$0xff] }
 0x1c9   : > { %2198 = vmatprep.mubr.f32.mxu0 %v319_v50  ;;  %v427_v50 = vld [vmem:[%s4023_s15 + $0x7d0] sm:$0xff] }
 0x1cb   : > { %1589 = vmatmul.mubr.f32.gmra.mrb[94].mxu1 %v602_v60  ;;  %v710_v60 = vld [vmem:[%s4023_s15 + $0x10a8] sm:$0xff] }
 0x1cc   : > { %2199 = vmatmul.mubr.f32.gmra.mrb[30].mxu0 %v318_v61  ;;  %1593 = vmatprep.mubr.f32.mxu1 %v612_v63  ;;  %v426_v61 = vld [vmem:[%s4023_s15 + $0x7c8] sm:$0xff]  ;;  %v720_v63 = vld [vmem:[%s4023_s15 + $0x10f8] sm:$0xff] }
 0x1cd   : > { %2203 = vmatprep.mubr.f32.mxu0 %v328_v1  ;;  %v436_v1 = vld [vmem:[%s4023_s15 + $0x818] sm:$0xff] }
 0x1cf   : > { %1594 = vmatmul.mubr.f32.gmra.mrb[96].mxu1 %v611_v2  ;;  %v719_v2 = vld [vmem:[%s4023_s15 + $0x10f0] sm:$0xff] }
 0x1d0   : > { %2204 = vmatmul.mubr.f32.gmra.mrb[32].mxu0 %v327_v56  ;;  %1598 = vmatprep.mubr.f32.mxu1 %v621_v4  ;;  %v435_v56 = vld [vmem:[%s4023_s15 + $0x810] sm:$0xff]  ;;  %v729_v4 = vld [vmem:[%s4023_s15 + $0x1140] sm:$0xff] }
 0x1d1   : > { %2208 = vmatprep.mubr.f32.mxu0 %v337_v9  ;;  %v445_v9 = vld [vmem:[%s4023_s15 + $0x860] sm:$0xff] }
 0x1d3   : > { %1599 = vmatmul.mubr.f32.gmra.mrb[98].mxu1 %v620_v10  ;;  %v728_v10 = vld [vmem:[%s4023_s15 + $0x1138] sm:$0xff] }
 0x1d4   : > { %2209 = vmatmul.mubr.f32.gmra.mrb[34].mxu0 %v336_v11  ;;  %1603 = vmatprep.mubr.f32.mxu1 %v630_v28  ;;  %v444_v11 = vld [vmem:[%s4023_s15 + $0x858] sm:$0xff]  ;;  %v738_v28 = vld [vmem:[%s4023_s15 + $0x1188] sm:$0xff] }
 0x1d5   : > { %2213 = vmatprep.mubr.f32.mxu0 %v346_v3  ;;  %v454_v3 = vld [vmem:[%s4023_s15 + $0x8a8] sm:$0xff] }
 0x1d7   : > { %1604 = vmatmul.mubr.f32.gmra.mrb[100].mxu1 %v629_v62  ;;  %v737_v62 = vld [vmem:[%s4023_s15 + $0x1180] sm:$0xff] }
 0x1d8   : > { %2214 = vmatmul.mubr.f32.gmra.mrb[36].mxu0 %v345_v14  ;;  %1608 = vmatprep.mubr.f32.mxu1 %v639_v15  ;;  %v453_v14 = vld [vmem:[%s4023_s15 + $0x8a0] sm:$0xff]  ;;  %v747_v15 = vld [vmem:[%s4023_s15 + $0x11d0] sm:$0xff] }
 0x1d9   : > { %2218 = vmatprep.mubr.f32.mxu0 %v355_v17  ;;  %v463_v17 = vld [vmem:[%s4023_s15 + $0x8f0] sm:$0xff] }
 0x1db   : > { %1609 = vmatmul.mubr.f32.gmra.mrb[102].mxu1 %v638_v19  ;;  %v746_v19 = vld [vmem:[%s4023_s15 + $0x11c8] sm:$0xff] }
 0x1dc   : > { %2219 = vmatmul.mubr.f32.gmra.mrb[38].mxu0 %v354_v21  ;;  %1613 = vmatprep.mubr.f32.mxu1 %v648_v18  ;;  %v462_v21 = vld [vmem:[%s4023_s15 + $0x8e8] sm:$0xff]  ;;  %v185_v18 = vld [vmem:[%s4023_s15 + $0x40] sm:$0xff] }
 0x1dd   : > { %2223 = vmatprep.mubr.f32.mxu0 %v364_v22  ;;  %v472_v22 = vld [vmem:[%s4023_s15 + $0x938] sm:$0xff] }
 0x1df   : > { %1614 = vmatmul.mubr.f32.gmra.mrb[104].mxu1 %v647_v23  ;;  %v194_v23 = vld [vmem:[%s4023_s15 + $0x88] sm:$0xff] }
 0x1e0   : > { %2224 = vmatmul.mubr.f32.gmra.mrb[40].mxu0 %v363_v25  ;;  %1618 = vmatprep.mubr.f32.mxu1 %v657_v13  ;;  %v471_v25 = vld [vmem:[%s4023_s15 + $0x930] sm:$0xff] }
 0x1e1   : > { %2228 = vmatprep.mubr.f32.mxu0 %v373_v24  ;;  %v203_v13 = vld [vmem:[%s4023_s15 + $0xd0] sm:$0xff]  ;;  %v481_v24 = vld [vmem:[%s4023_s15 + $0x980] sm:$0xff] }
 0x1e3   : > { %1619 = vmatmul.mubr.f32.gmra.mrb[106].mxu1 %v656_v31  ;;  %v212_v31 = vld [vmem:[%s4023_s15 + $0x118] sm:$0xff] }
 0x1e4   : > { %2229 = vmatmul.mubr.f32.gmra.mrb[42].mxu0 %v372_v32  ;;  %1623 = vmatprep.mubr.f32.mxu1 %v666_v20  ;;  %v480_v32 = vld [vmem:[%s4023_s15 + $0x978] sm:$0xff]  ;;  %v221_v20 = vld [vmem:[%s4023_s15 + $0x160] sm:$0xff] }
 0x1e5   : > { %2233 = vmatprep.mubr.f32.mxu0 %v382_v35  ;;  %v490_v35 = vld [vmem:[%s4023_s15 + $0x9c8] sm:$0xff] }
 0x1e7   : > { %1624 = vmatmul.mubr.f32.gmra.mrb[108].mxu1 %v665_v37  ;;  %v230_v37 = vld [vmem:[%s4023_s15 + $0x1a8] sm:$0xff] }
 0x1e8   : > { %2234 = vmatmul.mubr.f32.gmra.mrb[44].mxu0 %v381_v38  ;;  %1628 = vmatprep.mubr.f32.mxu1 %v675_v30  ;;  %v489_v38 = vld [vmem:[%s4023_s15 + $0x9c0] sm:$0xff]  ;;  %v239_v30 = vld [vmem:[%s4023_s15 + $0x1f0] sm:$0xff] }
 0x1e9   : > { %2238 = vmatprep.mubr.f32.mxu0 %v391_v27  ;;  %v499_v27 = vld [vmem:[%s4023_s15 + $0xa10] sm:$0xff] }
 0x1eb   : > { %1629 = vmatmul.mubr.f32.gmra.mrb[110].mxu1 %v674_v42  ;;  %v248_v42 = vld [vmem:[%s4023_s15 + $0x238] sm:$0xff] }
 0x1ec   : > { %2239 = vmatmul.mubr.f32.gmra.mrb[46].mxu0 %v390_v43  ;;  %1633 = vmatprep.mubr.f32.mxu1 %v684_v45  ;;  %v498_v43 = vld [vmem:[%s4023_s15 + $0xa08] sm:$0xff]  ;;  %v257_v45 = vld [vmem:[%s4023_s15 + $0x280] sm:$0xff] }
 0x1ed   : > { %2243 = vmatprep.mubr.f32.mxu0 %v400_v36  ;;  %v508_v36 = vld [vmem:[%s4023_s15 + $0xa58] sm:$0xff] }
 0x1ef   : > { %1634 = vmatmul.mubr.f32.gmra.mrb[112].mxu1 %v683_v47  ;;  %v266_v47 = vld [vmem:[%s4023_s15 + $0x2c8] sm:$0xff] }
 0x1f0   : > { %2244 = vmatmul.mubr.f32.gmra.mrb[48].mxu0 %v399_v34  ;;  %1638 = vmatprep.mubr.f32.mxu1 %v693_v48  ;;  %v507_v34 = vld [vmem:[%s4023_s15 + $0xa50] sm:$0xff] }
 0x1f1   : > { %2248 = vmatprep.mubr.f32.mxu0 %v409_v49  ;;  %v275_v48 = vld [vmem:[%s4023_s15 + $0x310] sm:$0xff]  ;;  %v517_v49 = vld [vmem:[%s4023_s15 + $0xaa0] sm:$0xff] }
 0x1f3   : > { %1639 = vmatmul.mubr.f32.gmra.mrb[114].mxu1 %v692_v52  ;;  %v284_v52 = vld [vmem:[%s4023_s15 + $0x358] sm:$0xff] }
 0x1f4   : > { %2249 = vmatmul.mubr.f32.gmra.mrb[50].mxu0 %v408_v53  ;;  %1643 = vmatprep.mubr.f32.mxu1 %v702_v41  ;;  %v516_v53 = vld [vmem:[%s4023_s15 + $0xa98] sm:$0xff]  ;;  %v293_v41 = vld [vmem:[%s4023_s15 + $0x3a0] sm:$0xff] }
 0x1f5   : > { %2253 = vmatprep.mubr.f32.mxu0 %v418_v54 }
 0x1f7   : > { %1644 = vmatmul.mubr.f32.gmra.mrb[116].mxu1 %v701_v55  ;;  %v526_v55 = vld [vmem:[%s4023_s15 + $0xae8] sm:$0xff] }
 0x1f8   : > { %2254 = vmatmul.mubr.f32.gmra.mrb[52].mxu0 %v417_v57  ;;  %1648 = vmatprep.mubr.f32.mxu1 %v711_v8  ;;  %v302_v8 = vld [vmem:[%s4023_s15 + $0x3e8] sm:$0xff] }
 0x1f9   : > { %2258 = vmatprep.mubr.f32.mxu0 %v427_v50  ;;  %v525_v50 = vld [vmem:[%s4023_s15 + $0xae0] sm:$0xff] }
 0x1fb   : > { %1649 = vmatmul.mubr.f32.gmra.mrb[118].mxu1 %v710_v60  ;;  %v311_v60 = vld [vmem:[%s4023_s15 + $0x430] sm:$0xff] }
 0x1fc   : > { %2259 = vmatmul.mubr.f32.gmra.mrb[54].mxu0 %v426_v61  ;;  %1653 = vmatprep.mubr.f32.mxu1 %v720_v63  ;;  %v535_v63 = vld [vmem:[%s4023_s15 + $0xb30] sm:$0xff] }
 0x1fd   : > { %2263 = vmatprep.mubr.f32.mxu0 %v436_v1 }
 0x1ff   : > { %1654 = vmatmul.mubr.f32.gmra.mrb[120].mxu1 %v719_v2  ;;  %v320_v2 = vld [vmem:[%s4023_s15 + $0x478] sm:$0xff] }
 0x200   : > { %2264 = vmatmul.mubr.f32.gmra.mrb[56].mxu0 %v435_v56  ;;  %1658 = vmatprep.mubr.f32.mxu1 %v729_v4  ;;  %v534_v56 = vld [vmem:[%s4023_s15 + $0xb28] sm:$0xff]  ;;  %v329_v4 = vld [vmem:[%s4023_s15 + $0x4c0] sm:$0xff] }
 0x201   : > { %2268 = vmatprep.mubr.f32.mxu0 %v445_v9 }
 0x203   : > { %1659 = vmatmul.mubr.f32.gmra.mrb[122].mxu1 %v728_v10  ;;  %v544_v10 = vld [vmem:[%s4023_s15 + $0xb78] sm:$0xff] }
 0x204   : > { %2269 = vmatmul.mubr.f32.gmra.mrb[58].mxu0 %v444_v11  ;;  %1663 = vmatprep.mubr.f32.mxu1 %v738_v28  ;;  %v338_v28 = vld [vmem:[%s4023_s15 + $0x508] sm:$0xff] }
 0x205   : > { %2273 = vmatprep.mubr.f32.mxu0 %v454_v3  ;;  %v543_v3 = vld [vmem:[%s4023_s15 + $0xb70] sm:$0xff] }
 0x207   : > { %1664 = vmatmul.mubr.f32.gmra.mrb[124].mxu1 %v737_v62  ;;  %v347_v62 = vld [vmem:[%s4023_s15 + $0x550] sm:$0xff] }
 0x208   : > { %2274 = vmatmul.mubr.f32.gmra.mrb[60].mxu0 %v453_v14  ;;  %1668 = vmatprep.mubr.f32.mxu1 %v747_v15  ;;  %v553_v15 = vld [vmem:[%s4023_s15 + $0xbc0] sm:$0xff] }
 0x209   : > { %2278 = vmatprep.mubr.f32.mxu0 %v463_v17 }
 0x20b   : > { %1669 = vmatmul.mubr.f32.gmra.mrb[126].mxu1 %v746_v19  ;;  %v356_v19 = vld [vmem:[%s4023_s15 + $0x598] sm:$0xff] }
 0x20c   : > { %2279 = vmatmul.mubr.f32.gmra.mrb[62].mxu0 %v462_v21  ;;  %3137 = vmatprep.mubr.f32.mxu1 %v185_v18  ;;  %v552_v21 = vld [vmem:[%s4023_s15 + $0xbb8] sm:$0xff]  ;;  %v365_v18 = vld [vmem:[%s4023_s15 + $0x5e0] sm:$0xff] }
 0x20d   : > { %2283 = vmatprep.mubr.f32.mxu0 %v472_v22 }
 0x20f   : > { %3138 = vmatmul.mubr.f32.vlgmr.msra.gmra.mrb[128].mxu1 %v194_v23  ;;  %v562_v23 = vld [vmem:[%s4023_s15 + $0xc08] sm:$0xff] }
 0x210   : > { %2284 = vmatmul.mubr.f32.gmra.mrb[64].mxu0 %v471_v25  ;;  %3140 = vmatprep.mubr.f32.mxu1 %v203_v13  ;;  %v374_v13 = vld [vmem:[%s4023_s15 + $0x628] sm:$0xff] }
 0x211   : > { %2288 = vmatprep.mubr.f32.mxu0 %v481_v24  ;;  %v561_v24 = vld [vmem:[%s4023_s15 + $0xc00] sm:$0xff] }
 0x213   : > { %3141 = vmatmul.mubr.f32.gmra.mrb[130].mxu1 %v212_v31  ;;  %v383_v31 = vld [vmem:[%s4023_s15 + $0x670] sm:$0xff] }
 0x214   : > { %2289 = vmatmul.mubr.f32.gmra.mrb[66].mxu0 %v480_v32  ;;  %3143 = vmatprep.mubr.f32.mxu1 %v221_v20  ;;  %v571_v20 = vld [vmem:[%s4023_s15 + $0xc50] sm:$0xff] }
 0x215   : > { %2293 = vmatprep.mubr.f32.mxu0 %v490_v35 }
 0x217   : > { %3144 = vmatmul.mubr.f32.gmra.mrb[132].mxu1 %v230_v37  ;;  %v392_v37 = vld [vmem:[%s4023_s15 + $0x6b8] sm:$0xff] }
 0x218   : > { %2294 = vmatmul.mubr.f32.gmra.mrb[68].mxu0 %v489_v38  ;;  %3146 = vmatprep.mubr.f32.mxu1 %v239_v30  ;;  %v570_v38 = vld [vmem:[%s4023_s15 + $0xc48] sm:$0xff]  ;;  %v401_v30 = vld [vmem:[%s4023_s15 + $0x700] sm:$0xff] }
 0x219   : > { %2298 = vmatprep.mubr.f32.mxu0 %v499_v27 }
 0x21b   : > { %3147 = vmatmul.mubr.f32.gmra.mrb[134].mxu1 %v248_v42  ;;  %v580_v42 = vld [vmem:[%s4023_s15 + $0xc98] sm:$0xff] }
 0x21c   : > { %2299 = vmatmul.mubr.f32.gmra.mrb[70].mxu0 %v498_v43  ;;  %3149 = vmatprep.mubr.f32.mxu1 %v257_v45  ;;  %v410_v45 = vld [vmem:[%s4023_s15 + $0x748] sm:$0xff] }
 0x21d   : > { %2303 = vmatprep.mubr.f32.mxu0 %v508_v36  ;;  %v579_v36 = vld [vmem:[%s4023_s15 + $0xc90] sm:$0xff] }
 0x21f   : > { %3150 = vmatmul.mubr.f32.gmra.mrb[136].mxu1 %v266_v47  ;;  %v419_v47 = vld [vmem:[%s4023_s15 + $0x790] sm:$0xff] }
 0x220   : > { %2304 = vmatmul.mubr.f32.gmra.mrb[72].mxu0 %v507_v34  ;;  %3152 = vmatprep.mubr.f32.mxu1 %v275_v48  ;;  %v589_v48 = vld [vmem:[%s4023_s15 + $0xce0] sm:$0xff] }
 0x221   : > { %2308 = vmatprep.mubr.f32.mxu0 %v517_v49 }
 0x222   : > { %v5014_v54 = vpop.f32.mrb[32].mxu1 }
 0x223   : > { %v1437_v57 = vpop.f32.mrb[33].mxu1  ;;  %3153 = vmatmul.mubr.f32.gmra.mrb[138].mxu1 %v284_v52  ;;  %v428_v52 = vld [vmem:[%s4023_s15 + $0x7d8] sm:$0xff] }
 0x224   : > { %2309 = vmatmul.mubr.f32.gmra.mrb[74].mxu0 %v516_v53  ;;  %3155 = vmatprep.mubr.f32.mxu1 %v293_v41  ;;  %v588_v53 = vld [vmem:[%s4023_s15 + $0xcd8] sm:$0xff]  ;;  %v437_v41 = vld [vmem:[%s4023_s15 + $0x820] sm:$0xff]  ;;  %v598_v57 = vld [vmem:[%s4023_s15 + $0xd28] sm:$0xff] }
 0x225   : > { %2313 = vmatprep.mubr.f32.mxu0 %v526_v55 }
 0x226   : > { %v5020_v61 = vpop.f32.mrb[34].mxu1 }
 0x227   : > { %v1442_v1 = vpop.f32.mrb[35].mxu1  ;;  %3156 = vmatmul.mubr.f32.gmra.mrb[140].mxu1 %v302_v8 }
 0x228   : > { %2314 = vmatmul.mubr.f32.gmra.mrb[76].mxu0 %v525_v50  ;;  %3158 = vmatprep.mubr.f32.mxu1 %v311_v60  ;;  %v446_v50 = vld [vmem:[%s4023_s15 + $0x868] sm:$0xff]  ;;  %v597_v60 = vld [vmem:[%s4023_s15 + $0xd20] sm:$0xff] }
 0x229   : > { %2318 = vmatprep.mubr.f32.mxu0 %v535_v63  ;;  %v455_v63 = vld [vmem:[%s4023_s15 + $0x8b0] sm:$0xff] }
 0x22a   : > { %v5026_v9 = vpop.f32.mrb[36].mxu1 }
 0x22b   : > { %v1447_v11 = vpop.f32.mrb[37].mxu1  ;;  %3159 = vmatmul.mubr.f32.gmra.mrb[142].mxu1 %v320_v2  ;;  %v607_v2 = vld [vmem:[%s4023_s15 + $0xd70] sm:$0xff] }
 0x22c   : > { %2319 = vmatmul.mubr.f32.gmra.mrb[78].mxu0 %v534_v56  ;;  %3161 = vmatprep.mubr.f32.mxu1 %v329_v4  ;;  %v464_v4 = vld [vmem:[%s4023_s15 + $0x8f8] sm:$0xff]  ;;  %v473_v11 = vld [vmem:[%s4023_s15 + $0x940] sm:$0xff] }
 0x22d   : > { %2323 = vmatprep.mubr.f32.mxu0 %v544_v10  ;;  %v606_v10 = vld [vmem:[%s4023_s15 + $0xd68] sm:$0xff] }
 0x22e   : > { %v5032_v14 = vpop.f32.mrb[38].mxu1 }
 0x22f   : > { %v1452_v17 = vpop.f32.mrb[39].mxu1  ;;  %3162 = vmatmul.mubr.f32.gmra.mrb[144].mxu1 %v338_v28 }
 0x230   : > { %2324 = vmatmul.mubr.f32.gmra.mrb[80].mxu0 %v543_v3  ;;  %3164 = vmatprep.mubr.f32.mxu1 %v347_v62  ;;  %v616_v3 = vld [vmem:[%s4023_s15 + $0xdb8] sm:$0xff]  ;;  %v615_v17 = vld [vmem:[%s4023_s15 + $0xdb0] sm:$0xff] }
 0x231   : > { %2328 = vmatprep.mubr.f32.mxu0 %v553_v15  ;;  %v482_v15 = vld [vmem:[%s4023_s15 + $0x988] sm:$0xff] }
 0x232   : > { %v5038_v22 = vpop.f32.mrb[40].mxu1 }
 0x233   : > { %v1457_v25 = vpop.f32.mrb[41].mxu1  ;;  %3165 = vmatmul.mubr.f32.gmra.mrb[146].mxu1 %v356_v19  ;;  %v491_v19 = vld [vmem:[%s4023_s15 + $0x9d0] sm:$0xff] }
 0x234   : > { %2329 = vmatmul.mubr.f32.gmra.mrb[82].mxu0 %v552_v21  ;;  %3167 = vmatprep.mubr.f32.mxu1 %v365_v18  ;;  %v625_v18 = vld [vmem:[%s4023_s15 + $0xe00] sm:$0xff]  ;;  %v500_v25 = vld [vmem:[%s4023_s15 + $0xa18] sm:$0xff] }
 0x235   : > { %2333 = vmatprep.mubr.f32.mxu0 %v562_v23 }
 0x236   : > { %v5044_v32 = vpop.f32.mrb[42].mxu1 }
 0x237   : > { %v1462_v35 = vpop.f32.mrb[43].mxu1  ;;  %3168 = vmatmul.mubr.f32.gmra.mrb[148].mxu1 %v374_v13  ;;  %v624_v13 = vld [vmem:[%s4023_s15 + $0xdf8] sm:$0xff] }
 0x238   : > { %2334 = vmatmul.mubr.f32.gmra.mrb[84].mxu0 %v561_v24  ;;  %3170 = vmatprep.mubr.f32.mxu1 %v383_v31  ;;  %v509_v24 = vld [vmem:[%s4023_s15 + $0xa60] sm:$0xff] }
 0x239   : > { %2338 = vmatprep.mubr.f32.mxu0 %v571_v20  ;;  %v634_v20 = vld [vmem:[%s4023_s15 + $0xe48] sm:$0xff] }
 0x23a   : > { %v5050_v27 = vpop.f32.mrb[44].mxu1 }
 0x23b   : > { %v1467_v43 = vpop.f32.mrb[45].mxu1  ;;  %3171 = vmatmul.mubr.f32.gmra.mrb[150].mxu1 %v392_v37  ;;  %v518_v37 = vld [vmem:[%s4023_s15 + $0xaa8] sm:$0xff] }
 0x23c   : > { %2339 = vmatmul.mubr.f32.gmra.mrb[86].mxu0 %v570_v38  ;;  %3173 = vmatprep.mubr.f32.mxu1 %v401_v30  ;;  %v633_v38 = vld [vmem:[%s4023_s15 + $0xe40] sm:$0xff]  ;;  %v527_v30 = vld [vmem:[%s4023_s15 + $0xaf0] sm:$0xff] }
 0x23d   : > { %2343 = vmatprep.mubr.f32.mxu0 %v580_v42  ;;  %v643_v43 = vld [vmem:[%s4023_s15 + $0xe90] sm:$0xff] }
 0x23e   : > { %v5056_v34 = vpop.f32.mrb[46].mxu1 }
 0x23f   : > { %v1472_v49 = vpop.f32.mrb[47].mxu1  ;;  %3174 = vmatmul.mubr.f32.gmra.mrb[152].mxu1 %v410_v45 }
 0x240   : > { %2344 = vmatmul.mubr.f32.gmra.mrb[88].mxu0 %v579_v36  ;;  %3176 = vmatprep.mubr.f32.mxu1 %v419_v47  ;;  %v536_v36 = vld [vmem:[%s4023_s15 + $0xb38] sm:$0xff]  ;;  %v642_v47 = vld [vmem:[%s4023_s15 + $0xe88] sm:$0xff] }
 0x241   : > { %2348 = vmatprep.mubr.f32.mxu0 %v589_v48  ;;  %v545_v48 = vld [vmem:[%s4023_s15 + $0xb80] sm:$0xff] }
 0x242   : > { %v5062_v55 = vpop.f32.mrb[48].mxu1 }
 0x243   : > { %v1477_v8 = vpop.f32.mrb[49].mxu1  ;;  %3177 = vmatmul.mubr.f32.gmra.mrb[154].mxu1 %v428_v52  ;;  %v652_v52 = vld [vmem:[%s4023_s15 + $0xed8] sm:$0xff] }
 0x244   : > { %2349 = vmatmul.mubr.f32.gmra.mrb[90].mxu0 %v588_v53  ;;  %3179 = vmatprep.mubr.f32.mxu1 %v437_v41  ;;  %v554_v41 = vld [vmem:[%s4023_s15 + $0xbc8] sm:$0xff]  ;;  %v563_v8 = vld [vmem:[%s4023_s15 + $0xc10] sm:$0xff] }
 0x245   : > { %2353 = vmatprep.mubr.f32.mxu0 %v598_v57  ;;  %v651_v57 = vld [vmem:[%s4023_s15 + $0xed0] sm:$0xff] }
 0x246   : > { %v5068_v1 = vpop.f32.mrb[50].mxu1 }
 0x247   : > { %v1482_v56 = vpop.f32.mrb[51].mxu1  ;;  %3180 = vmatmul.mubr.f32.gmra.mrb[156].mxu1 %v446_v50 }
 0x248   : > { %2354 = vmatmul.mubr.f32.gmra.mrb[92].mxu0 %v597_v60  ;;  %3182 = vmatprep.mubr.f32.mxu1 %v455_v63  ;;  %v661_v60 = vld [vmem:[%s4023_s15 + $0xf20] sm:$0xff]  ;;  %v572_v56 = vld [vmem:[%s4023_s15 + $0xc58] sm:$0xff] }
 0x249   : > { %2358 = vmatprep.mubr.f32.mxu0 %v607_v2  ;;  %v5110_v63 = vld [vmem:[%s5585_s2] ss:$0 sm:$0xff] }
 0x24a   : > { %v5074_v28 = vpop.f32.mrb[52].mxu1 }
 0x24b   : > { %v1487_v62 = vpop.f32.mrb[53].mxu1  ;;  %3183 = vmatmul.mubr.f32.gmra.mrb[158].mxu1 %v464_v4  ;;  %v660_v4 = vld [vmem:[%s4023_s15 + $0xf18] sm:$0xff] }
 0x24c   : > { %2359 = vmatmul.mubr.f32.gmra.mrb[94].mxu0 %v606_v10  ;;  %3185 = vmatprep.mubr.f32.mxu1 %v473_v11  ;;  %v581_v10 = vld [vmem:[%s4023_s15 + $0xca0] sm:$0xff]  ;;  %v971_v11 = vadd.f32 %v5110_v63, %v4683_v44  ;;  %v670_v62 = vld [vmem:[%s4023_s15 + $0xf68] sm:$0xff]  ;;  %v976_v44 = vadd.f32 %v5110_v63, %v4689_v59  ;;  %v981_v59 = vadd.f32 %v5110_v63, %v4695_v0 }
 0x24d   : > { %2363 = vmatprep.mubr.f32.mxu0 %v616_v3  ;;  %v986_v0 = vadd.f32 %v5110_v63, %v4701_v7  ;;  %v991_v7 = vadd.f32 %v5110_v63, %v4707_v12  ;;  %v996_v12 = vadd.f32 %v5110_v63, %v4713_v5  ;;  %v1001_v5 = vadd.f32 %v5110_v63, %v4719_v26 }
 0x24e   : > { %v5080_v21 = vpop.f32.mrb[54].mxu1  ;;  %v1006_v26 = vadd.f32 %v5110_v63, %v4725_v33  ;;  %v1011_v33 = vadd.f32 %v5110_v63, %v4731_v39  ;;  %v1016_v39 = vadd.f32 %v5110_v63, %v4737_v46 }
 0x24f   : > { %v1492_v23 = vpop.f32.mrb[55].mxu1  ;;  %3186 = vmatmul.mubr.f32.gmra.mrb[160].mxu1 %v482_v15 }
 0x250   : > { %2364 = vmatmul.mubr.f32.gmra.mrb[96].mxu0 %v615_v17  ;;  %3188 = vmatprep.mubr.f32.mxu1 %v491_v19  ;;  %v590_v23 = vld [vmem:[%s4023_s15 + $0xce8] sm:$0xff] }
 0x251   : > { %2368 = vmatprep.mubr.f32.mxu0 %v625_v18 }
 0x252   : > { %v5086_v31 = vpop.f32.mrb[56].mxu1 }
 0x253   : > { %v1497_v35 = vpop.f32.mrb[57].mxu1  ;;  %3189 = vmatmul.mubr.f32.gmra.mrb[162].mxu1 %v500_v25  ;;  %v669_v25 = vld [vmem:[%s4023_s15 + $0xf60] sm:$0xff] }
 0x254   : > { %2369 = vmatmul.mubr.f32.gmra.mrb[98].mxu0 %v624_v13  ;;  %3191 = vmatprep.mubr.f32.mxu1 %v509_v24  ;;  %v599_v13 = vld [vmem:[%s4023_s15 + $0xd30] sm:$0xff] }
 0x255   : > { %2373 = vmatprep.mubr.f32.mxu0 %v634_v20  ;;  %v679_v20 = vld [vmem:[%s4023_s15 + $0xfb0] sm:$0xff] }
 0x256   : > { %v5092_v42 = vpop.f32.mrb[58].mxu1 }
 0x257   : > { %v1502_v45 = vpop.f32.mrb[59].mxu1  ;;  %3192 = vmatmul.mubr.f32.gmra.mrb[164].mxu1 %v518_v37 }
 0x258   : > { %2374 = vmatmul.mubr.f32.gmra.mrb[100].mxu0 %v633_v38  ;;  %3194 = vmatprep.mubr.f32.mxu1 %v527_v30  ;;  %v678_v45 = vld [vmem:[%s4023_s15 + $0xfa8] sm:$0xff] }
 0x259   : > { %2378 = vmatprep.mubr.f32.mxu0 %v643_v43  ;;  %v608_v43 = vld [vmem:[%s4023_s15 + $0xd78] sm:$0xff] }
 0x25a   : > { %v5098_v49 = vpop.f32.mrb[60].mxu1 }
 0x25b   : > { %v1507_v53 = vpop.f32.mrb[61].mxu1  ;;  %3195 = vmatmul.mubr.f32.gmra.mrb[166].mxu1 %v536_v36  ;;  %v617_v36 = vld [vmem:[%s4023_s15 + $0xdc0] sm:$0xff] }
 0x25c   : > { %2379 = vmatmul.mubr.f32.gmra.mrb[102].mxu0 %v642_v47  ;;  %3197 = vmatprep.mubr.f32.mxu1 %v545_v48  ;;  %v688_v48 = vld [vmem:[%s4023_s15 + $0xff8] sm:$0xff] }
 0x25d   : > { %2383 = vmatprep.mubr.f32.mxu0 %v652_v52 }
 0x25e   : > { %v5104_v50 = vpop.f32.mrb[62].mxu1 }
 0x25f   : > { %v1512_v2 = vpop.f32.mrb[63].mxu1  ;;  %3198 = vmatmul.mubr.f32.gmra.mrb[168].mxu1 %v554_v41 }
 0x260   : > { %2384 = vmatmul.mubr.f32.gmra.mrb[104].mxu0 %v651_v57  ;;  %3200 = vmatprep.mubr.f32.mxu1 %v563_v8  ;;  %v626_v8 = vld [vmem:[%s4023_s15 + $0xe08] sm:$0xff]  ;;  %v635_v2 = vld [vmem:[%s4023_s15 + $0xe50] sm:$0xff] }
 0x261   : > { %2388 = vmatprep.mubr.f32.mxu0 %v661_v60  ;;  %v687_v60 = vld [vmem:[%s4023_s15 + $0xff0] sm:$0xff] }
 0x262   : > { %v5117_v3 = vpop.f32.mrb[64].mxu1 }
 0x263   : > { %v2125_v15 = vpop.f32.mrb[0].mxu0  ;;  %v1517_v17 = vpop.f32.mrb[65].mxu1  ;;  %3201 = vmatmul.mubr.f32.gmra.mrb[170].mxu1 %v572_v56 }
 0x264   : > { %v5120_v19 = vadd.f32 %v2125_v15, %v971_v11  ;;  %v2127_v18 = vpop.f32.mrb[1].mxu0  ;;  %2389 = vmatmul.mubr.f32.gmra.mrb[106].mxu0 %v660_v4  ;;  %3203 = vmatprep.mubr.f32.mxu1 %v581_v10  ;;  %v697_v4 = vld [vmem:[%s4023_s15 + $0x1040] sm:$0xff]  ;;  %v644_v17 = vld [vmem:[%s4023_s15 + $0xe98] sm:$0xff] }
 0x265   : > { %2393 = vmatprep.mubr.f32.mxu0 %v670_v62  ;;  %v696_v18 = vld [vmem:[%s4023_s15 + $0x1038] sm:$0xff] }
 0x266   : > { %v5127_v24 = vpop.f32.mrb[66].mxu1 }
 0x267   : > { %v2130_v35 = vpop.f32.mrb[2].mxu0  ;;  %v1522_v37 = vpop.f32.mrb[67].mxu1  ;;  %3204 = vmatmul.mubr.f32.gmra.mrb[172].mxu1 %v590_v23  ;;  %v653_v23 = vld [vmem:[%s4023_s15 + $0xee0] sm:$0xff] }
 0x268   : > { %v5130_v38 = vadd.f32 %v2130_v35, %v976_v44  ;;  %v2132_v30 = vpop.f32.mrb[3].mxu0  ;;  %2394 = vmatmul.mubr.f32.gmra.mrb[108].mxu0 %v669_v25  ;;  %3206 = vmatprep.mubr.f32.mxu1 %v599_v13  ;;  %v706_v13 = vld [vmem:[%s4023_s15 + $0x1088] sm:$0xff] }
 0x269   : > { %2398 = vmatprep.mubr.f32.mxu0 %v679_v20  ;;  %v662_v30 = vld [vmem:[%s4023_s15 + $0xf28] sm:$0xff] }
 0x26a   : > { %v5137_v47 = vpop.f32.mrb[68].mxu1 }
 0x26b   : > { %v2135_v52 = vpop.f32.mrb[4].mxu0  ;;  %v1527_v53 = vpop.f32.mrb[69].mxu1  ;;  %3207 = vmatmul.mubr.f32.gmra.mrb[174].mxu1 %v608_v43  ;;  %v705_v43 = vld [vmem:[%s4023_s15 + $0x1080] sm:$0xff] }
 0x26c   : > { %v5140_v41 = vadd.f32 %v2135_v52, %v981_v59  ;;  %v2137_v57 = vpop.f32.mrb[5].mxu0  ;;  %2399 = vmatmul.mubr.f32.gmra.mrb[110].mxu0 %v678_v45  ;;  %3209 = vmatprep.mubr.f32.mxu1 %v617_v36  ;;  %v671_v45 = vld [vmem:[%s4023_s15 + $0xf70] sm:$0xff] }
 0x26d   : > { %2403 = vmatprep.mubr.f32.mxu0 %v688_v48  ;;  %v715_v59 = vld [vmem:[%s4023_s15 + $0x10d0] sm:$0xff] }
 0x26e   : > { %v5147_v56 = vpop.f32.mrb[70].mxu1 }
 0x26f   : > { %v2140_v10 = vpop.f32.mrb[6].mxu0  ;;  %v1532_v11 = vpop.f32.mrb[71].mxu1  ;;  %3210 = vmatmul.mubr.f32.gmra.mrb[176].mxu1 %v626_v8  ;;  %v680_v8 = vld [vmem:[%s4023_s15 + $0xfb8] sm:$0xff] }
 0x270   : > { %v5150_v62 = vadd.f32 %v2140_v10, %v986_v0  ;;  %v2142_v15 = vpop.f32.mrb[7].mxu0  ;;  %2404 = vmatmul.mubr.f32.gmra.mrb[112].mxu0 %v687_v60  ;;  %3212 = vmatprep.mubr.f32.mxu1 %v635_v2  ;;  %v714_v60 = vld [vmem:[%s4023_s15 + $0x10c8] sm:$0xff]  ;;  %v689_v2 = vld [vmem:[%s4023_s15 + $0x1000] sm:$0xff] }
 0x271   : > { %2408 = vmatprep.mubr.f32.mxu0 %v697_v4  ;;  %v724_v4 = vld [vmem:[%s4023_s15 + $0x1118] sm:$0xff] }
 0x272   : > { %v5157_v25 = vpop.f32.mrb[72].mxu1 }
 0x273   : > { %v2145_v44 = vpop.f32.mrb[8].mxu0  ;;  %v1537_v20 = vpop.f32.mrb[73].mxu1  ;;  %3213 = vmatmul.mubr.f32.gmra.mrb[178].mxu1 %v644_v17 }
 0x274   : > { %v5160_v35 = vadd.f32 %v2145_v44, %v991_v7  ;;  %v2147_v37 = vpop.f32.mrb[9].mxu0  ;;  %2409 = vmatmul.mubr.f32.gmra.mrb[114].mxu0 %v696_v18  ;;  %3215 = vmatprep.mubr.f32.mxu1 %v653_v23  ;;  %v698_v18 = vld [vmem:[%s4023_s15 + $0x1048] sm:$0xff]  ;;  %v723_v23 = vld [vmem:[%s4023_s15 + $0x1110] sm:$0xff]  ;;  %v733_v44 = vld [vmem:[%s4023_s15 + $0x1160] sm:$0xff] }
 0x275   : > { %2413 = vmatprep.mubr.f32.mxu0 %v706_v13  ;;  %v707_v7 = vld [vmem:[%s4023_s15 + $0x1090] sm:$0xff] }
 0x276   : > { %v5167_v36 = vpop.f32.mrb[74].mxu1 }
 0x277   : > { %v2150_v48 = vpop.f32.mrb[10].mxu0  ;;  %v1542_v52 = vpop.f32.mrb[75].mxu1  ;;  %3216 = vmatmul.mubr.f32.gmra.mrb[180].mxu1 %v662_v30 }
 0x278   : > { %v5170_v53 = vadd.f32 %v2150_v48, %v996_v12  ;;  %v2152_v57 = vpop.f32.mrb[11].mxu0  ;;  %2414 = vmatmul.mubr.f32.gmra.mrb[116].mxu0 %v705_v43  ;;  %3218 = vmatprep.mubr.f32.mxu1 %v671_v45  ;;  %v716_v45 = vld [vmem:[%s4023_s15 + $0x10d8] sm:$0xff]  ;;  %v742_v52 = vld [vmem:[%s4023_s15 + $0x11a8] sm:$0xff] }
 0x279   : > { %2418 = vmatprep.mubr.f32.mxu0 %v715_v59  ;;  %v732_v12 = vld [vmem:[%s4023_s15 + $0x1158] sm:$0xff]  ;;  %v725_v59 = vld [vmem:[%s4023_s15 + $0x1120] sm:$0xff] }
 0x27a   : > { %v5177_v0 = vpop.f32.mrb[76].mxu1 }
 0x27b   : > { %v2155_v10 = vpop.f32.mrb[12].mxu0  ;;  %v1547_v11 = vpop.f32.mrb[77].mxu1  ;;  %3219 = vmatmul.mubr.f32.gmra.mrb[182].mxu1 %v680_v8 }
 0x27c   : > { %v5180_v15 = vadd.f32 %v2155_v10, %v1001_v5  ;;  %v2157_v17 = vpop.f32.mrb[13].mxu0  ;;  %2419 = vmatmul.mubr.f32.gmra.mrb[118].mxu0 %v714_v60  ;;  %3221 = vmatprep.mubr.f32.mxu1 %v689_v2  ;;  %v734_v5 = vld [vmem:[%s4023_s15 + $0x1168] sm:$0xff]  ;;  %v743_v10 = vld [vmem:[%s4023_s15 + $0x11b0] sm:$0xff] }
 0x27d   : > { %2423 = vmatprep.mubr.f32.mxu0 %v724_v4  ;;  %v741_v4 = vld [vmem:[%s4023_s15 + $0x11a0] sm:$0xff]  ;;  %v751_v17 = vld [vmem:[%s4023_s15 + $0x11f0] sm:$0xff] }
 0x27e   : > { %v5187_v13 = vpop.f32.mrb[78].mxu1 }
 0x27f   : > { %v2160_v20 = vpop.f32.mrb[14].mxu0  ;;  %v1552_v37 = vpop.f32.mrb[79].mxu1  ;;  %3222 = vmatmul.mubr.f32.gmra.mrb[184].mxu1 %v698_v18 }
 0x280   : > { %v5190_v30 = vadd.f32 %v2160_v20, %v1006_v26  ;;  %v2162_v43 = vpop.f32.mrb[15].mxu0  ;;  %2424 = vmatmul.mubr.f32.gmra.mrb[120].mxu0 %v723_v23  ;;  %3224 = vmatprep.mubr.f32.mxu1 %v707_v7  ;;  %v750_v20 = vld [vmem:[%s4023_s15 + $0x11e8] sm:$0xff]  ;;  %v1021_v37 = vadd.f32 %v5110_v63, %v4743_v51  ;;  %v1031_v51 = vadd.f32 %v5110_v63, %v4768_v6 }
 0x281   : > { %2428 = vmatprep.mubr.f32.mxu0 %v733_v44  ;;  %v752_v44 = vld [vmem:[%s4023_s15 + $0x11f8] sm:$0xff]  ;;  %v1041_v6 = vadd.f32 %v5110_v63, %v4792_v29  ;;  %v3521_v29 = vadd.f32 %v5110_v63, %v5014_v54  ;;  %v3525_v54 = vadd.f32 %v5110_v63, %v5026_v9  ;;  %v3529_v9 = vadd.f32 %v5110_v63, %v5038_v22  ;;  %s3021_s15 = sshll.u32 %s5614_s30, 3 }
 0x282   : > { %v5197_v48 = vpop.f32.mrb[80].mxu1  ;;  %v3533_v22 = vadd.f32 %v5110_v63, %v5050_v27  ;;  %v3537_v27 = vadd.f32 %v5110_v63, %v5062_v55  ;;  %v3541_v55 = vadd.f32 %v5110_v63, %v5074_v28  ;;  %v3545_v28 = vadd.f32 %v5110_v63, %v5086_v31  ;;  %s5355_s20 = scalar_lea.vmem %s5586_s3, %s3021_s15 }
 0x283   : > { %v2165_v57 = vpop.f32.mrb[16].mxu0  ;;  %v1557_v8 = vpop.f32.mrb[81].mxu1  ;;  %3225 = vmatmul.mubr.f32.gmra.mrb[186].mxu1 %v716_v45  ;;  %v3549_v31 = vadd.f32 %v5110_v63, %v5098_v49  ;;  %v3553_v49 = vadd.f32 %v5110_v63, %v5117_v3  ;;  %v3555_v3 = vadd.f32 %v5110_v63, %v5127_v24 }
 0x284   : > { %v5200_v60 = vadd.f32 %v2165_v57, %v1011_v33  ;;  %v2167_v2 = vpop.f32.mrb[17].mxu0  ;;  %2429 = vmatmul.mubr.f32.gmra.mrb[122].mxu0 %v732_v12  ;;  %3227 = vmatprep.mubr.f32.mxu1 %v725_v59  ;;  %v1026_v33 = vadd.f32 %v5110_v63, %v4754_v58  ;;  %v1036_v58 = vadd.f32 %v5110_v63, %v4780_v16 }
 0x285   : > { %2433 = vmatprep.mubr.f32.mxu0 %v742_v52  ;;  %v1046_v16 = vadd.f32 %v5110_v63, %v4804_v40  ;;  %v3523_v40 = vadd.f32 %v5110_v63, %v5020_v61  ;;  %v3527_v61 = vadd.f32 %v5110_v63, %v5032_v14  ;;  %v3531_v14 = vadd.f32 %v5110_v63, %v5044_v32 }
 0x286   : > { %v5207_v11 = vpop.f32.mrb[82].mxu1  ;;  %v3535_v32 = vadd.f32 %v5110_v63, %v5056_v34  ;;  %v3539_v34 = vadd.f32 %v5110_v63, %v5068_v1  ;;  %v3543_v1 = vadd.f32 %v5110_v63, %v5080_v21  ;;  %v3547_v21 = vadd.f32 %v5110_v63, %v5092_v42 }
 0x287   : > { %v2170_v18 = vpop.f32.mrb[18].mxu0  ;;  %v1562_v23 = vpop.f32.mrb[83].mxu1  ;;  %3228 = vmatmul.mubr.f32.gmra.mrb[188].mxu1 %v734_v5  ;;  %v3551_v42 = vadd.f32 %v5110_v63, %v5104_v50 }
 0x288   : > { %v5210_v7 = vadd.f32 %v2170_v18, %v1016_v39  ;;  %v2172_v26 = vpop.f32.mrb[19].mxu0  ;;  %2434 = vmatmul.mubr.f32.gmra.mrb[124].mxu0 %v741_v4  ;;  %3230 = vmatprep.mubr.f32.mxu1 %v743_v10 }
 0x289   : > { %2438 = vmatprep.mubr.f32.mxu0 %v751_v17 }
 0x28a   : > { %v5216_v43 = vpop.f32.mrb[84].mxu1 }
 0x28b   : > { %v2175_v46 = vpop.f32.mrb[20].mxu0  ;;  %v1567_v45 = vpop.f32.mrb[85].mxu1  ;;  %3231 = vmatmul.mubr.f32.gmra.mrb[190].mxu1 %v752_v44 }
 0x28c   : > { %v5218_v12 = vadd.f32 %v2175_v46, %v1021_v37  ;;  %v2177_v59 = vpop.f32.mrb[21].mxu0  ;;  %2439 = vmatmul.mubr.f32.gmra.mrb[126].mxu0 %v750_v20 }
 0x28e   : > { %v5222_v52 = vpop.f32.mrb[86].mxu1 }
 0x28f   : > { %v2180_v57 = vpop.f32.mrb[22].mxu0  ;;  %v1572_v8 = vpop.f32.mrb[87].mxu1 }
 0x290   : > { %v5224_v2 = vadd.f32 %v2180_v57, %v1026_v33  ;;  %v2182_v5 = vpop.f32.mrb[23].mxu0 }
 0x292   : > { %v5228_v4 = vpop.f32.mrb[88].mxu1 }
 0x293   : > { %v2185_v10 = vpop.f32.mrb[24].mxu0  ;;  %v1577_v39 = vpop.f32.mrb[89].mxu1 }
 0x294   : > { %v5230_v17 = vadd.f32 %v2185_v10, %v1031_v51  ;;  %v2187_v18 = vpop.f32.mrb[25].mxu0 }
 0x296   : > { %v5234_v23 = vpop.f32.mrb[90].mxu1 }
 0x297   : > { %v2190_v26 = vpop.f32.mrb[26].mxu0  ;;  %v1582_v44 = vpop.f32.mrb[91].mxu1 }
 0x298   : > { %v5236_v20 = vadd.f32 %v2190_v26, %v1036_v58  ;;  %v2192_v37 = vpop.f32.mrb[27].mxu0 }
 0x29a   : > { %v5240_v46 = vpop.f32.mrb[92].mxu1 }
 0x29b   : > { %v2195_v45 = vpop.f32.mrb[28].mxu0  ;;  %v1587_v59 = vpop.f32.mrb[93].mxu1 }
 0x29c   : > { %v5242_v33 = vadd.f32 %v2195_v45, %v1041_v6  ;;  %v2197_v57 = vpop.f32.mrb[29].mxu0 }
 0x29e   : > { %v5246_v8 = vpop.f32.mrb[94].mxu1 }
 0x29f   : > { %v2200_v5 = vpop.f32.mrb[30].mxu0  ;;  %v1592_v51 = vpop.f32.mrb[95].mxu1 }
 0x2a0   : > { %v5248_v10 = vadd.f32 %v2200_v5, %v1046_v16  ;;  %v2202_v39 = vpop.f32.mrb[31].mxu0 }
 0x2a2   : > { %v5252_v18 = vpop.f32.mrb[96].mxu1 }
 0x2a3   : > { %v2205_v58 = vpop.f32.mrb[32].mxu0  ;;  %v1597_v26 = vpop.f32.mrb[97].mxu1 }
 0x2a4   : > { %v5254_v44 = vadd.f32 %v3521_v29, %v2205_v58  ;;  %v2207_v37 = vpop.f32.mrb[33].mxu0 }
 0x2a6   : > { %v5258_v6 = vpop.f32.mrb[98].mxu1 }
 0x2a7   : > { %v2210_v45 = vpop.f32.mrb[34].mxu0  ;;  %v1602_v59 = vpop.f32.mrb[99].mxu1 }
 0x2a8   : > { %v5260_v57 = vadd.f32 %v3523_v40, %v2210_v45  ;;  %v2212_v16 = vpop.f32.mrb[35].mxu0 }
 0x2aa   : > { %v5264_v5 = vpop.f32.mrb[100].mxu1 }
 0x2ab   : > { %5587 = vst [vmem:[#allocation2_spill] sm:$0xff] %v5264_v5  ;;  %v2215_v51 = vpop.f32.mrb[36].mxu0  ;;  %v1607_v39 = vpop.f32.mrb[101].mxu1 }
 0x2ac   : > { %v5266_v29 = vadd.f32 %v3525_v54, %v2215_v51  ;;  %v2217_v58 = vpop.f32.mrb[37].mxu0 }
 0x2ae   : > { %v5270_v26 = vpop.f32.mrb[102].mxu1 }
 0x2af   : > { %5588 = vst [vmem:[#allocation3_spill] sm:$0xff] %v5270_v26  ;;  %v2220_v37 = vpop.f32.mrb[38].mxu0  ;;  %v1612_v59 = vpop.f32.mrb[103].mxu1 }
 0x2b0   : > { %v5272_v40 = vadd.f32 %v3527_v61, %v2220_v37  ;;  %v2222_v45 = vpop.f32.mrb[39].mxu0 }
 0x2b2   : > { %v5276_v16 = vpop.f32.mrb[104].mxu1 }
 0x2b3   : > { %5589 = vst [vmem:[#allocation4_spill] sm:$0xff] %v5276_v16  ;;  %v2225_v5 = vpop.f32.mrb[40].mxu0  ;;  %v1617_v39 = vpop.f32.mrb[105].mxu1 }
 0x2b4   : > { %v5278_v54 = vadd.f32 %v3529_v9, %v2225_v5  ;;  %v2227_v51 = vpop.f32.mrb[41].mxu0 }
 0x2b6   : > { %v5282_v58 = vpop.f32.mrb[106].mxu1 }
 0x2b7   : > { %5590 = vst [vmem:[#allocation5_spill] sm:$0xff] %v5282_v58  ;;  %v2230_v26 = vpop.f32.mrb[42].mxu0  ;;  %v1622_v59 = vpop.f32.mrb[107].mxu1 }
 0x2b8   : > { %v5284_v61 = vadd.f32 %v3531_v14, %v2230_v26  ;;  %v2232_v37 = vpop.f32.mrb[43].mxu0 }
 0x2ba   : > { %v5288_v45 = vpop.f32.mrb[108].mxu1 }
 0x2bb   : > { %5591 = vst [vmem:[#allocation6_spill] sm:$0xff] %v5288_v45  ;;  %v2235_v16 = vpop.f32.mrb[44].mxu0  ;;  %v1627_v39 = vpop.f32.mrb[109].mxu1 }
 0x2bc   : > { %v5290_v5 = vadd.f32 %v3533_v22, %v2235_v16  ;;  %v2237_v9 = vpop.f32.mrb[45].mxu0 }
 0x2be   : > { %v5294_v51 = vpop.f32.mrb[110].mxu1 }
 0x2bf   : > { %5592 = vst [vmem:[#allocation7_spill] sm:$0xff] %v5294_v51  ;;  %v2240_v58 = vpop.f32.mrb[46].mxu0  ;;  %v1632_v59 = vpop.f32.mrb[111].mxu1 }
 0x2c0   : > { %v5296_v26 = vadd.f32 %v3535_v32, %v2240_v58  ;;  %v2242_v14 = vpop.f32.mrb[47].mxu0 }
 0x2c2   : > { %v5300_v37 = vpop.f32.mrb[112].mxu1 }
 0x2c3   : > { %5593 = vst [vmem:[#allocation8_spill] sm:$0xff] %v5300_v37  ;;  %v2245_v45 = vpop.f32.mrb[48].mxu0  ;;  %v1637_v39 = vpop.f32.mrb[113].mxu1 }
 0x2c4   : > { %v5302_v16 = vadd.f32 %v3537_v27, %v2245_v45  ;;  %v2247_v22 = vpop.f32.mrb[49].mxu0 }
 0x2c6   : > { %v5306_v9 = vpop.f32.mrb[114].mxu1 }
 0x2c7   : > { %5594 = vst [vmem:[#allocation9_spill] sm:$0xff] %v5306_v9  ;;  %v2250_v51 = vpop.f32.mrb[50].mxu0  ;;  %v1642_v59 = vpop.f32.mrb[115].mxu1 }
 0x2c8   : > { %v5308_v58 = vadd.f32 %v3539_v34, %v2250_v51  ;;  %v2252_v32 = vpop.f32.mrb[51].mxu0 }
 0x2ca   : > { %v5312_v14 = vpop.f32.mrb[116].mxu1 }
 0x2cb   : > { %5595 = vst [vmem:[#allocation10_spill] sm:$0xff] %v5312_v14  ;;  %v2255_v37 = vpop.f32.mrb[52].mxu0  ;;  %v1647_v39 = vpop.f32.mrb[117].mxu1 }
 0x2cc   : > { %v5314_v45 = vadd.f32 %v3541_v55, %v2255_v37  ;;  %v2257_v27 = vpop.f32.mrb[53].mxu0 }
 0x2ce   : > { %v5318_v22 = vpop.f32.mrb[118].mxu1 }
 0x2cf   : > { %5596 = vst [vmem:[#allocation11_spill] sm:$0xff] %v5318_v22  ;;  %v2260_v9 = vpop.f32.mrb[54].mxu0  ;;  %v1652_v59 = vpop.f32.mrb[119].mxu1 }
 0x2d0   : > { %v5320_v51 = vadd.f32 %v3543_v1, %v2260_v9  ;;  %v2262_v34 = vpop.f32.mrb[55].mxu0 }
 0x2d2   : > { %v5324_v32 = vpop.f32.mrb[120].mxu1 }
 0x2d3   : > { %5597 = vst [vmem:[#allocation12_spill] sm:$0xff] %v5324_v32  ;;  %v2265_v14 = vpop.f32.mrb[56].mxu0  ;;  %v1657_v39 = vpop.f32.mrb[121].mxu1 }
 0x2d4   : > { %v5326_v37 = vadd.f32 %v3545_v28, %v2265_v14  ;;  %v2267_v55 = vpop.f32.mrb[57].mxu0 }
 0x2d6   : > { %v5330_v27 = vpop.f32.mrb[122].mxu1 }
 0x2d7   : > { %5598 = vst [vmem:[#allocation13_spill] sm:$0xff] %v5330_v27  ;;  %v2270_v22 = vpop.f32.mrb[58].mxu0  ;;  %v1662_v9 = vpop.f32.mrb[123].mxu1 }
 0x2d8   : > { %v5332_v1 = vadd.f32 %v3547_v21, %v2270_v22  ;;  %v2272_v59 = vpop.f32.mrb[59].mxu0 }
 0x2da   : > { %v5336_v34 = vpop.f32.mrb[124].mxu1 }
 0x2db   : > { %5599 = vst [vmem:[#allocation14_spill] sm:$0xff] %v5336_v34  ;;  %v2275_v39 = vpop.f32.mrb[60].mxu0  ;;  %v1667_v14 = vpop.f32.mrb[125].mxu1 }
 0x2dc   : > { %v5338_v28 = vadd.f32 %v3549_v31, %v2275_v39  ;;  %v2277_v55 = vpop.f32.mrb[61].mxu0 }
 0x2de   : > { %v5342_v27 = vpop.f32.mrb[126].mxu1 }
 0x2df   : > { %v2280_v32 = vpop.f32.mrb[62].mxu0  ;;  %v1672_v9 = vpop.f32.mrb[127].mxu1 }
 0x2e0   : > { %v5344_v22 = vadd.f32 %v3551_v42, %v2280_v32  ;;  %v2282_v21 = vpop.f32.mrb[63].mxu0 }
 0x2e2   : > { %v3139_v59 = vpop.f32.mrb[128].mxu1 }
 0x2e3   : > { %v2285_v34 = vpop.f32.mrb[64].mxu0  ;;  %v2516_v31 = vadd.f32 %v5130_v38, %v3139_v59  ;;  %v2510_v39 = vpop.f32.mrb[129].mxu1 }
 0x2e4   : > { %v5350_v14 = vadd.f32 %v3553_v49, %v2285_v34  ;;  %v2287_v50 = vpop.f32.mrb[65].mxu0  ;;  %v2511_v32 = vadd.f32 %v5120_v19, %v2510_v39 }
 0x2e5   : > { %v2830_v55 = vmax.f32 %v2516_v31, 0.0  ;;  %v3557_v31 = vadd.f32 %v5110_v63, %v5137_v47 }
 0x2e6   : > { %v2829_v42 = vmax.f32 %v2511_v32, 0.0  ;;  %v3142_v38 = vpop.f32.mrb[130].mxu1 }
 0x2e7   : > { %2894 = vst [vmem:[%s5355_s20 + $0x8] sm:$0xff] %v2830_v55  ;;  %v2290_v34 = vpop.f32.mrb[66].mxu0  ;;  %v2526_v9 = vadd.f32 %v5150_v62, %v3142_v38  ;;  %v2520_v21 = vpop.f32.mrb[131].mxu1 }
 0x2e8   : > { %2893 = vst [vmem:[%s5355_s20] sm:$0xff] %v2829_v42  ;;  %v5363_v49 = vadd.f32 %v3555_v3, %v2290_v34  ;;  %v2292_v59 = vpop.f32.mrb[67].mxu0  ;;  %v2521_v50 = vadd.f32 %v5140_v41, %v2520_v21  ;;  %v3559_v34 = vadd.f32 %v5110_v63, %v5147_v56 }
 0x2e9   : > { %v2832_v19 = vmax.f32 %v2526_v9, 0.0 }
 0x2ea   : > { %v2831_v24 = vmax.f32 %v2521_v50, 0.0  ;;  %v3145_v39 = vpop.f32.mrb[132].mxu1 }
 0x2eb   : > { %2896 = vst [vmem:[%s5355_s20 + $0x18] sm:$0xff] %v2832_v19  ;;  %v2295_v32 = vpop.f32.mrb[68].mxu0  ;;  %v2536_v55 = vadd.f32 %v5170_v53, %v3145_v39  ;;  %v2530_v62 = vpop.f32.mrb[133].mxu1 }
 0x2ec   : > { %2895 = vst [vmem:[%s5355_s20 + $0x10] sm:$0xff] %v2831_v24  ;;  %v5371_v42 = vadd.f32 %v3557_v31, %v2295_v32  ;;  %v2297_v3 = vpop.f32.mrb[69].mxu0  ;;  %v2531_v38 = vadd.f32 %v5160_v35, %v2530_v62  ;;  %v3561_v24 = vadd.f32 %v5110_v63, %v5157_v25 }
 0x2ed   : > { %v2834_v41 = vmax.f32 %v2536_v55, 0.0 }
 0x2ee   : > { %v2833_v47 = vmax.f32 %v2531_v38, 0.0  ;;  %v3148_v9 = vpop.f32.mrb[134].mxu1 }
 0x2ef   : > { %2898 = vst [vmem:[%s5355_s20 + $0x28] sm:$0xff] %v2834_v41  ;;  %v2300_v21 = vpop.f32.mrb[70].mxu0  ;;  %v2546_v59 = vadd.f32 %v5190_v30, %v3148_v9  ;;  %v2540_v53 = vpop.f32.mrb[135].mxu1  ;;  %v3563_v41 = vadd.f32 %v5110_v63, %v5167_v36 }
 0x2f0   : > { %2897 = vst [vmem:[%s5355_s20 + $0x20] sm:$0xff] %v2833_v47  ;;  %v5379_v50 = vadd.f32 %v3559_v34, %v2300_v21  ;;  %v2302_v19 = vpop.f32.mrb[71].mxu0  ;;  %v2541_v31 = vadd.f32 %v5180_v15, %v2540_v53 }
 0x2f1   : > { %v2836_v35 = vmax.f32 %v2546_v59, 0.0  ;;  %v3565_v19 = vadd.f32 %v5110_v63, %v5177_v0 }
 0x2f2   : > { %v2835_v56 = vmax.f32 %v2541_v31, 0.0  ;;  %v3151_v39 = vpop.f32.mrb[136].mxu1 }
 0x2f3   : > { %2900 = vst [vmem:[%s5355_s20 + $0x38] sm:$0xff] %v2836_v35  ;;  %v2305_v32 = vpop.f32.mrb[72].mxu0  ;;  %v2556_v55 = vadd.f32 %v5210_v7, %v3151_v39  ;;  %v2550_v30 = vpop.f32.mrb[137].mxu1 }
 0x2f4   : > { %2899 = vst [vmem:[%s5355_s20 + $0x30] sm:$0xff] %v2835_v56  ;;  %v5387_v62 = vadd.f32 %v3561_v24, %v2305_v32  ;;  %v2307_v3 = vpop.f32.mrb[73].mxu0  ;;  %v2551_v38 = vadd.f32 %v5200_v60, %v2550_v30 }
 0x2f5   : > { %v2838_v15 = vmax.f32 %v2556_v55, 0.0  ;;  %v3567_v55 = vadd.f32 %v5110_v63, %v5187_v13 }
 0x2f6   : > { %v2837_v25 = vmax.f32 %v2551_v38, 0.0  ;;  %v3154_v34 = vpop.f32.mrb[138].mxu1 }
 0x2f7   : > { %2902 = vst [vmem:[%s5355_s20 + $0x48] sm:$0xff] %v2838_v15  ;;  %v2310_v47 = vpop.f32.mrb[74].mxu0  ;;  %v2566_v9 = vadd.f32 %v5224_v2, %v3154_v34  ;;  %v2560_v7 = vpop.f32.mrb[139].mxu1  ;;  %v3569_v34 = vadd.f32 %v5110_v63, %v5197_v48 }
 0x2f8   : > { %2901 = vst [vmem:[%s5355_s20 + $0x40] sm:$0xff] %v2837_v25  ;;  %v5395_v21 = vadd.f32 %v3563_v41, %v2310_v47  ;;  %v2312_v59 = vpop.f32.mrb[75].mxu0  ;;  %v2561_v53 = vadd.f32 %v5218_v12, %v2560_v7 }
 0x2f9   : > { %v2840_v60 = vmax.f32 %v2566_v9, 0.0 }
 0x2fa   : > { %v2839_v36 = vmax.f32 %v2561_v53, 0.0  ;;  %v3157_v31 = vpop.f32.mrb[140].mxu1 }
 0x2fb   : > { %2904 = vst [vmem:[%s5355_s20 + $0x58] sm:$0xff] %v2840_v60  ;;  %v2315_v35 = vpop.f32.mrb[76].mxu0  ;;  %v2576_v24 = vadd.f32 %v5236_v20, %v3157_v31  ;;  %v2570_v2 = vpop.f32.mrb[141].mxu1 }
 0x2fc   : > { %2903 = vst [vmem:[%s5355_s20 + $0x50] sm:$0xff] %v2839_v36  ;;  %v5403_v56 = vadd.f32 %v3565_v19, %v2315_v35  ;;  %v2317_v39 = vpop.f32.mrb[77].mxu0  ;;  %v2571_v32 = vadd.f32 %v5230_v17, %v2570_v2  ;;  %v3571_v19 = vadd.f32 %v5110_v63, %v5207_v11 }
 0x2fd   : > { %v2842_v12 = vmax.f32 %v2576_v24, 0.0 }
 0x2fe   : > { %v2841_v0 = vmax.f32 %v2571_v32, 0.0  ;;  %v3160_v30 = vpop.f32.mrb[142].mxu1  ;;  %v3573_v32 = vadd.f32 %v5110_v63, %v5216_v43 }
 0x2ff   : > { %2906 = vst [vmem:[%s5355_s20 + $0x68] sm:$0xff] %v2842_v12  ;;  %v2320_v3 = vpop.f32.mrb[78].mxu0  ;;  %v2586_v38 = vadd.f32 %v5248_v10, %v3160_v30  ;;  %v2580_v20 = vpop.f32.mrb[143].mxu1 }
 0x300   : > { %2905 = vst [vmem:[%s5355_s20 + $0x60] sm:$0xff] %v2841_v0  ;;  %v5411_v15 = vadd.f32 %v3567_v55, %v2320_v3  ;;  %v2322_v41 = vpop.f32.mrb[79].mxu0  ;;  %v2581_v25 = vadd.f32 %v5242_v33, %v2580_v20  ;;  %v3575_v20 = vadd.f32 %v5110_v63, %v5222_v52 }
 0x301   : > { %v2844_v17 = vmax.f32 %v2586_v38, 0.0 }
 0x302   : > { %v2843_v13 = vmax.f32 %v2581_v25, 0.0  ;;  %v3163_v47 = vpop.f32.mrb[144].mxu1 }
 0x303   : > { %2908 = vst [vmem:[%s5355_s20 + $0x78] sm:$0xff] %v2844_v17  ;;  %v2325_v9 = vpop.f32.mrb[80].mxu0  ;;  %v2596_v7 = vadd.f32 %v5260_v57, %v3163_v47  ;;  %v2590_v10 = vpop.f32.mrb[145].mxu1 }
 0x304   : > { %2907 = vst [vmem:[%s5355_s20 + $0x70] sm:$0xff] %v2843_v13  ;;  %v5419_v59 = vadd.f32 %v3569_v34, %v2325_v9  ;;  %v2327_v53 = vpop.f32.mrb[81].mxu0  ;;  %v2591_v60 = vadd.f32 %v5254_v44, %v2590_v10  ;;  %v3577_v9 = vadd.f32 %v5110_v63, %v5228_v4 }
 0x305   : > { %v2846_v33 = vmax.f32 %v2596_v7, 0.0 }
 0x306   : > { %v2845_v48 = vmax.f32 %v2591_v60, 0.0  ;;  %v3166_v36 = vpop.f32.mrb[146].mxu1 }
 0x307   : > { %2910 = vst [vmem:[%s5355_s20 + $0x88] sm:$0xff] %v2846_v33  ;;  %v2330_v31 = vpop.f32.mrb[82].mxu0  ;;  %v2606_v35 = vadd.f32 %v5272_v40, %v3166_v36  ;;  %v2600_v57 = vpop.f32.mrb[147].mxu1 }
 0x308   : > { %2909 = vst [vmem:[%s5355_s20 + $0x80] sm:$0xff] %v2845_v48  ;;  %v5427_v24 = vadd.f32 %v3571_v19, %v2330_v31  ;;  %v2332_v2 = vpop.f32.mrb[83].mxu0  ;;  %v2601_v39 = vadd.f32 %v5266_v29, %v2600_v57  ;;  %v3579_v48 = vadd.f32 %v5110_v63, %v5234_v23 }
 0x309   : > { %v2848_v44 = vmax.f32 %v2606_v35, 0.0 }
 0x30a   : > { %v2847_v11 = vmax.f32 %v2601_v39, 0.0  ;;  %v3169_v12 = vpop.f32.mrb[148].mxu1 }
 0x30b   : > { %2912 = vst [vmem:[%s5355_s20 + $0x98] sm:$0xff] %v2848_v44  ;;  %v2335_v55 = vpop.f32.mrb[84].mxu0  ;;  %v2616_v0 = vadd.f32 %v5284_v61, %v3169_v12  ;;  %v2610_v40 = vpop.f32.mrb[149].mxu1  ;;  %v3581_v44 = vadd.f32 %v5110_v63, %v5240_v46 }
 0x30c   : > { %2911 = vst [vmem:[%s5355_s20 + $0x90] sm:$0xff] %v2847_v11  ;;  %v5435_v30 = vadd.f32 %v3573_v32, %v2335_v55  ;;  %v2337_v3 = vpop.f32.mrb[85].mxu0  ;;  %v2611_v38 = vadd.f32 %v5278_v54, %v2610_v40 }
 0x30d   : > { %v2850_v29 = vmax.f32 %v2616_v0, 0.0  ;;  %v3583_v3 = vadd.f32 %v5110_v63, %v5246_v8 }
 0x30e   : > { %v2849_v43 = vmax.f32 %v2611_v38, 0.0  ;;  %v3172_v41 = vpop.f32.mrb[150].mxu1 }
 0x30f   : > { %2914 = vst [vmem:[%s5355_s20 + $0xa8] sm:$0xff] %v2850_v29  ;;  %v2340_v25 = vpop.f32.mrb[86].mxu0  ;;  %v2626_v17 = vadd.f32 %v5296_v26, %v3172_v41  ;;  %v2620_v61 = vpop.f32.mrb[151].mxu1 }
 0x310   : > { %2913 = vst [vmem:[%s5355_s20 + $0xa0] sm:$0xff] %v2849_v43  ;;  %v5443_v34 = vadd.f32 %v3575_v20, %v2340_v25  ;;  %v2342_v13 = vpop.f32.mrb[87].mxu0  ;;  %v2621_v47 = vadd.f32 %v5290_v5, %v2620_v61 }
 0x311   : > { %v2852_v54 = vmax.f32 %v2626_v17, 0.0  ;;  %v3585_v17 = vadd.f32 %v5110_v63, %v5252_v18 }
 0x312   : > { %v2851_v52 = vmax.f32 %v2621_v47, 0.0  ;;  %v3175_v7 = vpop.f32.mrb[152].mxu1 }
 0x313   : > { %2916 = vst [vmem:[%s5355_s20 + $0xb8] sm:$0xff] %v2852_v54  ;;  %v2345_v10 = vpop.f32.mrb[88].mxu0  ;;  %v2636_v53 = vadd.f32 %v5308_v58, %v3175_v7  ;;  %v2630_v26 = vpop.f32.mrb[153].mxu1  ;;  %v3587_v7 = vadd.f32 %v5110_v63, %v5258_v6 }
 0x314   : > { %2915 = vst [vmem:[%s5355_s20 + $0xb0] sm:$0xff] %v2851_v52  ;;  %v5451_v60 = vadd.f32 %v3577_v9, %v2345_v10  ;;  %v2347_v33 = vpop.f32.mrb[89].mxu0  ;;  %v2631_v19 = vadd.f32 %v5302_v16, %v2630_v26 }
 0x315   : > { %v2854_v5 = vmax.f32 %v2636_v53, 0.0 }
 0x316   : > { %v2853_v4 = vmax.f32 %v2631_v19, 0.0  ;;  %v3178_v36 = vpop.f32.mrb[154].mxu1 }
 0x317   : > { %2918 = vst [vmem:[%s5355_s20 + $0xc8] sm:$0xff] %v2854_v5  ;;  %v2350_v31 = vpop.f32.mrb[90].mxu0  ;;  %v2646_v35 = vadd.f32 %v5320_v51, %v3178_v36  ;;  %v2640_v58 = vpop.f32.mrb[155].mxu1 }
 0x318   : > { %2917 = vst [vmem:[%s5355_s20 + $0xc0] sm:$0xff] %v2853_v4  ;;  %v5459_v57 = vadd.f32 %v3579_v48, %v2350_v31  ;;  %v2352_v2 = vpop.f32.mrb[91].mxu0  ;;  %v2641_v39 = vadd.f32 %v5314_v45, %v2640_v58  ;;  %v5600_v48 = vld [vmem:[#allocation2_spill] sm:$0xff] }
 0x319   : > { %v2856_v16 = vmax.f32 %v2646_v35, 0.0  ;;  %v3589_v4 = vadd.f32 %v5110_v63, %v5600_v48 }
 0x31a   : > { %v2855_v23 = vmax.f32 %v2641_v39, 0.0  ;;  %v3181_v32 = vpop.f32.mrb[156].mxu1 }
 0x31b   : > { %2920 = vst [vmem:[%s5355_s20 + $0xd8] sm:$0xff] %v2856_v16  ;;  %v2355_v11 = vpop.f32.mrb[92].mxu0  ;;  %v2656_v12 = vadd.f32 %v5332_v1, %v3181_v32  ;;  %v2650_v51 = vpop.f32.mrb[157].mxu1  ;;  %v5601_v16 = vld [vmem:[#allocation3_spill] sm:$0xff] }
 0x31c   : > { %2919 = vst [vmem:[%s5355_s20 + $0xd0] sm:$0xff] %v2855_v23  ;;  %v5467_v55 = vadd.f32 %v3581_v44, %v2355_v11  ;;  %v2357_v0 = vpop.f32.mrb[93].mxu0  ;;  %v2651_v40 = vadd.f32 %v5326_v37, %v2650_v51  ;;  %v3591_v44 = vadd.f32 %v5110_v63, %v5601_v16  ;;  %v5513_v63 = vld [vmem:[%s5585_s2] ss:$0 sm:$0xff] }
 0x31d   : > { %v2858_v45 = vmax.f32 %v2656_v12, 0.0 }
 0x31e   : > { %v2857_v46 = vmax.f32 %v2651_v40, 0.0  ;;  %v3184_v38 = vpop.f32.mrb[158].mxu1 }
 0x31f   : > { %2922 = vst [vmem:[%s5355_s20 + $0xe8] sm:$0xff] %v2858_v45  ;;  %v2360_v29 = vpop.f32.mrb[94].mxu0  ;;  %v2666_v20 = vadd.f32 %v5344_v22, %v3184_v38  ;;  %v2660_v1 = vpop.f32.mrb[159].mxu1  ;;  %v5602_v45 = vld [vmem:[#allocation4_spill] sm:$0xff] }
 0x320   : > { %2921 = vst [vmem:[%s5355_s20 + $0xe0] sm:$0xff] %v2857_v46  ;;  %v5475_v43 = vadd.f32 %v3583_v3, %v2360_v29  ;;  %v2362_v41 = vpop.f32.mrb[95].mxu0  ;;  %v2661_v25 = vadd.f32 %v5338_v28, %v2660_v1  ;;  %v3593_v3 = vadd.f32 %v5513_v63, %v5602_v45 }
 0x321   : > { %v2860_v37 = vmax.f32 %v2666_v20, 0.0 }
 0x322   : > { %v2859_v8 = vmax.f32 %v2661_v25, 0.0  ;;  %v3187_v61 = vpop.f32.mrb[160].mxu1 }
 0x323   : > { %2924 = vst [vmem:[%s5355_s20 + $0xf8] sm:$0xff] %v2860_v37  ;;  %v2365_v13 = vpop.f32.mrb[96].mxu0  ;;  %v2676_v47 = vadd.f32 %v5363_v49, %v3187_v61  ;;  %v2670_v22 = vpop.f32.mrb[161].mxu1  ;;  %v5603_v37 = vld [vmem:[#allocation5_spill] sm:$0xff] }
 0x324   : > { %2923 = vst [vmem:[%s5355_s20 + $0xf0] sm:$0xff] %v2859_v8  ;;  %v5483_v54 = vadd.f32 %v3585_v17, %v2365_v13  ;;  %v2367_v9 = vpop.f32.mrb[97].mxu0  ;;  %v2671_v52 = vadd.f32 %v5350_v14, %v2670_v22  ;;  %v3595_v17 = vadd.f32 %v5513_v63, %v5603_v37 }
 0x325   : > { %v2862_v28 = vmax.f32 %v2676_v47, 0.0 }
 0x326   : > { %v2861_v18 = vmax.f32 %v2671_v52, 0.0  ;;  %v3190_v10 = vpop.f32.mrb[162].mxu1 }
 0x327   : > { %2926 = vst [vmem:[%s5355_s20 + $0x108] sm:$0xff] %v2862_v28  ;;  %v2370_v53 = vpop.f32.mrb[98].mxu0  ;;  %v2686_v26 = vadd.f32 %v5379_v50, %v3190_v10  ;;  %v2680_v49 = vpop.f32.mrb[163].mxu1 }
 0x328   : > { %2925 = vst [vmem:[%s5355_s20 + $0x100] sm:$0xff] %v2861_v18  ;;  %v5491_v33 = vadd.f32 %v3587_v7, %v2370_v53  ;;  %v2372_v19 = vpop.f32.mrb[99].mxu0  ;;  %v2681_v5 = vadd.f32 %v5371_v42, %v2680_v49 }
 0x329   : > { %v2864_v14 = vmax.f32 %v2686_v26, 0.0 }
 0x32a   : > { %v2863_v6 = vmax.f32 %v2681_v5, 0.0  ;;  %v3193_v36 = vpop.f32.mrb[164].mxu1 }
 0x32b   : > { %2928 = vst [vmem:[%s5355_s20 + $0x118] sm:$0xff] %v2864_v14  ;;  %v2375_v31 = vpop.f32.mrb[100].mxu0  ;;  %v2696_v35 = vadd.f32 %v5395_v21, %v3193_v36  ;;  %v2690_v50 = vpop.f32.mrb[165].mxu1 }
 0x32c   : > { %2927 = vst [vmem:[%s5355_s20 + $0x110] sm:$0xff] %v2863_v6  ;;  %v5499_v58 = vadd.f32 %v3589_v4, %v2375_v31  ;;  %v2377_v2 = vpop.f32.mrb[101].mxu0  ;;  %v2691_v39 = vadd.f32 %v5387_v62, %v2690_v50 }
 0x32d   : > { %v2866_v42 = vmax.f32 %v2696_v35, 0.0 }
 0x32e   : > { %v2865_v23 = vmax.f32 %v2691_v39, 0.0  ;;  %v3196_v32 = vpop.f32.mrb[166].mxu1 }
 0x32f   : > { %2930 = vst [vmem:[%s5355_s20 + $0x128] sm:$0xff] %v2866_v42  ;;  %v2380_v11 = vpop.f32.mrb[102].mxu0  ;;  %v2706_v12 = vadd.f32 %v5411_v15, %v3196_v32  ;;  %v2700_v21 = vpop.f32.mrb[167].mxu1 }
 0x330   : > { %2929 = vst [vmem:[%s5355_s20 + $0x120] sm:$0xff] %v2865_v23  ;;  %v5507_v51 = vadd.f32 %v3591_v44, %v2380_v11  ;;  %v2382_v0 = vpop.f32.mrb[103].mxu0  ;;  %v2701_v40 = vadd.f32 %v5403_v56, %v2700_v21 }
 0x331   : > { %v2868_v62 = vmax.f32 %v2706_v12, 0.0 }
 0x332   : > { %v2867_v46 = vmax.f32 %v2701_v40, 0.0  ;;  %v3199_v38 = vpop.f32.mrb[168].mxu1 }
 0x333   : > { %2932 = vst [vmem:[%s5355_s20 + $0x138] sm:$0xff] %v2868_v62  ;;  %v2385_v15 = vpop.f32.mrb[104].mxu0  ;;  %v2716_v29 = vadd.f32 %v5427_v24, %v3199_v38  ;;  %v2710_v20 = vpop.f32.mrb[169].mxu1 }
 0x334   : > { %2931 = vst [vmem:[%s5355_s20 + $0x130] sm:$0xff] %v2867_v46  ;;  %v5520_v56 = vadd.f32 %v3593_v3, %v2385_v15  ;;  %v2387_v1 = vpop.f32.mrb[105].mxu0  ;;  %v2711_v41 = vadd.f32 %v5419_v59, %v2710_v20  ;;  %v5604_v59 = vld [vmem:[#allocation6_spill] sm:$0xff] }
 0x335   : > { %v2870_v25 = vmax.f32 %v2716_v29, 0.0  ;;  %v3597_v7 = vadd.f32 %v5513_v63, %v5604_v59 }
 0x336   : > { %v2869_v8 = vmax.f32 %v2711_v41, 0.0  ;;  %v3202_v61 = vpop.f32.mrb[170].mxu1 }
 0x337   : > { %2934 = vst [vmem:[%s5355_s20 + $0x148] sm:$0xff] %v2870_v25  ;;  %v2390_v13 = vpop.f32.mrb[106].mxu0  ;;  %v2726_v47 = vadd.f32 %v5443_v34, %v3202_v61  ;;  %v2720_v24 = vpop.f32.mrb[171].mxu1 }
 0x338   : > { %2933 = vst [vmem:[%s5355_s20 + $0x140] sm:$0xff] %v2869_v8  ;;  %v3596_v22 = vadd.f32 %v3595_v17, %v2390_v13  ;;  %v2392_v9 = vpop.f32.mrb[107].mxu0  ;;  %v2721_v52 = vadd.f32 %v5435_v30, %v2720_v24  ;;  %v5605_v30 = vld [vmem:[#allocation7_spill] sm:$0xff] }
 0x339   : > { %v2872_v28 = vmax.f32 %v2726_v47, 0.0  ;;  %v3599_v48 = vadd.f32 %v5513_v63, %v5605_v30  ;;  %v5609_v24 = vld [vmem:[#allocation11_spill] sm:$0xff] }
 0x33a   : > { %v2871_v18 = vmax.f32 %v2721_v52, 0.0  ;;  %v3205_v10 = vpop.f32.mrb[172].mxu1 }
 0x33b   : > { %2936 = vst [vmem:[%s5355_s20 + $0x158] sm:$0xff] %v2872_v28  ;;  %v2395_v53 = vpop.f32.mrb[108].mxu0  ;;  %v2736_v26 = vadd.f32 %v5459_v57, %v3205_v10  ;;  %v2730_v49 = vpop.f32.mrb[173].mxu1 }
 0x33c   : > { %2935 = vst [vmem:[%s5355_s20 + $0x150] sm:$0xff] %v2871_v18  ;;  %v3598_v34 = vadd.f32 %v3597_v7, %v2395_v53  ;;  %v2397_v19 = vpop.f32.mrb[109].mxu0  ;;  %v2731_v5 = vadd.f32 %v5451_v60, %v2730_v49  ;;  %v5606_v60 = vld [vmem:[#allocation8_spill] sm:$0xff] }
 0x33d   : > { %v2874_v14 = vmax.f32 %v2736_v26, 0.0  ;;  %v3601_v42 = vadd.f32 %v5513_v63, %v5606_v60  ;;  %v5610_v26 = vld [vmem:[#allocation12_spill] sm:$0xff] }
 0x33e   : > { %v2873_v4 = vmax.f32 %v2731_v5, 0.0  ;;  %v3208_v6 = vpop.f32.mrb[174].mxu1 }
 0x33f   : > { %2938 = vst [vmem:[%s5355_s20 + $0x168] sm:$0xff] %v2874_v14  ;;  %v2400_v36 = vpop.f32.mrb[110].mxu0  ;;  %v2746_v31 = vadd.f32 %v5475_v43, %v3208_v6  ;;  %v2740_v35 = vpop.f32.mrb[175].mxu1 }
 0x340   : > { %2937 = vst [vmem:[%s5355_s20 + $0x160] sm:$0xff] %v2873_v4  ;;  %v3600_v57 = vadd.f32 %v3599_v48, %v2400_v36  ;;  %v2402_v50 = vpop.f32.mrb[111].mxu0  ;;  %v2741_v2 = vadd.f32 %v5467_v55, %v2740_v35  ;;  %v5607_v55 = vld [vmem:[#allocation9_spill] sm:$0xff] }
 0x341   : > { %v2876_v39 = vmax.f32 %v2746_v31, 0.0  ;;  %v3603_v40 = vadd.f32 %v5513_v63, %v5607_v55  ;;  %v5611_v31 = vld [vmem:[#allocation13_spill] sm:$0xff] }
 0x342   : > { %v2875_v16 = vmax.f32 %v2741_v2, 0.0  ;;  %v3211_v44 = vpop.f32.mrb[176].mxu1 }
 0x343   : > { %2940 = vst [vmem:[%s5355_s20 + $0x178] sm:$0xff] %v2876_v39  ;;  %v2405_v23 = vpop.f32.mrb[112].mxu0  ;;  %v2756_v32 = vadd.f32 %v5491_v33, %v3211_v44  ;;  %v2750_v11 = vpop.f32.mrb[177].mxu1 }
 0x344   : > { %2939 = vst [vmem:[%s5355_s20 + $0x170] sm:$0xff] %v2875_v16  ;;  %v3602_v43 = vadd.f32 %v3601_v42, %v2405_v23  ;;  %v2407_v12 = vpop.f32.mrb[113].mxu0  ;;  %v2751_v21 = vadd.f32 %v5483_v54, %v2750_v11  ;;  %v5608_v54 = vld [vmem:[#allocation10_spill] sm:$0xff] }
 0x345   : > { %v2878_v0 = vmax.f32 %v2756_v32, 0.0  ;;  %v3605_v1 = vadd.f32 %v5513_v63, %v5608_v54  ;;  %v5612_v23 = vld [vmem:[#allocation14_spill] sm:$0xff] }
 0x346   : > { %v2877_v62 = vmax.f32 %v2751_v21, 0.0  ;;  %v3214_v45 = vpop.f32.mrb[178].mxu1  ;;  %v3613_v32 = vadd.f32 %v5513_v63, %v5612_v23 }
 0x347   : > { %2942 = vst [vmem:[%s5355_s20 + $0x188] sm:$0xff] %v2878_v0  ;;  %v2410_v3 = vpop.f32.mrb[114].mxu0  ;;  %v2766_v46 = vadd.f32 %v5507_v51, %v3214_v45  ;;  %v2760_v38 = vpop.f32.mrb[179].mxu1 }
 0x348   : > { %2941 = vst [vmem:[%s5355_s20 + $0x180] sm:$0xff] %v2877_v62  ;;  %v3604_v33 = vadd.f32 %v3603_v40, %v2410_v3  ;;  %v2412_v15 = vpop.f32.mrb[115].mxu0  ;;  %v2761_v29 = vadd.f32 %v5499_v58, %v2760_v38  ;;  %v3607_v58 = vadd.f32 %v5513_v63, %v5609_v24  ;;  %v3615_v3 = vadd.f32 %v5513_v63, %v5342_v27 }
 0x349   : > { %v2880_v20 = vmax.f32 %v2766_v46, 0.0 }
 0x34a   : > { %v2879_v41 = vmax.f32 %v2761_v29, 0.0  ;;  %v3217_v25 = vpop.f32.mrb[180].mxu1 }
 0x34b   : > { %2944 = vst [vmem:[%s5355_s20 + $0x198] sm:$0xff] %v2880_v20  ;;  %v2415_v37 = vpop.f32.mrb[116].mxu0  ;;  %v2776_v17 = vadd.f32 %v3596_v22, %v3217_v25  ;;  %v2770_v8 = vpop.f32.mrb[181].mxu1 }
 0x34c   : > { %2943 = vst [vmem:[%s5355_s20 + $0x190] sm:$0xff] %v2879_v41  ;;  %v3606_v51 = vadd.f32 %v3605_v1, %v2415_v37  ;;  %v2417_v61 = vpop.f32.mrb[117].mxu0  ;;  %v2771_v13 = vadd.f32 %v5520_v56, %v2770_v8  ;;  %v3609_v56 = vadd.f32 %v5513_v63, %v5610_v26 }
 0x34d   : > { %v2882_v47 = vmax.f32 %v2776_v17, 0.0 }
 0x34e   : > { %v2881_v9 = vmax.f32 %v2771_v13, 0.0  ;;  %v3220_v52 = vpop.f32.mrb[182].mxu1 }
 0x34f   : > { %2946 = vst [vmem:[%s5355_s20 + $0x1a8] sm:$0xff] %v2882_v47  ;;  %v2420_v28 = vpop.f32.mrb[118].mxu0  ;;  %v2786_v59 = vadd.f32 %v3600_v57, %v3220_v52  ;;  %v2780_v7 = vpop.f32.mrb[183].mxu1 }
 0x350   : > { %2945 = vst [vmem:[%s5355_s20 + $0x1a0] sm:$0xff] %v2881_v9  ;;  %v3608_v22 = vadd.f32 %v3607_v58, %v2420_v28  ;;  %v2422_v18 = vpop.f32.mrb[119].mxu0  ;;  %v2781_v10 = vadd.f32 %v3598_v34, %v2780_v7  ;;  %v3611_v34 = vadd.f32 %v5513_v63, %v5611_v31 }
 0x351   : > { %v2884_v53 = vmax.f32 %v2786_v59, 0.0 }
 0x352   : > { %v2883_v49 = vmax.f32 %v2781_v10, 0.0  ;;  %v3223_v19 = vpop.f32.mrb[184].mxu1 }
 0x353   : > { %2948 = vst [vmem:[%s5355_s20 + $0x1b8] sm:$0xff] %v2884_v53  ;;  %v2425_v5 = vpop.f32.mrb[120].mxu0  ;;  %v2796_v14 = vadd.f32 %v3604_v33, %v3223_v19  ;;  %v2790_v30 = vpop.f32.mrb[185].mxu1 }
 0x354   : > { %2947 = vst [vmem:[%s5355_s20 + $0x1b0] sm:$0xff] %v2883_v49  ;;  %v3610_v48 = vadd.f32 %v3609_v56, %v2425_v5  ;;  %v2427_v4 = vpop.f32.mrb[121].mxu0  ;;  %v2791_v6 = vadd.f32 %v3602_v43, %v2790_v30 }
 0x355   : > { %v2886_v36 = vmax.f32 %v2796_v14, 0.0 }
 0x356   : > { %v2885_v35 = vmax.f32 %v2791_v6, 0.0  ;;  %v3226_v57 = vpop.f32.mrb[186].mxu1 }
 0x357   : > { %2950 = vst [vmem:[%s5355_s20 + $0x1c8] sm:$0xff] %v2886_v36  ;;  %v2430_v50 = vpop.f32.mrb[122].mxu0  ;;  %v2806_v2 = vadd.f32 %v3608_v22, %v3226_v57  ;;  %v2800_v39 = vpop.f32.mrb[187].mxu1 }
 0x358   : > { %2949 = vst [vmem:[%s5355_s20 + $0x1c0] sm:$0xff] %v2885_v35  ;;  %v3612_v60 = vadd.f32 %v3611_v34, %v2430_v50  ;;  %v2432_v42 = vpop.f32.mrb[123].mxu0  ;;  %v2801_v16 = vadd.f32 %v3606_v51, %v2800_v39 }
 0x359   : > { %v2888_v44 = vmax.f32 %v2806_v2, 0.0 }
 0x35a   : > { %v2887_v11 = vmax.f32 %v2801_v16, 0.0  ;;  %v3229_v43 = vpop.f32.mrb[188].mxu1 }
 0x35b   : > { %2952 = vst [vmem:[%s5355_s20 + $0x1d8] sm:$0xff] %v2888_v44  ;;  %v2435_v12 = vpop.f32.mrb[124].mxu0  ;;  %v2816_v21 = vadd.f32 %v3612_v60, %v3229_v43  ;;  %v2810_v0 = vpop.f32.mrb[189].mxu1 }
 0x35c   : > { %2951 = vst [vmem:[%s5355_s20 + $0x1d0] sm:$0xff] %v2887_v11  ;;  %v3614_v55 = vadd.f32 %v3613_v32, %v2435_v12  ;;  %v2437_v40 = vpop.f32.mrb[125].mxu0  ;;  %v2811_v62 = vadd.f32 %v3610_v48, %v2810_v0 }
 0x35d   : > { %v2890_v45 = vmax.f32 %v2816_v21, 0.0 }
 0x35e   : > { %v2889_v46 = vmax.f32 %v2811_v62, 0.0  ;;  %v3232_v38 = vpop.f32.mrb[190].mxu1 }
 0x35f   : > { %2954 = vst [vmem:[%s5355_s20 + $0x1e8] sm:$0xff] %v2890_v45  ;;  %v2440_v33 = vpop.f32.mrb[126].mxu0  ;;  %v2820_v15 = vpop.f32.mrb[191].mxu1 }
 0x360   : > { %2953 = vst [vmem:[%s5355_s20 + $0x1e0] sm:$0xff] %v2889_v46  ;;  %v3616_v29 = vadd.f32 %v3615_v3, %v2440_v33  ;;  %v2442_v20 = vpop.f32.mrb[127].mxu0  ;;  %v2821_v54 = vadd.f32 %v3614_v55, %v2820_v15 }
 0x362   : > { %v2826_v1 = vadd.f32 %v3616_v29, %v3232_v38  ;;  %v2891_v41 = vmax.f32 %v2821_v54, 0.0 }
 0x364   : > { %v2892_v25 = vmax.f32 %v2826_v1, 0.0  ;;  %2955 = vst [vmem:[%s5355_s20 + $0x1f0] sm:$0xff] %v2891_v41 }
 0x366   : > { %2956 = vst [vmem:[%s5355_s20 + $0x1f8] sm:$0xff] %v2892_v25 }
 0x367 PF: > { %s13_s12 = sadd.s32 1, %s3890_s12  }
 0x368   : > { %p10_p4 = scmp.ge.s32.totalorder %s13_s12, 5  }
 0x36a   :  { %12 = sbr.rel (!%p10_p4) target bundleno = 1 (0x1), region = 62 }

// kernel: session5_model_forward.10
= control target key start
LH: loop header
LB: loop body
LE: loop exit
PB: predicated region body
PF: predicated region fallthrough
CT: control target
= control target key end

     0   :  { %v1970_v0 = vmov 0.0|0.0   ;;  %vm1971_vm0 = vmmov 0   ;;  %s3500_s1 = inlined_call_operand.vmem [shape: f32[1152,128], index: 1, kind: input, shape index: {}]   ;;  %s3501_s0 = inlined_call_operand.vmem [shape: f32[200,1152], index: 0, kind: input, shape index: {}]   ;;  %s3502_s2 = inlined_call_operand.vmem [shape: f32[1,128], index: 2, kind: input, shape index: {}]   ;;  %s3503_s3 = inlined_call_operand.vmem [shape: f32[200,128], index: 3, kind: output, shape index: {}]  }
   0x1   :  { %1543 = vmatprep.subr.bf16.mxu1 %v1970_v0  ;;  %1639 = vmatprep.subr.bf16.mxu0 %v1970_v0  ;;  %v239_v1 = vld [vmem:[%s3500_s1] sm:$0xff]  ;;  %v240_v2 = vld [vmem:[%s3500_s1 + $0x8] sm:$0xff]  ;;  %v241_v6 = vld [vmem:[%s3500_s1 + $0x10] sm:$0xff] }
   0x2   :  { %v303_v3 = vld [vmem:[%s3500_s1 + $0x200] sm:$0xff]  ;;  %v1544_v4 = vpack.c.bf16 %v240_v2, %v239_v1  ;;  %v304_v5 = vld [vmem:[%s3500_s1 + $0x208] sm:$0xff]  ;;  %v242_v7 = vld [vmem:[%s3500_s1 + $0x18] sm:$0xff] }
   0x3   :  { %v1640_v8 = vpack.c.bf16 %v304_v5, %v303_v3  ;;  %v305_v9 = vld [vmem:[%s3500_s1 + $0x210] sm:$0xff]  ;;  %v306_v10 = vld [vmem:[%s3500_s1 + $0x218] sm:$0xff]  ;;  %v1547_v11 = vpack.c.bf16 %v242_v7, %v241_v6  ;;  %v243_v13 = vld [vmem:[%s3500_s1 + $0x20] sm:$0xff] }
   0x4   :  { %1545 = vmatpush1.bf16.msra.mxu1 %v1544_v4  ;;  %v1643_v12 = vpack.c.bf16 %v306_v10, %v305_v9  ;;  %v244_v14 = vld [vmem:[%s3500_s1 + $0x28] sm:$0xff]  ;;  %v307_v15 = vld [vmem:[%s3500_s1 + $0x220] sm:$0xff]  ;;  %v245_v19 = vld [vmem:[%s3500_s1 + $0x30] sm:$0xff] }
   0x5   :  { %1641 = vmatpush1.bf16.msra.mxu0 %v1640_v8  ;;  %1546 = vmatprep.subr.bf16.mxu1 %v1970_v0  ;;  %v308_v16 = vld [vmem:[%s3500_s1 + $0x228] sm:$0xff]  ;;  %v1550_v17 = vpack.c.bf16 %v244_v14, %v243_v13  ;;  %v246_v20 = vld [vmem:[%s3500_s1 + $0x38] sm:$0xff]  ;;  %v309_v21 = vld [vmem:[%s3500_s1 + $0x230] sm:$0xff] }
   0x6   :  { %1642 = vmatprep.subr.bf16.mxu0 %v1970_v0  ;;  %v1646_v18 = vpack.c.bf16 %v308_v16, %v307_v15  ;;  %v310_v22 = vld [vmem:[%s3500_s1 + $0x238] sm:$0xff]  ;;  %v1553_v23 = vpack.c.bf16 %v246_v20, %v245_v19  ;;  %v247_v25 = vld [vmem:[%s3500_s1 + $0x40] sm:$0xff]  ;;  %v248_v26 = vld [vmem:[%s3500_s1 + $0x48] sm:$0xff] }
   0x7   :  { %v1649_v24 = vpack.c.bf16 %v310_v22, %v309_v21  ;;  %v311_v27 = vld [vmem:[%s3500_s1 + $0x240] sm:$0xff]  ;;  %v312_v28 = vld [vmem:[%s3500_s1 + $0x248] sm:$0xff]  ;;  %v1556_v29 = vpack.c.bf16 %v248_v26, %v247_v25  ;;  %v249_v31 = vld [vmem:[%s3500_s1 + $0x50] sm:$0xff] }
   0x8   :  { %1548 = vmatpush1.bf16.msra.mxu1 %v1547_v11  ;;  %v1652_v30 = vpack.c.bf16 %v312_v28, %v311_v27  ;;  %v250_v32 = vld [vmem:[%s3500_s1 + $0x58] sm:$0xff]  ;;  %v313_v33 = vld [vmem:[%s3500_s1 + $0x250] sm:$0xff]  ;;  %v251_v37 = vld [vmem:[%s3500_s1 + $0x60] sm:$0xff] }
   0x9   :  { %1644 = vmatpush1.bf16.msra.mxu0 %v1643_v12  ;;  %1549 = vmatprep.subr.bf16.mxu1 %v1970_v0  ;;  %v314_v34 = vld [vmem:[%s3500_s1 + $0x258] sm:$0xff]  ;;  %v1559_v35 = vpack.c.bf16 %v250_v32, %v249_v31  ;;  %v252_v38 = vld [vmem:[%s3500_s1 + $0x68] sm:$0xff]  ;;  %v315_v39 = vld [vmem:[%s3500_s1 + $0x260] sm:$0xff] }
   0xa   :  { %1645 = vmatprep.subr.bf16.mxu0 %v1970_v0  ;;  %v1655_v36 = vpack.c.bf16 %v314_v34, %v313_v33  ;;  %v316_v40 = vld [vmem:[%s3500_s1 + $0x268] sm:$0xff]  ;;  %v1562_v43 = vpack.c.bf16 %v252_v38, %v251_v37  ;;  %v253_v45 = vld [vmem:[%s3500_s1 + $0x70] sm:$0xff]  ;;  %v254_v46 = vld [vmem:[%s3500_s1 + $0x78] sm:$0xff] }
   0xb   :  { %v15_v41 = vld [vmem:[%s3501_s0 + $0x8] sm:$0xff]  ;;  %v1658_v44 = vpack.c.bf16 %v316_v40, %v315_v39  ;;  %v317_v47 = vld [vmem:[%s3500_s1 + $0x270] sm:$0xff]  ;;  %v318_v48 = vld [vmem:[%s3500_s1 + $0x278] sm:$0xff]  ;;  %v1565_v49 = vpack.c.bf16 %v254_v46, %v253_v45 }
   0xc   :  { %1551 = vmatpush1.bf16.msra.mxu1 %v1550_v17  ;;  %v19_v42 = vld [vmem:[%s3501_s0 + $0x28] sm:$0xff]  ;;  %454 = vmatprep.mubr.f32.mxu1 %v15_v41  ;;  %v1661_v50 = vpack.c.bf16 %v318_v48, %v317_v47  ;;  %v255_v51 = vld [vmem:[%s3500_s1 + $0x80] sm:$0xff]  ;;  %v257_v57 = vld [vmem:[%s3500_s1 + $0x90] sm:$0xff] }
   0xd   :  { %1647 = vmatpush1.bf16.msra.mxu0 %v1646_v18  ;;  %1552 = vmatprep.subr.bf16.mxu1 %v1970_v0  ;;  %v256_v52 = vld [vmem:[%s3500_s1 + $0x88] sm:$0xff]  ;;  %v319_v53 = vld [vmem:[%s3500_s1 + $0x280] sm:$0xff]  ;;  %v258_v58 = vld [vmem:[%s3500_s1 + $0x98] sm:$0xff] }
   0xe   :  { %1648 = vmatprep.subr.bf16.mxu0 %v1970_v0  ;;  %834 = vmatprep.mubr.f32.mxu0 %v19_v42  ;;  %v320_v54 = vld [vmem:[%s3500_s1 + $0x288] sm:$0xff]  ;;  %v1568_v55 = vpack.c.bf16 %v256_v52, %v255_v51  ;;  %v321_v59 = vld [vmem:[%s3500_s1 + $0x290] sm:$0xff]  ;;  %v322_v60 = vld [vmem:[%s3500_s1 + $0x298] sm:$0xff]  ;;  %v1571_v61 = vpack.c.bf16 %v258_v58, %v257_v57 }
   0xf   :  { %v1664_v56 = vpack.c.bf16 %v320_v54, %v319_v53  ;;  %v1667_v62 = vpack.c.bf16 %v322_v60, %v321_v59  ;;  %v259_v63 = vld [vmem:[%s3500_s1 + $0xa0] sm:$0xff]  ;;  %v260_v1 = vld [vmem:[%s3500_s1 + $0xa8] sm:$0xff]  ;;  %v261_v6 = vld [vmem:[%s3500_s1 + $0xb0] sm:$0xff] }
  0x10   :  { %1554 = vmatpush1.bf16.msra.mxu1 %v1553_v23  ;;  %v323_v2 = vld [vmem:[%s3500_s1 + $0x2a0] sm:$0xff]  ;;  %v324_v3 = vld [vmem:[%s3500_s1 + $0x2a8] sm:$0xff]  ;;  %v1574_v4 = vpack.c.bf16 %v260_v1, %v259_v63  ;;  %v262_v7 = vld [vmem:[%s3500_s1 + $0xb8] sm:$0xff] }
  0x11   :  { %1650 = vmatpush1.bf16.msra.mxu0 %v1649_v24  ;;  %1555 = vmatprep.subr.bf16.mxu1 %v1970_v0  ;;  %v1670_v5 = vpack.c.bf16 %v324_v3, %v323_v2  ;;  %v325_v8 = vld [vmem:[%s3500_s1 + $0x2b0] sm:$0xff]  ;;  %v326_v9 = vld [vmem:[%s3500_s1 + $0x2b8] sm:$0xff]  ;;  %v1577_v10 = vpack.c.bf16 %v262_v7, %v261_v6  ;;  %v263_v12 = vld [vmem:[%s3500_s1 + $0xc0] sm:$0xff] }
  0x12   :  { %1651 = vmatprep.subr.bf16.mxu0 %v1970_v0  ;;  %v1673_v11 = vpack.c.bf16 %v326_v9, %v325_v8  ;;  %v264_v13 = vld [vmem:[%s3500_s1 + $0xc8] sm:$0xff]  ;;  %v327_v14 = vld [vmem:[%s3500_s1 + $0x2c0] sm:$0xff]  ;;  %v265_v18 = vld [vmem:[%s3500_s1 + $0xd0] sm:$0xff] }
  0x13   :  { %v328_v15 = vld [vmem:[%s3500_s1 + $0x2c8] sm:$0xff]  ;;  %v1580_v16 = vpack.c.bf16 %v264_v13, %v263_v12  ;;  %v266_v19 = vld [vmem:[%s3500_s1 + $0xd8] sm:$0xff]  ;;  %v329_v20 = vld [vmem:[%s3500_s1 + $0x2d0] sm:$0xff] }
  0x14   :  { %1557 = vmatpush1.bf16.msra.mxu1 %v1556_v29  ;;  %v1676_v17 = vpack.c.bf16 %v328_v15, %v327_v14  ;;  %v330_v21 = vld [vmem:[%s3500_s1 + $0x2d8] sm:$0xff]  ;;  %v1583_v22 = vpack.c.bf16 %v266_v19, %v265_v18  ;;  %v267_v24 = vld [vmem:[%s3500_s1 + $0xe0] sm:$0xff]  ;;  %v268_v25 = vld [vmem:[%s3500_s1 + $0xe8] sm:$0xff] }
  0x15   :  { %1653 = vmatpush1.bf16.msra.mxu0 %v1652_v30  ;;  %1558 = vmatprep.subr.bf16.mxu1 %v1970_v0  ;;  %v1679_v23 = vpack.c.bf16 %v330_v21, %v329_v20  ;;  %v331_v26 = vld [vmem:[%s3500_s1 + $0x2e0] sm:$0xff]  ;;  %v332_v27 = vld [vmem:[%s3500_s1 + $0x2e8] sm:$0xff]  ;;  %v1586_v28 = vpack.c.bf16 %v268_v25, %v267_v24  ;;  %v269_v30 = vld [vmem:[%s3500_s1 + $0xf0] sm:$0xff] }
  0x16   :  { %1654 = vmatprep.subr.bf16.mxu0 %v1970_v0  ;;  %v1682_v29 = vpack.c.bf16 %v332_v27, %v331_v26  ;;  %v270_v31 = vld [vmem:[%s3500_s1 + $0xf8] sm:$0xff]  ;;  %v333_v32 = vld [vmem:[%s3500_s1 + $0x2f0] sm:$0xff]  ;;  %v336_v37 = vld [vmem:[%s3500_s1 + $0x308] sm:$0xff] }
  0x17   :  { %v334_v33 = vld [vmem:[%s3500_s1 + $0x2f8] sm:$0xff]  ;;  %v1589_v34 = vpack.c.bf16 %v270_v31, %v269_v30  ;;  %v271_v38 = vld [vmem:[%s3500_s1 + $0x100] sm:$0xff]  ;;  %v272_v39 = vld [vmem:[%s3500_s1 + $0x108] sm:$0xff] }
  0x18   :  { %1560 = vmatpush1.bf16.msra.mxu1 %v1559_v35  ;;  %v1685_v35 = vpack.c.bf16 %v334_v33, %v333_v32  ;;  %v14_v40 = vld [vmem:[%s3501_s0] sm:$0xff]  ;;  %v337_v45 = vld [vmem:[%s3500_s1 + $0x310] sm:$0xff]  ;;  %v338_v46 = vld [vmem:[%s3500_s1 + $0x318] sm:$0xff] }
  0x19   :  { %1656 = vmatpush1.bf16.msra.mxu0 %v1655_v36  ;;  %1561 = vmatprep.subr.bf16.mxu1 %v1970_v0  ;;  %v335_v36 = vld [vmem:[%s3500_s1 + $0x300] sm:$0xff]  ;;  %v28_v47 = vld [vmem:[%s3501_s0 + $0x70] sm:$0xff]  ;;  %v27_v51 = vld [vmem:[%s3501_s0 + $0x68] sm:$0xff]  ;;  %v2273_v53 = vpack.c.bf16 %v338_v46, %v337_v45 }
  0x1a   :  { %1657 = vmatprep.subr.bf16.mxu0 %v1970_v0  ;;  %v18_v41 = vld [vmem:[%s3501_s0 + $0x20] sm:$0xff]  ;;  %v2241_v42 = vpack.c.bf16 %v336_v37, %v335_v36  ;;  %v273_v48 = vld [vmem:[%s3500_s1 + $0x110] sm:$0xff]  ;;  %v33_v52 = vld [vmem:[%s3501_s0 + $0x98] sm:$0xff] }
  0x1b   :  { %v37_v54 = vld [vmem:[%s3501_s0 + $0xb8] sm:$0xff]  ;;  %v340_v57 = vld [vmem:[%s3500_s1 + $0x328] sm:$0xff]  ;;  %v275_v58 = vld [vmem:[%s3500_s1 + $0x120] sm:$0xff] }
  0x1c   :  { %1563 = vmatpush1.bf16.msra.mxu1 %v1562_v43  ;;  %v24_v43 = vld [vmem:[%s3501_s0 + $0x50] sm:$0xff]  ;;  %v276_v59 = vld [vmem:[%s3500_s1 + $0x128] sm:$0xff]  ;;  %v46_v1 = vld [vmem:[%s3501_s0 + $0x100] sm:$0xff] }
  0x1d   :  { %1659 = vmatpush1.bf16.msra.mxu0 %v1658_v44  ;;  %1564 = vmatprep.subr.bf16.mxu1 %v1970_v0  ;;  %v1592_v44 = vpack.c.bf16 %v272_v39, %v271_v38  ;;  %v32_v60 = vld [vmem:[%s3501_s0 + $0x90] sm:$0xff]  ;;  %v1598_v2 = vpack.c.bf16 %v276_v59, %v275_v58  ;;  %v278_v6 = vld [vmem:[%s3500_s1 + $0x138] sm:$0xff]  ;;  %v51_v9 = vld [vmem:[%s3501_s0 + $0x128] sm:$0xff] }
  0x1e   :  { %1660 = vmatprep.subr.bf16.mxu0 %v1970_v0  ;;  %v341_v3 = vld [vmem:[%s3500_s1 + $0x330] sm:$0xff]  ;;  %v41_v7 = vld [vmem:[%s3501_s0 + $0xd8] sm:$0xff]  ;;  %v343_v13 = vld [vmem:[%s3500_s1 + $0x340] sm:$0xff] }
  0x1f   :  { %v45_v8 = vld [vmem:[%s3501_s0 + $0xf8] sm:$0xff]  ;;  %v344_v14 = vld [vmem:[%s3500_s1 + $0x348] sm:$0xff]  ;;  %v279_v15 = vld [vmem:[%s3500_s1 + $0x140] sm:$0xff] }
  0x20   :  { %1566 = vmatpush1.bf16.msra.mxu1 %v1565_v49  ;;  %v274_v49 = vld [vmem:[%s3500_s1 + $0x118] sm:$0xff]  ;;  %v54_v18 = vld [vmem:[%s3501_s0 + $0x140] sm:$0xff]  ;;  %v60_v19 = vld [vmem:[%s3501_s0 + $0x170] sm:$0xff]  ;;  %v2360_v20 = vpack.c.bf16 %v344_v14, %v343_v13 }
  0x21   :  { %1662 = vmatpush1.bf16.msra.mxu0 %v1661_v50  ;;  %1567 = vmatprep.subr.bf16.mxu1 %v1970_v0  ;;  %v23_v50 = vld [vmem:[%s3501_s0 + $0x48] sm:$0xff]  ;;  %v64_v21 = vld [vmem:[%s3501_s0 + $0x190] sm:$0xff]  ;;  %v346_v24 = vld [vmem:[%s3500_s1 + $0x358] sm:$0xff] }
  0x22   :  { %1663 = vmatprep.subr.bf16.mxu0 %v1970_v0  ;;  %v281_v25 = vld [vmem:[%s3500_s1 + $0x150] sm:$0xff]  ;;  %v282_v26 = vld [vmem:[%s3500_s1 + $0x158] sm:$0xff]  ;;  %v59_v27 = vld [vmem:[%s3501_s0 + $0x168] sm:$0xff] }
  0x23   :  { %v73_v31 = vld [vmem:[%s3501_s0 + $0x1d8] sm:$0xff]  ;;  %v1607_v32 = vpack.c.bf16 %v282_v26, %v281_v25  ;;  %v347_v33 = vld [vmem:[%s3500_s1 + $0x360] sm:$0xff]  ;;  %v284_v36 = vld [vmem:[%s3500_s1 + $0x168] sm:$0xff] }
  0x24   :  { %1569 = vmatpush1.bf16.msra.mxu1 %v1568_v55  ;;  %v1595_v55 = vpack.c.bf16 %v274_v49, %v273_v48  ;;  %v68_v37 = vld [vmem:[%s3501_s0 + $0x1b0] sm:$0xff]  ;;  %v78_v39 = vld [vmem:[%s3501_s0 + $0x200] sm:$0xff]  ;;  %v350_v45 = vld [vmem:[%s3500_s1 + $0x378] sm:$0xff] }
  0x25   :  { %1665 = vmatpush1.bf16.msra.mxu0 %v1664_v56  ;;  %1570 = vmatprep.subr.bf16.mxu1 %v1970_v0  ;;  %v339_v56 = vld [vmem:[%s3500_s1 + $0x320] sm:$0xff]  ;;  %v72_v38 = vld [vmem:[%s3501_s0 + $0x1d0] sm:$0xff]  ;;  %v77_v48 = vld [vmem:[%s3501_s0 + $0x1f8] sm:$0xff] }
  0x26   :  { %1666 = vmatprep.subr.bf16.mxu0 %v1970_v0  ;;  %v2302_v63 = vpack.c.bf16 %v340_v57, %v339_v56  ;;  %v285_v46 = vld [vmem:[%s3500_s1 + $0x170] sm:$0xff]  ;;  %v81_v49 = vld [vmem:[%s3501_s0 + $0x218] sm:$0xff]  ;;  %v352_v56 = vld [vmem:[%s3500_s1 + $0x388] sm:$0xff] }
  0x27   :  { %v287_v57 = vld [vmem:[%s3500_s1 + $0x180] sm:$0xff]  ;;  %v288_v58 = vld [vmem:[%s3500_s1 + $0x188] sm:$0xff]  ;;  %v357_v25 = vld [vmem:[%s3500_s1 + $0x3b0] sm:$0xff] }
  0x28   :  { %1572 = vmatpush1.bf16.msra.mxu1 %v1571_v61  ;;  %v36_v61 = vld [vmem:[%s3501_s0 + $0xb0] sm:$0xff]  ;;  %v86_v59 = vld [vmem:[%s3501_s0 + $0x240] sm:$0xff]  ;;  %v358_v26 = vld [vmem:[%s3500_s1 + $0x3b8] sm:$0xff] }
  0x29   :  { %1668 = vmatpush1.bf16.msra.mxu0 %v1667_v62  ;;  %1573 = vmatprep.subr.bf16.mxu1 %v1970_v0  ;;  %v42_v62 = vld [vmem:[%s3501_s0 + $0xe0] sm:$0xff] }
  0x2a   :  { %1669 = vmatprep.subr.bf16.mxu0 %v1970_v0  ;;  %v355_v14 = vld [vmem:[%s3500_s1 + $0x3a0] sm:$0xff] }
  0x2c   :  { %1575 = vmatpush1.bf16.msra.mxu1 %v1574_v4  ;;  %v342_v4 = vld [vmem:[%s3500_s1 + $0x338] sm:$0xff] }
  0x2d   :  { %1671 = vmatpush1.bf16.msra.mxu0 %v1670_v5  ;;  %1576 = vmatprep.subr.bf16.mxu1 %v1970_v0  ;;  %v277_v5 = vld [vmem:[%s3500_s1 + $0x130] sm:$0xff] }
  0x2e   :  { %1672 = vmatprep.subr.bf16.mxu0 %v1970_v0  ;;  %v1601_v12 = vpack.c.bf16 %v278_v6, %v277_v5  ;;  %v289_v5 = vld [vmem:[%s3500_s1 + $0x190] sm:$0xff]  ;;  %v290_v6 = vld [vmem:[%s3500_s1 + $0x198] sm:$0xff] }
  0x2f   :  { %v1619_v13 = vpack.c.bf16 %v290_v6, %v289_v5  ;;  %v150_v5 = vld [vmem:[%s3501_s0 + $0x440] sm:$0xff] }
  0x30   :  { %1578 = vmatpush1.bf16.msra.mxu1 %v1577_v10  ;;  %v2331_v10 = vpack.c.bf16 %v342_v4, %v341_v3  ;;  %v353_v3 = vld [vmem:[%s3500_s1 + $0x390] sm:$0xff]  ;;  %v354_v4 = vld [vmem:[%s3500_s1 + $0x398] sm:$0xff] }
  0x31   :  { %1674 = vmatpush1.bf16.msra.mxu0 %v1673_v11  ;;  %1579 = vmatprep.subr.bf16.mxu1 %v1970_v0  ;;  %v55_v11 = vld [vmem:[%s3501_s0 + $0x148] sm:$0xff] }
  0x32   :  { %1675 = vmatprep.subr.bf16.mxu0 %v1970_v0 }
  0x34   :  { %1581 = vmatpush1.bf16.msra.mxu1 %v1580_v16  ;;  %v280_v16 = vld [vmem:[%s3500_s1 + $0x148] sm:$0xff] }
  0x35   :  { %1677 = vmatpush1.bf16.msra.mxu0 %v1676_v17  ;;  %1582 = vmatprep.subr.bf16.mxu1 %v1970_v0  ;;  %v50_v17 = vld [vmem:[%s3501_s0 + $0x120] sm:$0xff] }
  0x36   :  { %1678 = vmatprep.subr.bf16.mxu0 %v1970_v0 }
  0x38   :  { %1584 = vmatpush1.bf16.msra.mxu1 %v1583_v22  ;;  %v1604_v22 = vpack.c.bf16 %v280_v16, %v279_v15  ;;  %v356_v15 = vld [vmem:[%s3500_s1 + $0x3a8] sm:$0xff]  ;;  %v291_v16 = vld [vmem:[%s3500_s1 + $0x1a0] sm:$0xff] }
  0x39   :  { %1680 = vmatpush1.bf16.msra.mxu0 %v1679_v23  ;;  %1585 = vmatprep.subr.bf16.mxu1 %v1970_v0  ;;  %v345_v23 = vld [vmem:[%s3500_s1 + $0x350] sm:$0xff] }
  0x3a   :  { %1681 = vmatprep.subr.bf16.mxu0 %v1970_v0  ;;  %v2389_v30 = vpack.c.bf16 %v346_v24, %v345_v23  ;;  %v118_v23 = vld [vmem:[%s3501_s0 + $0x340] sm:$0xff] }
  0x3c   :  { %1587 = vmatpush1.bf16.msra.mxu1 %v1586_v28  ;;  %v63_v28 = vld [vmem:[%s3501_s0 + $0x188] sm:$0xff] }
  0x3d   :  { %1683 = vmatpush1.bf16.msra.mxu0 %v1682_v29  ;;  %1588 = vmatprep.subr.bf16.mxu1 %v1970_v0  ;;  %v69_v29 = vld [vmem:[%s3501_s0 + $0x1b8] sm:$0xff] }
  0x3e   :  { %1684 = vmatprep.subr.bf16.mxu0 %v1970_v0 }
  0x40   :  { %1590 = vmatpush1.bf16.msra.mxu1 %v1589_v34  ;;  %v348_v34 = vld [vmem:[%s3500_s1 + $0x368] sm:$0xff] }
  0x41   :  { %1686 = vmatpush1.bf16.msra.mxu0 %v1685_v35  ;;  %1591 = vmatprep.subr.bf16.mxu1 %v1970_v0  ;;  %v283_v35 = vld [vmem:[%s3500_s1 + $0x160] sm:$0xff] }
  0x42   :  { %1687 = vmatprep.subr.bf16.mxu0 %v1970_v0 }
  0x43   :  { %455 = vmatmul.mubr.f32.vlgmr.msra.gmra.mrb[0].mxu1 %v14_v40  ;;  %v2418_v40 = vpack.c.bf16 %v348_v34, %v347_v33  ;;  %v2563_v33 = vpack.c.bf16 %v358_v26, %v357_v25  ;;  %v127_v34 = vld [vmem:[%s3501_s0 + $0x388] sm:$0xff]  ;;  %v168_v25 = vld [vmem:[%s3501_s0 + $0x4d0] sm:$0xff] }
  0x44   :  { %835 = vmatmul.mubr.f32.vlgmr.msra.gmra.mrb[0].mxu0 %v18_v41  ;;  %459 = vmatprep.mubr.f32.mxu1 %v24_v43  ;;  %v82_v41 = vld [vmem:[%s3501_s0 + $0x220] sm:$0xff]  ;;  %v1610_v43 = vpack.c.bf16 %v284_v36, %v283_v35  ;;  %v172_v26 = vld [vmem:[%s3501_s0 + $0x4f0] sm:$0xff] }
  0x45   :  { %1689 = vmatpush1.bf16.msra.mxu0 %v2241_v42  ;;  %1593 = vmatpush1.bf16.msra.mxu1 %v1592_v44  ;;  %v349_v44 = vld [vmem:[%s3500_s1 + $0x370] sm:$0xff]  ;;  %v359_v36 = vld [vmem:[%s3500_s1 + $0x3c0] sm:$0xff] }
  0x46   :  { %839 = vmatprep.mubr.f32.mxu0 %v28_v47  ;;  %1690 = vmatprep.subr.bf16.mxu0 %v1970_v0  ;;  %v286_v47 = vld [vmem:[%s3500_s1 + $0x178] sm:$0xff] }
  0x47   :  { %460 = vmatmul.mubr.f32.gmra.mrb[2].mxu1 %v23_v50  ;;  %1594 = vmatprep.subr.bf16.mxu1 %v1970_v0  ;;  %v87_v50 = vld [vmem:[%s3501_s0 + $0x248] sm:$0xff] }
  0x48   :  { %840 = vmatmul.mubr.f32.gmra.mrb[2].mxu0 %v27_v51  ;;  %464 = vmatprep.mubr.f32.mxu1 %v33_v52  ;;  %v2447_v51 = vpack.c.bf16 %v350_v45, %v349_v44  ;;  %v91_v52 = vld [vmem:[%s3501_s0 + $0x268] sm:$0xff]  ;;  %v132_v44 = vld [vmem:[%s3501_s0 + $0x3b0] sm:$0xff] }
  0x49   :  { %844 = vmatprep.mubr.f32.mxu0 %v37_v54  ;;  %1692 = vmatpush1.bf16.msra.mxu0 %v2273_v53  ;;  %v1613_v54 = vpack.c.bf16 %v286_v47, %v285_v46  ;;  %v136_v46 = vld [vmem:[%s3501_s0 + $0x3d0] sm:$0xff] }
  0x4a   :  { %1596 = vmatpush1.bf16.msra.mxu1 %v1595_v55  ;;  %1693 = vmatprep.subr.bf16.mxu0 %v1970_v0  ;;  %v351_v55 = vld [vmem:[%s3500_s1 + $0x380] sm:$0xff] }
  0x4b   :  { %465 = vmatmul.mubr.f32.gmra.mrb[4].mxu1 %v32_v60  ;;  %1597 = vmatprep.subr.bf16.mxu1 %v1970_v0  ;;  %v90_v60 = vld [vmem:[%s3501_s0 + $0x260] sm:$0xff] }
  0x4c   :  { %845 = vmatmul.mubr.f32.gmra.mrb[4].mxu0 %v36_v61  ;;  %469 = vmatprep.mubr.f32.mxu1 %v42_v62  ;;  %v96_v61 = vld [vmem:[%s3501_s0 + $0x290] sm:$0xff]  ;;  %v2476_v62 = vpack.c.bf16 %v352_v56, %v351_v55  ;;  %v135_v55 = vld [vmem:[%s3501_s0 + $0x3c8] sm:$0xff]  ;;  %v141_v56 = vld [vmem:[%s3501_s0 + $0x3f8] sm:$0xff] }
  0x4d   :  { %849 = vmatprep.mubr.f32.mxu0 %v46_v1  ;;  %1695 = vmatpush1.bf16.msra.mxu0 %v2302_v63  ;;  %v100_v1 = vld [vmem:[%s3501_s0 + $0x2b0] sm:$0xff] }
  0x4e   :  { %1599 = vmatpush1.bf16.msra.mxu1 %v1598_v2  ;;  %1696 = vmatprep.subr.bf16.mxu0 %v1970_v0  ;;  %v1616_v2 = vpack.c.bf16 %v288_v58, %v287_v57  ;;  %v145_v58 = vld [vmem:[%s3501_s0 + $0x418] sm:$0xff] }
  0x4f   :  { %470 = vmatmul.mubr.f32.gmra.mrb[6].mxu1 %v41_v7  ;;  %1600 = vmatprep.subr.bf16.mxu1 %v1970_v0  ;;  %v95_v7 = vld [vmem:[%s3501_s0 + $0x288] sm:$0xff] }
  0x50   :  { %850 = vmatmul.mubr.f32.gmra.mrb[6].mxu0 %v45_v8  ;;  %474 = vmatprep.mubr.f32.mxu1 %v51_v9  ;;  %v99_v8 = vld [vmem:[%s3501_s0 + $0x2a8] sm:$0xff]  ;;  %v105_v9 = vld [vmem:[%s3501_s0 + $0x2d8] sm:$0xff] }
  0x51   :  { %854 = vmatprep.mubr.f32.mxu0 %v55_v11  ;;  %1698 = vmatpush1.bf16.msra.mxu0 %v2331_v10  ;;  %v2505_v11 = vpack.c.bf16 %v354_v4, %v353_v3  ;;  %v140_v3 = vld [vmem:[%s3501_s0 + $0x3f0] sm:$0xff] }
  0x52   :  { %1602 = vmatpush1.bf16.msra.mxu1 %v1601_v12  ;;  %1699 = vmatprep.subr.bf16.mxu0 %v1970_v0  ;;  %v109_v12 = vld [vmem:[%s3501_s0 + $0x2f8] sm:$0xff]  ;;  %v144_v4 = vld [vmem:[%s3501_s0 + $0x410] sm:$0xff] }
  0x53   :  { %475 = vmatmul.mubr.f32.gmra.mrb[8].mxu1 %v50_v17  ;;  %1603 = vmatprep.subr.bf16.mxu1 %v1970_v0  ;;  %v292_v17 = vld [vmem:[%s3500_s1 + $0x1a8] sm:$0xff] }
  0x54   :  { %855 = vmatmul.mubr.f32.gmra.mrb[8].mxu0 %v54_v18  ;;  %479 = vmatprep.mubr.f32.mxu1 %v60_v19  ;;  %v104_v18 = vld [vmem:[%s3501_s0 + $0x2d0] sm:$0xff]  ;;  %v1622_v24 = vpack.c.bf16 %v292_v17, %v291_v16  ;;  %v153_v16 = vld [vmem:[%s3501_s0 + $0x458] sm:$0xff]  ;;  %v159_v17 = vld [vmem:[%s3501_s0 + $0x488] sm:$0xff] }
  0x55   :  { %859 = vmatprep.mubr.f32.mxu0 %v64_v21  ;;  %1701 = vmatpush1.bf16.msra.mxu0 %v2360_v20  ;;  %v108_v19 = vld [vmem:[%s3501_s0 + $0x2f0] sm:$0xff]  ;;  %v114_v21 = vld [vmem:[%s3501_s0 + $0x320] sm:$0xff] }
  0x56   :  { %1605 = vmatpush1.bf16.msra.mxu1 %v1604_v22  ;;  %1702 = vmatprep.subr.bf16.mxu0 %v1970_v0  ;;  %v2534_v22 = vpack.c.bf16 %v356_v15, %v355_v14  ;;  %v302_v14 = vld [vmem:[%s3500_s1 + $0x1f8] sm:$0xff] }
  0x57   :  { %480 = vmatmul.mubr.f32.gmra.mrb[10].mxu1 %v59_v27  ;;  %1606 = vmatprep.subr.bf16.mxu1 %v1970_v0  ;;  %v293_v27 = vld [vmem:[%s3500_s1 + $0x1b0] sm:$0xff]  ;;  %v149_v15 = vld [vmem:[%s3501_s0 + $0x438] sm:$0xff] }
  0x58   :  { %860 = vmatmul.mubr.f32.gmra.mrb[10].mxu0 %v63_v28  ;;  %484 = vmatprep.mubr.f32.mxu1 %v69_v29  ;;  %v294_v28 = vld [vmem:[%s3500_s1 + $0x1b8] sm:$0xff] }
  0x59   :  { %864 = vmatprep.mubr.f32.mxu0 %v73_v31  ;;  %1704 = vmatpush1.bf16.msra.mxu0 %v2389_v30  ;;  %v113_v29 = vld [vmem:[%s3501_s0 + $0x318] sm:$0xff]  ;;  %v1625_v35 = vpack.c.bf16 %v294_v28, %v293_v27  ;;  %v167_v27 = vld [vmem:[%s3501_s0 + $0x4c8] sm:$0xff] }
  0x5a   :  { %1608 = vmatpush1.bf16.msra.mxu1 %v1607_v32  ;;  %1705 = vmatprep.subr.bf16.mxu0 %v1970_v0  ;;  %v117_v31 = vld [vmem:[%s3501_s0 + $0x338] sm:$0xff]  ;;  %v123_v32 = vld [vmem:[%s3501_s0 + $0x368] sm:$0xff] }
  0x5b   :  { %485 = vmatmul.mubr.f32.gmra.mrb[12].mxu1 %v68_v37  ;;  %1609 = vmatprep.subr.bf16.mxu1 %v1970_v0  ;;  %v360_v37 = vld [vmem:[%s3500_s1 + $0x3c8] sm:$0xff] }
  0x5c   :  { %865 = vmatmul.mubr.f32.gmra.mrb[12].mxu0 %v72_v38  ;;  %489 = vmatprep.mubr.f32.mxu1 %v78_v39  ;;  %v295_v38 = vld [vmem:[%s3500_s1 + $0x1c0] sm:$0xff]  ;;  %v296_v39 = vld [vmem:[%s3500_s1 + $0x1c8] sm:$0xff]  ;;  %v2592_v45 = vpack.c.bf16 %v360_v37, %v359_v36  ;;  %v185_v37 = vld [vmem:[%s3501_s0 + $0x558] sm:$0xff] }
  0x5d   :  { %869 = vmatprep.mubr.f32.mxu0 %v82_v41  ;;  %1707 = vmatpush1.bf16.msra.mxu0 %v2418_v40  ;;  %v122_v41 = vld [vmem:[%s3501_s0 + $0x360] sm:$0xff]  ;;  %v1628_v47 = vpack.c.bf16 %v296_v39, %v295_v38  ;;  %v171_v28 = vld [vmem:[%s3501_s0 + $0x4e8] sm:$0xff]  ;;  %v189_v38 = vld [vmem:[%s3501_s0 + $0x578] sm:$0xff] }
  0x5e   :  { %1611 = vmatpush1.bf16.msra.mxu1 %v1610_v43  ;;  %1708 = vmatprep.subr.bf16.mxu0 %v1970_v0  ;;  %v126_v43 = vld [vmem:[%s3501_s0 + $0x380] sm:$0xff]  ;;  %v195_v39 = vld [vmem:[%s3501_s0 + $0x5a8] sm:$0xff] }
  0x5f   :  { %490 = vmatmul.mubr.f32.gmra.mrb[14].mxu1 %v77_v48  ;;  %1612 = vmatprep.subr.bf16.mxu1 %v1970_v0  ;;  %v361_v48 = vld [vmem:[%s3500_s1 + $0x3d0] sm:$0xff]  ;;  %v190_v36 = vld [vmem:[%s3501_s0 + $0x580] sm:$0xff] }
  0x60   :  { %870 = vmatmul.mubr.f32.gmra.mrb[14].mxu0 %v81_v49  ;;  %494 = vmatprep.mubr.f32.mxu1 %v87_v50  ;;  %v362_v49 = vld [vmem:[%s3500_s1 + $0x3d8] sm:$0xff]  ;;  %v297_v50 = vld [vmem:[%s3500_s1 + $0x1d0] sm:$0xff] }
  0x61   :  { %874 = vmatprep.mubr.f32.mxu0 %v91_v52  ;;  %1710 = vmatpush1.bf16.msra.mxu0 %v2447_v51  ;;  %v298_v52 = vld [vmem:[%s3500_s1 + $0x1d8] sm:$0xff]  ;;  %v2621_v57 = vpack.c.bf16 %v362_v49, %v361_v48  ;;  %v203_v48 = vld [vmem:[%s3501_s0 + $0x5e8] sm:$0xff] }
  0x62   :  { %1614 = vmatpush1.bf16.msra.mxu1 %v1613_v54  ;;  %1711 = vmatprep.subr.bf16.mxu0 %v1970_v0  ;;  %v131_v54 = vld [vmem:[%s3501_s0 + $0x3a8] sm:$0xff] }
  0x63   :  { %495 = vmatmul.mubr.f32.gmra.mrb[16].mxu1 %v86_v59  ;;  %1615 = vmatprep.subr.bf16.mxu1 %v1970_v0  ;;  %v1631_v59 = vpack.c.bf16 %v298_v52, %v297_v50  ;;  %v207_v49 = vld [vmem:[%s3501_s0 + $0x608] sm:$0xff]  ;;  %v213_v50 = vld [vmem:[%s3501_s0 + $0x638] sm:$0xff] }
  0x64   :  { %875 = vmatmul.mubr.f32.gmra.mrb[16].mxu0 %v90_v60  ;;  %499 = vmatprep.mubr.f32.mxu1 %v96_v61  ;;  %v363_v60 = vld [vmem:[%s3500_s1 + $0x3e0] sm:$0xff]  ;;  %v364_v61 = vld [vmem:[%s3500_s1 + $0x3e8] sm:$0xff]  ;;  %v217_v52 = vld [vmem:[%s3501_s0 + $0x658] sm:$0xff] }
  0x65   :  { %879 = vmatprep.mubr.f32.mxu0 %v100_v1  ;;  %1713 = vmatpush1.bf16.msra.mxu0 %v2476_v62  ;;  %v299_v1 = vld [vmem:[%s3500_s1 + $0x1e0] sm:$0xff]  ;;  %v2650_v6 = vpack.c.bf16 %v364_v61, %v363_v60  ;;  %v225_v60 = vld [vmem:[%s3501_s0 + $0x698] sm:$0xff]  ;;  %v231_v61 = vld [vmem:[%s3501_s0 + $0x6c8] sm:$0xff] }
  0x66   :  { %1617 = vmatpush1.bf16.msra.mxu1 %v1616_v2  ;;  %1714 = vmatprep.subr.bf16.mxu0 %v1970_v0  ;;  %v300_v2 = vld [vmem:[%s3500_s1 + $0x1e8] sm:$0xff] }
  0x67   :  { %500 = vmatmul.mubr.f32.gmra.mrb[18].mxu1 %v95_v7  ;;  %1618 = vmatprep.subr.bf16.mxu1 %v1970_v0  ;;  %v154_v7 = vld [vmem:[%s3501_s0 + $0x460] sm:$0xff] }
  0x68   :  { %880 = vmatmul.mubr.f32.gmra.mrb[18].mxu0 %v99_v8  ;;  %504 = vmatprep.mubr.f32.mxu1 %v105_v9  ;;  %v1634_v8 = vpack.c.bf16 %v300_v2, %v299_v1  ;;  %v365_v9 = vld [vmem:[%s3500_s1 + $0x3f0] sm:$0xff]  ;;  %v235_v1 = vld [vmem:[%s3501_s0 + $0x6e8] sm:$0xff]  ;;  %v230_v2 = vld [vmem:[%s3501_s0 + $0x6c0] sm:$0xff] }
  0x69   :  { %884 = vmatprep.mubr.f32.mxu0 %v109_v12  ;;  %1716 = vmatpush1.bf16.msra.mxu0 %v2505_v11  ;;  %v366_v12 = vld [vmem:[%s3500_s1 + $0x3f8] sm:$0xff] }
  0x6a   :  { %1620 = vmatpush1.bf16.msra.mxu1 %v1619_v13  ;;  %1717 = vmatprep.subr.bf16.mxu0 %v1970_v0  ;;  %v301_v13 = vld [vmem:[%s3500_s1 + $0x1f0] sm:$0xff] }
  0x6b   :  { %505 = vmatmul.mubr.f32.gmra.mrb[20].mxu1 %v104_v18  ;;  %1621 = vmatprep.subr.bf16.mxu1 %v1970_v0  ;;  %v2679_v18 = vpack.c.bf16 %v366_v12, %v365_v9  ;;  %v16_v9 = vld [vmem:[%s3501_s0 + $0x10] sm:$0xff] }
  0x6c   :  { %885 = vmatmul.mubr.f32.gmra.mrb[20].mxu0 %v108_v19  ;;  %509 = vmatprep.mubr.f32.mxu1 %v114_v21  ;;  %v163_v19 = vld [vmem:[%s3501_s0 + $0x4a8] sm:$0xff]  ;;  %v1637_v21 = vpack.c.bf16 %v302_v14, %v301_v13  ;;  %v20_v12 = vld [vmem:[%s3501_s0 + $0x30] sm:$0xff]  ;;  %v26_v14 = vld [vmem:[%s3501_s0 + $0x60] sm:$0xff] }
  0x6d   :  { %889 = vmatprep.mubr.f32.mxu0 %v118_v23  ;;  %1719 = vmatpush1.bf16.msra.mxu0 %v2534_v22  ;;  %v158_v23 = vld [vmem:[%s3501_s0 + $0x480] sm:$0xff] }
  0x6e   :  { %1623 = vmatpush1.bf16.msra.mxu1 %v1622_v24  ;;  %1720 = vmatprep.subr.bf16.mxu0 %v1970_v0  ;;  %v162_v24 = vld [vmem:[%s3501_s0 + $0x4a0] sm:$0xff] }
  0x6f   :  { %510 = vmatmul.mubr.f32.gmra.mrb[22].mxu1 %v113_v29  ;;  %1624 = vmatprep.subr.bf16.mxu1 %v1970_v0  ;;  %v177_v29 = vld [vmem:[%s3501_s0 + $0x518] sm:$0xff] }
  0x70   :  { %890 = vmatmul.mubr.f32.gmra.mrb[22].mxu0 %v117_v31  ;;  %514 = vmatprep.mubr.f32.mxu1 %v123_v32  ;;  %v181_v31 = vld [vmem:[%s3501_s0 + $0x538] sm:$0xff]  ;;  %v176_v32 = vld [vmem:[%s3501_s0 + $0x510] sm:$0xff] }
  0x71   :  { %894 = vmatprep.mubr.f32.mxu0 %v127_v34  ;;  %1722 = vmatpush1.bf16.msra.mxu0 %v2563_v33  ;;  %v180_v34 = vld [vmem:[%s3501_s0 + $0x530] sm:$0xff] }
  0x72   :  { %1626 = vmatpush1.bf16.msra.mxu1 %v1625_v35  ;;  %1723 = vmatprep.subr.bf16.mxu0 %v1970_v0  ;;  %v186_v35 = vld [vmem:[%s3501_s0 + $0x560] sm:$0xff] }
  0x73   :  { %515 = vmatmul.mubr.f32.gmra.mrb[24].mxu1 %v122_v41  ;;  %1627 = vmatprep.subr.bf16.mxu1 %v1970_v0  ;;  %v199_v41 = vld [vmem:[%s3501_s0 + $0x5c8] sm:$0xff] }
  0x74   :  { %895 = vmatmul.mubr.f32.gmra.mrb[24].mxu0 %v126_v43  ;;  %519 = vmatprep.mubr.f32.mxu1 %v132_v44  ;;  %v194_v43 = vld [vmem:[%s3501_s0 + $0x5a0] sm:$0xff] }
  0x75   :  { %899 = vmatprep.mubr.f32.mxu0 %v136_v46  ;;  %1725 = vmatpush1.bf16.msra.mxu0 %v2592_v45  ;;  %v198_v44 = vld [vmem:[%s3501_s0 + $0x5c0] sm:$0xff]  ;;  %v204_v46 = vld [vmem:[%s3501_s0 + $0x5f0] sm:$0xff] }
  0x76   :  { %1629 = vmatpush1.bf16.msra.mxu1 %v1628_v47  ;;  %1726 = vmatprep.subr.bf16.mxu0 %v1970_v0  ;;  %v208_v47 = vld [vmem:[%s3501_s0 + $0x610] sm:$0xff] }
  0x77   :  { %520 = vmatmul.mubr.f32.gmra.mrb[26].mxu1 %v131_v54  ;;  %1630 = vmatprep.subr.bf16.mxu1 %v1970_v0  ;;  %v212_v54 = vld [vmem:[%s3501_s0 + $0x630] sm:$0xff] }
  0x78   :  { %900 = vmatmul.mubr.f32.gmra.mrb[26].mxu0 %v135_v55  ;;  %524 = vmatprep.mubr.f32.mxu1 %v141_v56  ;;  %v216_v55 = vld [vmem:[%s3501_s0 + $0x650] sm:$0xff]  ;;  %v222_v56 = vld [vmem:[%s3501_s0 + $0x680] sm:$0xff] }
  0x79   :  { %904 = vmatprep.mubr.f32.mxu0 %v145_v58  ;;  %1728 = vmatpush1.bf16.msra.mxu0 %v2621_v57  ;;  %v226_v58 = vld [vmem:[%s3501_s0 + $0x6a0] sm:$0xff] }
  0x7a   :  { %1632 = vmatpush1.bf16.msra.mxu1 %v1631_v59  ;;  %1729 = vmatprep.subr.bf16.mxu0 %v1970_v0  ;;  %v221_v59 = vld [vmem:[%s3501_s0 + $0x678] sm:$0xff] }
  0x7b   :  { %525 = vmatmul.mubr.f32.gmra.mrb[28].mxu1 %v140_v3  ;;  %1633 = vmatprep.subr.bf16.mxu1 %v1970_v0  ;;  %v234_v3 = vld [vmem:[%s3501_s0 + $0x6e0] sm:$0xff] }
  0x7c   :  { %905 = vmatmul.mubr.f32.gmra.mrb[28].mxu0 %v144_v4  ;;  %529 = vmatprep.mubr.f32.mxu1 %v150_v5  ;;  %v17_v4 = vld [vmem:[%s3501_s0 + $0x18] sm:$0xff] }
  0x7d   :  { %909 = vmatprep.mubr.f32.mxu0 %v154_v7  ;;  %1731 = vmatpush1.bf16.msra.mxu0 %v2650_v6  ;;  %v21_v5 = vld [vmem:[%s3501_s0 + $0x38] sm:$0xff]  ;;  %v367_v7 = vld [vmem:[%s3500_s1 + $0x400] sm:$0xff] }
  0x7e   :  { %1635 = vmatpush1.bf16.msra.mxu1 %v1634_v8  ;;  %1732 = vmatprep.subr.bf16.mxu0 %v1970_v0  ;;  %v368_v8 = vld [vmem:[%s3500_s1 + $0x408] sm:$0xff] }
  0x7f   :  { %530 = vmatmul.mubr.f32.gmra.mrb[30].mxu1 %v149_v15  ;;  %1636 = vmatprep.subr.bf16.mxu1 %v1970_v0  ;;  %v1736_v13 = vpack.c.bf16 %v368_v8, %v367_v7  ;;  %v369_v15 = vld [vmem:[%s3500_s1 + $0x410] sm:$0xff]  ;;  %v89_v7 = vld [vmem:[%s3501_s0 + $0x258] sm:$0xff] }
  0x80   :  { %910 = vmatmul.mubr.f32.gmra.mrb[30].mxu0 %v153_v16  ;;  %534 = vmatprep.mubr.f32.mxu1 %v159_v17  ;;  %v370_v16 = vld [vmem:[%s3500_s1 + $0x418] sm:$0xff]  ;;  %v30_v17 = vld [vmem:[%s3501_s0 + $0x80] sm:$0xff] }
  0x81   :  { %914 = vmatprep.mubr.f32.mxu0 %v163_v19  ;;  %1734 = vmatpush1.bf16.msra.mxu0 %v2679_v18  ;;  %v25_v19 = vld [vmem:[%s3501_s0 + $0x58] sm:$0xff] }
  0x82   :  { %1638 = vmatpush1.bf16.msra.mxu1 %v1637_v21  ;;  %1735 = vmatprep.subr.bf16.mxu0 %v1970_v0  ;;  %v29_v21 = vld [vmem:[%s3501_s0 + $0x78] sm:$0xff] }
  0x83   :  { %535 = vmatmul.mubr.f32.gmra.mrb[32].mxu1 %v158_v23  ;;  %1759 = vmatprep.subr.bf16.mxu1 %v1970_v0  ;;  %v35_v23 = vld [vmem:[%s3501_s0 + $0xa8] sm:$0xff] }
  0x84   :  { %915 = vmatmul.mubr.f32.gmra.mrb[32].mxu0 %v162_v24  ;;  %539 = vmatprep.mubr.f32.mxu1 %v168_v25  ;;  %v1739_v24 = vpack.c.bf16 %v370_v16, %v369_v15  ;;  %v39_v25 = vld [vmem:[%s3501_s0 + $0xc8] sm:$0xff]  ;;  %v97_v15 = vld [vmem:[%s3501_s0 + $0x298] sm:$0xff] }
  0x85   :  { %919 = vmatprep.mubr.f32.mxu0 %v172_v26  ;;  %v372_v26 = vld [vmem:[%s3500_s1 + $0x428] sm:$0xff]  ;;  %v101_v16 = vld [vmem:[%s3501_s0 + $0x2b8] sm:$0xff] }
  0x87   :  { %540 = vmatmul.mubr.f32.gmra.mrb[34].mxu1 %v167_v27  ;;  %v34_v27 = vld [vmem:[%s3501_s0 + $0xa0] sm:$0xff] }
  0x88   :  { %920 = vmatmul.mubr.f32.gmra.mrb[34].mxu0 %v171_v28  ;;  %544 = vmatprep.mubr.f32.mxu1 %v177_v29  ;;  %v38_v28 = vld [vmem:[%s3501_s0 + $0xc0] sm:$0xff]  ;;  %v44_v29 = vld [vmem:[%s3501_s0 + $0xf0] sm:$0xff] }
  0x89   :  { %924 = vmatprep.mubr.f32.mxu0 %v181_v31 }
  0x8b   :  { %545 = vmatmul.mubr.f32.gmra.mrb[36].mxu1 %v176_v32  ;;  %v48_v32 = vld [vmem:[%s3501_s0 + $0x110] sm:$0xff] }
  0x8c   :  { %925 = vmatmul.mubr.f32.gmra.mrb[36].mxu0 %v180_v34  ;;  %549 = vmatprep.mubr.f32.mxu1 %v186_v35  ;;  %v373_v34 = vld [vmem:[%s3500_s1 + $0x430] sm:$0xff]  ;;  %v374_v35 = vld [vmem:[%s3500_s1 + $0x438] sm:$0xff] }
  0x8d   :  { %929 = vmatprep.mubr.f32.mxu0 %v190_v36  ;;  %v47_v36 = vld [vmem:[%s3501_s0 + $0x108] sm:$0xff] }
  0x8f   :  { %550 = vmatmul.mubr.f32.gmra.mrb[38].mxu1 %v185_v37  ;;  %v53_v37 = vld [vmem:[%s3501_s0 + $0x138] sm:$0xff] }
  0x90   :  { %930 = vmatmul.mubr.f32.gmra.mrb[38].mxu0 %v189_v38  ;;  %554 = vmatprep.mubr.f32.mxu1 %v195_v39  ;;  %v1745_v38 = vpack.c.bf16 %v374_v35, %v373_v34  ;;  %v57_v39 = vld [vmem:[%s3501_s0 + $0x158] sm:$0xff]  ;;  %v31_v34 = vld [vmem:[%s3501_s0 + $0x88] sm:$0xff] }
  0x91   :  { %934 = vmatprep.mubr.f32.mxu0 %v199_v41  ;;  %v375_v41 = vld [vmem:[%s3500_s1 + $0x440] sm:$0xff]  ;;  %v151_v35 = vld [vmem:[%s3501_s0 + $0x448] sm:$0xff] }
  0x93   :  { %555 = vmatmul.mubr.f32.gmra.mrb[40].mxu1 %v194_v43  ;;  %v376_v43 = vld [vmem:[%s3500_s1 + $0x448] sm:$0xff] }
  0x94   :  { %935 = vmatmul.mubr.f32.gmra.mrb[40].mxu0 %v198_v44  ;;  %559 = vmatprep.mubr.f32.mxu1 %v204_v46  ;;  %v52_v44 = vld [vmem:[%s3501_s0 + $0x130] sm:$0xff]  ;;  %v62_v46 = vld [vmem:[%s3501_s0 + $0x180] sm:$0xff] }
  0x95   :  { %939 = vmatprep.mubr.f32.mxu0 %v208_v47  ;;  %v1748_v47 = vpack.c.bf16 %v376_v43, %v375_v41  ;;  %v67_v41 = vld [vmem:[%s3501_s0 + $0x1a8] sm:$0xff]  ;;  %v188_v43 = vld [vmem:[%s3501_s0 + $0x570] sm:$0xff] }
  0x97   :  { %560 = vmatmul.mubr.f32.gmra.mrb[42].mxu1 %v203_v48  ;;  %v66_v48 = vld [vmem:[%s3501_s0 + $0x1a0] sm:$0xff] }
  0x98   :  { %940 = vmatmul.mubr.f32.gmra.mrb[42].mxu0 %v207_v49  ;;  %564 = vmatprep.mubr.f32.mxu1 %v213_v50  ;;  %v377_v49 = vld [vmem:[%s3500_s1 + $0x450] sm:$0xff]  ;;  %v378_v50 = vld [vmem:[%s3500_s1 + $0x458] sm:$0xff] }
  0x99   :  { %944 = vmatprep.mubr.f32.mxu0 %v217_v52  ;;  %v61_v52 = vld [vmem:[%s3501_s0 + $0x178] sm:$0xff] }
  0x9b   :  { %565 = vmatmul.mubr.f32.gmra.mrb[44].mxu1 %v212_v54  ;;  %v71_v54 = vld [vmem:[%s3501_s0 + $0x1c8] sm:$0xff] }
  0x9c   :  { %945 = vmatmul.mubr.f32.gmra.mrb[44].mxu0 %v216_v55  ;;  %569 = vmatprep.mubr.f32.mxu1 %v222_v56  ;;  %v1751_v55 = vpack.c.bf16 %v378_v50, %v377_v49  ;;  %v75_v56 = vld [vmem:[%s3501_s0 + $0x1e8] sm:$0xff]  ;;  %v206_v49 = vld [vmem:[%s3501_s0 + $0x600] sm:$0xff]  ;;  %v205_v50 = vld [vmem:[%s3501_s0 + $0x5f8] sm:$0xff] }
  0x9d   :  { %949 = vmatprep.mubr.f32.mxu0 %v226_v58  ;;  %v379_v58 = vld [vmem:[%s3500_s1 + $0x460] sm:$0xff] }
  0x9f   :  { %570 = vmatmul.mubr.f32.gmra.mrb[46].mxu1 %v221_v59  ;;  %v380_v59 = vld [vmem:[%s3500_s1 + $0x468] sm:$0xff] }
  0xa0   :  { %950 = vmatmul.mubr.f32.gmra.mrb[46].mxu0 %v225_v60  ;;  %574 = vmatprep.mubr.f32.mxu1 %v231_v61  ;;  %v70_v60 = vld [vmem:[%s3501_s0 + $0x1c0] sm:$0xff]  ;;  %v80_v61 = vld [vmem:[%s3501_s0 + $0x210] sm:$0xff] }
  0xa1   :  { %954 = vmatprep.mubr.f32.mxu0 %v235_v1  ;;  %v1754_v1 = vpack.c.bf16 %v380_v59, %v379_v58  ;;  %v223_v58 = vld [vmem:[%s3501_s0 + $0x688] sm:$0xff]  ;;  %v112_v59 = vld [vmem:[%s3501_s0 + $0x310] sm:$0xff] }
  0xa3   :  { %575 = vmatmul.mubr.f32.gmra.mrb[48].mxu1 %v230_v2  ;;  %v84_v2 = vld [vmem:[%s3501_s0 + $0x230] sm:$0xff] }
  0xa4   :  { %955 = vmatmul.mubr.f32.gmra.mrb[48].mxu0 %v234_v3  ;;  %644 = vmatprep.mubr.f32.mxu1 %v17_v4  ;;  %v381_v3 = vld [vmem:[%s3500_s1 + $0x470] sm:$0xff]  ;;  %v382_v4 = vld [vmem:[%s3500_s1 + $0x478] sm:$0xff] }
  0xa5   :  { %1024 = vmatprep.mubr.f32.mxu0 %v21_v5  ;;  %v79_v5 = vld [vmem:[%s3501_s0 + $0x208] sm:$0xff]  ;;  %v1757_v8 = vpack.c.bf16 %v382_v4, %v381_v3  ;;  %v130_v3 = vld [vmem:[%s3501_s0 + $0x3a0] sm:$0xff] }
  0xa6   :  { %v147_v4 = vld [vmem:[%s3501_s0 + $0x428] sm:$0xff] }
  0xa7   :  { %645 = vmatmul.mubr.f32.vlgmr.msra.gmra.mrb[0].mxu1 %v16_v9  ;;  %v93_v9 = vld [vmem:[%s3501_s0 + $0x278] sm:$0xff] }
  0xa8   :  { %1025 = vmatmul.mubr.f32.vlgmr.msra.gmra.mrb[0].mxu0 %v20_v12  ;;  %649 = vmatprep.mubr.f32.mxu1 %v26_v14  ;;  %v88_v12 = vld [vmem:[%s3501_s0 + $0x250] sm:$0xff]  ;;  %v102_v14 = vld [vmem:[%s3501_s0 + $0x2c0] sm:$0xff] }
  0xa9   :  { %1737 = vmatpush3.bf16.msra.mxu0 %v1736_v13  ;;  %1775 = vmatpush1.bf16.msra.mxu1 %v2241_v42  ;;  %v371_v42 = vld [vmem:[%s3500_s1 + $0x420] sm:$0xff]  ;;  %v92_v13 = vld [vmem:[%s3501_s0 + $0x270] sm:$0xff] }
  0xaa   :  { %1029 = vmatprep.mubr.f32.mxu0 %v30_v17  ;;  %1738 = vmatprep.subr.bf16.mxu0 %v1970_v0  ;;  %v1742_v31 = vpack.c.bf16 %v372_v26, %v371_v42  ;;  %v107_v17 = vld [vmem:[%s3501_s0 + $0x2e8] sm:$0xff]  ;;  %v125_v42 = vld [vmem:[%s3501_s0 + $0x378] sm:$0xff]  ;;  %v124_v26 = vld [vmem:[%s3501_s0 + $0x370] sm:$0xff] }
  0xab   :  { %650 = vmatmul.mubr.f32.gmra.mrb[2].mxu1 %v25_v19  ;;  %1760 = vmatprep.subr.bf16.mxu1 %v1970_v0  ;;  %v106_v19 = vld [vmem:[%s3501_s0 + $0x2e0] sm:$0xff] }
  0xac   :  { %1030 = vmatmul.mubr.f32.gmra.mrb[2].mxu0 %v29_v21  ;;  %654 = vmatprep.mubr.f32.mxu1 %v35_v23  ;;  %v110_v21 = vld [vmem:[%s3501_s0 + $0x300] sm:$0xff]  ;;  %v116_v23 = vld [vmem:[%s3501_s0 + $0x330] sm:$0xff] }
  0xad   :  { %1034 = vmatprep.mubr.f32.mxu0 %v39_v25  ;;  %1740 = vmatpush3.bf16.msra.mxu0 %v1739_v24  ;;  %v115_v24 = vld [vmem:[%s3501_s0 + $0x328] sm:$0xff] }
  0xae   :  { %1776 = vmatpush1.bf16.msra.mxu1 %v2273_v53  ;;  %1741 = vmatprep.subr.bf16.mxu0 %v1970_v0  ;;  %v43_v53 = vld [vmem:[%s3501_s0 + $0xe8] sm:$0xff] }
  0xaf   :  { %655 = vmatmul.mubr.f32.gmra.mrb[4].mxu1 %v34_v27  ;;  %1761 = vmatprep.subr.bf16.mxu1 %v1970_v0  ;;  %v119_v25 = vld [vmem:[%s3501_s0 + $0x348] sm:$0xff]  ;;  %v128_v27 = vld [vmem:[%s3501_s0 + $0x390] sm:$0xff] }
  0xb0   :  { %1035 = vmatmul.mubr.f32.gmra.mrb[4].mxu0 %v38_v28  ;;  %659 = vmatprep.mubr.f32.mxu1 %v44_v29  ;;  %v134_v28 = vld [vmem:[%s3501_s0 + $0x3c0] sm:$0xff]  ;;  %v1972_v29 = vmov 0.0  }
  0xb1   :  { %1039 = vmatprep.mubr.f32.mxu0 %v48_v32  ;;  %1743 = vmatpush3.bf16.msra.mxu0 %v1742_v31  ;;  %v22_v31 = vld [vmem:[%s3501_s0 + $0x40] sm:$0xff] }
  0xb2   :  { %1777 = vmatpush1.bf16.msra.mxu1 %v2302_v63  ;;  %1744 = vmatprep.subr.bf16.mxu0 %v1970_v0  ;;  %v56_v63 = vld [vmem:[%s3501_s0 + $0x150] sm:$0xff]  ;;  %v142_v32 = vld [vmem:[%s3501_s0 + $0x400] sm:$0xff] }
  0xb3   :  { %660 = vmatmul.mubr.f32.gmra.mrb[6].mxu1 %v43_v53  ;;  %1762 = vmatprep.subr.bf16.mxu1 %v1970_v0  ;;  %v40_v53 = vld [vmem:[%s3501_s0 + $0xd0] sm:$0xff] }
  0xb4   :  { %1040 = vmatmul.mubr.f32.gmra.mrb[6].mxu0 %v47_v36  ;;  %664 = vmatprep.mubr.f32.mxu1 %v53_v37  ;;  %v160_v36 = vld [vmem:[%s3501_s0 + $0x490] sm:$0xff]  ;;  %v49_v37 = vld [vmem:[%s3501_s0 + $0x118] sm:$0xff] }
  0xb5   :  { %1044 = vmatprep.mubr.f32.mxu0 %v57_v39  ;;  %1746 = vmatpush3.bf16.msra.mxu0 %v1745_v38  ;;  %v58_v38 = vld [vmem:[%s3501_s0 + $0x160] sm:$0xff]  ;;  %v179_v39 = vld [vmem:[%s3501_s0 + $0x528] sm:$0xff] }
  0xb6   :  { %1778 = vmatpush1.bf16.msra.mxu1 %v2331_v10  ;;  %1747 = vmatprep.subr.bf16.mxu0 %v1970_v0  ;;  %v65_v10 = vld [vmem:[%s3501_s0 + $0x198] sm:$0xff] }
  0xb7   :  { %665 = vmatmul.mubr.f32.gmra.mrb[8].mxu1 %v52_v44  ;;  %1763 = vmatprep.subr.bf16.mxu1 %v1970_v0  ;;  %v187_v44 = vld [vmem:[%s3501_s0 + $0x568] sm:$0xff] }
  0xb8   :  { %1045 = vmatmul.mubr.f32.gmra.mrb[8].mxu0 %v56_v63  ;;  %669 = vmatprep.mubr.f32.mxu1 %v62_v46  ;;  %v76_v63 = vld [vmem:[%s3501_s0 + $0x1f0] sm:$0xff]  ;;  %v197_v46 = vld [vmem:[%s3501_s0 + $0x5b8] sm:$0xff] }
  0xb9   :  { %1049 = vmatprep.mubr.f32.mxu0 %v66_v48  ;;  %1749 = vmatpush3.bf16.msra.mxu0 %v1748_v47  ;;  %v196_v47 = vld [vmem:[%s3501_s0 + $0x5b0] sm:$0xff]  ;;  %v85_v48 = vld [vmem:[%s3501_s0 + $0x238] sm:$0xff] }
  0xba   :  { %1779 = vmatpush1.bf16.msra.mxu1 %v2360_v20  ;;  %1750 = vmatprep.subr.bf16.mxu0 %v1970_v0  ;;  %v74_v20 = vld [vmem:[%s3501_s0 + $0x1e0] sm:$0xff] }
  0xbb   :  { %670 = vmatmul.mubr.f32.gmra.mrb[10].mxu1 %v61_v52  ;;  %1764 = vmatprep.subr.bf16.mxu1 %v1970_v0  ;;  %v94_v52 = vld [vmem:[%s3501_s0 + $0x280] sm:$0xff] }
  0xbc   :  { %1050 = vmatmul.mubr.f32.gmra.mrb[10].mxu0 %v65_v10  ;;  %674 = vmatprep.mubr.f32.mxu1 %v71_v54  ;;  %v215_v10 = vld [vmem:[%s3501_s0 + $0x648] sm:$0xff]  ;;  %v214_v54 = vld [vmem:[%s3501_s0 + $0x640] sm:$0xff] }
  0xbd   :  { %1054 = vmatprep.mubr.f32.mxu0 %v75_v56  ;;  %1752 = vmatpush3.bf16.msra.mxu0 %v1751_v55  ;;  %v103_v55 = vld [vmem:[%s3501_s0 + $0x2c8] sm:$0xff]  ;;  %v224_v56 = vld [vmem:[%s3501_s0 + $0x690] sm:$0xff] }
  0xbe   :  { %1780 = vmatpush1.bf16.msra.mxu1 %v2389_v30  ;;  %1753 = vmatprep.subr.bf16.mxu0 %v1970_v0  ;;  %v83_v30 = vld [vmem:[%s3501_s0 + $0x228] sm:$0xff] }
  0xbf   :  { %675 = vmatmul.mubr.f32.gmra.mrb[12].mxu1 %v70_v60  ;;  %1765 = vmatprep.subr.bf16.mxu1 %v1970_v0  ;;  %v233_v60 = vld [vmem:[%s3501_s0 + $0x6d8] sm:$0xff] }
  0xc0   :  { %1055 = vmatmul.mubr.f32.gmra.mrb[12].mxu0 %v74_v20  ;;  %679 = vmatprep.mubr.f32.mxu1 %v80_v61  ;;  %v232_v20 = vld [vmem:[%s3501_s0 + $0x6d0] sm:$0xff]  ;;  %v121_v61 = vld [vmem:[%s3501_s0 + $0x358] sm:$0xff] }
  0xc1   :  { %1059 = vmatprep.mubr.f32.mxu0 %v84_v2  ;;  %1755 = vmatpush3.bf16.msra.mxu0 %v1754_v1  ;;  %v138_v1 = vld [vmem:[%s3501_s0 + $0x3e0] sm:$0xff]  ;;  %v137_v2 = vld [vmem:[%s3501_s0 + $0x3d8] sm:$0xff] }
  0xc2   :  { %1781 = vmatpush1.bf16.msra.mxu1 %v2418_v40  ;;  %1756 = vmatprep.subr.bf16.mxu0 %v1970_v0  ;;  %v98_v40 = vld [vmem:[%s3501_s0 + $0x2a0] sm:$0xff] }
  0xc3   :  { %680 = vmatmul.mubr.f32.gmra.mrb[14].mxu1 %v79_v5  ;;  %1766 = vmatprep.subr.bf16.mxu1 %v1970_v0  ;;  %v146_v5 = vld [vmem:[%s3501_s0 + $0x420] sm:$0xff] }
  0xc4   :  { %1060 = vmatmul.mubr.f32.gmra.mrb[14].mxu0 %v83_v30  ;;  %684 = vmatprep.mubr.f32.mxu1 %v89_v7  ;;  %v139_v30 = vld [vmem:[%s3501_s0 + $0x3e8] sm:$0xff]  ;;  %v156_v7 = vld [vmem:[%s3501_s0 + $0x470] sm:$0xff] }
  0xc5   :  { %1064 = vmatprep.mubr.f32.mxu0 %v93_v9  ;;  %1758 = vmatpush3.bf16.msra.mxu0 %v1757_v8  ;;  %v155_v8 = vld [vmem:[%s3501_s0 + $0x468] sm:$0xff]  ;;  %v148_v9 = vld [vmem:[%s3501_s0 + $0x430] sm:$0xff] }
  0xc6   :  { %1782 = vmatpush1.bf16.msra.mxu1 %v2447_v51  ;;  %v111_v51 = vld [vmem:[%s3501_s0 + $0x308] sm:$0xff] }
  0xc7   :  { %685 = vmatmul.mubr.f32.gmra.mrb[16].mxu1 %v88_v12  ;;  %1767 = vmatprep.subr.bf16.mxu1 %v1970_v0  ;;  %v165_v12 = vld [vmem:[%s3501_s0 + $0x4b8] sm:$0xff] }
  0xc8   :  { %1065 = vmatmul.mubr.f32.gmra.mrb[16].mxu0 %v92_v13  ;;  %689 = vmatprep.mubr.f32.mxu1 %v98_v40  ;;  %v164_v13 = vld [vmem:[%s3501_s0 + $0x4b0] sm:$0xff]  ;;  %v157_v40 = vld [vmem:[%s3501_s0 + $0x478] sm:$0xff] }
  0xc9   :  { %1069 = vmatprep.mubr.f32.mxu0 %v102_v14  ;;  %v174_v14 = vld [vmem:[%s3501_s0 + $0x500] sm:$0xff] }
  0xca   :  { %1783 = vmatpush1.bf16.msra.mxu1 %v2476_v62  ;;  %v120_v62 = vld [vmem:[%s3501_s0 + $0x350] sm:$0xff] }
  0xcb   :  { %690 = vmatmul.mubr.f32.gmra.mrb[18].mxu1 %v97_v15  ;;  %1768 = vmatprep.subr.bf16.mxu1 %v1970_v0  ;;  %v173_v15 = vld [vmem:[%s3501_s0 + $0x4f8] sm:$0xff] }
  0xcc   :  { %1070 = vmatmul.mubr.f32.gmra.mrb[18].mxu0 %v101_v16  ;;  %694 = vmatprep.mubr.f32.mxu1 %v107_v17  ;;  %v166_v16 = vld [vmem:[%s3501_s0 + $0x4c0] sm:$0xff]  ;;  %v183_v17 = vld [vmem:[%s3501_s0 + $0x548] sm:$0xff] }
  0xcd   :  { %1074 = vmatprep.mubr.f32.mxu0 %v111_v51  ;;  %v182_v51 = vld [vmem:[%s3501_s0 + $0x540] sm:$0xff] }
  0xce   :  { %1784 = vmatpush1.bf16.msra.mxu1 %v2505_v11  ;;  %v129_v11 = vld [vmem:[%s3501_s0 + $0x398] sm:$0xff] }
  0xcf   :  { %695 = vmatmul.mubr.f32.gmra.mrb[20].mxu1 %v106_v19  ;;  %1769 = vmatprep.subr.bf16.mxu1 %v1970_v0  ;;  %v175_v19 = vld [vmem:[%s3501_s0 + $0x508] sm:$0xff] }
  0xd0   :  { %1075 = vmatmul.mubr.f32.gmra.mrb[20].mxu0 %v110_v21  ;;  %699 = vmatprep.mubr.f32.mxu1 %v116_v23  ;;  %v192_v21 = vld [vmem:[%s3501_s0 + $0x590] sm:$0xff]  ;;  %v191_v23 = vld [vmem:[%s3501_s0 + $0x588] sm:$0xff] }
  0xd1   :  { %1079 = vmatprep.mubr.f32.mxu0 %v120_v62  ;;  %v184_v62 = vld [vmem:[%s3501_s0 + $0x550] sm:$0xff] }
  0xd2   :  { %1785 = vmatpush1.bf16.msra.mxu1 %v2534_v22  ;;  %v133_v22 = vld [vmem:[%s3501_s0 + $0x3b8] sm:$0xff] }
  0xd3   :  { %700 = vmatmul.mubr.f32.gmra.mrb[22].mxu1 %v115_v24  ;;  %1770 = vmatprep.subr.bf16.mxu1 %v1970_v0  ;;  %v201_v24 = vld [vmem:[%s3501_s0 + $0x5d8] sm:$0xff] }
  0xd4   :  { %1080 = vmatmul.mubr.f32.gmra.mrb[22].mxu0 %v119_v25  ;;  %704 = vmatprep.mubr.f32.mxu1 %v125_v42  ;;  %v200_v25 = vld [vmem:[%s3501_s0 + $0x5d0] sm:$0xff]  ;;  %v193_v42 = vld [vmem:[%s3501_s0 + $0x598] sm:$0xff] }
  0xd5   :  { %1084 = vmatprep.mubr.f32.mxu0 %v129_v11  ;;  %v210_v11 = vld [vmem:[%s3501_s0 + $0x620] sm:$0xff] }
  0xd6   :  { %1786 = vmatpush1.bf16.msra.mxu1 %v2563_v33  ;;  %v143_v33 = vld [vmem:[%s3501_s0 + $0x408] sm:$0xff] }
  0xd7   :  { %705 = vmatmul.mubr.f32.gmra.mrb[24].mxu1 %v124_v26  ;;  %1771 = vmatprep.subr.bf16.mxu1 %v1970_v0  ;;  %v209_v26 = vld [vmem:[%s3501_s0 + $0x618] sm:$0xff] }
  0xd8   :  { %1085 = vmatmul.mubr.f32.gmra.mrb[24].mxu0 %v128_v27  ;;  %709 = vmatprep.mubr.f32.mxu1 %v134_v28  ;;  %v202_v27 = vld [vmem:[%s3501_s0 + $0x5e0] sm:$0xff]  ;;  %v219_v28 = vld [vmem:[%s3501_s0 + $0x668] sm:$0xff] }
  0xd9   :  { %1468 = vmatprep.mubr.msk.f32.mxu0 %vm1971_vm0, %v1972_v29 }
  0xda   :  { %1787 = vmatpush1.bf16.msra.mxu1 %v2592_v45  ;;  %v152_v45 = vld [vmem:[%s3501_s0 + $0x450] sm:$0xff] }
  0xdb   :  { %710 = vmatmul.mubr.f32.gmra.mrb[26].mxu1 %v133_v22  ;;  %1772 = vmatprep.subr.bf16.mxu1 %v1970_v0  ;;  %v218_v22 = vld [vmem:[%s3501_s0 + $0x660] sm:$0xff] }
  0xdc   :  { %1469 = vmatmul.mubr.f32.vlgmr.msra.gmra.mrb[0].mxu0 %v22_v31  ;;  %714 = vmatprep.mubr.f32.mxu1 %v143_v33  ;;  %v211_v31 = vld [vmem:[%s3501_s0 + $0x628] sm:$0xff]  ;;  %v228_v33 = vld [vmem:[%s3501_s0 + $0x6b0] sm:$0xff] }
  0xdd   :  { %1471 = vmatprep.mubr.msk.f32.mxu0 %vm1971_vm0, %v1972_v29 }
  0xde   :  { %1788 = vmatpush1.bf16.msra.mxu1 %v2621_v57  ;;  %v161_v57 = vld [vmem:[%s3501_s0 + $0x498] sm:$0xff] }
  0xdf   :  { %715 = vmatmul.mubr.f32.gmra.mrb[28].mxu1 %v142_v32  ;;  %1773 = vmatprep.subr.bf16.mxu1 %v1970_v0  ;;  %v227_v32 = vld [vmem:[%s3501_s0 + $0x6a8] sm:$0xff] }
  0xe0   :  { %1472 = vmatmul.mubr.f32.gmra.mrb[2].mxu0 %v31_v34  ;;  %719 = vmatprep.mubr.f32.mxu1 %v152_v45  ;;  %v220_v34 = vld [vmem:[%s3501_s0 + $0x670] sm:$0xff]  ;;  %v237_v45 = vld [vmem:[%s3501_s0 + $0x6f8] sm:$0xff] }
  0xe1   :  { %1474 = vmatprep.mubr.msk.f32.mxu0 %vm1971_vm0, %v1972_v29 }
  0xe2   :  { %1789 = vmatpush1.bf16.msra.mxu1 %v2650_v6  ;;  %v170_v6 = vld [vmem:[%s3501_s0 + $0x4e0] sm:$0xff] }
  0xe3   :  { %720 = vmatmul.mubr.f32.gmra.mrb[30].mxu1 %v151_v35  ;;  %1774 = vmatprep.subr.bf16.mxu1 %v1970_v0  ;;  %v169_v0 = vld [vmem:[%s3501_s0 + $0x4d8] sm:$0xff]  ;;  %v236_v35 = vld [vmem:[%s3501_s0 + $0x6f0] sm:$0xff] }
  0xe4   :  { %1475 = vmatmul.mubr.f32.gmra.mrb[4].mxu0 %v40_v53  ;;  %724 = vmatprep.mubr.f32.mxu1 %v161_v57  ;;  %v229_v53 = vld [vmem:[%s3501_s0 + $0x6b8] sm:$0xff]  ;;  %v238_v57 = vld [vmem:[%s3501_s0 + $0x700] sm:$0xff] }
  0xe5   :  { %1477 = vmatprep.mubr.msk.f32.mxu0 %vm1971_vm0, %v1972_v29 }
  0xe6   :  { %1790 = vmatpush1.bf16.msra.mxu1 %v2679_v18  ;;  %v178_v18 = vld [vmem:[%s3501_s0 + $0x520] sm:$0xff] }
  0xe7   :  { %725 = vmatmul.mubr.f32.gmra.mrb[32].mxu1 %v160_v36 }
  0xe8   :  { %1478 = vmatmul.mubr.f32.gmra.mrb[6].mxu0 %v49_v37  ;;  %729 = vmatprep.mubr.f32.mxu1 %v170_v6 }
  0xe9   :  { %1480 = vmatprep.mubr.msk.f32.mxu0 %vm1971_vm0, %v1972_v29 }
  0xeb   :  { %730 = vmatmul.mubr.f32.gmra.mrb[34].mxu1 %v169_v0 }
  0xec   :  { %1481 = vmatmul.mubr.f32.gmra.mrb[8].mxu0 %v58_v38  ;;  %734 = vmatprep.mubr.f32.mxu1 %v179_v39 }
  0xed   :  { %1483 = vmatprep.mubr.msk.f32.mxu0 %vm1971_vm0, %v1972_v29 }
  0xef   :  { %735 = vmatmul.mubr.f32.gmra.mrb[36].mxu1 %v178_v18 }
  0xf0   :  { %1484 = vmatmul.mubr.f32.gmra.mrb[10].mxu0 %v67_v41  ;;  %739 = vmatprep.mubr.f32.mxu1 %v188_v43 }
  0xf1   :  { %1486 = vmatprep.mubr.msk.f32.mxu0 %vm1971_vm0, %v1972_v29 }
  0xf3   :  { %740 = vmatmul.mubr.f32.gmra.mrb[38].mxu1 %v187_v44 }
  0xf4   :  { %1487 = vmatmul.mubr.f32.gmra.mrb[12].mxu0 %v76_v63  ;;  %744 = vmatprep.mubr.f32.mxu1 %v197_v46 }
  0xf5   :  { %1489 = vmatprep.mubr.msk.f32.mxu0 %vm1971_vm0, %v1972_v29 }
  0xf7   :  { %745 = vmatmul.mubr.f32.gmra.mrb[40].mxu1 %v196_v47 }
  0xf8   :  { %1490 = vmatmul.mubr.f32.gmra.mrb[14].mxu0 %v85_v48  ;;  %749 = vmatprep.mubr.f32.mxu1 %v206_v49 }
  0xf9   :  { %1492 = vmatprep.mubr.msk.f32.mxu0 %vm1971_vm0, %v1972_v29 }
  0xfb   :  { %750 = vmatmul.mubr.f32.gmra.mrb[42].mxu1 %v205_v50 }
  0xfc   :  { %1493 = vmatmul.mubr.f32.gmra.mrb[16].mxu0 %v94_v52  ;;  %754 = vmatprep.mubr.f32.mxu1 %v215_v10 }
  0xfd   :  { %1495 = vmatprep.mubr.msk.f32.mxu0 %vm1971_vm0, %v1972_v29 }
  0xff   :  { %755 = vmatmul.mubr.f32.gmra.mrb[44].mxu1 %v214_v54 }
 0x100   :  { %1496 = vmatmul.mubr.f32.gmra.mrb[18].mxu0 %v103_v55  ;;  %759 = vmatprep.mubr.f32.mxu1 %v224_v56 }
 0x101   :  { %1498 = vmatprep.mubr.msk.f32.mxu0 %vm1971_vm0, %v1972_v29 }
 0x103   :  { %760 = vmatmul.mubr.f32.gmra.mrb[46].mxu1 %v223_v58 }
 0x104   :  { %1499 = vmatmul.mubr.f32.gmra.mrb[20].mxu0 %v112_v59  ;;  %764 = vmatprep.mubr.f32.mxu1 %v233_v60 }
 0x105   :  { %1501 = vmatprep.mubr.msk.f32.mxu0 %vm1971_vm0, %v1972_v29 }
 0x107   :  { %765 = vmatmul.mubr.f32.gmra.mrb[48].mxu1 %v232_v20 }
 0x108   :  { %1502 = vmatmul.mubr.f32.gmra.mrb[22].mxu0 %v121_v61  ;;  %1089 = vmatprep.mubr.f32.mxu1 %v138_v1 }
 0x109   :  { %1504 = vmatprep.mubr.msk.f32.mxu0 %vm1971_vm0, %v1972_v29 }
 0x10b   :  { %1090 = vmatmul.mubr.f32.vlgmr.msra.gmra.mrb[50].mxu1 %v137_v2 }
 0x10c   :  { %1505 = vmatmul.mubr.f32.gmra.mrb[24].mxu0 %v130_v3  ;;  %1094 = vmatprep.mubr.f32.mxu1 %v147_v4 }
 0x10d   :  { %1507 = vmatprep.mubr.msk.f32.mxu0 %vm1971_vm0, %v1972_v29 }
 0x10f   :  { %1095 = vmatmul.mubr.f32.gmra.mrb[52].mxu1 %v146_v5 }
 0x110   :  { %1508 = vmatmul.mubr.f32.gmra.mrb[50].mxu0 %v139_v30  ;;  %1099 = vmatprep.mubr.f32.mxu1 %v156_v7 }
 0x111   :  { %1510 = vmatprep.mubr.msk.f32.mxu0 %vm1971_vm0, %v1972_v29 }
 0x113   :  { %1100 = vmatmul.mubr.f32.gmra.mrb[54].mxu1 %v155_v8 }
 0x114   :  { %1511 = vmatmul.mubr.f32.gmra.mrb[52].mxu0 %v148_v9  ;;  %1104 = vmatprep.mubr.f32.mxu1 %v165_v12 }
 0x115   :  { %1513 = vmatprep.mubr.msk.f32.mxu0 %vm1971_vm0, %v1972_v29 }
 0x117   :  { %1105 = vmatmul.mubr.f32.gmra.mrb[56].mxu1 %v164_v13 }
 0x118   :  { %1514 = vmatmul.mubr.f32.gmra.mrb[54].mxu0 %v157_v40  ;;  %1109 = vmatprep.mubr.f32.mxu1 %v174_v14 }
 0x119   :  { %1516 = vmatprep.mubr.msk.f32.mxu0 %vm1971_vm0, %v1972_v29 }
 0x11b   :  { %1110 = vmatmul.mubr.f32.gmra.mrb[58].mxu1 %v173_v15 }
 0x11c   :  { %1517 = vmatmul.mubr.f32.gmra.mrb[56].mxu0 %v166_v16  ;;  %1114 = vmatprep.mubr.f32.mxu1 %v183_v17 }
 0x11d   :  { %1519 = vmatprep.mubr.msk.f32.mxu0 %vm1971_vm0, %v1972_v29 }
 0x11f   :  { %1115 = vmatmul.mubr.f32.gmra.mrb[60].mxu1 %v182_v51 }
 0x120   :  { %1520 = vmatmul.mubr.f32.gmra.mrb[58].mxu0 %v175_v19  ;;  %1119 = vmatprep.mubr.f32.mxu1 %v192_v21 }
 0x121   :  { %1522 = vmatprep.mubr.msk.f32.mxu0 %vm1971_vm0, %v1972_v29 }
 0x123   :  { %1120 = vmatmul.mubr.f32.gmra.mrb[62].mxu1 %v191_v23 }
 0x124   :  { %1523 = vmatmul.mubr.f32.gmra.mrb[60].mxu0 %v184_v62  ;;  %1124 = vmatprep.mubr.f32.mxu1 %v201_v24 }
 0x125   :  { %1525 = vmatprep.mubr.msk.f32.mxu0 %vm1971_vm0, %v1972_v29 }
 0x127   :  { %1125 = vmatmul.mubr.f32.gmra.mrb[64].mxu1 %v200_v25  ;;  %v3343_v25 = vld [vmem:[%s3502_s2] ss:$0 sm:$0xff] }
 0x128   :  { %1526 = vmatmul.mubr.f32.gmra.mrb[62].mxu0 %v193_v42  ;;  %1129 = vmatprep.mubr.f32.mxu1 %v210_v11 }
 0x129   :  { %1528 = vmatprep.mubr.msk.f32.mxu0 %vm1971_vm0, %v1972_v29 }
 0x12b   :  { %1130 = vmatmul.mubr.f32.gmra.mrb[66].mxu1 %v209_v26 }
 0x12c   :  { %1529 = vmatmul.mubr.f32.gmra.mrb[64].mxu0 %v202_v27  ;;  %1134 = vmatprep.mubr.f32.mxu1 %v219_v28 }
 0x12d   :  { %1531 = vmatprep.mubr.msk.f32.mxu0 %vm1971_vm0, %v1972_v29 }
 0x12f   :  { %1135 = vmatmul.mubr.f32.gmra.mrb[68].mxu1 %v218_v22 }
 0x130   :  { %1532 = vmatmul.mubr.f32.gmra.mrb[66].mxu0 %v211_v31  ;;  %1139 = vmatprep.mubr.f32.mxu1 %v228_v33 }
 0x131   :  { %1534 = vmatprep.mubr.msk.f32.mxu0 %vm1971_vm0, %v1972_v29 }
 0x133   :  { %1140 = vmatmul.mubr.f32.gmra.mrb[70].mxu1 %v227_v32 }
 0x134   :  { %1535 = vmatmul.mubr.f32.gmra.mrb[68].mxu0 %v220_v34  ;;  %1144 = vmatprep.mubr.f32.mxu1 %v237_v45 }
 0x135   :  { %1537 = vmatprep.mubr.msk.f32.mxu0 %vm1971_vm0, %v1972_v29 }
 0x137   :  { %1145 = vmatmul.mubr.f32.gmra.mrb[72].mxu1 %v236_v35 }
 0x138   :  { %1538 = vmatmul.mubr.f32.gmra.mrb[70].mxu0 %v229_v53 }
 0x139   :  { %1540 = vmatprep.mubr.msk.f32.mxu0 %vm1971_vm0, %v1972_v29 }
 0x13c   :  { %1541 = vmatmul.mubr.f32.gmra.mrb[72].mxu0 %v238_v57 }
 0x14b   :  { %v901_v36 = vpop.f32.mrb[26].mxu0 }
 0x14c   :  { %v903_v37 = vpop.f32.mrb[27].mxu0 }
 0x14f   :  { %v3302_v6 = vpop.f32.mrb[28].mxu0 }
 0x150   :  { %v908_v0 = vpop.f32.mrb[29].mxu0 }
 0x153   :  { %v3304_v38 = vpop.f32.mrb[30].mxu0 }
 0x154   :  { %v913_v39 = vpop.f32.mrb[31].mxu0 }
 0x157   :  { %v3306_v18 = vpop.f32.mrb[32].mxu0 }
 0x158   :  { %v918_v41 = vpop.f32.mrb[33].mxu0 }
 0x15b   :  { %v3308_v43 = vpop.f32.mrb[34].mxu0 }
 0x15c   :  { %v923_v44 = vpop.f32.mrb[35].mxu0 }
 0x15f   :  { %v3310_v29 = vpop.f32.mrb[36].mxu0 }
 0x160   :  { %v928_v63 = vpop.f32.mrb[37].mxu0 }
 0x163   :  { %v3312_v46 = vpop.f32.mrb[38].mxu0 }
 0x164   :  { %v933_v47 = vpop.f32.mrb[39].mxu0 }
 0x167   :  { %v3314_v48 = vpop.f32.mrb[40].mxu0 }
 0x168   :  { %v938_v49 = vpop.f32.mrb[41].mxu0 }
 0x16b   :  { %v3316_v50 = vpop.f32.mrb[42].mxu0 }
 0x16c   :  { %v943_v52 = vpop.f32.mrb[43].mxu0 }
 0x16f   :  { %v3318_v10 = vpop.f32.mrb[44].mxu0 }
 0x170   :  { %v948_v54 = vpop.f32.mrb[45].mxu0 }
 0x173   :  { %v3320_v55 = vpop.f32.mrb[46].mxu0 }
 0x174   :  { %v953_v56 = vpop.f32.mrb[47].mxu0 }
 0x177   :  { %v3322_v58 = vpop.f32.mrb[48].mxu0 }
 0x178   :  { %v958_v59 = vpop.f32.mrb[49].mxu0 }
 0x17a   :  { %v646_v60 = vpop.f32.mrb[0].mxu1 }
 0x17b   :  { %v648_v20 = vpop.f32.mrb[1].mxu1  ;;  %v1791_v11 = vadd.f32 %v3343_v25, %v646_v60 }
 0x17e   :  { %v651_v61 = vpop.f32.mrb[2].mxu1 }
 0x17f   :  { %v653_v1 = vpop.f32.mrb[3].mxu1  ;;  %v1793_v34 = vadd.f32 %v3343_v25, %v651_v61 }
 0x182   :  { %v656_v2 = vpop.f32.mrb[4].mxu1 }
 0x183   :  { %v658_v3 = vpop.f32.mrb[5].mxu1 }
 0x186   :  { %v661_v4 = vpop.f32.mrb[6].mxu1 }
 0x187   :  { %v663_v5 = vpop.f32.mrb[7].mxu1 }
 0x18a   :  { %v666_v30 = vpop.f32.mrb[8].mxu1 }
 0x18b   :  { %v668_v7 = vpop.f32.mrb[9].mxu1 }
 0x18e   :  { %v3324_v8 = vpop.f32.mrb[10].mxu1 }
 0x18f   :  { %v673_v9 = vpop.f32.mrb[11].mxu1 }
 0x192   :  { %v3326_v12 = vpop.f32.mrb[12].mxu1 }
 0x193   :  { %v678_v13 = vpop.f32.mrb[13].mxu1 }
 0x196   :  { %v3328_v40 = vpop.f32.mrb[14].mxu1 }
 0x197   :  { %v683_v14 = vpop.f32.mrb[15].mxu1 }
 0x19a   :  { %v3330_v15 = vpop.f32.mrb[16].mxu1 }
 0x19b   :  { %v688_v16 = vpop.f32.mrb[17].mxu1 }
 0x19e   :  { %v3332_v17 = vpop.f32.mrb[18].mxu1 }
 0x19f   :  { %v693_v51 = vpop.f32.mrb[19].mxu1 }
 0x1a2   :  { %v3334_v19 = vpop.f32.mrb[20].mxu1 }
 0x1a3   :  { %v698_v21 = vpop.f32.mrb[21].mxu1 }
 0x1a6   :  { %v3336_v23 = vpop.f32.mrb[22].mxu1 }
 0x1a7   :  { %v703_v62 = vpop.f32.mrb[23].mxu1 }
 0x1aa   :  { %v3338_v24 = vpop.f32.mrb[24].mxu1 }
 0x1ab   :  { %v708_v42 = vpop.f32.mrb[25].mxu1 }
 0x1ae   :  { %v711_v26 = vpop.f32.mrb[26].mxu1 }
 0x1af   :  { %v1817_v27 = vadd.f32 %v3343_v25, %v711_v26  ;;  %v1216_v28 = vpop.f32.mrb[0].mxu0  ;;  %v713_v22 = vpop.f32.mrb[27].mxu1 }
 0x1b0   :  { %v1792_v31 = vadd.f32 %v1791_v11, %v1216_v28  ;;  %v1470_v33 = vpop.f32.mrb[1].mxu0 }
 0x1b1   :  { %v3347_v32 = vadd.f32 %v1817_v27, %v901_v36  ;;  %v1795_v36 = vadd.f32 %v3343_v25, %v656_v2 }
 0x1b2   :  { %v1340_v45 = vmax.f32 %v1792_v31, 0.0  ;;  %v716_v35 = vpop.f32.mrb[28].mxu1 }
 0x1b3   :  { %v1821_v53 = vadd.f32 %v3343_v25, %v716_v35  ;;  %v1221_v57 = vpop.f32.mrb[2].mxu0  ;;  %v718_v37 = vpop.f32.mrb[29].mxu1 }
 0x1b4   :  { %1365 = vst [vmem:[%s3503_s3] sm:$0xff] %v1340_v45  ;;  %v1794_v0 = vadd.f32 %v1793_v34, %v1221_v57  ;;  %v1473_v39 = vpop.f32.mrb[3].mxu0 }
 0x1b5   :  { %v3355_v41 = vadd.f32 %v1821_v53, %v3302_v6  ;;  %v1797_v6 = vadd.f32 %v3343_v25, %v661_v4 }
 0x1b6   :  { %v1341_v44 = vmax.f32 %v1794_v0, 0.0  ;;  %v721_v63 = vpop.f32.mrb[30].mxu1 }
 0x1b7   :  { %v1825_v47 = vadd.f32 %v3343_v25, %v721_v63  ;;  %v1226_v49 = vpop.f32.mrb[4].mxu0  ;;  %v723_v52 = vpop.f32.mrb[31].mxu1 }
 0x1b8   :  { %1366 = vst [vmem:[%s3503_s3 + $0x8] sm:$0xff] %v1341_v44  ;;  %v1796_v54 = vadd.f32 %v1795_v36, %v1226_v49  ;;  %v1476_v56 = vpop.f32.mrb[5].mxu0 }
 0x1b9   :  { %v3363_v59 = vadd.f32 %v1825_v47, %v3304_v38  ;;  %v1799_v38 = vadd.f32 %v3343_v25, %v666_v30 }
 0x1ba   :  { %v1342_v60 = vmax.f32 %v1796_v54, 0.0  ;;  %v726_v20 = vpop.f32.mrb[32].mxu1 }
 0x1bb   :  { %v1829_v61 = vadd.f32 %v3343_v25, %v726_v20  ;;  %v1231_v1 = vpop.f32.mrb[6].mxu0  ;;  %v728_v2 = vpop.f32.mrb[33].mxu1 }
 0x1bc   :  { %1367 = vst [vmem:[%s3503_s3 + $0x10] sm:$0xff] %v1342_v60  ;;  %v1798_v3 = vadd.f32 %v1797_v6, %v1231_v1  ;;  %v1479_v5 = vpop.f32.mrb[7].mxu0 }
 0x1bd   :  { %v3371_v7 = vadd.f32 %v1829_v61, %v3306_v18  ;;  %v1801_v18 = vadd.f32 %v3343_v25, %v3324_v8 }
 0x1be   :  { %v1343_v9 = vmax.f32 %v1798_v3, 0.0  ;;  %v731_v13 = vpop.f32.mrb[34].mxu1 }
 0x1bf   :  { %v1833_v4 = vadd.f32 %v3343_v25, %v731_v13  ;;  %v1236_v14 = vpop.f32.mrb[8].mxu0  ;;  %v733_v16 = vpop.f32.mrb[35].mxu1 }
 0x1c0   :  { %1368 = vst [vmem:[%s3503_s3 + $0x18] sm:$0xff] %v1343_v9  ;;  %v1800_v51 = vadd.f32 %v1799_v38, %v1236_v14  ;;  %v1482_v21 = vpop.f32.mrb[9].mxu0 }
 0x1c1   :  { %v3379_v62 = vadd.f32 %v1833_v4, %v3308_v43  ;;  %v1803_v43 = vadd.f32 %v3343_v25, %v3326_v12 }
 0x1c2   :  { %v1344_v42 = vmax.f32 %v1800_v51, 0.0  ;;  %v736_v30 = vpop.f32.mrb[36].mxu1 }
 0x1c3   :  { %v1837_v11 = vadd.f32 %v3343_v25, %v736_v30  ;;  %v1241_v26 = vpop.f32.mrb[10].mxu0  ;;  %v738_v27 = vpop.f32.mrb[37].mxu1 }
 0x1c4   :  { %1369 = vst [vmem:[%s3503_s3 + $0x20] sm:$0xff] %v1344_v42  ;;  %v1802_v28 = vadd.f32 %v1801_v18, %v1241_v26  ;;  %v1485_v22 = vpop.f32.mrb[11].mxu0 }
 0x1c5   :  { %v3388_v31 = vadd.f32 %v1837_v11, %v3310_v29  ;;  %v1805_v29 = vadd.f32 %v3343_v25, %v3328_v40 }
 0x1c6   :  { %v1345_v33 = vmax.f32 %v1802_v28, 0.0  ;;  %v741_v8 = vpop.f32.mrb[38].mxu1 }
 0x1c7   :  { %v1841_v34 = vadd.f32 %v3343_v25, %v741_v8  ;;  %v1246_v45 = vpop.f32.mrb[12].mxu0  ;;  %v743_v35 = vpop.f32.mrb[39].mxu1 }
 0x1c8   :  { %1370 = vst [vmem:[%s3503_s3 + $0x28] sm:$0xff] %v1345_v33  ;;  %v1804_v53 = vadd.f32 %v1803_v43, %v1246_v45  ;;  %v1488_v57 = vpop.f32.mrb[13].mxu0 }
 0x1c9   :  { %v3397_v37 = vadd.f32 %v1841_v34, %v3312_v46  ;;  %v1807_v46 = vadd.f32 %v3343_v25, %v3330_v15 }
 0x1ca   :  { %v1346_v0 = vmax.f32 %v1804_v53, 0.0  ;;  %v746_v12 = vpop.f32.mrb[40].mxu1 }
 0x1cb   :  { %v1845_v39 = vadd.f32 %v3343_v25, %v746_v12  ;;  %v1251_v36 = vpop.f32.mrb[14].mxu0  ;;  %v748_v44 = vpop.f32.mrb[41].mxu1 }
 0x1cc   :  { %1371 = vst [vmem:[%s3503_s3 + $0x30] sm:$0xff] %v1346_v0  ;;  %v1806_v63 = vadd.f32 %v1805_v29, %v1251_v36  ;;  %v1491_v47 = vpop.f32.mrb[15].mxu0 }
 0x1cd   :  { %v3406_v49 = vadd.f32 %v1845_v39, %v3314_v48  ;;  %v1809_v48 = vadd.f32 %v3343_v25, %v3332_v17 }
 0x1ce   :  { %v1347_v52 = vmax.f32 %v1806_v63, 0.0  ;;  %v751_v40 = vpop.f32.mrb[42].mxu1 }
 0x1cf   :  { %v1849_v54 = vadd.f32 %v3343_v25, %v751_v40  ;;  %v1256_v56 = vpop.f32.mrb[16].mxu0  ;;  %v753_v6 = vpop.f32.mrb[43].mxu1 }
 0x1d0   :  { %1372 = vst [vmem:[%s3503_s3 + $0x38] sm:$0xff] %v1347_v52  ;;  %v1808_v60 = vadd.f32 %v1807_v46, %v1256_v56  ;;  %v1494_v20 = vpop.f32.mrb[17].mxu0 }
 0x1d1   :  { %v3415_v61 = vadd.f32 %v1849_v54, %v3316_v50  ;;  %v1811_v50 = vadd.f32 %v3343_v25, %v3334_v19 }
 0x1d2   :  { %v1348_v1 = vmax.f32 %v1808_v60, 0.0  ;;  %v756_v15 = vpop.f32.mrb[44].mxu1 }
 0x1d3   :  { %v1853_v2 = vadd.f32 %v3343_v25, %v756_v15  ;;  %v1261_v3 = vpop.f32.mrb[18].mxu0  ;;  %v758_v5 = vpop.f32.mrb[45].mxu1 }
 0x1d4   :  { %1373 = vst [vmem:[%s3503_s3 + $0x40] sm:$0xff] %v1348_v1  ;;  %v1810_v38 = vadd.f32 %v1809_v48, %v1261_v3  ;;  %v1497_v9 = vpop.f32.mrb[19].mxu0 }
 0x1d5   :  { %v3424_v13 = vadd.f32 %v1853_v2, %v3318_v10  ;;  %v1813_v10 = vadd.f32 %v3343_v25, %v3336_v23 }
 0x1d6   :  { %v1349_v4 = vmax.f32 %v1810_v38, 0.0  ;;  %v761_v17 = vpop.f32.mrb[46].mxu1 }
 0x1d7   :  { %v1857_v14 = vadd.f32 %v3343_v25, %v761_v17  ;;  %v1266_v16 = vpop.f32.mrb[20].mxu0  ;;  %v763_v51 = vpop.f32.mrb[47].mxu1 }
 0x1d8   :  { %1374 = vst [vmem:[%s3503_s3 + $0x48] sm:$0xff] %v1349_v4  ;;  %v1812_v21 = vadd.f32 %v1811_v50, %v1266_v16  ;;  %v1500_v18 = vpop.f32.mrb[21].mxu0 }
 0x1d9   :  { %v3433_v42 = vadd.f32 %v1857_v14, %v3320_v55  ;;  %v1815_v55 = vadd.f32 %v3343_v25, %v3338_v24 }
 0x1da   :  { %v1350_v30 = vmax.f32 %v1812_v21, 0.0  ;;  %v766_v19 = vpop.f32.mrb[48].mxu1 }
 0x1db   :  { %v1861_v11 = vadd.f32 %v3343_v25, %v766_v19  ;;  %v1271_v26 = vpop.f32.mrb[22].mxu0  ;;  %v768_v27 = vpop.f32.mrb[49].mxu1 }
 0x1dc   :  { %1375 = vst [vmem:[%s3503_s3 + $0x50] sm:$0xff] %v1350_v30  ;;  %v1814_v28 = vadd.f32 %v1813_v10, %v1271_v26  ;;  %v1503_v22 = vpop.f32.mrb[23].mxu0 }
 0x1dd   :  { %v3442_v43 = vadd.f32 %v1861_v11, %v3322_v58 }
 0x1de   :  { %v1351_v33 = vmax.f32 %v1814_v28, 0.0  ;;  %v1091_v23 = vpop.f32.mrb[50].mxu1 }
 0x1df   :  { %v1819_v8 = vadd.f32 %v3347_v32, %v1091_v23  ;;  %v1276_v34 = vpop.f32.mrb[24].mxu0  ;;  %v1093_v45 = vpop.f32.mrb[51].mxu1 }
 0x1e0   :  { %1376 = vst [vmem:[%s3503_s3 + $0x58] sm:$0xff] %v1351_v33  ;;  %v1816_v35 = vadd.f32 %v1815_v55, %v1276_v34  ;;  %v1506_v53 = vpop.f32.mrb[25].mxu0 }
 0x1e2   :  { %v1352_v57 = vmax.f32 %v1816_v35, 0.0  ;;  %v1096_v29 = vpop.f32.mrb[52].mxu1 }
 0x1e3   :  { %v1823_v58 = vadd.f32 %v3355_v41, %v1096_v29  ;;  %v1281_v0 = vpop.f32.mrb[50].mxu0  ;;  %v1098_v12 = vpop.f32.mrb[53].mxu1 }
 0x1e4   :  { %1377 = vst [vmem:[%s3503_s3 + $0x60] sm:$0xff] %v1352_v57  ;;  %v1820_v24 = vadd.f32 %v1819_v8, %v1281_v0  ;;  %v1509_v25 = vpop.f32.mrb[51].mxu0 }
 0x1e6   :  { %v1353_v32 = vmax.f32 %v1820_v24, 0.0  ;;  %v1101_v39 = vpop.f32.mrb[54].mxu1 }
 0x1e7   :  { %v1827_v36 = vadd.f32 %v3363_v59, %v1101_v39  ;;  %v1286_v44 = vpop.f32.mrb[52].mxu0  ;;  %v1103_v63 = vpop.f32.mrb[55].mxu1 }
 0x1e8   :  { %1378 = vst [vmem:[%s3503_s3 + $0x68] sm:$0xff] %v1353_v32  ;;  %v1824_v47 = vadd.f32 %v1823_v58, %v1286_v44  ;;  %v1512_v41 = vpop.f32.mrb[53].mxu0 }
 0x1ea   :  { %v1354_v46 = vmax.f32 %v1824_v47, 0.0  ;;  %v1106_v52 = vpop.f32.mrb[56].mxu1 }
 0x1eb   :  { %v1831_v40 = vadd.f32 %v3371_v7, %v1106_v52  ;;  %v1291_v54 = vpop.f32.mrb[54].mxu0  ;;  %v1108_v56 = vpop.f32.mrb[57].mxu1 }
 0x1ec   :  { %1379 = vst [vmem:[%s3503_s3 + $0x70] sm:$0xff] %v1354_v46  ;;  %v1828_v6 = vadd.f32 %v1827_v36, %v1291_v54  ;;  %v1515_v59 = vpop.f32.mrb[55].mxu0 }
 0x1ee   :  { %v1355_v60 = vmax.f32 %v1828_v6, 0.0  ;;  %v1111_v20 = vpop.f32.mrb[58].mxu1 }
 0x1ef   :  { %v1835_v48 = vadd.f32 %v3379_v62, %v1111_v20  ;;  %v1296_v1 = vpop.f32.mrb[56].mxu0  ;;  %v1113_v15 = vpop.f32.mrb[59].mxu1 }
 0x1f0   :  { %1380 = vst [vmem:[%s3503_s3 + $0x78] sm:$0xff] %v1355_v60  ;;  %v1832_v2 = vadd.f32 %v1831_v40, %v1296_v1  ;;  %v1518_v7 = vpop.f32.mrb[57].mxu0 }
 0x1f2   :  { %v1356_v3 = vmax.f32 %v1832_v2, 0.0  ;;  %v1116_v5 = vpop.f32.mrb[60].mxu1 }
 0x1f3   :  { %v1839_v38 = vadd.f32 %v3388_v31, %v1116_v5  ;;  %v1301_v9 = vpop.f32.mrb[58].mxu0  ;;  %v1118_v50 = vpop.f32.mrb[61].mxu1 }
 0x1f4   :  { %1381 = vst [vmem:[%s3503_s3 + $0x80] sm:$0xff] %v1356_v3  ;;  %v1836_v4 = vadd.f32 %v1835_v48, %v1301_v9  ;;  %v1521_v62 = vpop.f32.mrb[59].mxu0 }
 0x1f6   :  { %v1357_v17 = vmax.f32 %v1836_v4, 0.0  ;;  %v1121_v14 = vpop.f32.mrb[62].mxu1 }
 0x1f7   :  { %v1843_v16 = vadd.f32 %v3397_v37, %v1121_v14  ;;  %v1306_v51 = vpop.f32.mrb[60].mxu0  ;;  %v1123_v21 = vpop.f32.mrb[63].mxu1 }
 0x1f8   :  { %1382 = vst [vmem:[%s3503_s3 + $0x88] sm:$0xff] %v1357_v17  ;;  %v1840_v18 = vadd.f32 %v1839_v38, %v1306_v51  ;;  %v1524_v31 = vpop.f32.mrb[61].mxu0 }
 0x1fa   :  { %v1358_v10 = vmax.f32 %v1840_v18, 0.0  ;;  %v1126_v30 = vpop.f32.mrb[64].mxu1 }
 0x1fb   :  { %v1847_v19 = vadd.f32 %v3406_v49, %v1126_v30  ;;  %v1311_v11 = vpop.f32.mrb[62].mxu0  ;;  %v1128_v26 = vpop.f32.mrb[65].mxu1 }
 0x1fc   :  { %1383 = vst [vmem:[%s3503_s3 + $0x90] sm:$0xff] %v1358_v10  ;;  %v1844_v27 = vadd.f32 %v1843_v16, %v1311_v11  ;;  %v1527_v37 = vpop.f32.mrb[63].mxu0 }
 0x1fe   :  { %v1359_v28 = vmax.f32 %v1844_v27, 0.0  ;;  %v1131_v22 = vpop.f32.mrb[66].mxu1 }
 0x1ff   :  { %v1851_v55 = vadd.f32 %v3415_v61, %v1131_v22  ;;  %v1316_v33 = vpop.f32.mrb[64].mxu0  ;;  %v1133_v23 = vpop.f32.mrb[67].mxu1 }
 0x200   :  { %1384 = vst [vmem:[%s3503_s3 + $0x98] sm:$0xff] %v1359_v28  ;;  %v1848_v8 = vadd.f32 %v1847_v19, %v1316_v33  ;;  %v1530_v49 = vpop.f32.mrb[65].mxu0 }
 0x202   :  { %v1360_v34 = vmax.f32 %v1848_v8, 0.0  ;;  %v1136_v45 = vpop.f32.mrb[68].mxu1 }
 0x203   :  { %v1855_v35 = vadd.f32 %v3424_v13, %v1136_v45  ;;  %v1321_v53 = vpop.f32.mrb[66].mxu0  ;;  %v1138_v57 = vpop.f32.mrb[69].mxu1 }
 0x204   :  { %1385 = vst [vmem:[%s3503_s3 + $0xa0] sm:$0xff] %v1360_v34  ;;  %v1852_v29 = vadd.f32 %v1851_v55, %v1321_v53  ;;  %v1533_v61 = vpop.f32.mrb[67].mxu0 }
 0x206   :  { %v1361_v58 = vmax.f32 %v1852_v29, 0.0  ;;  %v1141_v0 = vpop.f32.mrb[70].mxu1 }
 0x207   :  { %v1859_v12 = vadd.f32 %v3433_v42, %v1141_v0  ;;  %v1326_v24 = vpop.f32.mrb[68].mxu0  ;;  %v1143_v25 = vpop.f32.mrb[71].mxu1 }
 0x208   :  { %1386 = vst [vmem:[%s3503_s3 + $0xa8] sm:$0xff] %v1361_v58  ;;  %v1856_v32 = vadd.f32 %v1855_v35, %v1326_v24  ;;  %v1536_v13 = vpop.f32.mrb[69].mxu0 }
 0x20a   :  { %v1362_v39 = vmax.f32 %v1856_v32, 0.0  ;;  %v1146_v36 = vpop.f32.mrb[72].mxu1 }
 0x20b   :  { %v1863_v44 = vadd.f32 %v3442_v43, %v1146_v36  ;;  %v1331_v63 = vpop.f32.mrb[70].mxu0  ;;  %v1148_v47 = vpop.f32.mrb[73].mxu1 }
 0x20c   :  { %1387 = vst [vmem:[%s3503_s3 + $0xb0] sm:$0xff] %v1362_v39  ;;  %v1860_v41 = vadd.f32 %v1859_v12, %v1331_v63  ;;  %v1539_v42 = vpop.f32.mrb[71].mxu0 }
 0x20e   :  { %v1363_v46 = vmax.f32 %v1860_v41, 0.0 }
 0x20f   :  { %v1336_v52 = vpop.f32.mrb[72].mxu0 }
 0x210   :  { %1388 = vst [vmem:[%s3503_s3 + $0xb8] sm:$0xff] %v1363_v46  ;;  %v1864_v40 = vadd.f32 %v1863_v44, %v1336_v52  ;;  %v1542_v54 = vpop.f32.mrb[73].mxu0 }
 0x212   :  { %v1364_v56 = vmax.f32 %v1864_v40, 0.0 }
 0x214   :  { %1389 = vst [vmem:[%s3503_s3 + $0xc0] sm:$0xff] %v1364_v56 }

// kernel: session5_model_forward.12
= control target key start
LH: loop header
LB: loop body
LE: loop exit
PB: predicated region body
PF: predicated region fallthrough
CT: control target
= control target key end

     0   :  { %s243_s6 = smov 0   ;;  %s260_s0 = inlined_call_operand.vmem [shape: f32[2,8,4,512], index: 0, kind: input, shape index: {}]   ;;  %s261_s1 = inlined_call_operand.vmem [shape: f32[2,4,4,256], index: 1, kind: output, shape index: {}]  }
   0x1 LB: > { %s204_s7 = sadd.s32 4294967295, %s231_s6   ;;  %p208_p0 = scmp.ge.s32.totalorder %s231_s6, 1  ;;  %s231_s6 = sphi %s243_s6, %s11_s6  }
   0x2   : > { %p87_p1 = scmp.lt.s32.totalorder %s231_s6, 3 }
   0x4   : > { %p88_p2 = pnand %p208_p0, %p87_p1 }
   0x5   : > { %p107_p3 = scmp.lt.s32.totalorder (!%p88_p2), %s204_s7, 1 }
   0x6   : > { %91 = sbr.rel (%p88_p2) target bundleno = 27 (0x1b), region = 24 }
   0xd   : > { %s263_s7 = smov (!%p107_p3, %s204_s7), 1 }
   0xe   : > { %s215_s8 = sshll.u32 %s263_s7, 7  ;;  %s216_s12 = sshll.u32 %s263_s7, 5 }
   0xf   : > { %s111_s11 = scalar_lea.vmem %s260_s0, %s215_s8  ;;  %s116_s15 = scalar_lea.vmem %s261_s1, %s216_s12 }
  0x10   : > { %v117_v0 = vld [vmem:[%s111_s11] sm:$0xff]  ;;  %v118_v1 = vld [vmem:[%s111_s11 + $0x8] sm:$0xff]  ;;  %v119_v2 = vld [vmem:[%s111_s11 + $0x10] sm:$0xff] }
  0x11   : > { %v120_v3 = vld [vmem:[%s111_s11 + $0x18] sm:$0xff]  ;;  %v133_v4 = vmax.f32 %v117_v0, %v118_v1  ;;  %v121_v5 = vld [vmem:[%s111_s11 + $0x20] sm:$0xff]  ;;  %v122_v6 = vld [vmem:[%s111_s11 + $0x28] sm:$0xff] }
  0x12   : > { %v134_v7 = vmax.f32 %v119_v2, %v120_v3  ;;  %v123_v8 = vld [vmem:[%s111_s11 + $0x30] sm:$0xff]  ;;  %v124_v9 = vld [vmem:[%s111_s11 + $0x38] sm:$0xff]  ;;  %v135_v10 = vmax.f32 %v121_v5, %v122_v6  ;;  %v125_v11 = vld [vmem:[%s111_s11 + $0x40] sm:$0xff] }
  0x13   : > { %v136_v12 = vmax.f32 %v123_v8, %v124_v9  ;;  %v126_v13 = vld [vmem:[%s111_s11 + $0x48] sm:$0xff]  ;;  %v127_v14 = vld [vmem:[%s111_s11 + $0x50] sm:$0xff]  ;;  %v128_v15 = vld [vmem:[%s111_s11 + $0x58] sm:$0xff] }
  0x14   : > { %v141_v16 = vmax.f32 %v133_v4, %v134_v7  ;;  %v137_v17 = vmax.f32 %v125_v11, %v126_v13  ;;  %v138_v18 = vmax.f32 %v127_v14, %v128_v15  ;;  %v129_v19 = vld [vmem:[%s111_s11 + $0x60] sm:$0xff]  ;;  %v130_v20 = vld [vmem:[%s111_s11 + $0x68] sm:$0xff]  ;;  %v131_v21 = vld [vmem:[%s111_s11 + $0x70] sm:$0xff] }
  0x15   : > { %v142_v22 = vmax.f32 %v135_v10, %v136_v12  ;;  %v132_v23 = vld [vmem:[%s111_s11 + $0x78] sm:$0xff]  ;;  %v139_v24 = vmax.f32 %v129_v19, %v130_v20 }
  0x16   : > { %145 = vst [vmem:[%s116_s15] sm:$0xff] %v141_v16  ;;  %v143_v25 = vmax.f32 %v137_v17, %v138_v18  ;;  %v140_v26 = vmax.f32 %v131_v21, %v132_v23 }
  0x17   : > { %146 = vst [vmem:[%s116_s15 + $0x8] sm:$0xff] %v142_v22 }
  0x18   : > { %147 = vst [vmem:[%s116_s15 + $0x10] sm:$0xff] %v143_v25  ;;  %v144_v27 = vmax.f32 %v139_v24, %v140_v26 }
  0x1a   : > { %148 = vst [vmem:[%s116_s15 + $0x18] sm:$0xff] %v144_v27 }
  0x1b PF: > { %s11_s6 = sadd.s32 1, %s231_s6  }
  0x1c   : > { %p8_p4 = scmp.ge.s32.totalorder %s11_s6, 4  }
  0x1e   :  { %10 = sbr.rel (!%p8_p4) target bundleno = 1 (0x1), region = 54 }

// kernel: session5_model_forward.11
= control target key start
LH: loop header
LB: loop body
LE: loop exit
PB: predicated region body
PF: predicated region fallthrough
CT: control target
= control target key end

     0   :  { %s3525_s1 = inlined_call_operand.vmem [shape: f32[1152,256], index: 1, kind: input, shape index: {}]   ;;  %s3526_s0 = inlined_call_operand.vmem [shape: f32[128,1152], index: 0, kind: input, shape index: {}]   ;;  %s3527_s2 = inlined_call_operand.vmem [shape: f32[1,256], index: 2, kind: input, shape index: {}]   ;;  %s3528_s3 = inlined_call_operand.vmem [shape: f32[128,256], index: 3, kind: output, shape index: {}]  }
   0x1   :  { %v159_v0 = vld [vmem:[%s3525_s1 + $0x8] sm:$0xff]  ;;  %v161_v1 = vld [vmem:[%s3525_s1 + $0x18] sm:$0xff]  ;;  %v158_v5 = vld [vmem:[%s3525_s1] sm:$0xff] }
   0x2   :  { %v287_v2 = vld [vmem:[%s3525_s1 + $0x408] sm:$0xff]  ;;  %v1331_v3 = vpack.c.bf16 %v161_v1, %v159_v0  ;;  %v289_v4 = vld [vmem:[%s3525_s1 + $0x418] sm:$0xff]  ;;  %v160_v6 = vld [vmem:[%s3525_s1 + $0x10] sm:$0xff] }
   0x3   :  { %v1459_v7 = vpack.c.bf16 %v289_v4, %v287_v2  ;;  %v1333_v8 = vpack.c.bf16 %v160_v6, %v158_v5  ;;  %v286_v9 = vld [vmem:[%s3525_s1 + $0x400] sm:$0xff]  ;;  %v288_v10 = vld [vmem:[%s3525_s1 + $0x410] sm:$0xff]  ;;  %v163_v11 = vld [vmem:[%s3525_s1 + $0x28] sm:$0xff] }
   0x4   :  { %1332 = vmatprep.subr.bf16.mxu1 %v1331_v3  ;;  %v1461_v12 = vpack.c.bf16 %v288_v10, %v286_v9  ;;  %v165_v13 = vld [vmem:[%s3525_s1 + $0x38] sm:$0xff]  ;;  %v291_v14 = vld [vmem:[%s3525_s1 + $0x428] sm:$0xff]  ;;  %v162_v18 = vld [vmem:[%s3525_s1 + $0x20] sm:$0xff] }
   0x5   :  { %v293_v15 = vld [vmem:[%s3525_s1 + $0x438] sm:$0xff]  ;;  %1460 = vmatprep.subr.bf16.mxu0 %v1459_v7  ;;  %1334 = vmatpush1.bf16.msra.mxu1 %v1333_v8  ;;  %v1335_v16 = vpack.c.bf16 %v165_v13, %v163_v11  ;;  %v164_v19 = vld [vmem:[%s3525_s1 + $0x30] sm:$0xff]  ;;  %v290_v20 = vld [vmem:[%s3525_s1 + $0x420] sm:$0xff] }
   0x6   :  { %v1463_v17 = vpack.c.bf16 %v293_v15, %v291_v14  ;;  %1462 = vmatpush1.bf16.msra.mxu0 %v1461_v12  ;;  %v1337_v21 = vpack.c.bf16 %v164_v19, %v162_v18  ;;  %v292_v22 = vld [vmem:[%s3525_s1 + $0x430] sm:$0xff]  ;;  %v167_v23 = vld [vmem:[%s3525_s1 + $0x48] sm:$0xff]  ;;  %v169_v24 = vld [vmem:[%s3525_s1 + $0x58] sm:$0xff] }
   0x7   :  { %1336 = vmatprep.subr.bf16.mxu1 %v1335_v16  ;;  %v1465_v25 = vpack.c.bf16 %v292_v22, %v290_v20  ;;  %v1339_v26 = vpack.c.bf16 %v169_v24, %v167_v23  ;;  %v295_v27 = vld [vmem:[%s3525_s1 + $0x448] sm:$0xff]  ;;  %v297_v28 = vld [vmem:[%s3525_s1 + $0x458] sm:$0xff]  ;;  %v166_v29 = vld [vmem:[%s3525_s1 + $0x40] sm:$0xff] }
   0x8   :  { %1464 = vmatprep.subr.bf16.mxu0 %v1463_v17  ;;  %v1467_v30 = vpack.c.bf16 %v297_v28, %v295_v27  ;;  %v168_v31 = vld [vmem:[%s3525_s1 + $0x50] sm:$0xff]  ;;  %v294_v32 = vld [vmem:[%s3525_s1 + $0x440] sm:$0xff]  ;;  %v171_v35 = vld [vmem:[%s3525_s1 + $0x68] sm:$0xff] }
   0x9   :  { %v296_v33 = vld [vmem:[%s3525_s1 + $0x450] sm:$0xff]  ;;  %1338 = vmatpush1.bf16.msra.mxu1 %v1337_v21  ;;  %v1341_v34 = vpack.c.bf16 %v168_v31, %v166_v29  ;;  %v173_v36 = vld [vmem:[%s3525_s1 + $0x78] sm:$0xff]  ;;  %v299_v37 = vld [vmem:[%s3525_s1 + $0x468] sm:$0xff] }
   0xa   :  { %1466 = vmatpush1.bf16.msra.mxu0 %v1465_v25  ;;  %1340 = vmatprep.subr.bf16.mxu1 %v1339_v26  ;;  %v1469_v38 = vpack.c.bf16 %v296_v33, %v294_v32  ;;  %v1343_v39 = vpack.c.bf16 %v173_v36, %v171_v35  ;;  %v301_v40 = vld [vmem:[%s3525_s1 + $0x478] sm:$0xff]  ;;  %v170_v41 = vld [vmem:[%s3525_s1 + $0x60] sm:$0xff]  ;;  %v172_v42 = vld [vmem:[%s3525_s1 + $0x70] sm:$0xff] }
   0xb   :  { %1468 = vmatprep.subr.bf16.mxu0 %v1467_v30  ;;  %v1471_v43 = vpack.c.bf16 %v301_v40, %v299_v37  ;;  %v298_v44 = vld [vmem:[%s3525_s1 + $0x460] sm:$0xff]  ;;  %v300_v45 = vld [vmem:[%s3525_s1 + $0x470] sm:$0xff]  ;;  %v175_v46 = vld [vmem:[%s3525_s1 + $0x88] sm:$0xff]  ;;  %v1345_v50 = vpack.c.bf16 %v172_v42, %v170_v41 }
   0xc   :  { %v177_v47 = vld [vmem:[%s3525_s1 + $0x98] sm:$0xff]  ;;  %v303_v48 = vld [vmem:[%s3525_s1 + $0x488] sm:$0xff]  ;;  %v1473_v51 = vpack.c.bf16 %v300_v45, %v298_v44  ;;  %v174_v53 = vld [vmem:[%s3525_s1 + $0x80] sm:$0xff] }
   0xd   :  { %v305_v49 = vld [vmem:[%s3525_s1 + $0x498] sm:$0xff]  ;;  %1342 = vmatpush1.bf16.msra.mxu1 %v1341_v34  ;;  %v1347_v52 = vpack.c.bf16 %v177_v47, %v175_v46  ;;  %v176_v54 = vld [vmem:[%s3525_s1 + $0x90] sm:$0xff]  ;;  %v302_v55 = vld [vmem:[%s3525_s1 + $0x480] sm:$0xff] }
   0xe   :  { %1470 = vmatpush1.bf16.msra.mxu0 %v1469_v38  ;;  %1344 = vmatprep.subr.bf16.mxu1 %v1343_v39  ;;  %v1475_v56 = vpack.c.bf16 %v305_v49, %v303_v48  ;;  %v304_v57 = vld [vmem:[%s3525_s1 + $0x490] sm:$0xff]  ;;  %v179_v58 = vld [vmem:[%s3525_s1 + $0xa8] sm:$0xff]  ;;  %v181_v59 = vld [vmem:[%s3525_s1 + $0xb8] sm:$0xff]  ;;  %v1349_v62 = vpack.c.bf16 %v176_v54, %v174_v53 }
   0xf   :  { %1472 = vmatprep.subr.bf16.mxu0 %v1471_v43  ;;  %v307_v60 = vld [vmem:[%s3525_s1 + $0x4a8] sm:$0xff]  ;;  %v309_v61 = vld [vmem:[%s3525_s1 + $0x4b8] sm:$0xff]  ;;  %v1477_v63 = vpack.c.bf16 %v304_v57, %v302_v55  ;;  %v1351_v0 = vpack.c.bf16 %v181_v59, %v179_v58  ;;  %v178_v1 = vld [vmem:[%s3525_s1 + $0xa0] sm:$0xff] }
  0x10   :  { %v180_v2 = vld [vmem:[%s3525_s1 + $0xb0] sm:$0xff]  ;;  %v306_v3 = vld [vmem:[%s3525_s1 + $0x4a0] sm:$0xff]  ;;  %v1479_v4 = vpack.c.bf16 %v309_v61, %v307_v60  ;;  %v183_v6 = vld [vmem:[%s3525_s1 + $0xc8] sm:$0xff] }
  0x11   :  { %1346 = vmatpush1.bf16.msra.mxu1 %v1345_v50  ;;  %v308_v5 = vld [vmem:[%s3525_s1 + $0x4b0] sm:$0xff]  ;;  %v185_v7 = vld [vmem:[%s3525_s1 + $0xd8] sm:$0xff]  ;;  %v311_v8 = vld [vmem:[%s3525_s1 + $0x4c8] sm:$0xff]  ;;  %v1353_v10 = vpack.c.bf16 %v180_v2, %v178_v1 }
  0x12   :  { %1474 = vmatpush1.bf16.msra.mxu0 %v1473_v51  ;;  %1348 = vmatprep.subr.bf16.mxu1 %v1347_v52  ;;  %v313_v9 = vld [vmem:[%s3525_s1 + $0x4d8] sm:$0xff]  ;;  %v1481_v11 = vpack.c.bf16 %v308_v5, %v306_v3  ;;  %v1355_v12 = vpack.c.bf16 %v185_v7, %v183_v6  ;;  %v182_v13 = vld [vmem:[%s3525_s1 + $0xc0] sm:$0xff]  ;;  %v184_v14 = vld [vmem:[%s3525_s1 + $0xd0] sm:$0xff] }
  0x13   :  { %1476 = vmatprep.subr.bf16.mxu0 %v1475_v56  ;;  %v310_v15 = vld [vmem:[%s3525_s1 + $0x4c0] sm:$0xff]  ;;  %v1483_v16 = vpack.c.bf16 %v313_v9, %v311_v8  ;;  %v312_v17 = vld [vmem:[%s3525_s1 + $0x4d0] sm:$0xff]  ;;  %v187_v18 = vld [vmem:[%s3525_s1 + $0xe8] sm:$0xff]  ;;  %v1357_v22 = vpack.c.bf16 %v184_v14, %v182_v13 }
  0x14   :  { %v189_v19 = vld [vmem:[%s3525_s1 + $0xf8] sm:$0xff]  ;;  %v315_v20 = vld [vmem:[%s3525_s1 + $0x4e8] sm:$0xff]  ;;  %v1485_v23 = vpack.c.bf16 %v312_v17, %v310_v15  ;;  %v186_v25 = vld [vmem:[%s3525_s1 + $0xe0] sm:$0xff] }
  0x15   :  { %1350 = vmatpush1.bf16.msra.mxu1 %v1349_v62  ;;  %v317_v21 = vld [vmem:[%s3525_s1 + $0x4f8] sm:$0xff]  ;;  %v1359_v24 = vpack.c.bf16 %v189_v19, %v187_v18  ;;  %v188_v26 = vld [vmem:[%s3525_s1 + $0xf0] sm:$0xff]  ;;  %v314_v27 = vld [vmem:[%s3525_s1 + $0x4e0] sm:$0xff] }
  0x16   :  { %1478 = vmatpush1.bf16.msra.mxu0 %v1477_v63  ;;  %1352 = vmatprep.subr.bf16.mxu1 %v1351_v0  ;;  %v1487_v28 = vpack.c.bf16 %v317_v21, %v315_v20  ;;  %v316_v29 = vld [vmem:[%s3525_s1 + $0x4f0] sm:$0xff]  ;;  %v191_v30 = vld [vmem:[%s3525_s1 + $0x108] sm:$0xff]  ;;  %v193_v31 = vld [vmem:[%s3525_s1 + $0x118] sm:$0xff]  ;;  %v1361_v34 = vpack.c.bf16 %v188_v26, %v186_v25 }
  0x17   :  { %1480 = vmatprep.subr.bf16.mxu0 %v1479_v4  ;;  %v319_v32 = vld [vmem:[%s3525_s1 + $0x508] sm:$0xff]  ;;  %v321_v33 = vld [vmem:[%s3525_s1 + $0x518] sm:$0xff]  ;;  %v1489_v35 = vpack.c.bf16 %v316_v29, %v314_v27  ;;  %v1363_v36 = vpack.c.bf16 %v193_v31, %v191_v30  ;;  %v190_v37 = vld [vmem:[%s3525_s1 + $0x100] sm:$0xff] }
  0x18   :  { %v192_v38 = vld [vmem:[%s3525_s1 + $0x110] sm:$0xff]  ;;  %v318_v39 = vld [vmem:[%s3525_s1 + $0x500] sm:$0xff]  ;;  %v1491_v40 = vpack.c.bf16 %v321_v33, %v319_v32  ;;  %v195_v42 = vld [vmem:[%s3525_s1 + $0x128] sm:$0xff] }
  0x19   :  { %1354 = vmatpush1.bf16.msra.mxu1 %v1353_v10  ;;  %v320_v41 = vld [vmem:[%s3525_s1 + $0x510] sm:$0xff]  ;;  %v197_v43 = vld [vmem:[%s3525_s1 + $0x138] sm:$0xff]  ;;  %v323_v44 = vld [vmem:[%s3525_s1 + $0x528] sm:$0xff]  ;;  %v1365_v46 = vpack.c.bf16 %v192_v38, %v190_v37 }
  0x1a   :  { %1482 = vmatpush1.bf16.msra.mxu0 %v1481_v11  ;;  %1356 = vmatprep.subr.bf16.mxu1 %v1355_v12  ;;  %v325_v45 = vld [vmem:[%s3525_s1 + $0x538] sm:$0xff]  ;;  %v1493_v47 = vpack.c.bf16 %v320_v41, %v318_v39  ;;  %v1367_v48 = vpack.c.bf16 %v197_v43, %v195_v42  ;;  %v194_v49 = vld [vmem:[%s3525_s1 + $0x120] sm:$0xff]  ;;  %v196_v50 = vld [vmem:[%s3525_s1 + $0x130] sm:$0xff] }
  0x1b   :  { %1484 = vmatprep.subr.bf16.mxu0 %v1483_v16  ;;  %v322_v51 = vld [vmem:[%s3525_s1 + $0x520] sm:$0xff]  ;;  %v1495_v52 = vpack.c.bf16 %v325_v45, %v323_v44  ;;  %v324_v53 = vld [vmem:[%s3525_s1 + $0x530] sm:$0xff]  ;;  %v199_v54 = vld [vmem:[%s3525_s1 + $0x148] sm:$0xff]  ;;  %v1369_v58 = vpack.c.bf16 %v196_v50, %v194_v49 }
  0x1c   :  { %v201_v55 = vld [vmem:[%s3525_s1 + $0x158] sm:$0xff]  ;;  %v327_v56 = vld [vmem:[%s3525_s1 + $0x548] sm:$0xff]  ;;  %v1497_v59 = vpack.c.bf16 %v324_v53, %v322_v51  ;;  %v198_v61 = vld [vmem:[%s3525_s1 + $0x140] sm:$0xff] }
  0x1d   :  { %1358 = vmatpush1.bf16.msra.mxu1 %v1357_v22  ;;  %v329_v57 = vld [vmem:[%s3525_s1 + $0x558] sm:$0xff]  ;;  %v1371_v60 = vpack.c.bf16 %v201_v55, %v199_v54  ;;  %v200_v62 = vld [vmem:[%s3525_s1 + $0x150] sm:$0xff]  ;;  %v326_v63 = vld [vmem:[%s3525_s1 + $0x540] sm:$0xff] }
  0x1e   :  { %1486 = vmatpush1.bf16.msra.mxu0 %v1485_v23  ;;  %1360 = vmatprep.subr.bf16.mxu1 %v1359_v24  ;;  %v1499_v0 = vpack.c.bf16 %v329_v57, %v327_v56  ;;  %v328_v1 = vld [vmem:[%s3525_s1 + $0x550] sm:$0xff]  ;;  %v203_v2 = vld [vmem:[%s3525_s1 + $0x168] sm:$0xff]  ;;  %v205_v3 = vld [vmem:[%s3525_s1 + $0x178] sm:$0xff]  ;;  %v1373_v6 = vpack.c.bf16 %v200_v62, %v198_v61 }
  0x1f   :  { %1488 = vmatprep.subr.bf16.mxu0 %v1487_v28  ;;  %v331_v4 = vld [vmem:[%s3525_s1 + $0x568] sm:$0xff]  ;;  %v333_v5 = vld [vmem:[%s3525_s1 + $0x578] sm:$0xff]  ;;  %v202_v7 = vld [vmem:[%s3525_s1 + $0x160] sm:$0xff]  ;;  %v1501_v8 = vpack.c.bf16 %v328_v1, %v326_v63  ;;  %v1375_v9 = vpack.c.bf16 %v205_v3, %v203_v2 }
  0x20   :  { %v204_v10 = vld [vmem:[%s3525_s1 + $0x170] sm:$0xff]  ;;  %v330_v11 = vld [vmem:[%s3525_s1 + $0x560] sm:$0xff]  ;;  %v1503_v13 = vpack.c.bf16 %v333_v5, %v331_v4  ;;  %v207_v14 = vld [vmem:[%s3525_s1 + $0x188] sm:$0xff] }
  0x21   :  { %1362 = vmatpush1.bf16.msra.mxu1 %v1361_v34  ;;  %v332_v12 = vld [vmem:[%s3525_s1 + $0x570] sm:$0xff]  ;;  %v209_v15 = vld [vmem:[%s3525_s1 + $0x198] sm:$0xff]  ;;  %v15_v16 = vld [vmem:[%s3526_s0 + $0x8] sm:$0xff]  ;;  %v1377_v20 = vpack.c.bf16 %v204_v10, %v202_v7 }
  0x22   :  { %1490 = vmatpush1.bf16.msra.mxu0 %v1489_v35  ;;  %1364 = vmatprep.subr.bf16.mxu1 %v1363_v36  ;;  %v335_v17 = vld [vmem:[%s3525_s1 + $0x588] sm:$0xff]  ;;  %v337_v18 = vld [vmem:[%s3525_s1 + $0x598] sm:$0xff]  ;;  %v1505_v21 = vpack.c.bf16 %v332_v12, %v330_v11  ;;  %v1379_v22 = vpack.c.bf16 %v209_v15, %v207_v14  ;;  %v206_v23 = vld [vmem:[%s3525_s1 + $0x180] sm:$0xff] }
  0x23   :  { %1492 = vmatprep.subr.bf16.mxu0 %v1491_v40  ;;  %522 = vmatprep.mubr.f32.mxu1 %v15_v16  ;;  %v19_v19 = vld [vmem:[%s3526_s0 + $0x28] sm:$0xff]  ;;  %v208_v24 = vld [vmem:[%s3525_s1 + $0x190] sm:$0xff]  ;;  %v334_v25 = vld [vmem:[%s3525_s1 + $0x580] sm:$0xff]  ;;  %v1507_v26 = vpack.c.bf16 %v337_v18, %v335_v17 }
  0x24   :  { %844 = vmatprep.mubr.f32.mxu0 %v19_v19  ;;  %v336_v27 = vld [vmem:[%s3525_s1 + $0x590] sm:$0xff]  ;;  %v211_v28 = vld [vmem:[%s3525_s1 + $0x1a8] sm:$0xff]  ;;  %v213_v29 = vld [vmem:[%s3525_s1 + $0x1b8] sm:$0xff]  ;;  %v1381_v32 = vpack.c.bf16 %v208_v24, %v206_v23 }
  0x25   :  { %1366 = vmatpush1.bf16.msra.mxu1 %v1365_v46  ;;  %v339_v30 = vld [vmem:[%s3525_s1 + $0x5a8] sm:$0xff]  ;;  %v341_v31 = vld [vmem:[%s3525_s1 + $0x5b8] sm:$0xff]  ;;  %v1509_v33 = vpack.c.bf16 %v336_v27, %v334_v25  ;;  %v1383_v34 = vpack.c.bf16 %v213_v29, %v211_v28  ;;  %v210_v35 = vld [vmem:[%s3525_s1 + $0x1a0] sm:$0xff] }
  0x26   :  { %1494 = vmatpush1.bf16.msra.mxu0 %v1493_v47  ;;  %1368 = vmatprep.subr.bf16.mxu1 %v1367_v48  ;;  %v212_v36 = vld [vmem:[%s3525_s1 + $0x1b0] sm:$0xff]  ;;  %v338_v37 = vld [vmem:[%s3525_s1 + $0x5a0] sm:$0xff]  ;;  %v1511_v38 = vpack.c.bf16 %v341_v31, %v339_v30  ;;  %v215_v40 = vld [vmem:[%s3525_s1 + $0x1c8] sm:$0xff] }
  0x27   :  { %1496 = vmatprep.subr.bf16.mxu0 %v1495_v52  ;;  %v340_v39 = vld [vmem:[%s3525_s1 + $0x5b0] sm:$0xff]  ;;  %v217_v41 = vld [vmem:[%s3525_s1 + $0x1d8] sm:$0xff]  ;;  %v343_v42 = vld [vmem:[%s3525_s1 + $0x5c8] sm:$0xff]  ;;  %v1385_v44 = vpack.c.bf16 %v212_v36, %v210_v35 }
  0x28   :  { %v345_v43 = vld [vmem:[%s3525_s1 + $0x5d8] sm:$0xff]  ;;  %v1513_v45 = vpack.c.bf16 %v340_v39, %v338_v37  ;;  %v1387_v46 = vpack.c.bf16 %v217_v41, %v215_v40  ;;  %v214_v47 = vld [vmem:[%s3525_s1 + $0x1c0] sm:$0xff]  ;;  %v216_v48 = vld [vmem:[%s3525_s1 + $0x1d0] sm:$0xff] }
  0x29   :  { %1370 = vmatpush1.bf16.msra.mxu1 %v1369_v58  ;;  %v342_v49 = vld [vmem:[%s3525_s1 + $0x5c0] sm:$0xff]  ;;  %v1515_v50 = vpack.c.bf16 %v345_v43, %v343_v42  ;;  %v344_v51 = vld [vmem:[%s3525_s1 + $0x5d0] sm:$0xff]  ;;  %v219_v52 = vld [vmem:[%s3525_s1 + $0x1e8] sm:$0xff]  ;;  %v1389_v56 = vpack.c.bf16 %v216_v48, %v214_v47 }
  0x2a   :  { %1498 = vmatpush1.bf16.msra.mxu0 %v1497_v59  ;;  %1372 = vmatprep.subr.bf16.mxu1 %v1371_v60  ;;  %v221_v53 = vld [vmem:[%s3525_s1 + $0x1f8] sm:$0xff]  ;;  %v347_v54 = vld [vmem:[%s3525_s1 + $0x5e8] sm:$0xff]  ;;  %v1517_v57 = vpack.c.bf16 %v344_v51, %v342_v49  ;;  %v218_v59 = vld [vmem:[%s3525_s1 + $0x1e0] sm:$0xff] }
  0x2b   :  { %1500 = vmatprep.subr.bf16.mxu0 %v1499_v0  ;;  %v349_v55 = vld [vmem:[%s3525_s1 + $0x5f8] sm:$0xff]  ;;  %v1391_v58 = vpack.c.bf16 %v221_v53, %v219_v52  ;;  %v220_v60 = vld [vmem:[%s3525_s1 + $0x1f0] sm:$0xff]  ;;  %v346_v61 = vld [vmem:[%s3525_s1 + $0x5e0] sm:$0xff] }
  0x2c   :  { %v1519_v62 = vpack.c.bf16 %v349_v55, %v347_v54  ;;  %v348_v63 = vld [vmem:[%s3525_s1 + $0x5f0] sm:$0xff]  ;;  %v223_v0 = vld [vmem:[%s3525_s1 + $0x208] sm:$0xff]  ;;  %v225_v1 = vld [vmem:[%s3525_s1 + $0x218] sm:$0xff]  ;;  %v1393_v4 = vpack.c.bf16 %v220_v60, %v218_v59 }
  0x2d   :  { %1374 = vmatpush1.bf16.msra.mxu1 %v1373_v6  ;;  %v351_v2 = vld [vmem:[%s3525_s1 + $0x608] sm:$0xff]  ;;  %v353_v3 = vld [vmem:[%s3525_s1 + $0x618] sm:$0xff]  ;;  %v1521_v5 = vpack.c.bf16 %v348_v63, %v346_v61  ;;  %v1395_v6 = vpack.c.bf16 %v225_v1, %v223_v0  ;;  %v222_v7 = vld [vmem:[%s3525_s1 + $0x200] sm:$0xff] }
  0x2e   :  { %1502 = vmatpush1.bf16.msra.mxu0 %v1501_v8  ;;  %1376 = vmatprep.subr.bf16.mxu1 %v1375_v9  ;;  %v224_v8 = vld [vmem:[%s3525_s1 + $0x210] sm:$0xff]  ;;  %v2241_v9 = vpack.c.bf16 %v353_v3, %v351_v2  ;;  %v350_v10 = vld [vmem:[%s3525_s1 + $0x600] sm:$0xff]  ;;  %v227_v12 = vld [vmem:[%s3525_s1 + $0x228] sm:$0xff] }
  0x2f   :  { %1504 = vmatprep.subr.bf16.mxu0 %v1503_v13  ;;  %v352_v11 = vld [vmem:[%s3525_s1 + $0x610] sm:$0xff]  ;;  %v229_v13 = vld [vmem:[%s3525_s1 + $0x238] sm:$0xff]  ;;  %v14_v14 = vld [vmem:[%s3526_s0] sm:$0xff]  ;;  %v1397_v15 = vpack.c.bf16 %v224_v8, %v222_v7 }
  0x30   :  { %v355_v16 = vld [vmem:[%s3525_s1 + $0x628] sm:$0xff]  ;;  %v357_v17 = vld [vmem:[%s3525_s1 + $0x638] sm:$0xff]  ;;  %v18_v18 = vld [vmem:[%s3526_s0 + $0x20] sm:$0xff]  ;;  %v2267_v19 = vpack.c.bf16 %v352_v11, %v350_v10  ;;  %v1399_v23 = vpack.c.bf16 %v229_v13, %v227_v12 }
  0x31   :  { %1378 = vmatpush1.bf16.msra.mxu1 %v1377_v20  ;;  %v226_v20 = vld [vmem:[%s3525_s1 + $0x220] sm:$0xff]  ;;  %v356_v25 = vld [vmem:[%s3525_s1 + $0x630] sm:$0xff]  ;;  %v2288_v27 = vpack.c.bf16 %v357_v17, %v355_v16  ;;  %v231_v28 = vld [vmem:[%s3525_s1 + $0x248] sm:$0xff] }
  0x32   :  { %1506 = vmatpush1.bf16.msra.mxu0 %v1505_v21  ;;  %1380 = vmatprep.subr.bf16.mxu1 %v1379_v22  ;;  %v228_v21 = vld [vmem:[%s3525_s1 + $0x230] sm:$0xff]  ;;  %v354_v24 = vld [vmem:[%s3525_s1 + $0x620] sm:$0xff]  ;;  %v233_v29 = vld [vmem:[%s3525_s1 + $0x258] sm:$0xff] }
  0x33   :  { %1508 = vmatprep.subr.bf16.mxu0 %v1507_v26  ;;  %v24_v22 = vld [vmem:[%s3526_s0 + $0x50] sm:$0xff]  ;;  %v23_v30 = vld [vmem:[%s3526_s0 + $0x48] sm:$0xff]  ;;  %v1401_v31 = vpack.c.bf16 %v228_v21, %v226_v20  ;;  %v2309_v35 = vpack.c.bf16 %v356_v25, %v354_v24  ;;  %v230_v36 = vld [vmem:[%s3525_s1 + $0x240] sm:$0xff]  ;;  %v1403_v39 = vpack.c.bf16 %v233_v29, %v231_v28 }
  0x34   :  { %v28_v26 = vld [vmem:[%s3526_s0 + $0x70] sm:$0xff]  ;;  %v358_v40 = vld [vmem:[%s3525_s1 + $0x640] sm:$0xff]  ;;  %v37_v42 = vld [vmem:[%s3526_s0 + $0xb8] sm:$0xff] }
  0x35   :  { %1382 = vmatpush1.bf16.msra.mxu1 %v1381_v32  ;;  %v359_v32 = vld [vmem:[%s3525_s1 + $0x648] sm:$0xff]  ;;  %v232_v37 = vld [vmem:[%s3525_s1 + $0x250] sm:$0xff]  ;;  %v365_v49 = vld [vmem:[%s3525_s1 + $0x678] sm:$0xff] }
  0x36   :  { %1510 = vmatpush1.bf16.msra.mxu0 %v1509_v33  ;;  %1384 = vmatprep.subr.bf16.mxu1 %v1383_v34  ;;  %v361_v33 = vld [vmem:[%s3525_s1 + $0x658] sm:$0xff]  ;;  %v27_v34 = vld [vmem:[%s3526_s0 + $0x68] sm:$0xff]  ;;  %v360_v41 = vld [vmem:[%s3525_s1 + $0x650] sm:$0xff]  ;;  %v1405_v47 = vpack.c.bf16 %v232_v37, %v230_v36 }
  0x37   :  { %1512 = vmatprep.subr.bf16.mxu0 %v1511_v38  ;;  %v33_v38 = vld [vmem:[%s3526_s0 + $0x98] sm:$0xff]  ;;  %v2330_v43 = vpack.c.bf16 %v361_v33, %v359_v32  ;;  %v363_v48 = vld [vmem:[%s3525_s1 + $0x668] sm:$0xff]  ;;  %v2351_v51 = vpack.c.bf16 %v360_v41, %v358_v40  ;;  %v234_v52 = vld [vmem:[%s3525_s1 + $0x260] sm:$0xff] }
  0x38   :  { %v236_v53 = vld [vmem:[%s3525_s1 + $0x270] sm:$0xff]  ;;  %v42_v54 = vld [vmem:[%s3526_s0 + $0xe0] sm:$0xff]  ;;  %v2372_v59 = vpack.c.bf16 %v365_v49, %v363_v48  ;;  %v239_v60 = vld [vmem:[%s3525_s1 + $0x288] sm:$0xff] }
  0x39   :  { %1386 = vmatpush1.bf16.msra.mxu1 %v1385_v44  ;;  %v235_v44 = vld [vmem:[%s3525_s1 + $0x268] sm:$0xff]  ;;  %v241_v61 = vld [vmem:[%s3525_s1 + $0x298] sm:$0xff]  ;;  %v1409_v63 = vpack.c.bf16 %v236_v53, %v234_v52  ;;  %v366_v8 = vld [vmem:[%s3525_s1 + $0x680] sm:$0xff] }
  0x3a   :  { %1514 = vmatpush1.bf16.msra.mxu0 %v1513_v45  ;;  %1388 = vmatprep.subr.bf16.mxu1 %v1387_v46  ;;  %v237_v45 = vld [vmem:[%s3525_s1 + $0x278] sm:$0xff]  ;;  %v32_v46 = vld [vmem:[%s3526_s0 + $0x90] sm:$0xff]  ;;  %v367_v0 = vld [vmem:[%s3525_s1 + $0x688] sm:$0xff]  ;;  %v1411_v7 = vpack.c.bf16 %v241_v61, %v239_v60 }
  0x3b   :  { %1516 = vmatprep.subr.bf16.mxu0 %v1515_v50  ;;  %v36_v50 = vld [vmem:[%s3526_s0 + $0xb0] sm:$0xff]  ;;  %v1407_v55 = vpack.c.bf16 %v237_v45, %v235_v44  ;;  %v369_v1 = vld [vmem:[%s3525_s1 + $0x698] sm:$0xff]  ;;  %v55_v11 = vld [vmem:[%s3526_s0 + $0x148] sm:$0xff] }
  0x3c   :  { %v45_v2 = vld [vmem:[%s3526_s0 + $0xf8] sm:$0xff]  ;;  %v368_v10 = vld [vmem:[%s3525_s1 + $0x690] sm:$0xff]  ;;  %v2414_v12 = vpack.c.bf16 %v369_v1, %v367_v0  ;;  %v243_v13 = vld [vmem:[%s3525_s1 + $0x2a8] sm:$0xff] }
  0x3d   :  { %1390 = vmatpush1.bf16.msra.mxu1 %v1389_v56  ;;  %v362_v56 = vld [vmem:[%s3525_s1 + $0x660] sm:$0xff]  ;;  %v371_v17 = vld [vmem:[%s3525_s1 + $0x6a8] sm:$0xff]  ;;  %v2435_v21 = vpack.c.bf16 %v368_v10, %v366_v8  ;;  %v60_v24 = vld [vmem:[%s3526_s0 + $0x170] sm:$0xff] }
  0x3e   :  { %1518 = vmatpush1.bf16.msra.mxu0 %v1517_v57  ;;  %1392 = vmatprep.subr.bf16.mxu1 %v1391_v58  ;;  %v364_v57 = vld [vmem:[%s3525_s1 + $0x670] sm:$0xff]  ;;  %v46_v58 = vld [vmem:[%s3526_s0 + $0x100] sm:$0xff]  ;;  %v249_v32 = vld [vmem:[%s3525_s1 + $0x2d8] sm:$0xff] }
  0x3f   :  { %1520 = vmatprep.subr.bf16.mxu0 %v1519_v62  ;;  %v41_v62 = vld [vmem:[%s3526_s0 + $0xd8] sm:$0xff]  ;;  %v2393_v3 = vpack.c.bf16 %v364_v57, %v362_v56  ;;  %v54_v20 = vld [vmem:[%s3526_s0 + $0x140] sm:$0xff]  ;;  %v372_v28 = vld [vmem:[%s3525_s1 + $0x6b0] sm:$0xff] }
  0x40   :  { %v64_v29 = vld [vmem:[%s3526_s0 + $0x190] sm:$0xff]  ;;  %v59_v33 = vld [vmem:[%s3526_s0 + $0x168] sm:$0xff]  ;;  %v377_v37 = vld [vmem:[%s3525_s1 + $0x6d8] sm:$0xff] }
  0x41   :  { %1394 = vmatpush1.bf16.msra.mxu1 %v1393_v4  ;;  %v238_v4 = vld [vmem:[%s3525_s1 + $0x280] sm:$0xff]  ;;  %v375_v36 = vld [vmem:[%s3525_s1 + $0x6c8] sm:$0xff]  ;;  %v248_v41 = vld [vmem:[%s3525_s1 + $0x2d0] sm:$0xff] }
  0x42   :  { %1522 = vmatpush1.bf16.msra.mxu0 %v1521_v5  ;;  %1396 = vmatprep.subr.bf16.mxu1 %v1395_v6  ;;  %v240_v5 = vld [vmem:[%s3525_s1 + $0x290] sm:$0xff]  ;;  %v51_v6 = vld [vmem:[%s3526_s0 + $0x128] sm:$0xff]  ;;  %v246_v40 = vld [vmem:[%s3525_s1 + $0x2c0] sm:$0xff]  ;;  %v2498_v48 = vpack.c.bf16 %v377_v37, %v375_v36 }
  0x43   :  { %1524 = vmatprep.subr.bf16.mxu0 %v2241_v9  ;;  %v1413_v16 = vpack.c.bf16 %v240_v5, %v238_v4  ;;  %v374_v45 = vld [vmem:[%s3525_s1 + $0x6c0] sm:$0xff]  ;;  %v251_v49 = vld [vmem:[%s3525_s1 + $0x2e8] sm:$0xff]  ;;  %v68_v52 = vld [vmem:[%s3526_s0 + $0x1b0] sm:$0xff]  ;;  %v1421_v53 = vpack.c.bf16 %v248_v41, %v246_v40 }
  0x44   :  { %523 = vmatmul.mubr.f32.vlgmr.msra.gmra.mrb[0].mxu1 %v14_v14  ;;  %v245_v14 = vld [vmem:[%s3525_s1 + $0x2b8] sm:$0xff]  ;;  %v72_v56 = vld [vmem:[%s3526_s0 + $0x1d0] sm:$0xff]  ;;  %v78_v61 = vld [vmem:[%s3526_s0 + $0x200] sm:$0xff] }
  0x45   :  { %845 = vmatmul.mubr.f32.vlgmr.msra.gmra.mrb[0].mxu0 %v18_v18  ;;  %1398 = vmatpush1.bf16.msra.mxu1 %v1397_v15  ;;  %v50_v15 = vld [vmem:[%s3526_s0 + $0x120] sm:$0xff]  ;;  %v373_v18 = vld [vmem:[%s3525_s1 + $0x6b8] sm:$0xff]  ;;  %v1415_v25 = vpack.c.bf16 %v245_v14, %v243_v13  ;;  %v252_v60 = vld [vmem:[%s3525_s1 + $0x2f0] sm:$0xff] }
  0x46   :  { %1526 = vmatpush1.bf16.msra.mxu0 %v2267_v19  ;;  %528 = vmatprep.mubr.f32.mxu1 %v24_v22  ;;  %v242_v22 = vld [vmem:[%s3525_s1 + $0x2a0] sm:$0xff]  ;;  %v380_v0 = vld [vmem:[%s3525_s1 + $0x6f0] sm:$0xff]  ;;  %v255_v4 = vld [vmem:[%s3525_s1 + $0x308] sm:$0xff] }
  0x47   :  { %850 = vmatprep.mubr.f32.mxu0 %v28_v26  ;;  %1400 = vmatprep.subr.bf16.mxu1 %v1399_v23  ;;  %v244_v23 = vld [vmem:[%s3525_s1 + $0x2b0] sm:$0xff]  ;;  %v370_v26 = vld [vmem:[%s3525_s1 + $0x6a0] sm:$0xff]  ;;  %v257_v5 = vld [vmem:[%s3525_s1 + $0x318] sm:$0xff] }
  0x48   :  { %529 = vmatmul.mubr.f32.gmra.mrb[2].mxu1 %v23_v30  ;;  %1528 = vmatprep.subr.bf16.mxu0 %v2288_v27  ;;  %v2456_v30 = vpack.c.bf16 %v373_v18, %v371_v17  ;;  %v82_v1 = vld [vmem:[%s3526_s0 + $0x220] sm:$0xff]  ;;  %v383_v8 = vld [vmem:[%s3525_s1 + $0x708] sm:$0xff]  ;;  %v385_v10 = vld [vmem:[%s3525_s1 + $0x718] sm:$0xff]  ;;  %v1427_v17 = vpack.c.bf16 %v257_v5, %v255_v4 }
  0x49   :  { %851 = vmatmul.mubr.f32.gmra.mrb[2].mxu0 %v27_v34  ;;  %1402 = vmatpush1.bf16.msra.mxu1 %v1401_v31  ;;  %v247_v31 = vld [vmem:[%s3525_s1 + $0x2c8] sm:$0xff]  ;;  %v1417_v34 = vpack.c.bf16 %v244_v23, %v242_v22  ;;  %v254_v14 = vld [vmem:[%s3525_s1 + $0x300] sm:$0xff]  ;;  %v2582_v23 = vpack.c.bf16 %v385_v10, %v383_v8  ;;  %v260_v36 = vld [vmem:[%s3525_s1 + $0x330] sm:$0xff] }
  0x4a   :  { %1530 = vmatpush1.bf16.msra.mxu0 %v2309_v35  ;;  %534 = vmatprep.mubr.f32.mxu1 %v33_v38  ;;  %v63_v38 = vld [vmem:[%s3526_s0 + $0x188] sm:$0xff]  ;;  %v1419_v44 = vpack.c.bf16 %v249_v32, %v247_v31  ;;  %v382_v18 = vld [vmem:[%s3525_s1 + $0x700] sm:$0xff]  ;;  %v389_v31 = vld [vmem:[%s3525_s1 + $0x738] sm:$0xff] }
  0x4b   :  { %856 = vmatprep.mubr.f32.mxu0 %v37_v42  ;;  %1404 = vmatprep.subr.bf16.mxu1 %v1403_v39  ;;  %v2477_v39 = vpack.c.bf16 %v372_v28, %v370_v26  ;;  %v69_v42 = vld [vmem:[%s3526_s0 + $0x1b8] sm:$0xff]  ;;  %v91_v22 = vld [vmem:[%s3526_s0 + $0x268] sm:$0xff]  ;;  %v86_v26 = vld [vmem:[%s3526_s0 + $0x240] sm:$0xff] }
  0x4c   :  { %535 = vmatmul.mubr.f32.gmra.mrb[4].mxu1 %v32_v46  ;;  %1532 = vmatprep.subr.bf16.mxu0 %v2330_v43  ;;  %v376_v46 = vld [vmem:[%s3525_s1 + $0x6d0] sm:$0xff]  ;;  %v90_v32 = vld [vmem:[%s3526_s0 + $0x260] sm:$0xff]  ;;  %v269_v4 = vld [vmem:[%s3525_s1 + $0x378] sm:$0xff] }
  0x4d   :  { %857 = vmatmul.mubr.f32.gmra.mrb[4].mxu0 %v36_v50  ;;  %1406 = vmatpush1.bf16.msra.mxu1 %v1405_v47  ;;  %v73_v47 = vld [vmem:[%s3526_s0 + $0x1d8] sm:$0xff]  ;;  %v2519_v57 = vpack.c.bf16 %v376_v46, %v374_v45  ;;  %v96_v37 = vld [vmem:[%s3526_s0 + $0x290] sm:$0xff]  ;;  %v386_v40 = vld [vmem:[%s3525_s1 + $0x720] sm:$0xff] }
  0x4e   :  { %1534 = vmatpush1.bf16.msra.mxu0 %v2351_v51  ;;  %540 = vmatprep.mubr.f32.mxu1 %v42_v54  ;;  %v253_v50 = vld [vmem:[%s3525_s1 + $0x2f8] sm:$0xff]  ;;  %v379_v54 = vld [vmem:[%s3525_s1 + $0x6e8] sm:$0xff]  ;;  %v388_v41 = vld [vmem:[%s3525_s1 + $0x730] sm:$0xff] }
  0x4f   :  { %862 = vmatprep.mubr.f32.mxu0 %v46_v58  ;;  %1408 = vmatprep.subr.bf16.mxu1 %v1407_v55  ;;  %v381_v55 = vld [vmem:[%s3525_s1 + $0x6f8] sm:$0xff]  ;;  %v250_v58 = vld [vmem:[%s3525_s1 + $0x2e0] sm:$0xff]  ;;  %v263_v45 = vld [vmem:[%s3525_s1 + $0x348] sm:$0xff] }
  0x50   :  { %541 = vmatmul.mubr.f32.gmra.mrb[6].mxu1 %v41_v62  ;;  %1536 = vmatprep.subr.bf16.mxu0 %v2372_v59  ;;  %v1423_v62 = vpack.c.bf16 %v253_v50, %v251_v49  ;;  %v265_v46 = vld [vmem:[%s3525_s1 + $0x358] sm:$0xff]  ;;  %v391_v50 = vld [vmem:[%s3525_s1 + $0x748] sm:$0xff]  ;;  %v104_v5 = vld [vmem:[%s3526_s0 + $0x2d0] sm:$0xff] }
  0x51   :  { %863 = vmatmul.mubr.f32.gmra.mrb[6].mxu0 %v45_v2  ;;  %1410 = vmatpush1.bf16.msra.mxu1 %v1409_v63  ;;  %v378_v63 = vld [vmem:[%s3525_s1 + $0x6e0] sm:$0xff]  ;;  %v2540_v2 = vpack.c.bf16 %v381_v55, %v379_v54  ;;  %v2645_v54 = vpack.c.bf16 %v388_v41, %v386_v40  ;;  %v397_v8 = vld [vmem:[%s3525_s1 + $0x778] sm:$0xff]  ;;  %v108_v10 = vld [vmem:[%s3526_s0 + $0x2f0] sm:$0xff] }
  0x52   :  { %1538 = vmatpush1.bf16.msra.mxu0 %v2393_v3  ;;  %546 = vmatprep.mubr.f32.mxu1 %v51_v6  ;;  %v77_v6 = vld [vmem:[%s3526_s0 + $0x1f8] sm:$0xff]  ;;  %v2561_v13 = vpack.c.bf16 %v380_v0, %v378_v63  ;;  %v262_v55 = vld [vmem:[%s3525_s1 + $0x340] sm:$0xff]  ;;  %v123_v40 = vld [vmem:[%s3526_s0 + $0x368] sm:$0xff] }
  0x53   :  { %868 = vmatprep.mubr.f32.mxu0 %v55_v11  ;;  %1412 = vmatprep.subr.bf16.mxu1 %v1411_v7  ;;  %v1425_v7 = vpack.c.bf16 %v252_v60, %v250_v58  ;;  %v81_v11 = vld [vmem:[%s3526_s0 + $0x218] sm:$0xff]  ;;  %v1435_v60 = vpack.c.bf16 %v265_v46, %v263_v45  ;;  %v400_v45 = vld [vmem:[%s3525_s1 + $0x790] sm:$0xff]  ;;  %v127_v46 = vld [vmem:[%s3526_s0 + $0x388] sm:$0xff] }
  0x54   :  { %547 = vmatmul.mubr.f32.gmra.mrb[8].mxu1 %v50_v15  ;;  %1540 = vmatprep.subr.bf16.mxu0 %v2414_v12  ;;  %v256_v15 = vld [vmem:[%s3525_s1 + $0x310] sm:$0xff]  ;;  %v105_v58 = vld [vmem:[%s3526_s0 + $0x2d8] sm:$0xff] }
  0x55   :  { %869 = vmatmul.mubr.f32.gmra.mrb[8].mxu0 %v54_v20  ;;  %1414 = vmatpush1.bf16.msra.mxu1 %v1413_v16  ;;  %v87_v16 = vld [vmem:[%s3526_s0 + $0x248] sm:$0xff]  ;;  %v384_v20 = vld [vmem:[%s3525_s1 + $0x710] sm:$0xff]  ;;  %v1429_v28 = vpack.c.bf16 %v256_v15, %v254_v14  ;;  %v109_v63 = vld [vmem:[%s3526_s0 + $0x2f8] sm:$0xff] }
  0x56   :  { %1542 = vmatpush1.bf16.msra.mxu0 %v2435_v21  ;;  %552 = vmatprep.mubr.f32.mxu1 %v60_v24  ;;  %v259_v24 = vld [vmem:[%s3525_s1 + $0x328] sm:$0xff]  ;;  %v266_v14 = vld [vmem:[%s3525_s1 + $0x360] sm:$0xff]  ;;  %v268_v15 = vld [vmem:[%s3525_s1 + $0x370] sm:$0xff] }
  0x57   :  { %874 = vmatprep.mubr.f32.mxu0 %v64_v29  ;;  %1416 = vmatprep.subr.bf16.mxu1 %v1415_v25  ;;  %v261_v25 = vld [vmem:[%s3525_s1 + $0x338] sm:$0xff]  ;;  %v387_v29 = vld [vmem:[%s3525_s1 + $0x728] sm:$0xff] }
  0x58   :  { %553 = vmatmul.mubr.f32.gmra.mrb[10].mxu1 %v59_v33  ;;  %1544 = vmatprep.subr.bf16.mxu0 %v2456_v30  ;;  %v2603_v33 = vpack.c.bf16 %v384_v20, %v382_v18  ;;  %v394_v18 = vld [vmem:[%s3525_s1 + $0x760] sm:$0xff]  ;;  %v396_v20 = vld [vmem:[%s3525_s1 + $0x770] sm:$0xff] }
  0x59   :  { %875 = vmatmul.mubr.f32.gmra.mrb[10].mxu0 %v63_v38  ;;  %1418 = vmatpush1.bf16.msra.mxu1 %v1417_v34  ;;  %v258_v34 = vld [vmem:[%s3525_s1 + $0x320] sm:$0xff]  ;;  %v1431_v38 = vpack.c.bf16 %v261_v25, %v259_v24  ;;  %v271_v25 = vld [vmem:[%s3525_s1 + $0x388] sm:$0xff] }
  0x5a   :  { %1546 = vmatpush1.bf16.msra.mxu0 %v2477_v39  ;;  %558 = vmatprep.mubr.f32.mxu1 %v69_v42  ;;  %v100_v42 = vld [vmem:[%s3526_s0 + $0x2b0] sm:$0xff]  ;;  %v1433_v49 = vpack.c.bf16 %v260_v36, %v258_v34  ;;  %v117_v34 = vld [vmem:[%s3526_s0 + $0x338] sm:$0xff]  ;;  %v2729_v36 = vpack.c.bf16 %v396_v20, %v394_v18  ;;  %v135_v18 = vld [vmem:[%s3526_s0 + $0x3c8] sm:$0xff] }
  0x5b   :  { %880 = vmatprep.mubr.f32.mxu0 %v73_v47  ;;  %1420 = vmatprep.subr.bf16.mxu1 %v1419_v44  ;;  %v2624_v44 = vpack.c.bf16 %v389_v31, %v387_v29  ;;  %v95_v47 = vld [vmem:[%s3526_s0 + $0x288] sm:$0xff]  ;;  %v1441_v29 = vpack.c.bf16 %v268_v15, %v266_v14 }
  0x5c   :  { %559 = vmatmul.mubr.f32.gmra.mrb[12].mxu1 %v68_v52  ;;  %1548 = vmatprep.subr.bf16.mxu0 %v2498_v48  ;;  %v393_v52 = vld [vmem:[%s3525_s1 + $0x758] sm:$0xff]  ;;  %v399_v31 = vld [vmem:[%s3525_s1 + $0x788] sm:$0xff] }
  0x5d   :  { %881 = vmatmul.mubr.f32.gmra.mrb[12].mxu0 %v72_v56  ;;  %1422 = vmatpush1.bf16.msra.mxu1 %v1421_v53  ;;  %v99_v53 = vld [vmem:[%s3526_s0 + $0x2a8] sm:$0xff]  ;;  %v264_v56 = vld [vmem:[%s3525_s1 + $0x350] sm:$0xff]  ;;  %v2666_v0 = vpack.c.bf16 %v393_v52, %v391_v50  ;;  %v277_v50 = vld [vmem:[%s3525_s1 + $0x3b8] sm:$0xff] }
  0x5e   :  { %1550 = vmatpush1.bf16.msra.mxu0 %v2519_v57  ;;  %564 = vmatprep.mubr.f32.mxu1 %v78_v61  ;;  %v390_v61 = vld [vmem:[%s3525_s1 + $0x740] sm:$0xff]  ;;  %v131_v14 = vld [vmem:[%s3526_s0 + $0x3a8] sm:$0xff] }
  0x5f   :  { %886 = vmatprep.mubr.f32.mxu0 %v82_v1  ;;  %1424 = vmatprep.subr.bf16.mxu1 %v1423_v62  ;;  %v392_v62 = vld [vmem:[%s3525_s1 + $0x750] sm:$0xff]  ;;  %v267_v1 = vld [vmem:[%s3525_s1 + $0x368] sm:$0xff]  ;;  %v122_v52 = vld [vmem:[%s3526_s0 + $0x360] sm:$0xff] }
  0x60   :  { %565 = vmatmul.mubr.f32.gmra.mrb[14].mxu1 %v77_v6  ;;  %1552 = vmatprep.subr.bf16.mxu0 %v2540_v2  ;;  %v1437_v6 = vpack.c.bf16 %v264_v56, %v262_v55  ;;  %v403_v55 = vld [vmem:[%s3525_s1 + $0x7a8] sm:$0xff]  ;;  %v405_v56 = vld [vmem:[%s3525_s1 + $0x7b8] sm:$0xff] }
  0x61   :  { %887 = vmatmul.mubr.f32.gmra.mrb[14].mxu0 %v81_v11  ;;  %1426 = vmatpush1.bf16.msra.mxu1 %v1425_v7  ;;  %v395_v7 = vld [vmem:[%s3525_s1 + $0x768] sm:$0xff]  ;;  %v2687_v11 = vpack.c.bf16 %v392_v62, %v390_v61  ;;  %v274_v61 = vld [vmem:[%s3525_s1 + $0x3a0] sm:$0xff]  ;;  %v276_v62 = vld [vmem:[%s3525_s1 + $0x3b0] sm:$0xff] }
  0x62   :  { %1554 = vmatpush1.bf16.msra.mxu0 %v2561_v13  ;;  %570 = vmatprep.mubr.f32.mxu1 %v87_v16  ;;  %v114_v16 = vld [vmem:[%s3526_s0 + $0x320] sm:$0xff]  ;;  %v2708_v24 = vpack.c.bf16 %v397_v8, %v395_v7  ;;  %v2792_v7 = vpack.c.bf16 %v405_v56, %v403_v55  ;;  %v279_v8 = vld [vmem:[%s3525_s1 + $0x3c8] sm:$0xff]  ;;  %v1449_v15 = vpack.c.bf16 %v276_v62, %v274_v61 }
  0x63   :  { %892 = vmatprep.mubr.f32.mxu0 %v91_v22  ;;  %1428 = vmatprep.subr.bf16.mxu1 %v1427_v17  ;;  %v1439_v17 = vpack.c.bf16 %v269_v4, %v267_v1  ;;  %v118_v22 = vld [vmem:[%s3526_s0 + $0x340] sm:$0xff] }
  0x64   :  { %571 = vmatmul.mubr.f32.gmra.mrb[16].mxu1 %v86_v26  ;;  %1556 = vmatprep.subr.bf16.mxu0 %v2582_v23  ;;  %v273_v26 = vld [vmem:[%s3525_s1 + $0x398] sm:$0xff]  ;;  %v402_v4 = vld [vmem:[%s3525_s1 + $0x7a0] sm:$0xff] }
  0x65   :  { %893 = vmatmul.mubr.f32.gmra.mrb[16].mxu0 %v90_v32  ;;  %1430 = vmatpush1.bf16.msra.mxu1 %v1429_v28  ;;  %v113_v28 = vld [vmem:[%s3526_s0 + $0x318] sm:$0xff]  ;;  %v1443_v41 = vpack.c.bf16 %v273_v26, %v271_v25  ;;  %v280_v25 = vld [vmem:[%s3525_s1 + $0x3d0] sm:$0xff]  ;;  %v410_v56 = vld [vmem:[%s3525_s1 + $0x7e0] sm:$0xff] }
  0x66   :  { %1558 = vmatpush1.bf16.msra.mxu0 %v2603_v33  ;;  %576 = vmatprep.mubr.f32.mxu1 %v96_v37  ;;  %v401_v32 = vld [vmem:[%s3525_s1 + $0x798] sm:$0xff]  ;;  %v270_v37 = vld [vmem:[%s3525_s1 + $0x380] sm:$0xff] }
  0x67   :  { %898 = vmatprep.mubr.f32.mxu0 %v100_v42  ;;  %1432 = vmatprep.subr.bf16.mxu1 %v1431_v38  ;;  %v272_v38 = vld [vmem:[%s3525_s1 + $0x390] sm:$0xff]  ;;  %v398_v42 = vld [vmem:[%s3525_s1 + $0x780] sm:$0xff]  ;;  %v141_v26 = vld [vmem:[%s3526_s0 + $0x3f8] sm:$0xff] }
  0x68   :  { %577 = vmatmul.mubr.f32.gmra.mrb[18].mxu1 %v95_v47  ;;  %1560 = vmatprep.subr.bf16.mxu0 %v2624_v44  ;;  %v2750_v47 = vpack.c.bf16 %v401_v32, %v399_v31  ;;  %v408_v31 = vld [vmem:[%s3525_s1 + $0x7d0] sm:$0xff]  ;;  %v145_v32 = vld [vmem:[%s3526_s0 + $0x418] sm:$0xff]  ;;  %v154_v61 = vld [vmem:[%s3526_s0 + $0x460] sm:$0xff] }
  0x69   :  { %899 = vmatmul.mubr.f32.gmra.mrb[18].mxu0 %v99_v53  ;;  %1434 = vmatpush1.bf16.msra.mxu1 %v1433_v49  ;;  %v275_v49 = vld [vmem:[%s3525_s1 + $0x3a8] sm:$0xff]  ;;  %v1445_v53 = vpack.c.bf16 %v272_v38, %v270_v37  ;;  %v285_v38 = vld [vmem:[%s3525_s1 + $0x3f8] sm:$0xff] }
  0x6a   :  { %1562 = vmatpush1.bf16.msra.mxu0 %v2645_v54  ;;  %582 = vmatprep.mubr.f32.mxu1 %v105_v58  ;;  %v126_v58 = vld [vmem:[%s3526_s0 + $0x380] sm:$0xff]  ;;  %v1447_v1 = vpack.c.bf16 %v277_v50, %v275_v49  ;;  %v283_v37 = vld [vmem:[%s3525_s1 + $0x3e8] sm:$0xff] }
  0x6b   :  { %904 = vmatprep.mubr.f32.mxu0 %v109_v63  ;;  %1436 = vmatprep.subr.bf16.mxu1 %v1435_v60  ;;  %v2771_v60 = vpack.c.bf16 %v400_v45, %v398_v42  ;;  %v132_v63 = vld [vmem:[%s3526_s0 + $0x3b0] sm:$0xff]  ;;  %v411_v42 = vld [vmem:[%s3525_s1 + $0x7e8] sm:$0xff]  ;;  %v413_v45 = vld [vmem:[%s3525_s1 + $0x7f8] sm:$0xff]  ;;  %v1455_v55 = vpack.c.bf16 %v285_v38, %v283_v37 }
  0x6c   :  { %583 = vmatmul.mubr.f32.gmra.mrb[20].mxu1 %v104_v5  ;;  %1564 = vmatprep.subr.bf16.mxu0 %v2666_v0  ;;  %v404_v5 = vld [vmem:[%s3525_s1 + $0x7b0] sm:$0xff]  ;;  %v282_v50 = vld [vmem:[%s3525_s1 + $0x3e0] sm:$0xff]  ;;  %v2876_v62 = vpack.c.bf16 %v413_v45, %v411_v42  ;;  %v29_v42 = vld [vmem:[%s3526_s0 + $0x78] sm:$0xff] }
  0x6d   :  { %905 = vmatmul.mubr.f32.gmra.mrb[20].mxu0 %v108_v10  ;;  %1438 = vmatpush1.bf16.msra.mxu1 %v1437_v6  ;;  %v136_v6 = vld [vmem:[%s3526_s0 + $0x3d0] sm:$0xff]  ;;  %v281_v10 = vld [vmem:[%s3525_s1 + $0x3d8] sm:$0xff]  ;;  %v2813_v20 = vpack.c.bf16 %v404_v5, %v402_v4  ;;  %v415_v4 = vld [vmem:[%s3525_s1 + $0x808] sm:$0xff] }
  0x6e   :  { %1566 = vmatpush1.bf16.msra.mxu0 %v2687_v11  ;;  %588 = vmatprep.mubr.f32.mxu1 %v114_v16  ;;  %v407_v16 = vld [vmem:[%s3525_s1 + $0x7c8] sm:$0xff]  ;;  %v417_v5 = vld [vmem:[%s3525_s1 + $0x818] sm:$0xff]  ;;  %v30_v37 = vld [vmem:[%s3526_s0 + $0x80] sm:$0xff] }
  0x6f   :  { %910 = vmatprep.mubr.f32.mxu0 %v118_v22  ;;  %1440 = vmatprep.subr.bf16.mxu1 %v1439_v17  ;;  %v409_v17 = vld [vmem:[%s3525_s1 + $0x7d8] sm:$0xff]  ;;  %v278_v22 = vld [vmem:[%s3525_s1 + $0x3c0] sm:$0xff] }
  0x70   :  { %589 = vmatmul.mubr.f32.gmra.mrb[22].mxu1 %v113_v28  ;;  %1568 = vmatprep.subr.bf16.mxu0 %v2708_v24  ;;  %v1451_v28 = vpack.c.bf16 %v281_v10, %v279_v8  ;;  %v17_v10 = vld [vmem:[%s3526_s0 + $0x18] sm:$0xff] }
  0x71   :  { %911 = vmatmul.mubr.f32.gmra.mrb[22].mxu0 %v117_v34  ;;  %1442 = vmatpush1.bf16.msra.mxu1 %v1441_v29  ;;  %v406_v29 = vld [vmem:[%s3525_s1 + $0x7c0] sm:$0xff]  ;;  %v2834_v34 = vpack.c.bf16 %v409_v17, %v407_v16  ;;  %v21_v16 = vld [vmem:[%s3526_s0 + $0x38] sm:$0xff]  ;;  %v1587_v17 = vpack.c.bf16 %v417_v5, %v415_v4  ;;  %v48_v4 = vld [vmem:[%s3526_s0 + $0x110] sm:$0xff] }
  0x72   :  { %1570 = vmatpush1.bf16.msra.mxu0 %v2729_v36  ;;  %594 = vmatprep.mubr.f32.mxu1 %v123_v40  ;;  %v140_v40 = vld [vmem:[%s3526_s0 + $0x3f0] sm:$0xff]  ;;  %v2855_v49 = vpack.c.bf16 %v408_v31, %v406_v29  ;;  %v26_v29 = vld [vmem:[%s3526_s0 + $0x60] sm:$0xff] }
  0x73   :  { %916 = vmatprep.mubr.f32.mxu0 %v127_v46  ;;  %1444 = vmatprep.subr.bf16.mxu1 %v1443_v41  ;;  %v1453_v41 = vpack.c.bf16 %v280_v25, %v278_v22  ;;  %v144_v46 = vld [vmem:[%s3526_s0 + $0x410] sm:$0xff]  ;;  %v419_v22 = vld [vmem:[%s3525_s1 + $0x828] sm:$0xff]  ;;  %v421_v25 = vld [vmem:[%s3525_s1 + $0x838] sm:$0xff] }
  0x74   :  { %595 = vmatmul.mubr.f32.gmra.mrb[24].mxu1 %v122_v52  ;;  %1572 = vmatprep.subr.bf16.mxu0 %v2750_v47  ;;  %v284_v52 = vld [vmem:[%s3525_s1 + $0x3f0] sm:$0xff]  ;;  %v418_v31 = vld [vmem:[%s3525_s1 + $0x820] sm:$0xff]  ;;  %v1591_v38 = vpack.c.bf16 %v421_v25, %v419_v22  ;;  %v435_v25 = vld [vmem:[%s3525_s1 + $0x8a8] sm:$0xff] }
  0x75   :  { %917 = vmatmul.mubr.f32.gmra.mrb[24].mxu0 %v126_v58  ;;  %1446 = vmatpush1.bf16.msra.mxu1 %v1445_v53  ;;  %v150_v53 = vld [vmem:[%s3526_s0 + $0x440] sm:$0xff]  ;;  %v412_v58 = vld [vmem:[%s3525_s1 + $0x7f0] sm:$0xff] }
  0x76   :  { %1574 = vmatpush1.bf16.msra.mxu0 %v2771_v60  ;;  %600 = vmatprep.mubr.f32.mxu1 %v132_v63  ;;  %v149_v63 = vld [vmem:[%s3526_s0 + $0x438] sm:$0xff]  ;;  %v2891_v8 = vpack.c.bf16 %v412_v58, %v410_v56  ;;  %v38_v58 = vld [vmem:[%s3526_s0 + $0xc0] sm:$0xff] }
  0x77   :  { %922 = vmatprep.mubr.f32.mxu0 %v136_v6  ;;  %1448 = vmatprep.subr.bf16.mxu1 %v1447_v1  ;;  %v1457_v1 = vpack.c.bf16 %v284_v52, %v282_v50  ;;  %v153_v6 = vld [vmem:[%s3526_s0 + $0x458] sm:$0xff]  ;;  %v424_v50 = vld [vmem:[%s3525_s1 + $0x850] sm:$0xff]  ;;  %v39_v52 = vld [vmem:[%s3526_s0 + $0xc8] sm:$0xff] }
  0x78   :  { %601 = vmatmul.mubr.f32.gmra.mrb[26].mxu1 %v131_v14  ;;  %1576 = vmatprep.subr.bf16.mxu0 %v2792_v7  ;;  %v414_v14 = vld [vmem:[%s3525_s1 + $0x800] sm:$0xff]  ;;  %v429_v56 = vld [vmem:[%s3525_s1 + $0x878] sm:$0xff] }
  0x79   :  { %923 = vmatmul.mubr.f32.gmra.mrb[26].mxu0 %v135_v18  ;;  %1450 = vmatpush1.bf16.msra.mxu1 %v1449_v15  ;;  %v416_v15 = vld [vmem:[%s3525_s1 + $0x810] sm:$0xff] }
  0x7a   :  { %1578 = vmatpush1.bf16.msra.mxu0 %v2813_v20  ;;  %606 = vmatprep.mubr.f32.mxu1 %v141_v26  ;;  %v16_v18 = vld [vmem:[%s3526_s0 + $0x10] sm:$0xff] }
  0x7b   :  { %928 = vmatprep.mubr.f32.mxu0 %v145_v32  ;;  %1452 = vmatprep.subr.bf16.mxu1 %v1451_v28  ;;  %v20_v26 = vld [vmem:[%s3526_s0 + $0x30] sm:$0xff]  ;;  %v1589_v28 = vpack.c.bf16 %v416_v15, %v414_v14  ;;  %v47_v14 = vld [vmem:[%s3526_s0 + $0x108] sm:$0xff] }
  0x7c   :  { %607 = vmatmul.mubr.f32.gmra.mrb[28].mxu1 %v140_v40  ;;  %1580 = vmatprep.subr.bf16.mxu0 %v2834_v34  ;;  %v420_v32 = vld [vmem:[%s3525_s1 + $0x830] sm:$0xff]  ;;  %v423_v40 = vld [vmem:[%s3525_s1 + $0x848] sm:$0xff] }
  0x7d   :  { %929 = vmatmul.mubr.f32.gmra.mrb[28].mxu0 %v144_v46  ;;  %1454 = vmatpush1.bf16.msra.mxu1 %v1453_v41  ;;  %v425_v41 = vld [vmem:[%s3525_s1 + $0x858] sm:$0xff]  ;;  %v1593_v45 = vpack.c.bf16 %v420_v32, %v418_v31  ;;  %v422_v46 = vld [vmem:[%s3525_s1 + $0x840] sm:$0xff]  ;;  %v436_v32 = vld [vmem:[%s3525_s1 + $0x8b0] sm:$0xff] }
  0x7e   :  { %1582 = vmatpush1.bf16.msra.mxu0 %v2855_v49  ;;  %612 = vmatprep.mubr.f32.mxu1 %v150_v53  ;;  %v1595_v53 = vpack.c.bf16 %v425_v41, %v423_v40  ;;  %v434_v31 = vld [vmem:[%s3525_s1 + $0x8a0] sm:$0xff]  ;;  %v441_v40 = vld [vmem:[%s3525_s1 + $0x8d8] sm:$0xff] }
  0x7f   :  { %934 = vmatprep.mubr.f32.mxu0 %v154_v61  ;;  %1456 = vmatprep.subr.bf16.mxu1 %v1455_v55  ;;  %v427_v55 = vld [vmem:[%s3525_s1 + $0x868] sm:$0xff]  ;;  %v1597_v61 = vpack.c.bf16 %v424_v50, %v422_v46  ;;  %v65_v41 = vld [vmem:[%s3526_s0 + $0x198] sm:$0xff] }
  0x80   :  { %613 = vmatmul.mubr.f32.gmra.mrb[30].mxu1 %v149_v63  ;;  %1584 = vmatprep.subr.bf16.mxu0 %v2876_v62  ;;  %v426_v63 = vld [vmem:[%s3525_s1 + $0x860] sm:$0xff]  ;;  %v1599_v5 = vpack.c.bf16 %v429_v56, %v427_v55  ;;  %v75_v46 = vld [vmem:[%s3526_s0 + $0x1e8] sm:$0xff] }
  0x81   :  { %935 = vmatmul.mubr.f32.gmra.mrb[30].mxu0 %v153_v6  ;;  %1458 = vmatpush1.bf16.msra.mxu1 %v1457_v1  ;;  %v428_v1 = vld [vmem:[%s3525_s1 + $0x870] sm:$0xff]  ;;  %v431_v6 = vld [vmem:[%s3525_s1 + $0x888] sm:$0xff]  ;;  %v442_v56 = vld [vmem:[%s3525_s1 + $0x8e0] sm:$0xff] }
  0x82   :  { %1586 = vmatpush1.bf16.msra.mxu0 %v2891_v8  ;;  %683 = vmatprep.mubr.f32.mxu1 %v17_v10  ;;  %v433_v10 = vld [vmem:[%s3525_s1 + $0x898] sm:$0xff]  ;;  %v1601_v15 = vpack.c.bf16 %v428_v1, %v426_v63  ;;  %v83_v63 = vld [vmem:[%s3526_s0 + $0x228] sm:$0xff] }
  0x83   :  { %1005 = vmatprep.mubr.f32.mxu0 %v21_v16  ;;  %1619 = vmatprep.subr.bf16.mxu1 %v2241_v9  ;;  %v25_v9 = vld [vmem:[%s3526_s0 + $0x58] sm:$0xff]  ;;  %v430_v16 = vld [vmem:[%s3525_s1 + $0x880] sm:$0xff]  ;;  %v1603_v22 = vpack.c.bf16 %v433_v10, %v431_v6  ;;  %v31_v6 = vld [vmem:[%s3526_s0 + $0x88] sm:$0xff] }
  0x84   :  { %684 = vmatmul.mubr.f32.vlgmr.msra.gmra.mrb[0].mxu1 %v16_v18  ;;  %1588 = vmatprep.subr.bf16.mxu0 %v1587_v17  ;;  %v432_v17 = vld [vmem:[%s3525_s1 + $0x890] sm:$0xff]  ;;  %v57_v18 = vld [vmem:[%s3526_s0 + $0x158] sm:$0xff] }
  0x85   :  { %1006 = vmatmul.mubr.f32.vlgmr.msra.gmra.mrb[0].mxu0 %v20_v26  ;;  %1635 = vmatpush1.bf16.msra.mxu1 %v2267_v19  ;;  %v35_v19 = vld [vmem:[%s3526_s0 + $0xa8] sm:$0xff]  ;;  %v437_v26 = vld [vmem:[%s3525_s1 + $0x8b8] sm:$0xff]  ;;  %v40_v10 = vld [vmem:[%s3526_s0 + $0xd0] sm:$0xff] }
  0x86   :  { %1590 = vmatpush1.bf16.msra.mxu0 %v1589_v28  ;;  %689 = vmatprep.mubr.f32.mxu1 %v26_v29  ;;  %v56_v28 = vld [vmem:[%s3526_s0 + $0x150] sm:$0xff]  ;;  %v1605_v29 = vpack.c.bf16 %v432_v17, %v430_v16  ;;  %v85_v17 = vld [vmem:[%s3526_s0 + $0x238] sm:$0xff] }
  0x87   :  { %1011 = vmatprep.mubr.f32.mxu0 %v30_v37  ;;  %1620 = vmatprep.subr.bf16.mxu1 %v2288_v27  ;;  %v34_v27 = vld [vmem:[%s3526_s0 + $0xa0] sm:$0xff]  ;;  %v76_v16 = vld [vmem:[%s3526_s0 + $0x1f0] sm:$0xff] }
  0x88   :  { %690 = vmatmul.mubr.f32.gmra.mrb[2].mxu1 %v25_v9  ;;  %1592 = vmatprep.subr.bf16.mxu0 %v1591_v38  ;;  %v66_v37 = vld [vmem:[%s3526_s0 + $0x1a0] sm:$0xff]  ;;  %v1607_v38 = vpack.c.bf16 %v437_v26, %v435_v25  ;;  %v439_v9 = vld [vmem:[%s3525_s1 + $0x8c8] sm:$0xff]  ;;  %v112_v26 = vld [vmem:[%s3526_s0 + $0x310] sm:$0xff] }
  0x89   :  { %1012 = vmatmul.mubr.f32.gmra.mrb[2].mxu0 %v29_v42  ;;  %1636 = vmatpush1.bf16.msra.mxu1 %v2309_v35  ;;  %v44_v35 = vld [vmem:[%s3526_s0 + $0xf0] sm:$0xff]  ;;  %v1609_v42 = vpack.c.bf16 %v436_v32, %v434_v31  ;;  %v1611_v50 = vpack.c.bf16 %v441_v40, %v439_v9  ;;  %v110_v25 = vld [vmem:[%s3526_s0 + $0x300] sm:$0xff]  ;;  %v129_v31 = vld [vmem:[%s3526_s0 + $0x398] sm:$0xff] }
  0x8a   :  { %1594 = vmatpush1.bf16.msra.mxu0 %v1593_v45  ;;  %695 = vmatprep.mubr.f32.mxu1 %v35_v19  ;;  %v438_v45 = vld [vmem:[%s3525_s1 + $0x8c0] sm:$0xff]  ;;  %v440_v19 = vld [vmem:[%s3525_s1 + $0x8d0] sm:$0xff]  ;;  %v139_v9 = vld [vmem:[%s3526_s0 + $0x3e8] sm:$0xff] }
  0x8b   :  { %1017 = vmatprep.mubr.f32.mxu0 %v39_v52  ;;  %1621 = vmatprep.subr.bf16.mxu1 %v2330_v43  ;;  %v43_v43 = vld [vmem:[%s3526_s0 + $0xe8] sm:$0xff]  ;;  %v1613_v55 = vpack.c.bf16 %v440_v19, %v438_v45  ;;  %v128_v32 = vld [vmem:[%s3526_s0 + $0x390] sm:$0xff]  ;;  %v157_v19 = vld [vmem:[%s3526_s0 + $0x478] sm:$0xff] }
  0x8c   :  { %696 = vmatmul.mubr.f32.gmra.mrb[4].mxu1 %v34_v27  ;;  %1596 = vmatprep.subr.bf16.mxu0 %v1595_v53  ;;  %v443_v52 = vld [vmem:[%s3525_s1 + $0x8e8] sm:$0xff]  ;;  %v445_v53 = vld [vmem:[%s3525_s1 + $0x8f8] sm:$0xff]  ;;  %v74_v27 = vld [vmem:[%s3526_s0 + $0x1e0] sm:$0xff] }
  0x8d   :  { %1018 = vmatmul.mubr.f32.gmra.mrb[4].mxu0 %v38_v58  ;;  %1637 = vmatpush1.bf16.msra.mxu1 %v2351_v51  ;;  %v53_v51 = vld [vmem:[%s3526_s0 + $0x138] sm:$0xff]  ;;  %v444_v58 = vld [vmem:[%s3525_s1 + $0x8f0] sm:$0xff]  ;;  %v147_v40 = vld [vmem:[%s3526_s0 + $0x428] sm:$0xff] }
  0x8e   :  { %1598 = vmatpush1.bf16.msra.mxu0 %v1597_v61  ;;  %701 = vmatprep.mubr.f32.mxu1 %v44_v35  ;;  %v84_v61 = vld [vmem:[%s3526_s0 + $0x230] sm:$0xff]  ;;  %v1615_v35 = vpack.c.bf16 %v445_v53, %v443_v52  ;;  %v1617_v1 = vpack.c.bf16 %v444_v58, %v442_v56  ;;  %v155_v45 = vld [vmem:[%s3526_s0 + $0x468] sm:$0xff] }
  0x8f   :  { %1023 = vmatprep.mubr.f32.mxu0 %v48_v4  ;;  %1622 = vmatprep.subr.bf16.mxu1 %v2372_v59  ;;  %v52_v59 = vld [vmem:[%s3526_s0 + $0x130] sm:$0xff]  ;;  %v89_v4 = vld [vmem:[%s3526_s0 + $0x258] sm:$0xff] }
  0x90   :  { %702 = vmatmul.mubr.f32.gmra.mrb[6].mxu1 %v43_v43  ;;  %1600 = vmatprep.subr.bf16.mxu0 %v1599_v5  ;;  %v22_v5 = vld [vmem:[%s3526_s0 + $0x40] sm:$0xff] }
  0x91   :  { %1024 = vmatmul.mubr.f32.gmra.mrb[6].mxu0 %v47_v14  ;;  %1638 = vmatpush1.bf16.msra.mxu1 %v2393_v3  ;;  %v62_v3 = vld [vmem:[%s3526_s0 + $0x180] sm:$0xff]  ;;  %v49_v14 = vld [vmem:[%s3526_s0 + $0x118] sm:$0xff] }
  0x92   :  { %1602 = vmatpush1.bf16.msra.mxu0 %v1601_v15  ;;  %707 = vmatprep.mubr.f32.mxu1 %v53_v51  ;;  %v98_v43 = vld [vmem:[%s3526_s0 + $0x2a0] sm:$0xff]  ;;  %v67_v51 = vld [vmem:[%s3526_s0 + $0x1a8] sm:$0xff] }
  0x93   :  { %1029 = vmatprep.mubr.f32.mxu0 %v57_v18  ;;  %1623 = vmatprep.subr.bf16.mxu1 %v2414_v12  ;;  %v61_v12 = vld [vmem:[%s3526_s0 + $0x178] sm:$0xff]  ;;  %v58_v15 = vld [vmem:[%s3526_s0 + $0x160] sm:$0xff] }
  0x94   :  { %708 = vmatmul.mubr.f32.gmra.mrb[8].mxu1 %v52_v59  ;;  %1604 = vmatprep.subr.bf16.mxu0 %v1603_v22  ;;  %v94_v18 = vld [vmem:[%s3526_s0 + $0x280] sm:$0xff]  ;;  %v103_v22 = vld [vmem:[%s3526_s0 + $0x2c8] sm:$0xff] }
  0x95   :  { %1030 = vmatmul.mubr.f32.gmra.mrb[8].mxu0 %v56_v28  ;;  %1639 = vmatpush1.bf16.msra.mxu1 %v2435_v21  ;;  %v71_v21 = vld [vmem:[%s3526_s0 + $0x1c8] sm:$0xff]  ;;  %v120_v28 = vld [vmem:[%s3526_s0 + $0x350] sm:$0xff] }
  0x96   :  { %1606 = vmatpush1.bf16.msra.mxu0 %v1605_v29  ;;  %713 = vmatprep.mubr.f32.mxu1 %v62_v3  ;;  %v111_v59 = vld [vmem:[%s3526_s0 + $0x308] sm:$0xff]  ;;  %v121_v3 = vld [vmem:[%s3526_s0 + $0x358] sm:$0xff] }
  0x97   :  { %1035 = vmatprep.mubr.f32.mxu0 %v66_v37  ;;  %1624 = vmatprep.subr.bf16.mxu1 %v2456_v30  ;;  %v70_v30 = vld [vmem:[%s3526_s0 + $0x1c0] sm:$0xff]  ;;  %v119_v29 = vld [vmem:[%s3526_s0 + $0x348] sm:$0xff] }
  0x98   :  { %714 = vmatmul.mubr.f32.gmra.mrb[10].mxu1 %v61_v12  ;;  %1608 = vmatprep.subr.bf16.mxu0 %v1607_v38  ;;  %v130_v37 = vld [vmem:[%s3526_s0 + $0x3a0] sm:$0xff]  ;;  %v137_v12 = vld [vmem:[%s3526_s0 + $0x3d8] sm:$0xff] }
  0x99   :  { %1036 = vmatmul.mubr.f32.gmra.mrb[10].mxu0 %v65_v41  ;;  %1640 = vmatpush1.bf16.msra.mxu1 %v2477_v39  ;;  %v80_v39 = vld [vmem:[%s3526_s0 + $0x210] sm:$0xff]  ;;  %v138_v38 = vld [vmem:[%s3526_s0 + $0x3e0] sm:$0xff] }
  0x9a   :  { %1610 = vmatpush1.bf16.msra.mxu0 %v1609_v42  ;;  %719 = vmatprep.mubr.f32.mxu1 %v71_v21  ;;  %v146_v41 = vld [vmem:[%s3526_s0 + $0x420] sm:$0xff]  ;;  %v148_v42 = vld [vmem:[%s3526_s0 + $0x430] sm:$0xff] }
  0x9b   :  { %1041 = vmatprep.mubr.f32.mxu0 %v75_v46  ;;  %1625 = vmatprep.subr.bf16.mxu1 %v2498_v48  ;;  %v79_v48 = vld [vmem:[%s3526_s0 + $0x208] sm:$0xff]  ;;  %v156_v21 = vld [vmem:[%s3526_s0 + $0x470] sm:$0xff] }
  0x9c   :  { %720 = vmatmul.mubr.f32.gmra.mrb[12].mxu1 %v70_v30  ;;  %1612 = vmatprep.subr.bf16.mxu0 %v1611_v50 }
  0x9d   :  { %1042 = vmatmul.mubr.f32.gmra.mrb[12].mxu0 %v74_v27  ;;  %1641 = vmatpush1.bf16.msra.mxu1 %v2519_v57  ;;  %v88_v57 = vld [vmem:[%s3526_s0 + $0x250] sm:$0xff] }
  0x9e   :  { %1614 = vmatpush1.bf16.msra.mxu0 %v1613_v55  ;;  %725 = vmatprep.mubr.f32.mxu1 %v80_v39 }
  0x9f   :  { %1047 = vmatprep.mubr.f32.mxu0 %v84_v61  ;;  %1626 = vmatprep.subr.bf16.mxu1 %v2540_v2  ;;  %v1812_v2 = vmov 0.0  }
  0xa0   :  { %726 = vmatmul.mubr.f32.gmra.mrb[14].mxu1 %v79_v48  ;;  %1616 = vmatprep.subr.bf16.mxu0 %v1615_v35 }
  0xa1   :  { %1048 = vmatmul.mubr.f32.gmra.mrb[14].mxu0 %v83_v63  ;;  %1642 = vmatpush1.bf16.msra.mxu1 %v2561_v13  ;;  %v97_v13 = vld [vmem:[%s3526_s0 + $0x298] sm:$0xff] }
  0xa2   :  { %1618 = vmatpush1.bf16.msra.mxu0 %v1617_v1  ;;  %731 = vmatprep.mubr.f32.mxu1 %v89_v4 }
  0xa3   :  { %1166 = vmatprep.mubr.f32.mxu0 %v1812_v2  ;;  %1627 = vmatprep.subr.bf16.mxu1 %v2582_v23  ;;  %v107_v23 = vld [vmem:[%s3526_s0 + $0x2e8] sm:$0xff] }
  0xa4   :  { %732 = vmatmul.mubr.f32.gmra.mrb[16].mxu1 %v88_v57 }
  0xa5   :  { %1167 = vmatmul.mubr.f32.vlgmr.msra.gmra.mrb[0].mxu0 %v22_v5  ;;  %1643 = vmatpush1.bf16.msra.mxu1 %v2603_v33  ;;  %v106_v33 = vld [vmem:[%s3526_s0 + $0x2e0] sm:$0xff] }
  0xa6   :  { %737 = vmatprep.mubr.f32.mxu1 %v98_v43  ;;  %1172 = vmatprep.mubr.f32.mxu0 %v1812_v2 }
  0xa7   :  { %1628 = vmatprep.subr.bf16.mxu1 %v2624_v44  ;;  %v116_v44 = vld [vmem:[%s3526_s0 + $0x330] sm:$0xff] }
  0xa8   :  { %738 = vmatmul.mubr.f32.gmra.mrb[18].mxu1 %v97_v13 }
  0xa9   :  { %1173 = vmatmul.mubr.f32.gmra.mrb[2].mxu0 %v31_v6  ;;  %1644 = vmatpush1.bf16.msra.mxu1 %v2645_v54  ;;  %v115_v54 = vld [vmem:[%s3526_s0 + $0x328] sm:$0xff] }
  0xaa   :  { %743 = vmatprep.mubr.f32.mxu1 %v107_v23  ;;  %1178 = vmatprep.mubr.f32.mxu0 %v1812_v2 }
  0xab   :  { %1629 = vmatprep.subr.bf16.mxu1 %v2666_v0  ;;  %v125_v0 = vld [vmem:[%s3526_s0 + $0x378] sm:$0xff] }
  0xac   :  { %744 = vmatmul.mubr.f32.gmra.mrb[20].mxu1 %v106_v33 }
  0xad   :  { %1179 = vmatmul.mubr.f32.gmra.mrb[4].mxu0 %v40_v10  ;;  %1645 = vmatpush1.bf16.msra.mxu1 %v2687_v11  ;;  %v124_v11 = vld [vmem:[%s3526_s0 + $0x370] sm:$0xff]  ;;  %v448_v10 = vlaneseq }
  0xae   :  { %749 = vmatprep.mubr.f32.mxu1 %v116_v44  ;;  %1184 = vmatprep.mubr.f32.mxu0 %v1812_v2 }
  0xaf   :  { %1630 = vmatprep.subr.bf16.mxu1 %v2708_v24  ;;  %v134_v24 = vld [vmem:[%s3526_s0 + $0x3c0] sm:$0xff] }
  0xb0   :  { %750 = vmatmul.mubr.f32.gmra.mrb[22].mxu1 %v115_v54 }
  0xb1   :  { %1185 = vmatmul.mubr.f32.gmra.mrb[6].mxu0 %v49_v14  ;;  %1646 = vmatpush1.bf16.msra.mxu1 %v2729_v36  ;;  %v133_v36 = vld [vmem:[%s3526_s0 + $0x3b8] sm:$0xff]  ;;  %v449_v14 = vshrl.u32 %v448_v10, 7 }
  0xb2   :  { %755 = vmatprep.mubr.f32.mxu1 %v125_v0  ;;  %1190 = vmatprep.mubr.f32.mxu0 %v1812_v2 }
  0xb3   :  { %1631 = vmatprep.subr.bf16.mxu1 %v2750_v47  ;;  %v143_v47 = vld [vmem:[%s3526_s0 + $0x408] sm:$0xff] }
  0xb4   :  { %756 = vmatmul.mubr.f32.gmra.mrb[24].mxu1 %v124_v11 }
  0xb5   :  { %1191 = vmatmul.mubr.f32.gmra.mrb[8].mxu0 %v58_v15  ;;  %1647 = vmatpush1.bf16.msra.mxu1 %v2771_v60  ;;  %v142_v60 = vld [vmem:[%s3526_s0 + $0x400] sm:$0xff]  ;;  %v450_v15 = vsub.s32 0, %v449_v14 }
  0xb6   :  { %761 = vmatprep.mubr.f32.mxu1 %v134_v24  ;;  %1196 = vmatprep.mubr.f32.mxu0 %v1812_v2 }
  0xb7   :  { %1632 = vmatprep.subr.bf16.mxu1 %v2792_v7  ;;  %v152_v7 = vld [vmem:[%s3526_s0 + $0x450] sm:$0xff] }
  0xb8   :  { %762 = vmatmul.mubr.f32.gmra.mrb[26].mxu1 %v133_v36  ;;  %v446_v36 = vld [vmem:[%s3527_s2] sm:$0x3] }
  0xb9   :  { %1197 = vmatmul.mubr.f32.gmra.mrb[10].mxu0 %v67_v51  ;;  %1648 = vmatpush1.bf16.msra.mxu1 %v2813_v20  ;;  %v151_v20 = vld [vmem:[%s3526_s0 + $0x448] sm:$0xff]  ;;  %v454_v51 = vsub.s32 1, %v449_v14 }
  0xba   :  { %767 = vmatprep.mubr.f32.mxu1 %v143_v47  ;;  %1202 = vmatprep.mubr.f32.mxu0 %v1812_v2 }
  0xbb   :  { %1633 = vmatprep.subr.bf16.mxu1 %v2834_v34  ;;  %v93_v34 = vld [vmem:[%s3526_s0 + $0x278] sm:$0xff] }
  0xbc   :  { %768 = vmatmul.mubr.f32.gmra.mrb[28].mxu1 %v142_v60  ;;  %v3318_v60 = vrot.slane %v446_v36, %v450_v15 }
  0xbd   :  { %1203 = vmatmul.mubr.f32.gmra.mrb[12].mxu0 %v76_v16  ;;  %1649 = vmatpush1.bf16.msra.mxu1 %v2855_v49  ;;  %v92_v49 = vld [vmem:[%s3526_s0 + $0x270] sm:$0xff] }
  0xbe   :  { %773 = vmatprep.mubr.f32.mxu1 %v152_v7  ;;  %1208 = vmatprep.mubr.f32.mxu0 %v1812_v2  ;;  %v3322_v7 = vrot.slane %v446_v36, %v454_v51 }
  0xbf   :  { %1634 = vmatprep.subr.bf16.mxu1 %v2876_v62  ;;  %v102_v62 = vld [vmem:[%s3526_s0 + $0x2c0] sm:$0xff] }
  0xc0   :  { %774 = vmatmul.mubr.f32.gmra.mrb[30].mxu1 %v151_v20 }
  0xc1   :  { %1209 = vmatmul.mubr.f32.gmra.mrb[14].mxu0 %v85_v17  ;;  %1650 = vmatpush1.bf16.msra.mxu1 %v2891_v8  ;;  %v101_v8 = vld [vmem:[%s3526_s0 + $0x2b8] sm:$0xff] }
  0xc2   :  { %1053 = vmatprep.mubr.f32.mxu1 %v93_v34  ;;  %1214 = vmatprep.mubr.f32.mxu0 %v1812_v2 }
  0xc4   :  { %1054 = vmatmul.mubr.f32.vlgmr.msra.gmra.mrb[32].mxu1 %v92_v49 }
  0xc5   :  { %1215 = vmatmul.mubr.f32.gmra.mrb[32].mxu0 %v94_v18  ;;  %1059 = vmatprep.mubr.f32.mxu1 %v102_v62 }
  0xc6   :  { %1220 = vmatprep.mubr.f32.mxu0 %v1812_v2 }
  0xc8   :  { %1060 = vmatmul.mubr.f32.gmra.mrb[34].mxu1 %v101_v8 }
  0xc9   :  { %1221 = vmatmul.mubr.f32.gmra.mrb[34].mxu0 %v103_v22  ;;  %1065 = vmatprep.mubr.f32.mxu1 %v111_v59 }
  0xca   :  { %1226 = vmatprep.mubr.f32.mxu0 %v1812_v2 }
  0xcc   :  { %1066 = vmatmul.mubr.f32.gmra.mrb[36].mxu1 %v110_v25 }
  0xcd   :  { %1227 = vmatmul.mubr.f32.gmra.mrb[36].mxu0 %v112_v26  ;;  %1071 = vmatprep.mubr.f32.mxu1 %v120_v28 }
  0xce   :  { %1232 = vmatprep.mubr.f32.mxu0 %v1812_v2 }
  0xd0   :  { %1072 = vmatmul.mubr.f32.gmra.mrb[38].mxu1 %v119_v29 }
  0xd1   :  { %1233 = vmatmul.mubr.f32.gmra.mrb[38].mxu0 %v121_v3  ;;  %1077 = vmatprep.mubr.f32.mxu1 %v129_v31 }
  0xd2   :  { %1238 = vmatprep.mubr.f32.mxu0 %v1812_v2 }
  0xd4   :  { %1078 = vmatmul.mubr.f32.gmra.mrb[40].mxu1 %v128_v32 }
  0xd5   :  { %1239 = vmatmul.mubr.f32.gmra.mrb[40].mxu0 %v130_v37  ;;  %1083 = vmatprep.mubr.f32.mxu1 %v138_v38 }
  0xd6   :  { %1244 = vmatprep.mubr.f32.mxu0 %v1812_v2 }
  0xd8   :  { %1084 = vmatmul.mubr.f32.gmra.mrb[42].mxu1 %v137_v12 }
  0xd9   :  { %1245 = vmatmul.mubr.f32.gmra.mrb[42].mxu0 %v139_v9  ;;  %1089 = vmatprep.mubr.f32.mxu1 %v147_v40 }
  0xda   :  { %1250 = vmatprep.mubr.f32.mxu0 %v1812_v2 }
  0xdc   :  { %1090 = vmatmul.mubr.f32.gmra.mrb[44].mxu1 %v146_v41 }
  0xdd   :  { %1251 = vmatmul.mubr.f32.gmra.mrb[44].mxu0 %v148_v42  ;;  %1095 = vmatprep.mubr.f32.mxu1 %v156_v21 }
  0xde   :  { %1256 = vmatprep.mubr.f32.mxu0 %v1812_v2 }
  0xe0   :  { %1096 = vmatmul.mubr.f32.gmra.mrb[46].mxu1 %v155_v45 }
  0xe1   :  { %1257 = vmatmul.mubr.f32.gmra.mrb[46].mxu0 %v157_v19 }
 0x138   :  { %v894_v46 = vpop.f32.mrb[16].mxu0 }
 0x139   :  { %v896_v50 = vpop.f32.mrb[17].mxu0 }
 0x13c   :  { %v3273_v30 = vpop.f32.mrb[18].mxu0 }
 0x13d   :  { %v3275_v52 = vpop.f32.mrb[19].mxu0 }
 0x140   :  { %v3277_v53 = vpop.f32.mrb[20].mxu0 }
 0x141   :  { %v3279_v27 = vpop.f32.mrb[21].mxu0 }
 0x144   :  { %v3281_v55 = vpop.f32.mrb[22].mxu0 }
 0x145   :  { %v3283_v39 = vpop.f32.mrb[23].mxu0 }
 0x148   :  { %v3285_v56 = vpop.f32.mrb[24].mxu0 }
 0x149   :  { %v3287_v58 = vpop.f32.mrb[25].mxu0 }
 0x14c   :  { %v3289_v61 = vpop.f32.mrb[26].mxu0 }
 0x14d   :  { %v3291_v35 = vpop.f32.mrb[27].mxu0 }
 0x150   :  { %v3293_v48 = vpop.f32.mrb[28].mxu0 }
 0x151   :  { %v3295_v63 = vpop.f32.mrb[29].mxu0 }
 0x154   :  { %v3297_v1 = vpop.f32.mrb[30].mxu0 }
 0x155   :  { %v3299_v4 = vpop.f32.mrb[31].mxu0 }
 0x157   :  { %v685_v57 = vpop.f32.mrb[0].mxu1 }
 0x158   :  { %v687_v5 = vpop.f32.mrb[1].mxu1  ;;  %v1651_v17 = vadd.f32 %v685_v57, %v3318_v60 }
 0x159   :  { %v1653_v49 = vadd.f32 %v687_v5, %v3322_v7 }
 0x15b   :  { %v691_v2 = vpop.f32.mrb[2].mxu1 }
 0x15c   :  { %v693_v43 = vpop.f32.mrb[3].mxu1  ;;  %v1655_v29 = vadd.f32 %v691_v2, %v3318_v60 }
 0x15d   :  { %v1657_v37 = vadd.f32 %v693_v43, %v3322_v7 }
 0x15f   :  { %v697_v13 = vpop.f32.mrb[4].mxu1 }
 0x160   :  { %v699_v6 = vpop.f32.mrb[5].mxu1 }
 0x161   :  { %v1661_v2 = vadd.f32 %v699_v6, %v3322_v7 }
 0x163   :  { %v703_v23 = vpop.f32.mrb[6].mxu1 }
 0x164   :  { %v3301_v33 = vpop.f32.mrb[7].mxu1  ;;  %v1663_v51 = vadd.f32 %v703_v23, %v3318_v60 }
 0x167   :  { %v3303_v44 = vpop.f32.mrb[8].mxu1 }
 0x168   :  { %v3305_v54 = vpop.f32.mrb[9].mxu1 }
 0x16b   :  { %v3307_v0 = vpop.f32.mrb[10].mxu1 }
 0x16c   :  { %v3309_v11 = vpop.f32.mrb[11].mxu1 }
 0x16f   :  { %v3311_v24 = vpop.f32.mrb[12].mxu1 }
 0x170   :  { %v3316_v47 = vpop.f32.mrb[13].mxu1 }
 0x173   :  { %v3320_v16 = vpop.f32.mrb[14].mxu1 }
 0x174   :  { %v3324_v20 = vpop.f32.mrb[15].mxu1 }
 0x177   :  { %v733_v34 = vpop.f32.mrb[16].mxu1 }
 0x178   :  { %v1683_v18 = vadd.f32 %v733_v34, %v3318_v60  ;;  %v1168_v62 = vpop.f32.mrb[0].mxu0  ;;  %v735_v8 = vpop.f32.mrb[17].mxu1 }
 0x179   :  { %v1652_v22 = vadd.f32 %v1651_v17, %v1168_v62  ;;  %v1687_v59 = vadd.f32 %v735_v8, %v3322_v7  ;;  %v1170_v25 = vpop.f32.mrb[1].mxu0 }
 0x17a   :  { %v1654_v26 = vadd.f32 %v1653_v49, %v1170_v25  ;;  %v3330_v28 = vadd.f32 %v1683_v18, %v894_v46  ;;  %v1659_v46 = vadd.f32 %v697_v13, %v3318_v60  ;;  %v1665_v18 = vadd.f32 %v3301_v33, %v3322_v7 }
 0x17b   :  { %v1263_v3 = vmax.f32 %v1652_v22, 0.0  ;;  %v739_v31 = vpop.f32.mrb[18].mxu1  ;;  %v3333_v32 = vadd.f32 %v1687_v59, %v896_v50 }
 0x17c   :  { %v1264_v38 = vmax.f32 %v1654_v26, 0.0  ;;  %v1691_v12 = vadd.f32 %v739_v31, %v3318_v60  ;;  %v1174_v9 = vpop.f32.mrb[2].mxu0  ;;  %v741_v40 = vpop.f32.mrb[19].mxu1  ;;  %v1667_v26 = vadd.f32 %v3303_v44, %v3318_v60 }
 0x17d   :  { %1295 = vst [vmem:[%s3528_s3] sm:$0xff] %v1263_v3  ;;  %v1656_v41 = vadd.f32 %v1655_v29, %v1174_v9  ;;  %v1695_v42 = vadd.f32 %v741_v40, %v3322_v7  ;;  %v1176_v21 = vpop.f32.mrb[3].mxu0 }
 0x17e   :  { %1296 = vst [vmem:[%s3528_s3 + $0x8] sm:$0xff] %v1264_v38  ;;  %v1658_v45 = vadd.f32 %v1657_v37, %v1176_v21  ;;  %v3345_v19 = vadd.f32 %v1691_v12, %v3273_v30  ;;  %v1669_v37 = vadd.f32 %v3305_v54, %v3322_v7 }
 0x17f   :  { %v1265_v50 = vmax.f32 %v1656_v41, 0.0  ;;  %v745_v57 = vpop.f32.mrb[20].mxu1  ;;  %v3349_v5 = vadd.f32 %v1695_v42, %v3275_v52  ;;  %v1671_v42 = vadd.f32 %v3307_v0, %v3318_v60 }
 0x180   :  { %v1266_v43 = vmax.f32 %v1658_v45, 0.0  ;;  %v1699_v10 = vadd.f32 %v745_v57, %v3318_v60  ;;  %v1180_v14 = vpop.f32.mrb[4].mxu0  ;;  %v747_v15 = vpop.f32.mrb[21].mxu1 }
 0x181   :  { %1297 = vst [vmem:[%s3528_s3 + $0x10] sm:$0xff] %v1265_v50  ;;  %v1660_v30 = vadd.f32 %v1659_v46, %v1180_v14  ;;  %v1703_v36 = vadd.f32 %v747_v15, %v3322_v7  ;;  %v1182_v13 = vpop.f32.mrb[5].mxu0  ;;  %v1673_v50 = vadd.f32 %v3309_v11, %v3322_v7  ;;  %v1675_v15 = vadd.f32 %v3311_v24, %v3318_v60 }
 0x182   :  { %1298 = vst [vmem:[%s3528_s3 + $0x18] sm:$0xff] %v1266_v43  ;;  %v1662_v52 = vadd.f32 %v1661_v2, %v1182_v13  ;;  %v3361_v6 = vadd.f32 %v1699_v10, %v3277_v53 }
 0x183   :  { %v1267_v17 = vmax.f32 %v1660_v30, 0.0  ;;  %v751_v34 = vpop.f32.mrb[22].mxu1  ;;  %v3365_v49 = vadd.f32 %v1703_v36, %v3279_v27 }
 0x184   :  { %v1268_v62 = vmax.f32 %v1662_v52, 0.0  ;;  %v1707_v8 = vadd.f32 %v751_v34, %v3318_v60  ;;  %v1186_v22 = vpop.f32.mrb[6].mxu0  ;;  %v753_v59 = vpop.f32.mrb[23].mxu1  ;;  %v1677_v52 = vadd.f32 %v3316_v47, %v3322_v7 }
 0x185   :  { %1299 = vst [vmem:[%s3528_s3 + $0x20] sm:$0xff] %v1267_v17  ;;  %v1664_v53 = vadd.f32 %v1663_v51, %v1186_v22  ;;  %v1711_v23 = vadd.f32 %v753_v59, %v3322_v7  ;;  %v1188_v25 = vpop.f32.mrb[7].mxu0 }
 0x186   :  { %1300 = vst [vmem:[%s3528_s3 + $0x28] sm:$0xff] %v1268_v62  ;;  %v1666_v27 = vadd.f32 %v1665_v18, %v1188_v25  ;;  %v3378_v33 = vadd.f32 %v1707_v8, %v3281_v55  ;;  %v1679_v8 = vadd.f32 %v3320_v16, %v3318_v60 }
 0x187   :  { %v1269_v29 = vmax.f32 %v1664_v53, 0.0  ;;  %v757_v3 = vpop.f32.mrb[24].mxu1  ;;  %v3383_v31 = vadd.f32 %v1711_v23, %v3283_v39  ;;  %v1681_v23 = vadd.f32 %v3324_v20, %v3322_v7 }
 0x188   :  { %v1270_v38 = vmax.f32 %v1666_v27, 0.0  ;;  %v1715_v12 = vadd.f32 %v757_v3, %v3318_v60  ;;  %v1192_v9 = vpop.f32.mrb[8].mxu0  ;;  %v759_v40 = vpop.f32.mrb[25].mxu1 }
 0x189   :  { %1301 = vst [vmem:[%s3528_s3 + $0x30] sm:$0xff] %v1269_v29  ;;  %v1668_v55 = vadd.f32 %v1667_v26, %v1192_v9  ;;  %v1719_v44 = vadd.f32 %v759_v40, %v3322_v7  ;;  %v1194_v41 = vpop.f32.mrb[9].mxu0 }
 0x18a   :  { %1302 = vst [vmem:[%s3528_s3 + $0x38] sm:$0xff] %v1270_v38  ;;  %v1670_v39 = vadd.f32 %v1669_v37, %v1194_v41  ;;  %v3396_v54 = vadd.f32 %v1715_v12, %v3285_v56 }
 0x18b   :  { %v1271_v21 = vmax.f32 %v1668_v55, 0.0  ;;  %v763_v45 = vpop.f32.mrb[26].mxu1  ;;  %v3401_v46 = vadd.f32 %v1719_v44, %v3287_v58 }
 0x18c   :  { %v1272_v57 = vmax.f32 %v1670_v39, 0.0  ;;  %v1723_v2 = vadd.f32 %v763_v45, %v3318_v60  ;;  %v1198_v43 = vpop.f32.mrb[10].mxu0  ;;  %v765_v10 = vpop.f32.mrb[27].mxu1 }
 0x18d   :  { %1303 = vst [vmem:[%s3528_s3 + $0x40] sm:$0xff] %v1271_v21  ;;  %v1672_v56 = vadd.f32 %v1671_v42, %v1198_v43  ;;  %v1727_v0 = vadd.f32 %v765_v10, %v3322_v7  ;;  %v1200_v14 = vpop.f32.mrb[11].mxu0 }
 0x18e   :  { %1304 = vst [vmem:[%s3528_s3 + $0x48] sm:$0xff] %v1272_v57  ;;  %v1674_v58 = vadd.f32 %v1673_v50, %v1200_v14  ;;  %v3414_v11 = vadd.f32 %v1723_v2, %v3289_v61 }
 0x18f   :  { %v1273_v30 = vmax.f32 %v1672_v56, 0.0  ;;  %v769_v36 = vpop.f32.mrb[28].mxu1  ;;  %v3419_v13 = vadd.f32 %v1727_v0, %v3291_v35 }
 0x190   :  { %v1274_v51 = vmax.f32 %v1674_v58, 0.0  ;;  %v1731_v17 = vadd.f32 %v769_v36, %v3318_v60  ;;  %v1204_v34 = vpop.f32.mrb[12].mxu0  ;;  %v771_v18 = vpop.f32.mrb[29].mxu1 }
 0x191   :  { %1305 = vst [vmem:[%s3528_s3 + $0x50] sm:$0xff] %v1273_v30  ;;  %v1676_v61 = vadd.f32 %v1675_v15, %v1204_v34  ;;  %v1735_v24 = vadd.f32 %v771_v18, %v3322_v7  ;;  %v1206_v62 = vpop.f32.mrb[13].mxu0 }
 0x192   :  { %1306 = vst [vmem:[%s3528_s3 + $0x58] sm:$0xff] %v1274_v51  ;;  %v1678_v35 = vadd.f32 %v1677_v52, %v1206_v62  ;;  %v3432_v47 = vadd.f32 %v1731_v17, %v3293_v48 }
 0x193   :  { %v1275_v22 = vmax.f32 %v1676_v61, 0.0  ;;  %v775_v59 = vpop.f32.mrb[30].mxu1  ;;  %v3437_v53 = vadd.f32 %v1735_v24, %v3295_v63 }
 0x194   :  { %v1276_v25 = vmax.f32 %v1678_v35, 0.0  ;;  %v1739_v27 = vadd.f32 %v775_v59, %v3318_v60  ;;  %v1210_v26 = vpop.f32.mrb[14].mxu0  ;;  %v777_v29 = vpop.f32.mrb[31].mxu1 }
 0x195   :  { %1307 = vst [vmem:[%s3528_s3 + $0x60] sm:$0xff] %v1275_v22  ;;  %v1680_v48 = vadd.f32 %v1679_v8, %v1210_v26  ;;  %v1743_v16 = vadd.f32 %v777_v29, %v3322_v7  ;;  %v1212_v3 = vpop.f32.mrb[15].mxu0 }
 0x196   :  { %1308 = vst [vmem:[%s3528_s3 + $0x68] sm:$0xff] %v1276_v25  ;;  %v1682_v63 = vadd.f32 %v1681_v23, %v1212_v3  ;;  %v3450_v20 = vadd.f32 %v1739_v27, %v3297_v1 }
 0x197   :  { %v1277_v37 = vmax.f32 %v1680_v48, 0.0  ;;  %v1055_v60 = vpop.f32.mrb[32].mxu1  ;;  %v3453_v38 = vadd.f32 %v1743_v16, %v3299_v4 }
 0x198   :  { %v1278_v12 = vmax.f32 %v1682_v63, 0.0  ;;  %v1685_v9 = vadd.f32 %v3330_v28, %v1055_v60  ;;  %v1057_v40 = vpop.f32.mrb[33].mxu1  ;;  %v1216_v55 = vpop.f32.mrb[32].mxu0 }
 0x199   :  { %1309 = vst [vmem:[%s3528_s3 + $0x70] sm:$0xff] %v1277_v37  ;;  %v1689_v7 = vadd.f32 %v3333_v32, %v1057_v40  ;;  %v1218_v44 = vpop.f32.mrb[33].mxu0 }
 0x19a   :  { %1310 = vst [vmem:[%s3528_s3 + $0x78] sm:$0xff] %v1278_v12  ;;  %v1686_v1 = vadd.f32 %v1685_v9, %v1216_v55 }
 0x19b   :  { %v1690_v41 = vadd.f32 %v1689_v7, %v1218_v44  ;;  %v1061_v4 = vpop.f32.mrb[34].mxu1 }
 0x19c   :  { %v1279_v39 = vmax.f32 %v1686_v1, 0.0  ;;  %v1693_v42 = vadd.f32 %v3345_v19, %v1061_v4  ;;  %v1063_v28 = vpop.f32.mrb[35].mxu1  ;;  %v1222_v21 = vpop.f32.mrb[34].mxu0 }
 0x19d   :  { %v1280_v45 = vmax.f32 %v1690_v41, 0.0  ;;  %v1697_v50 = vadd.f32 %v3349_v5, %v1063_v28  ;;  %v1224_v57 = vpop.f32.mrb[35].mxu0 }
 0x19e   :  { %1311 = vst [vmem:[%s3528_s3 + $0x80] sm:$0xff] %v1279_v39  ;;  %v1694_v32 = vadd.f32 %v1693_v42, %v1222_v21 }
 0x19f   :  { %1312 = vst [vmem:[%s3528_s3 + $0x88] sm:$0xff] %v1280_v45  ;;  %v1698_v2 = vadd.f32 %v1697_v50, %v1224_v57  ;;  %v1067_v43 = vpop.f32.mrb[36].mxu1 }
 0x1a0   :  { %v1281_v10 = vmax.f32 %v1694_v32, 0.0  ;;  %v1701_v19 = vadd.f32 %v3361_v6, %v1067_v43  ;;  %v1069_v56 = vpop.f32.mrb[37].mxu1  ;;  %v1228_v0 = vpop.f32.mrb[36].mxu0 }
 0x1a1   :  { %v1282_v14 = vmax.f32 %v1698_v2, 0.0  ;;  %v1705_v5 = vadd.f32 %v3365_v49, %v1069_v56  ;;  %v1230_v58 = vpop.f32.mrb[37].mxu0 }
 0x1a2   :  { %1313 = vst [vmem:[%s3528_s3 + $0x90] sm:$0xff] %v1281_v10  ;;  %v1702_v15 = vadd.f32 %v1701_v19, %v1228_v0 }
 0x1a3   :  { %1314 = vst [vmem:[%s3528_s3 + $0x98] sm:$0xff] %v1282_v14  ;;  %v1706_v30 = vadd.f32 %v1705_v5, %v1230_v58  ;;  %v1073_v36 = vpop.f32.mrb[38].mxu1 }
 0x1a4   :  { %v1283_v52 = vmax.f32 %v1702_v15, 0.0  ;;  %v1709_v6 = vadd.f32 %v3378_v33, %v1073_v36  ;;  %v1075_v51 = vpop.f32.mrb[39].mxu1  ;;  %v1234_v17 = vpop.f32.mrb[38].mxu0 }
 0x1a5   :  { %v1284_v34 = vmax.f32 %v1706_v30, 0.0  ;;  %v1713_v49 = vadd.f32 %v3383_v31, %v1075_v51  ;;  %v1236_v18 = vpop.f32.mrb[39].mxu0 }
 0x1a6   :  { %1315 = vst [vmem:[%s3528_s3 + $0xa0] sm:$0xff] %v1283_v52  ;;  %v1710_v61 = vadd.f32 %v1709_v6, %v1234_v17 }
 0x1a7   :  { %1316 = vst [vmem:[%s3528_s3 + $0xa8] sm:$0xff] %v1284_v34  ;;  %v1714_v24 = vadd.f32 %v1713_v49, %v1236_v18  ;;  %v1079_v62 = vpop.f32.mrb[40].mxu1 }
 0x1a8   :  { %v1285_v35 = vmax.f32 %v1710_v61, 0.0  ;;  %v1717_v33 = vadd.f32 %v3396_v54, %v1079_v62  ;;  %v1081_v8 = vpop.f32.mrb[41].mxu1  ;;  %v1240_v22 = vpop.f32.mrb[40].mxu0 }
 0x1a9   :  { %v1286_v59 = vmax.f32 %v1714_v24, 0.0  ;;  %v1721_v31 = vadd.f32 %v3401_v46, %v1081_v8  ;;  %v1242_v23 = vpop.f32.mrb[41].mxu0 }
 0x1aa   :  { %1317 = vst [vmem:[%s3528_s3 + $0xb0] sm:$0xff] %v1285_v35  ;;  %v1718_v25 = vadd.f32 %v1717_v33, %v1240_v22 }
 0x1ab   :  { %1318 = vst [vmem:[%s3528_s3 + $0xb8] sm:$0xff] %v1286_v59  ;;  %v1722_v27 = vadd.f32 %v1721_v31, %v1242_v23  ;;  %v1085_v26 = vpop.f32.mrb[42].mxu1 }
 0x1ac   :  { %v1287_v29 = vmax.f32 %v1718_v25, 0.0  ;;  %v1725_v54 = vadd.f32 %v3414_v11, %v1085_v26  ;;  %v1087_v48 = vpop.f32.mrb[43].mxu1  ;;  %v1246_v16 = vpop.f32.mrb[42].mxu0 }
 0x1ad   :  { %v1288_v3 = vmax.f32 %v1722_v27, 0.0  ;;  %v1729_v46 = vadd.f32 %v3419_v13, %v1087_v48  ;;  %v1248_v63 = vpop.f32.mrb[43].mxu0 }
 0x1ae   :  { %1319 = vst [vmem:[%s3528_s3 + $0xc0] sm:$0xff] %v1287_v29  ;;  %v1726_v37 = vadd.f32 %v1725_v54, %v1246_v16 }
 0x1af   :  { %1320 = vst [vmem:[%s3528_s3 + $0xc8] sm:$0xff] %v1288_v3  ;;  %v1730_v60 = vadd.f32 %v1729_v46, %v1248_v63  ;;  %v1091_v12 = vpop.f32.mrb[44].mxu1 }
 0x1b0   :  { %v1289_v9 = vmax.f32 %v1726_v37, 0.0  ;;  %v1733_v11 = vadd.f32 %v3432_v47, %v1091_v12  ;;  %v1093_v40 = vpop.f32.mrb[45].mxu1  ;;  %v1252_v55 = vpop.f32.mrb[44].mxu0 }
 0x1b1   :  { %v1290_v7 = vmax.f32 %v1730_v60, 0.0  ;;  %v1737_v13 = vadd.f32 %v3437_v53, %v1093_v40  ;;  %v1254_v44 = vpop.f32.mrb[45].mxu0 }
 0x1b2   :  { %1321 = vst [vmem:[%s3528_s3 + $0xd0] sm:$0xff] %v1289_v9  ;;  %v1734_v1 = vadd.f32 %v1733_v11, %v1252_v55 }
 0x1b3   :  { %1322 = vst [vmem:[%s3528_s3 + $0xd8] sm:$0xff] %v1290_v7  ;;  %v1738_v41 = vadd.f32 %v1737_v13, %v1254_v44  ;;  %v1097_v4 = vpop.f32.mrb[46].mxu1 }
 0x1b4   :  { %v1291_v39 = vmax.f32 %v1734_v1, 0.0  ;;  %v1741_v47 = vadd.f32 %v3450_v20, %v1097_v4  ;;  %v1099_v42 = vpop.f32.mrb[47].mxu1  ;;  %v1258_v28 = vpop.f32.mrb[46].mxu0 }
 0x1b5   :  { %v1292_v21 = vmax.f32 %v1738_v41, 0.0  ;;  %v1745_v53 = vadd.f32 %v3453_v38, %v1099_v42  ;;  %v1260_v45 = vpop.f32.mrb[47].mxu0 }
 0x1b6   :  { %1323 = vst [vmem:[%s3528_s3 + $0xe0] sm:$0xff] %v1291_v39  ;;  %v1742_v50 = vadd.f32 %v1741_v47, %v1258_v28 }
 0x1b7   :  { %1324 = vst [vmem:[%s3528_s3 + $0xe8] sm:$0xff] %v1292_v21  ;;  %v1746_v57 = vadd.f32 %v1745_v53, %v1260_v45 }
 0x1b8   :  { %v1293_v32 = vmax.f32 %v1742_v50, 0.0 }
 0x1b9   :  { %v1294_v2 = vmax.f32 %v1746_v57, 0.0 }
 0x1ba   :  { %1325 = vst [vmem:[%s3528_s3 + $0xf0] sm:$0xff] %v1293_v32 }
 0x1bb   :  { %1326 = vst [vmem:[%s3528_s3 + $0xf8] sm:$0xff] %v1294_v2 }

// kernel: session5_model_forward.13
= control target key start
LH: loop header
LB: loop body
LE: loop exit
PB: predicated region body
PF: predicated region fallthrough
CT: control target
= control target key end

     0   :  { %v3116_v47 = vmov 1983009808   ;;  %v560_v49 = vlaneseq  ;;  %s4841_s0 = inlined_call_operand.vmem [shape: f32[2,4096], index: 0, kind: input, shape index: {}]   ;;  %s4842_s1 = inlined_call_operand.vmem [shape: f32[4096,50], index: 1, kind: input, shape index: {}]   ;;  %s4843_s2 = inlined_call_operand.vmem [shape: f32[1,50], index: 2, kind: input, shape index: {}]   ;;  %s4844_s3 = inlined_call_operand.vmem [shape: f32[50,10], index: 3, kind: input, shape index: {}]   ;;  %s4845_s4 = inlined_call_operand.vmem [shape: f32[1,10], index: 4, kind: input, shape index: {}]   ;;  %s4846_s5 = inlined_call_operand.hbm [shape: f32[2,10], index: 5, kind: output, shape index: {}]  }
   0x1   :  { %v45_v0 = vld [vmem:[%s4842_s1 + $0x80] sm:$0xff]  ;;  %v46_v1 = vld [vmem:[%s4842_s1 + $0x88] sm:$0xff]  ;;  %v47_v11 = vld [vmem:[%s4842_s1 + $0x90] sm:$0xff]  ;;  %v558_v48 = vunpack.c.l.s4 %v3116_v47 }
   0x2   :  { %v29_v2 = vld [vmem:[%s4842_s1] sm:$0xff]  ;;  %v2554_v3 = vpack.c.bf16 %v46_v1, %v45_v0  ;;  %v30_v4 = vld [vmem:[%s4842_s1 + $0x8] sm:$0xff]  ;;  %v48_v13 = vld [vmem:[%s4842_s1 + $0x98] sm:$0xff]  ;;  %v561_v0 = vshrl.u32 %v560_v49, 7 }
   0x3   :  { %v77_v5 = vld [vmem:[%s4842_s1 + $0x180] sm:$0xff]  ;;  %v78_v6 = vld [vmem:[%s4842_s1 + $0x188] sm:$0xff]  ;;  %v2556_v7 = vpack.c.bf16 %v30_v4, %v29_v2  ;;  %v31_v14 = vld [vmem:[%s4842_s1 + $0x10] sm:$0xff]  ;;  %v2558_v16 = vpack.c.bf16 %v48_v13, %v47_v11  ;;  %v559_v63 = vunpack.c.0.s8 %v558_v48 }
   0x4   :  { %v2586_v8 = vpack.c.bf16 %v78_v6, %v77_v5  ;;  %v61_v9 = vld [vmem:[%s4842_s1 + $0x100] sm:$0xff]  ;;  %v62_v10 = vld [vmem:[%s4842_s1 + $0x108] sm:$0xff]  ;;  %2555 = vmatprep.subr.bf16.mxu0 %v2554_v3  ;;  %v32_v15 = vld [vmem:[%s4842_s1 + $0x18] sm:$0xff] }
   0x5   :  { %v2588_v12 = vpack.c.bf16 %v62_v10, %v61_v9  ;;  %2557 = vmatpush3.bf16.msra.mxu0 %v2556_v7  ;;  %v2560_v17 = vpack.c.bf16 %v32_v15, %v31_v14  ;;  %v79_v18 = vld [vmem:[%s4842_s1 + $0x190] sm:$0xff]  ;;  %v80_v19 = vld [vmem:[%s4842_s1 + $0x198] sm:$0xff]  ;;  %v49_v23 = vld [vmem:[%s4842_s1 + $0xa0] sm:$0xff]  ;;  %v3301_v13 = vsub.s32 %v559_v63, %v561_v0 }
   0x6   :  { %2587 = vmatprep.subr.bf16.mxu1 %v2586_v8  ;;  %v63_v20 = vld [vmem:[%s4842_s1 + $0x110] sm:$0xff]  ;;  %v2590_v21 = vpack.c.bf16 %v80_v19, %v79_v18  ;;  %v64_v22 = vld [vmem:[%s4842_s1 + $0x118] sm:$0xff]  ;;  %v50_v24 = vld [vmem:[%s4842_s1 + $0xa8] sm:$0xff]  ;;  %2559 = vmatprep.subr.bf16.mxu0 %v2558_v16 }
   0x7   :  { %2589 = vmatpush3.bf16.msra.mxu1 %v2588_v12  ;;  %v2592_v25 = vpack.c.bf16 %v64_v22, %v63_v20  ;;  %v2562_v26 = vpack.c.bf16 %v50_v24, %v49_v23  ;;  %v33_v27 = vld [vmem:[%s4842_s1 + $0x20] sm:$0xff]  ;;  %v34_v28 = vld [vmem:[%s4842_s1 + $0x28] sm:$0xff]  ;;  %v51_v35 = vld [vmem:[%s4842_s1 + $0xb0] sm:$0xff] }
   0x8   :  { %v81_v29 = vld [vmem:[%s4842_s1 + $0x1a0] sm:$0xff]  ;;  %2591 = vmatprep.subr.bf16.mxu1 %v2590_v21  ;;  %v82_v30 = vld [vmem:[%s4842_s1 + $0x1a8] sm:$0xff]  ;;  %v2564_v33 = vpack.c.bf16 %v34_v28, %v33_v27  ;;  %v52_v36 = vld [vmem:[%s4842_s1 + $0xb8] sm:$0xff] }
   0x9   :  { %v65_v31 = vld [vmem:[%s4842_s1 + $0x120] sm:$0xff]  ;;  %v66_v32 = vld [vmem:[%s4842_s1 + $0x128] sm:$0xff]  ;;  %2561 = vmatpush3.bf16.msra.mxu0 %v2560_v17  ;;  %v2594_v34 = vpack.c.bf16 %v82_v30, %v81_v29  ;;  %v35_v37 = vld [vmem:[%s4842_s1 + $0x30] sm:$0xff]  ;;  %v2566_v39 = vpack.c.bf16 %v52_v36, %v51_v35 }
   0xa   :  { %2563 = vmatprep.subr.bf16.mxu0 %v2562_v26  ;;  %v2596_v38 = vpack.c.bf16 %v66_v32, %v65_v31  ;;  %v36_v40 = vld [vmem:[%s4842_s1 + $0x38] sm:$0xff]  ;;  %v83_v41 = vld [vmem:[%s4842_s1 + $0x1b0] sm:$0xff]  ;;  %v53_v46 = vld [vmem:[%s4842_s1 + $0xc0] sm:$0xff] }
   0xb   :  { %2593 = vmatpush3.bf16.msra.mxu1 %v2592_v25  ;;  %v84_v42 = vld [vmem:[%s4842_s1 + $0x1b8] sm:$0xff]  ;;  %v67_v44 = vld [vmem:[%s4842_s1 + $0x130] sm:$0xff]  ;;  %v54_v50 = vld [vmem:[%s4842_s1 + $0xc8] sm:$0xff]  ;;  %v2568_v51 = vpack.c.bf16 %v36_v40, %v35_v37 }
   0xc   :  { %2595 = vmatprep.subr.bf16.mxu1 %v2594_v34  ;;  %v2598_v43 = vpack.c.bf16 %v84_v42, %v83_v41  ;;  %v68_v45 = vld [vmem:[%s4842_s1 + $0x138] sm:$0xff]  ;;  %v85_v52 = vld [vmem:[%s4842_s1 + $0x1c0] sm:$0xff]  ;;  %v86_v53 = vld [vmem:[%s4842_s1 + $0x1c8] sm:$0xff]  ;;  %v2570_v55 = vpack.c.bf16 %v54_v50, %v53_v46 }
   0xd   :  { %2565 = vmatpush3.bf16.msra.mxu0 %v2564_v33  ;;  %v2600_v54 = vpack.c.bf16 %v68_v45, %v67_v44  ;;  %v37_v56 = vld [vmem:[%s4842_s1 + $0x40] sm:$0xff]  ;;  %v38_v57 = vld [vmem:[%s4842_s1 + $0x48] sm:$0xff]  ;;  %v2602_v59 = vpack.c.bf16 %v86_v53, %v85_v52  ;;  %v55_v61 = vld [vmem:[%s4842_s1 + $0xd0] sm:$0xff] }
   0xe   :  { %2567 = vmatprep.subr.bf16.mxu0 %v2566_v39  ;;  %v69_v58 = vld [vmem:[%s4842_s1 + $0x140] sm:$0xff]  ;;  %v70_v60 = vld [vmem:[%s4842_s1 + $0x148] sm:$0xff]  ;;  %v56_v62 = vld [vmem:[%s4842_s1 + $0xd8] sm:$0xff]  ;;  %v2572_v3 = vpack.c.bf16 %v38_v57, %v37_v56 }
   0xf   :  { %2597 = vmatpush3.bf16.msra.mxu1 %v2596_v38  ;;  %v87_v1 = vld [vmem:[%s4842_s1 + $0x1d0] sm:$0xff]  ;;  %v88_v2 = vld [vmem:[%s4842_s1 + $0x1d8] sm:$0xff]  ;;  %v2604_v4 = vpack.c.bf16 %v70_v60, %v69_v58  ;;  %v2574_v5 = vpack.c.bf16 %v56_v62, %v55_v61  ;;  %v57_v11 = vld [vmem:[%s4842_s1 + $0xe0] sm:$0xff] }
  0x10   :  { %2599 = vmatprep.subr.bf16.mxu1 %v2598_v43  ;;  %v39_v6 = vld [vmem:[%s4842_s1 + $0x50] sm:$0xff]  ;;  %v40_v7 = vld [vmem:[%s4842_s1 + $0x58] sm:$0xff]  ;;  %v2606_v9 = vpack.c.bf16 %v88_v2, %v87_v1  ;;  %v58_v12 = vld [vmem:[%s4842_s1 + $0xe8] sm:$0xff] }
  0x11   :  { %2569 = vmatpush3.bf16.msra.mxu0 %v2568_v51  ;;  %v71_v8 = vld [vmem:[%s4842_s1 + $0x150] sm:$0xff]  ;;  %v72_v10 = vld [vmem:[%s4842_s1 + $0x158] sm:$0xff]  ;;  %v89_v14 = vld [vmem:[%s4842_s1 + $0x1e0] sm:$0xff]  ;;  %v2576_v16 = vpack.c.bf16 %v40_v7, %v39_v6  ;;  %v2578_v19 = vpack.c.bf16 %v58_v12, %v57_v11 }
  0x12   :  { %2571 = vmatprep.subr.bf16.mxu0 %v2570_v55  ;;  %v90_v15 = vld [vmem:[%s4842_s1 + $0x1e8] sm:$0xff]  ;;  %v41_v17 = vld [vmem:[%s4842_s1 + $0x60] sm:$0xff]  ;;  %v2608_v18 = vpack.c.bf16 %v72_v10, %v71_v8  ;;  %v59_v25 = vld [vmem:[%s4842_s1 + $0xf0] sm:$0xff] }
  0x13   :  { %2601 = vmatpush3.bf16.msra.mxu1 %v2600_v54  ;;  %v42_v20 = vld [vmem:[%s4842_s1 + $0x68] sm:$0xff]  ;;  %v73_v21 = vld [vmem:[%s4842_s1 + $0x160] sm:$0xff]  ;;  %v2610_v23 = vpack.c.bf16 %v90_v15, %v89_v14  ;;  %v60_v26 = vld [vmem:[%s4842_s1 + $0xf8] sm:$0xff] }
  0x14   :  { %2603 = vmatprep.subr.bf16.mxu1 %v2602_v59  ;;  %v21_v22 = vld [vmem:[%s4841_s0] sm:$0xff]  ;;  %v74_v24 = vld [vmem:[%s4842_s1 + $0x168] sm:$0xff]  ;;  %v91_v29 = vld [vmem:[%s4842_s1 + $0x1f0] sm:$0xff]  ;;  %v2580_v31 = vpack.c.bf16 %v42_v20, %v41_v17  ;;  %v2582_v35 = vpack.c.bf16 %v60_v26, %v59_v25 }
  0x15   :  { %2573 = vmatpush3.bf16.msra.mxu0 %v2572_v3  ;;  %v563_v27 = vrot.slane %v21_v22, %v3301_v13  ;;  %v556_v28 = vcombine.high %v21_v22, %v21_v22  ;;  %v92_v30 = vld [vmem:[%s4842_s1 + $0x1f8] sm:$0xff]  ;;  %v2612_v34 = vpack.c.bf16 %v74_v24, %v73_v21  ;;  %v43_v36 = vld [vmem:[%s4842_s1 + $0x70] sm:$0xff]  ;;  %v109_v41 = vld [vmem:[%s4842_s1 + $0x280] sm:$0xff] }
  0x16   :  { %2575 = vmatprep.subr.bf16.mxu0 %v2574_v5  ;;  %v44_v37 = vld [vmem:[%s4842_s1 + $0x78] sm:$0xff]  ;;  %v75_v38 = vld [vmem:[%s4842_s1 + $0x170] sm:$0xff]  ;;  %v2614_v39 = vpack.c.bf16 %v92_v30, %v91_v29  ;;  %v110_v42 = vld [vmem:[%s4842_s1 + $0x288] sm:$0xff] }
  0x17   :  { %2605 = vmatpush3.bf16.msra.mxu1 %v2604_v4  ;;  %v571_v32 = vcombine.high %v563_v27, %v563_v27  ;;  %v570_v33 = vrot.slane %v556_v28, %v3301_v13  ;;  %v76_v40 = vld [vmem:[%s4842_s1 + $0x178] sm:$0xff]  ;;  %v141_v44 = vld [vmem:[%s4842_s1 + $0x380] sm:$0xff]  ;;  %v142_v45 = vld [vmem:[%s4842_s1 + $0x388] sm:$0xff]  ;;  %v2584_v46 = vpack.c.bf16 %v44_v37, %v43_v36  ;;  %v2618_v48 = vpack.c.bf16 %v110_v42, %v109_v41 }
  0x18   :  { %2607 = vmatprep.subr.bf16.mxu1 %v2606_v9  ;;  %v2616_v47 = vpack.c.bf16 %v76_v40, %v75_v38  ;;  %v93_v49 = vld [vmem:[%s4842_s1 + $0x200] sm:$0xff]  ;;  %v94_v50 = vld [vmem:[%s4842_s1 + $0x208] sm:$0xff]  ;;  %v2650_v52 = vpack.c.bf16 %v142_v45, %v141_v44  ;;  %v111_v54 = vld [vmem:[%s4842_s1 + $0x290] sm:$0xff] }
  0x19   :  { %2577 = vmatpush3.bf16.msra.mxu0 %v2576_v16  ;;  %788 = vmatprep.mubr.f32.mxu0 %v571_v32  ;;  %v572_v43 = vcombine.high %v570_v33, %v570_v33  ;;  %v125_v51 = vld [vmem:[%s4842_s1 + $0x300] sm:$0xff]  ;;  %v126_v53 = vld [vmem:[%s4842_s1 + $0x308] sm:$0xff]  ;;  %v112_v55 = vld [vmem:[%s4842_s1 + $0x298] sm:$0xff]  ;;  %v2620_v58 = vpack.c.bf16 %v94_v50, %v93_v49 }
  0x1a   :  { %2579 = vmatprep.subr.bf16.mxu0 %v2578_v19  ;;  %v143_v56 = vld [vmem:[%s4842_s1 + $0x390] sm:$0xff]  ;;  %v144_v57 = vld [vmem:[%s4842_s1 + $0x398] sm:$0xff]  ;;  %v2652_v59 = vpack.c.bf16 %v126_v53, %v125_v51  ;;  %v2622_v60 = vpack.c.bf16 %v112_v55, %v111_v54  ;;  %v113_v2 = vld [vmem:[%s4842_s1 + $0x2a0] sm:$0xff] }
  0x1b   :  { %2609 = vmatpush3.bf16.msra.mxu1 %v2608_v18  ;;  %858 = vmatprep.mubr.f32.mxu1 %v572_v43  ;;  %v95_v61 = vld [vmem:[%s4842_s1 + $0x210] sm:$0xff]  ;;  %v96_v62 = vld [vmem:[%s4842_s1 + $0x218] sm:$0xff]  ;;  %v2654_v0 = vpack.c.bf16 %v144_v57, %v143_v56  ;;  %v114_v3 = vld [vmem:[%s4842_s1 + $0x2a8] sm:$0xff] }
  0x1c   :  { %2611 = vmatprep.subr.bf16.mxu1 %v2610_v23  ;;  %v127_v63 = vld [vmem:[%s4842_s1 + $0x310] sm:$0xff]  ;;  %v128_v1 = vld [vmem:[%s4842_s1 + $0x318] sm:$0xff]  ;;  %v145_v4 = vld [vmem:[%s4842_s1 + $0x3a0] sm:$0xff]  ;;  %v2624_v6 = vpack.c.bf16 %v96_v62, %v95_v61  ;;  %v2626_v8 = vpack.c.bf16 %v114_v3, %v113_v2 }
  0x1d   :  { %2581 = vmatpush3.bf16.msra.mxu0 %v2580_v31  ;;  %v146_v5 = vld [vmem:[%s4842_s1 + $0x3a8] sm:$0xff]  ;;  %v2656_v7 = vpack.c.bf16 %v128_v1, %v127_v63  ;;  %v97_v9 = vld [vmem:[%s4842_s1 + $0x220] sm:$0xff]  ;;  %v115_v15 = vld [vmem:[%s4842_s1 + $0x2b0] sm:$0xff] }
  0x1e   :  { %2583 = vmatprep.subr.bf16.mxu0 %v2582_v35  ;;  %v98_v10 = vld [vmem:[%s4842_s1 + $0x228] sm:$0xff]  ;;  %v129_v11 = vld [vmem:[%s4842_s1 + $0x320] sm:$0xff]  ;;  %v2658_v12 = vpack.c.bf16 %v146_v5, %v145_v4  ;;  %v116_v16 = vld [vmem:[%s4842_s1 + $0x2b8] sm:$0xff] }
  0x1f   :  { %2613 = vmatpush3.bf16.msra.mxu1 %v2612_v34  ;;  %v130_v14 = vld [vmem:[%s4842_s1 + $0x328] sm:$0xff]  ;;  %v147_v17 = vld [vmem:[%s4842_s1 + $0x3b0] sm:$0xff]  ;;  %v148_v18 = vld [vmem:[%s4842_s1 + $0x3b8] sm:$0xff]  ;;  %v2628_v19 = vpack.c.bf16 %v98_v10, %v97_v9  ;;  %v2630_v21 = vpack.c.bf16 %v116_v16, %v115_v15 }
  0x20   :  { %2615 = vmatprep.subr.bf16.mxu1 %v2614_v39  ;;  %v2660_v20 = vpack.c.bf16 %v130_v14, %v129_v11  ;;  %v99_v22 = vld [vmem:[%s4842_s1 + $0x230] sm:$0xff]  ;;  %v100_v23 = vld [vmem:[%s4842_s1 + $0x238] sm:$0xff]  ;;  %v2662_v25 = vpack.c.bf16 %v148_v18, %v147_v17  ;;  %v118_v28 = vld [vmem:[%s4842_s1 + $0x2c8] sm:$0xff] }
  0x21   :  { %2585 = vmatpush3.bf16.msra.mxu0 %v2584_v46  ;;  %v131_v24 = vld [vmem:[%s4842_s1 + $0x330] sm:$0xff]  ;;  %v132_v26 = vld [vmem:[%s4842_s1 + $0x338] sm:$0xff]  ;;  %v149_v29 = vld [vmem:[%s4842_s1 + $0x3c0] sm:$0xff]  ;;  %v2632_v32 = vpack.c.bf16 %v100_v23, %v99_v22 }
  0x22   :  { %2619 = vmatprep.subr.bf16.mxu0 %v2618_v48  ;;  %v150_v30 = vld [vmem:[%s4842_s1 + $0x3c8] sm:$0xff]  ;;  %v2664_v35 = vpack.c.bf16 %v132_v26, %v131_v24  ;;  %v101_v37 = vld [vmem:[%s4842_s1 + $0x240] sm:$0xff]  ;;  %v119_v42 = vld [vmem:[%s4842_s1 + $0x2d0] sm:$0xff] }
  0x23   :  { %2617 = vmatpush3.bf16.msra.mxu1 %v2616_v47  ;;  %v22_v31 = vld [vmem:[%s4841_s0 + $0x8] sm:$0xff]  ;;  %v133_v39 = vld [vmem:[%s4842_s1 + $0x340] sm:$0xff]  ;;  %v2666_v40 = vpack.c.bf16 %v150_v30, %v149_v29  ;;  %v120_v43 = vld [vmem:[%s4842_s1 + $0x2d8] sm:$0xff] }
  0x24   :  { %2651 = vmatprep.subr.bf16.mxu1 %v2650_v52  ;;  %789 = vmatmul.mubr.f32.vlgmr.msra.gmra.mrb[0].mxu0 %v563_v27  ;;  %v117_v27 = vld [vmem:[%s4842_s1 + $0x2c0] sm:$0xff]  ;;  %v573_v34 = vcombine.high %v22_v31, %v22_v31  ;;  %v102_v38 = vld [vmem:[%s4842_s1 + $0x248] sm:$0xff]  ;;  %v151_v46 = vld [vmem:[%s4842_s1 + $0x3d0] sm:$0xff]  ;;  %v2638_v51 = vpack.c.bf16 %v120_v43, %v119_v42 }
  0x25   :  { %2621 = vmatpush3.bf16.msra.mxu0 %v2620_v58  ;;  %v2634_v36 = vpack.c.bf16 %v118_v28, %v117_v27  ;;  %v134_v41 = vld [vmem:[%s4842_s1 + $0x348] sm:$0xff]  ;;  %v152_v47 = vld [vmem:[%s4842_s1 + $0x3d8] sm:$0xff]  ;;  %v2636_v48 = vpack.c.bf16 %v102_v38, %v101_v37  ;;  %v103_v52 = vld [vmem:[%s4842_s1 + $0x250] sm:$0xff] }
  0x26   :  { %859 = vmatmul.mubr.f32.vlgmr.msra.gmra.mrb[0].mxu1 %v570_v33  ;;  %2623 = vmatprep.subr.bf16.mxu0 %v2622_v60  ;;  %v3462_v33 = vrot.slane %v22_v31, %v3301_v13  ;;  %v3485_v45 = vrot.slane %v573_v34, %v3301_v13  ;;  %v2668_v50 = vpack.c.bf16 %v134_v41, %v133_v39  ;;  %v104_v53 = vld [vmem:[%s4842_s1 + $0x258] sm:$0xff]  ;;  %v135_v54 = vld [vmem:[%s4842_s1 + $0x350] sm:$0xff]  ;;  %v121_v57 = vld [vmem:[%s4842_s1 + $0x2e0] sm:$0xff] }
  0x27   :  { %2653 = vmatpush3.bf16.msra.mxu1 %v2652_v59  ;;  %v2670_v55 = vpack.c.bf16 %v152_v47, %v151_v46  ;;  %v136_v56 = vld [vmem:[%s4842_s1 + $0x358] sm:$0xff]  ;;  %v122_v58 = vld [vmem:[%s4842_s1 + $0x2e8] sm:$0xff]  ;;  %v153_v59 = vld [vmem:[%s4842_s1 + $0x3e0] sm:$0xff]  ;;  %v2640_v61 = vpack.c.bf16 %v104_v53, %v103_v52 }
  0x28   :  { %2655 = vmatprep.subr.bf16.mxu1 %v2654_v0  ;;  %v588_v44 = vcombine.high %v3462_v33, %v3462_v33  ;;  %v589_v49 = vcombine.high %v3485_v45, %v3485_v45  ;;  %v154_v60 = vld [vmem:[%s4842_s1 + $0x3e8] sm:$0xff]  ;;  %v2672_v62 = vpack.c.bf16 %v136_v56, %v135_v54  ;;  %v2642_v63 = vpack.c.bf16 %v122_v58, %v121_v57  ;;  %v105_v0 = vld [vmem:[%s4842_s1 + $0x260] sm:$0xff]  ;;  %v123_v5 = vld [vmem:[%s4842_s1 + $0x2f0] sm:$0xff] }
  0x29   :  { %2625 = vmatpush3.bf16.msra.mxu0 %v2624_v6  ;;  %v106_v1 = vld [vmem:[%s4842_s1 + $0x268] sm:$0xff]  ;;  %v137_v2 = vld [vmem:[%s4842_s1 + $0x360] sm:$0xff]  ;;  %v2674_v3 = vpack.c.bf16 %v154_v60, %v153_v59  ;;  %v124_v6 = vld [vmem:[%s4842_s1 + $0x2f8] sm:$0xff] }
  0x2a   :  { %2627 = vmatprep.subr.bf16.mxu0 %v2626_v8  ;;  %928 = vmatprep.mubr.f32.mxu0 %v588_v44  ;;  %v138_v4 = vld [vmem:[%s4842_s1 + $0x368] sm:$0xff]  ;;  %v156_v8 = vld [vmem:[%s4842_s1 + $0x3f8] sm:$0xff]  ;;  %v2644_v9 = vpack.c.bf16 %v106_v1, %v105_v0  ;;  %v2646_v11 = vpack.c.bf16 %v124_v6, %v123_v5  ;;  %v139_v15 = vld [vmem:[%s4842_s1 + $0x370] sm:$0xff] }
  0x2b   :  { %2657 = vmatpush3.bf16.msra.mxu1 %v2656_v7  ;;  %998 = vmatprep.mubr.f32.mxu1 %v589_v49  ;;  %v155_v7 = vld [vmem:[%s4842_s1 + $0x3f0] sm:$0xff]  ;;  %v2676_v10 = vpack.c.bf16 %v138_v4, %v137_v2  ;;  %v108_v14 = vld [vmem:[%s4842_s1 + $0x278] sm:$0xff]  ;;  %v173_v18 = vld [vmem:[%s4842_s1 + $0x480] sm:$0xff] }
  0x2c   :  { %2659 = vmatprep.subr.bf16.mxu1 %v2658_v12  ;;  %v107_v12 = vld [vmem:[%s4842_s1 + $0x270] sm:$0xff]  ;;  %v2678_v16 = vpack.c.bf16 %v156_v8, %v155_v7  ;;  %v140_v17 = vld [vmem:[%s4842_s1 + $0x378] sm:$0xff]  ;;  %v157_v23 = vld [vmem:[%s4842_s1 + $0x400] sm:$0xff] }
  0x2d   :  { %2629 = vmatpush3.bf16.msra.mxu0 %v2628_v19  ;;  %v174_v19 = vld [vmem:[%s4842_s1 + $0x488] sm:$0xff]  ;;  %v2648_v22 = vpack.c.bf16 %v108_v14, %v107_v12  ;;  %v2680_v24 = vpack.c.bf16 %v140_v17, %v139_v15  ;;  %v189_v27 = vld [vmem:[%s4842_s1 + $0x500] sm:$0xff]  ;;  %v175_v30 = vld [vmem:[%s4842_s1 + $0x490] sm:$0xff] }
  0x2e   :  { %2631 = vmatprep.subr.bf16.mxu0 %v2630_v21  ;;  %v206_v21 = vld [vmem:[%s4842_s1 + $0x588] sm:$0xff]  ;;  %v176_v31 = vld [vmem:[%s4842_s1 + $0x498] sm:$0xff]  ;;  %v23_v37 = vld [vmem:[%s4841_s0 + $0x10] sm:$0xff] }
  0x2f   :  { %2661 = vmatpush3.bf16.msra.mxu1 %v2660_v20  ;;  %v205_v20 = vld [vmem:[%s4842_s1 + $0x580] sm:$0xff]  ;;  %v158_v26 = vld [vmem:[%s4842_s1 + $0x408] sm:$0xff]  ;;  %v208_v34 = vld [vmem:[%s4842_s1 + $0x598] sm:$0xff]  ;;  %v2686_v38 = vpack.c.bf16 %v176_v31, %v175_v30  ;;  %v3604_v42 = vrot.slane %v23_v37, %v3301_v13  ;;  %v590_v43 = vcombine.high %v23_v37, %v23_v37 }
  0x30   :  { %2663 = vmatprep.subr.bf16.mxu1 %v2662_v25  ;;  %v2682_v25 = vpack.c.bf16 %v174_v19, %v173_v18  ;;  %v190_v28 = vld [vmem:[%s4842_s1 + $0x508] sm:$0xff]  ;;  %v2714_v29 = vpack.c.bf16 %v206_v21, %v205_v20  ;;  %v159_v39 = vld [vmem:[%s4842_s1 + $0x410] sm:$0xff]  ;;  %v192_v46 = vld [vmem:[%s4842_s1 + $0x518] sm:$0xff] }
  0x31   :  { %2633 = vmatpush3.bf16.msra.mxu0 %v2632_v32  ;;  %v207_v32 = vld [vmem:[%s4842_s1 + $0x590] sm:$0xff]  ;;  %v177_v47 = vld [vmem:[%s4842_s1 + $0x4a0] sm:$0xff]  ;;  %v3625_v52 = vrot.slane %v590_v43, %v3301_v13  ;;  %v162_v56 = vld [vmem:[%s4842_s1 + $0x428] sm:$0xff] }
  0x32   :  { %2635 = vmatprep.subr.bf16.mxu0 %v2634_v36  ;;  %v2716_v36 = vpack.c.bf16 %v190_v28, %v189_v27  ;;  %v191_v41 = vld [vmem:[%s4842_s1 + $0x510] sm:$0xff]  ;;  %v2718_v44 = vpack.c.bf16 %v208_v34, %v207_v32  ;;  %v209_v49 = vld [vmem:[%s4842_s1 + $0x5a0] sm:$0xff]  ;;  %v194_v59 = vld [vmem:[%s4842_s1 + $0x528] sm:$0xff] }
  0x33   :  { %2665 = vmatpush3.bf16.msra.mxu1 %v2664_v35  ;;  %v2684_v35 = vpack.c.bf16 %v158_v26, %v157_v23  ;;  %v193_v57 = vld [vmem:[%s4842_s1 + $0x520] sm:$0xff]  ;;  %v179_v60 = vld [vmem:[%s4842_s1 + $0x4b0] sm:$0xff]  ;;  %v164_v4 = vld [vmem:[%s4842_s1 + $0x438] sm:$0xff] }
  0x34   :  { %2667 = vmatprep.subr.bf16.mxu1 %v2666_v40  ;;  %v160_v40 = vld [vmem:[%s4842_s1 + $0x418] sm:$0xff]  ;;  %v2724_v1 = vpack.c.bf16 %v194_v59, %v193_v57  ;;  %v195_v5 = vld [vmem:[%s4842_s1 + $0x530] sm:$0xff]  ;;  %v181_v8 = vld [vmem:[%s4842_s1 + $0x4c0] sm:$0xff] }
  0x35   :  { %2637 = vmatpush3.bf16.msra.mxu0 %v2636_v48  ;;  %v178_v48 = vld [vmem:[%s4842_s1 + $0x4a8] sm:$0xff]  ;;  %v2688_v53 = vpack.c.bf16 %v160_v40, %v159_v39  ;;  %v196_v7 = vld [vmem:[%s4842_s1 + $0x538] sm:$0xff]  ;;  %v197_v18 = vld [vmem:[%s4842_s1 + $0x540] sm:$0xff] }
  0x36   :  { %2639 = vmatprep.subr.bf16.mxu0 %v2638_v51  ;;  %v605_v51 = vcombine.high %v3604_v42, %v3604_v42  ;;  %v2690_v54 = vpack.c.bf16 %v178_v48, %v177_v47  ;;  %v2728_v14 = vpack.c.bf16 %v196_v7, %v195_v5  ;;  %v166_v17 = vld [vmem:[%s4842_s1 + $0x448] sm:$0xff]  ;;  %v183_v21 = vld [vmem:[%s4842_s1 + $0x4d0] sm:$0xff]  ;;  %v200_v32 = vld [vmem:[%s4842_s1 + $0x558] sm:$0xff] }
  0x37   :  { %2669 = vmatpush3.bf16.msra.mxu1 %v2668_v50  ;;  %v210_v50 = vld [vmem:[%s4842_s1 + $0x5a8] sm:$0xff]  ;;  %v215_v23 = vld [vmem:[%s4842_s1 + $0x5d0] sm:$0xff]  ;;  %v185_v34 = vld [vmem:[%s4842_s1 + $0x4e0] sm:$0xff] }
  0x38   :  { %2671 = vmatprep.subr.bf16.mxu1 %v2670_v55  ;;  %v161_v55 = vld [vmem:[%s4842_s1 + $0x420] sm:$0xff]  ;;  %v2722_v58 = vpack.c.bf16 %v210_v50, %v209_v49  ;;  %v198_v20 = vld [vmem:[%s4842_s1 + $0x548] sm:$0xff]  ;;  %v167_v28 = vld [vmem:[%s4842_s1 + $0x450] sm:$0xff] }
  0x39   :  { %2641 = vmatpush3.bf16.msra.mxu0 %v2640_v61  ;;  %v180_v61 = vld [vmem:[%s4842_s1 + $0x4b8] sm:$0xff]  ;;  %v2692_v0 = vpack.c.bf16 %v162_v56, %v161_v55  ;;  %v2732_v26 = vpack.c.bf16 %v198_v20, %v197_v18  ;;  %v199_v30 = vld [vmem:[%s4842_s1 + $0x550] sm:$0xff]  ;;  %v218_v37 = vld [vmem:[%s4842_s1 + $0x5e8] sm:$0xff] }
  0x3a   :  { %2643 = vmatprep.subr.bf16.mxu0 %v2642_v63  ;;  %v212_v63 = vld [vmem:[%s4842_s1 + $0x5b8] sm:$0xff]  ;;  %v2694_v2 = vpack.c.bf16 %v180_v61, %v179_v60  ;;  %v2736_v39 = vpack.c.bf16 %v200_v32, %v199_v30  ;;  %v170_v43 = vld [vmem:[%s4842_s1 + $0x468] sm:$0xff]  ;;  %v187_v48 = vld [vmem:[%s4842_s1 + $0x4f0] sm:$0xff] }
  0x3b   :  { %2673 = vmatpush3.bf16.msra.mxu1 %v2672_v62  ;;  %v211_v62 = vld [vmem:[%s4842_s1 + $0x5b0] sm:$0xff]  ;;  %v202_v47 = vld [vmem:[%s4842_s1 + $0x568] sm:$0xff]  ;;  %v188_v49 = vld [vmem:[%s4842_s1 + $0x4f8] sm:$0xff] }
  0x3c   :  { %2675 = vmatprep.subr.bf16.mxu1 %v2674_v3  ;;  %v163_v3 = vld [vmem:[%s4842_s1 + $0x430] sm:$0xff]  ;;  %v2726_v6 = vpack.c.bf16 %v212_v63, %v211_v62  ;;  %v2710_v55 = vpack.c.bf16 %v188_v49, %v187_v48  ;;  %v172_v57 = vld [vmem:[%s4842_s1 + $0x478] sm:$0xff]  ;;  %v237_v60 = vld [vmem:[%s4842_s1 + $0x680] sm:$0xff] }
  0x3d   :  { %2645 = vmatpush3.bf16.msra.mxu0 %v2644_v9  ;;  %v182_v9 = vld [vmem:[%s4842_s1 + $0x4c8] sm:$0xff]  ;;  %v2696_v12 = vpack.c.bf16 %v164_v4, %v163_v3  ;;  %v219_v50 = vld [vmem:[%s4842_s1 + $0x5f0] sm:$0xff]  ;;  %v204_v59 = vld [vmem:[%s4842_s1 + $0x578] sm:$0xff] }
  0x3e   :  { %2647 = vmatprep.subr.bf16.mxu0 %v2646_v11  ;;  %v214_v11 = vld [vmem:[%s4842_s1 + $0x5c8] sm:$0xff]  ;;  %v2698_v15 = vpack.c.bf16 %v182_v9, %v181_v8  ;;  %v171_v56 = vld [vmem:[%s4842_s1 + $0x470] sm:$0xff]  ;;  %v269_v62 = vld [vmem:[%s4842_s1 + $0x780] sm:$0xff] }
  0x3f   :  { %2677 = vmatpush3.bf16.msra.mxu1 %v2676_v10  ;;  %v213_v10 = vld [vmem:[%s4842_s1 + $0x5c0] sm:$0xff]  ;;  %v238_v61 = vld [vmem:[%s4842_s1 + $0x688] sm:$0xff]  ;;  %v239_v9 = vld [vmem:[%s4842_s1 + $0x690] sm:$0xff] }
  0x40   :  { %2679 = vmatprep.subr.bf16.mxu1 %v2678_v16  ;;  %v165_v16 = vld [vmem:[%s4842_s1 + $0x440] sm:$0xff]  ;;  %v2730_v19 = vpack.c.bf16 %v214_v11, %v213_v10  ;;  %v270_v63 = vld [vmem:[%s4842_s1 + $0x788] sm:$0xff]  ;;  %v2746_v3 = vpack.c.bf16 %v238_v61, %v237_v60  ;;  %v240_v10 = vld [vmem:[%s4842_s1 + $0x698] sm:$0xff] }
  0x41   :  { %2649 = vmatpush3.bf16.msra.mxu0 %v2648_v22  ;;  %v184_v22 = vld [vmem:[%s4842_s1 + $0x4d8] sm:$0xff]  ;;  %v221_v4 = vld [vmem:[%s4842_s1 + $0x600] sm:$0xff]  ;;  %v222_v5 = vld [vmem:[%s4842_s1 + $0x608] sm:$0xff]  ;;  %v2778_v7 = vpack.c.bf16 %v270_v63, %v269_v62  ;;  %v2750_v18 = vpack.c.bf16 %v240_v10, %v239_v9 }
  0x42   :  { %2683 = vmatprep.subr.bf16.mxu0 %v2682_v25  ;;  %v2700_v25 = vpack.c.bf16 %v166_v17, %v165_v16  ;;  %v2702_v27 = vpack.c.bf16 %v184_v22, %v183_v21  ;;  %v254_v8 = vld [vmem:[%s4842_s1 + $0x708] sm:$0xff]  ;;  %v2748_v16 = vpack.c.bf16 %v222_v5, %v221_v4  ;;  %v224_v20 = vld [vmem:[%s4842_s1 + $0x618] sm:$0xff]  ;;  %v255_v21 = vld [vmem:[%s4842_s1 + $0x710] sm:$0xff] }
  0x43   :  { %2681 = vmatpush3.bf16.msra.mxu1 %v2680_v24  ;;  %v216_v24 = vld [vmem:[%s4842_s1 + $0x5d8] sm:$0xff]  ;;  %v259_v48 = vld [vmem:[%s4842_s1 + $0x730] sm:$0xff]  ;;  %v262_v61 = vld [vmem:[%s4842_s1 + $0x748] sm:$0xff] }
  0x44   :  { %2715 = vmatprep.subr.bf16.mxu1 %v2714_v29  ;;  %929 = vmatmul.mubr.f32.vlgmr.msra.gmra.mrb[2].mxu0 %v3462_v33  ;;  %v2720_v33 = vpack.c.bf16 %v192_v46, %v191_v41  ;;  %v168_v29 = vld [vmem:[%s4842_s1 + $0x458] sm:$0xff]  ;;  %v2734_v31 = vpack.c.bf16 %v216_v24, %v215_v23  ;;  %v169_v41 = vld [vmem:[%s4842_s1 + $0x460] sm:$0xff]  ;;  %v247_v62 = vld [vmem:[%s4842_s1 + $0x6d0] sm:$0xff] }
  0x45   :  { %2685 = vmatpush3.bf16.msra.mxu0 %v2684_v35  ;;  %1068 = vmatprep.mubr.f32.mxu0 %v605_v51  ;;  %v186_v35 = vld [vmem:[%s4842_s1 + $0x4e8] sm:$0xff]  ;;  %v220_v51 = vld [vmem:[%s4842_s1 + $0x5f8] sm:$0xff]  ;;  %v241_v24 = vld [vmem:[%s4842_s1 + $0x6a0] sm:$0xff] }
  0x46   :  { %999 = vmatmul.mubr.f32.vlgmr.msra.gmra.mrb[2].mxu1 %v3485_v45  ;;  %2687 = vmatprep.subr.bf16.mxu0 %v2686_v38  ;;  %v606_v45 = vcombine.high %v3625_v52, %v3625_v52  ;;  %v2704_v38 = vpack.c.bf16 %v168_v29, %v167_v28  ;;  %v2706_v40 = vpack.c.bf16 %v186_v35, %v185_v34  ;;  %v256_v23 = vld [vmem:[%s4842_s1 + $0x718] sm:$0xff]  ;;  %v274_v28 = vld [vmem:[%s4842_s1 + $0x7a8] sm:$0xff]  ;;  %v257_v35 = vld [vmem:[%s4842_s1 + $0x720] sm:$0xff] }
  0x47   :  { %2717 = vmatpush3.bf16.msra.mxu1 %v2716_v36  ;;  %v217_v36 = vld [vmem:[%s4842_s1 + $0x5e0] sm:$0xff]  ;;  %v226_v34 = vld [vmem:[%s4842_s1 + $0x628] sm:$0xff]  ;;  %v248_v63 = vld [vmem:[%s4842_s1 + $0x6d8] sm:$0xff] }
  0x48   :  { %2719 = vmatprep.subr.bf16.mxu1 %v2718_v44  ;;  %1138 = vmatprep.mubr.f32.mxu1 %v606_v45  ;;  %v201_v44 = vld [vmem:[%s4842_s1 + $0x560] sm:$0xff]  ;;  %v2738_v46 = vpack.c.bf16 %v218_v37, %v217_v36  ;;  %v203_v45 = vld [vmem:[%s4842_s1 + $0x570] sm:$0xff]  ;;  %v2766_v4 = vpack.c.bf16 %v248_v63, %v247_v62  ;;  %v264_v9 = vld [vmem:[%s4842_s1 + $0x758] sm:$0xff] }
  0x49   :  { %2689 = vmatpush3.bf16.msra.mxu0 %v2688_v53  ;;  %v2708_v53 = vpack.c.bf16 %v170_v43, %v169_v41  ;;  %v243_v37 = vld [vmem:[%s4842_s1 + $0x6b0] sm:$0xff]  ;;  %v249_v10 = vld [vmem:[%s4842_s1 + $0x6e0] sm:$0xff] }
  0x4a   :  { %2691 = vmatprep.subr.bf16.mxu0 %v2690_v54  ;;  %v2740_v54 = vpack.c.bf16 %v202_v47, %v201_v44  ;;  %v228_v47 = vld [vmem:[%s4842_s1 + $0x638] sm:$0xff]  ;;  %v231_v5 = vld [vmem:[%s4842_s1 + $0x650] sm:$0xff] }
  0x4b   :  { %2721 = vmatpush3.bf16.msra.mxu1 %v2720_v33  ;;  %v24_v33 = vld [vmem:[%s4841_s0 + $0x18] sm:$0xff]  ;;  %v319_v62 = vld [vmem:[%s4842_s1 + $0x910] sm:$0xff] }
  0x4c   :  { %2723 = vmatprep.subr.bf16.mxu1 %v2722_v58  ;;  %v2742_v58 = vpack.c.bf16 %v220_v51, %v219_v50  ;;  %v3796_v11 = vrot.slane %v24_v33, %v3301_v13  ;;  %v260_v50 = vld [vmem:[%s4842_s1 + $0x738] sm:$0xff]  ;;  %v245_v51 = vld [vmem:[%s4842_s1 + $0x6c0] sm:$0xff] }
  0x4d   :  { %2693 = vmatpush3.bf16.msra.mxu0 %v2692_v0  ;;  %v607_v0 = vcombine.high %v24_v33, %v24_v33  ;;  %v277_v33 = vld [vmem:[%s4842_s1 + $0x7c0] sm:$0xff] }
  0x4e   :  { %2695 = vmatprep.subr.bf16.mxu0 %v2694_v2  ;;  %v2744_v2 = vpack.c.bf16 %v204_v59, %v203_v45  ;;  %v229_v45 = vld [vmem:[%s4842_s1 + $0x640] sm:$0xff] }
  0x4f   :  { %2725 = vmatpush3.bf16.msra.mxu1 %v2724_v1  ;;  %v2712_v1 = vpack.c.bf16 %v172_v57, %v171_v56  ;;  %v2792_v56 = vpack.c.bf16 %v260_v50, %v259_v48  ;;  %v261_v59 = vld [vmem:[%s4842_s1 + $0x740] sm:$0xff]  ;;  %v286_v48 = vld [vmem:[%s4842_s1 + $0x808] sm:$0xff] }
  0x50   :  { %2727 = vmatprep.subr.bf16.mxu1 %v2726_v6  ;;  %v253_v6 = vld [vmem:[%s4842_s1 + $0x700] sm:$0xff] }
  0x51   :  { %2697 = vmatpush3.bf16.msra.mxu0 %v2696_v12  ;;  %v271_v12 = vld [vmem:[%s4842_s1 + $0x790] sm:$0xff]  ;;  %v2780_v17 = vpack.c.bf16 %v254_v8, %v253_v6  ;;  %v232_v6 = vld [vmem:[%s4842_s1 + $0x658] sm:$0xff] }
  0x52   :  { %2699 = vmatprep.subr.bf16.mxu0 %v2698_v15  ;;  %v3805_v15 = vrot.slane %v607_v0, %v3301_v13  ;;  %v279_v0 = vld [vmem:[%s4842_s1 + $0x7d0] sm:$0xff] }
  0x53   :  { %2729 = vmatpush3.bf16.msra.mxu1 %v2728_v14  ;;  %v272_v14 = vld [vmem:[%s4842_s1 + $0x798] sm:$0xff] }
  0x54   :  { %2731 = vmatprep.subr.bf16.mxu1 %v2730_v19  ;;  %v223_v19 = vld [vmem:[%s4842_s1 + $0x610] sm:$0xff]  ;;  %v2782_v22 = vpack.c.bf16 %v272_v14, %v271_v12  ;;  %v623_v29 = vcombine.high %v3805_v15, %v3805_v15  ;;  %v250_v12 = vld [vmem:[%s4842_s1 + $0x6e8] sm:$0xff]  ;;  %v281_v14 = vld [vmem:[%s4842_s1 + $0x7e0] sm:$0xff] }
  0x55   :  { %2701 = vmatpush3.bf16.msra.mxu0 %v2700_v25  ;;  %v242_v25 = vld [vmem:[%s4842_s1 + $0x6a8] sm:$0xff]  ;;  %v2752_v30 = vpack.c.bf16 %v224_v20, %v223_v19  ;;  %v2770_v19 = vpack.c.bf16 %v250_v12, %v249_v10  ;;  %v233_v20 = vld [vmem:[%s4842_s1 + $0x660] sm:$0xff] }
  0x56   :  { %2703 = vmatprep.subr.bf16.mxu0 %v2702_v27  ;;  %v273_v27 = vld [vmem:[%s4842_s1 + $0x7a0] sm:$0xff]  ;;  %v2754_v32 = vpack.c.bf16 %v242_v25, %v241_v24  ;;  %v266_v24 = vld [vmem:[%s4842_s1 + $0x768] sm:$0xff]  ;;  %v251_v25 = vld [vmem:[%s4842_s1 + $0x6f0] sm:$0xff] }
  0x57   :  { %2733 = vmatpush3.bf16.msra.mxu1 %v2732_v26  ;;  %v622_v26 = vcombine.high %v3796_v11, %v3796_v11  ;;  %v2786_v36 = vpack.c.bf16 %v274_v28, %v273_v27  ;;  %v283_v27 = vld [vmem:[%s4842_s1 + $0x7f0] sm:$0xff]  ;;  %v284_v28 = vld [vmem:[%s4842_s1 + $0x7f8] sm:$0xff]  ;;  %v290_v10 = vld [vmem:[%s4842_s1 + $0x828] sm:$0xff] }
  0x58   :  { %2735 = vmatprep.subr.bf16.mxu1 %v2734_v31  ;;  %v2784_v31 = vpack.c.bf16 %v256_v23, %v255_v21  ;;  %v234_v21 = vld [vmem:[%s4842_s1 + $0x668] sm:$0xff]  ;;  %v321_v12 = vld [vmem:[%s4842_s1 + $0x920] sm:$0xff] }
  0x59   :  { %2705 = vmatpush3.bf16.msra.mxu0 %v2704_v38  ;;  %v244_v38 = vld [vmem:[%s4842_s1 + $0x6b8] sm:$0xff] }
  0x5a   :  { %2707 = vmatprep.subr.bf16.mxu0 %v2706_v40  ;;  %v276_v40 = vld [vmem:[%s4842_s1 + $0x7b8] sm:$0xff]  ;;  %v2758_v44 = vpack.c.bf16 %v244_v38, %v243_v37  ;;  %v301_v37 = vld [vmem:[%s4842_s1 + $0x880] sm:$0xff]  ;;  %v302_v38 = vld [vmem:[%s4842_s1 + $0x888] sm:$0xff] }
  0x5b   :  { %2737 = vmatpush3.bf16.msra.mxu1 %v2736_v39  ;;  %v275_v39 = vld [vmem:[%s4842_s1 + $0x7b0] sm:$0xff] }
  0x5c   :  { %2739 = vmatprep.subr.bf16.mxu1 %v2738_v46  ;;  %v227_v46 = vld [vmem:[%s4842_s1 + $0x630] sm:$0xff]  ;;  %v2790_v49 = vpack.c.bf16 %v276_v40, %v275_v39  ;;  %v333_v39 = vld [vmem:[%s4842_s1 + $0x980] sm:$0xff]  ;;  %v334_v40 = vld [vmem:[%s4842_s1 + $0x988] sm:$0xff] }
  0x5d   :  { %2709 = vmatpush3.bf16.msra.mxu0 %v2708_v53  ;;  %v246_v53 = vld [vmem:[%s4842_s1 + $0x6c8] sm:$0xff]  ;;  %v2842_v50 = vpack.c.bf16 %v334_v40, %v333_v39  ;;  %v311_v39 = vld [vmem:[%s4842_s1 + $0x8d0] sm:$0xff]  ;;  %v312_v40 = vld [vmem:[%s4842_s1 + $0x8d8] sm:$0xff] }
  0x5e   :  { %2711 = vmatprep.subr.bf16.mxu0 %v2710_v55  ;;  %v2760_v55 = vpack.c.bf16 %v228_v47, %v227_v46  ;;  %v2762_v57 = vpack.c.bf16 %v246_v53, %v245_v51  ;;  %v2810_v46 = vpack.c.bf16 %v302_v38, %v301_v37  ;;  %v285_v47 = vld [vmem:[%s4842_s1 + $0x800] sm:$0xff]  ;;  %v318_v51 = vld [vmem:[%s4842_s1 + $0x908] sm:$0xff]  ;;  %v303_v53 = vld [vmem:[%s4842_s1 + $0x890] sm:$0xff] }
  0x5f   :  { %2741 = vmatpush3.bf16.msra.mxu1 %v2740_v54  ;;  %v278_v54 = vld [vmem:[%s4842_s1 + $0x7c8] sm:$0xff] }
  0x60   :  { %2743 = vmatprep.subr.bf16.mxu1 %v2742_v58  ;;  %v230_v58 = vld [vmem:[%s4842_s1 + $0x648] sm:$0xff]  ;;  %v2794_v60 = vpack.c.bf16 %v278_v54, %v277_v33  ;;  %v304_v33 = vld [vmem:[%s4842_s1 + $0x898] sm:$0xff] }
  0x61   :  { %2713 = vmatpush3.bf16.msra.mxu0 %v2712_v1  ;;  %v280_v1 = vld [vmem:[%s4842_s1 + $0x7d8] sm:$0xff]  ;;  %v326_v38 = vld [vmem:[%s4842_s1 + $0x948] sm:$0xff] }
  0x62   :  { %2747 = vmatprep.subr.bf16.mxu0 %v2746_v3  ;;  %v2796_v3 = vpack.c.bf16 %v262_v61, %v261_v59  ;;  %v2798_v8 = vpack.c.bf16 %v280_v1, %v279_v0  ;;  %v2814_v59 = vpack.c.bf16 %v304_v33, %v303_v53  ;;  %v288_v61 = vld [vmem:[%s4842_s1 + $0x818] sm:$0xff]  ;;  %v305_v1 = vld [vmem:[%s4842_s1 + $0x8a0] sm:$0xff] }
  0x63   :  { %2745 = vmatpush3.bf16.msra.mxu1 %v2744_v2  ;;  %v2764_v2 = vpack.c.bf16 %v230_v58, %v229_v45  ;;  %v2812_v45 = vpack.c.bf16 %v286_v48, %v285_v47  ;;  %v320_v0 = vld [vmem:[%s4842_s1 + $0x918] sm:$0xff]  ;;  %v2830_v47 = vpack.c.bf16 %v312_v40, %v311_v39  ;;  %v295_v48 = vld [vmem:[%s4842_s1 + $0x850] sm:$0xff]  ;;  %v313_v33 = vld [vmem:[%s4842_s1 + $0x8e0] sm:$0xff] }
  0x64   :  { %2779 = vmatprep.subr.bf16.mxu1 %v2778_v7  ;;  %1069 = vmatmul.mubr.f32.vlgmr.msra.gmra.mrb[4].mxu0 %v3604_v42  ;;  %v225_v42 = vld [vmem:[%s4842_s1 + $0x620] sm:$0xff]  ;;  %v263_v7 = vld [vmem:[%s4842_s1 + $0x750] sm:$0xff]  ;;  %v328_v53 = vld [vmem:[%s4842_s1 + $0x958] sm:$0xff] }
  0x65   :  { %2749 = vmatpush3.bf16.msra.mxu0 %v2748_v16  ;;  %1208 = vmatprep.mubr.f32.mxu0 %v622_v26  ;;  %v2756_v41 = vpack.c.bf16 %v226_v34, %v225_v42  ;;  %v282_v16 = vld [vmem:[%s4842_s1 + $0x7e8] sm:$0xff]  ;;  %v252_v26 = vld [vmem:[%s4842_s1 + $0x6f8] sm:$0xff]  ;;  %v235_v42 = vld [vmem:[%s4842_s1 + $0x670] sm:$0xff] }
  0x66   :  { %1139 = vmatmul.mubr.f32.vlgmr.msra.gmra.mrb[4].mxu1 %v3625_v52  ;;  %2751 = vmatprep.subr.bf16.mxu0 %v2750_v18  ;;  %v258_v52 = vld [vmem:[%s4842_s1 + $0x728] sm:$0xff]  ;;  %v2800_v18 = vpack.c.bf16 %v264_v9, %v263_v7  ;;  %v2802_v23 = vpack.c.bf16 %v282_v16, %v281_v14  ;;  %v236_v34 = vld [vmem:[%s4842_s1 + $0x678] sm:$0xff]  ;;  %v307_v16 = vld [vmem:[%s4842_s1 + $0x8b0] sm:$0xff] }
  0x67   :  { %2781 = vmatpush3.bf16.msra.mxu1 %v2780_v17  ;;  %1278 = vmatprep.mubr.f32.mxu1 %v623_v29  ;;  %v2788_v43 = vpack.c.bf16 %v258_v52, %v257_v35  ;;  %v2768_v17 = vpack.c.bf16 %v232_v6, %v231_v5  ;;  %v2772_v29 = vpack.c.bf16 %v234_v21, %v233_v20  ;;  %v267_v35 = vld [vmem:[%s4842_s1 + $0x770] sm:$0xff]  ;;  %v268_v52 = vld [vmem:[%s4842_s1 + $0x778] sm:$0xff]  ;;  %v338_v5 = vld [vmem:[%s4842_s1 + $0x9a8] sm:$0xff] }
  0x68   :  { %2783 = vmatprep.subr.bf16.mxu1 %v2782_v22  ;;  %v265_v22 = vld [vmem:[%s4842_s1 + $0x760] sm:$0xff]  ;;  %v383_v39 = vld [vmem:[%s4842_s1 + $0xb10] sm:$0xff] }
  0x69   :  { %2753 = vmatpush3.bf16.msra.mxu0 %v2752_v30  ;;  %v25_v30 = vld [vmem:[%s4841_s0 + $0x20] sm:$0xff] }
  0x6a   :  { %2755 = vmatprep.subr.bf16.mxu0 %v2754_v32  ;;  %v2774_v32 = vpack.c.bf16 %v252_v26, %v251_v25  ;;  %v4003_v54 = vrot.slane %v25_v30, %v3301_v13  ;;  %v323_v25 = vld [vmem:[%s4842_s1 + $0x930] sm:$0xff] }
  0x6b   :  { %2785 = vmatpush3.bf16.msra.mxu1 %v2784_v31  ;;  %v2804_v31 = vpack.c.bf16 %v266_v24, %v265_v22  ;;  %v292_v24 = vld [vmem:[%s4842_s1 + $0x838] sm:$0xff] }
  0x6c   :  { %2787 = vmatprep.subr.bf16.mxu1 %v2786_v36  ;;  %v2806_v36 = vpack.c.bf16 %v284_v28, %v283_v27  ;;  %v324_v27 = vld [vmem:[%s4842_s1 + $0x938] sm:$0xff]  ;;  %v309_v28 = vld [vmem:[%s4842_s1 + $0x8c0] sm:$0xff] }
  0x6d   :  { %2757 = vmatpush3.bf16.msra.mxu0 %v2756_v41  ;;  %v624_v41 = vcombine.high %v25_v30, %v25_v30  ;;  %v341_v30 = vld [vmem:[%s4842_s1 + $0x9c0] sm:$0xff] }
  0x6e   :  { %2759 = vmatprep.subr.bf16.mxu0 %v2758_v44  ;;  %v2808_v44 = vpack.c.bf16 %v268_v52, %v267_v35  ;;  %v293_v35 = vld [vmem:[%s4842_s1 + $0x840] sm:$0xff] }
  0x6f   :  { %2789 = vmatpush3.bf16.msra.mxu1 %v2788_v43  ;;  %v2776_v43 = vpack.c.bf16 %v236_v34, %v235_v42  ;;  %v2856_v42 = vpack.c.bf16 %v324_v27, %v323_v25  ;;  %v325_v52 = vld [vmem:[%s4842_s1 + $0x940] sm:$0xff]  ;;  %v350_v25 = vld [vmem:[%s4842_s1 + $0xa08] sm:$0xff] }
  0x70   :  { %2791 = vmatprep.subr.bf16.mxu1 %v2790_v49  ;;  %v317_v49 = vld [vmem:[%s4842_s1 + $0x900] sm:$0xff] }
  0x71   :  { %2761 = vmatpush3.bf16.msra.mxu0 %v2760_v55  ;;  %v335_v55 = vld [vmem:[%s4842_s1 + $0x990] sm:$0xff]  ;;  %v2844_v58 = vpack.c.bf16 %v318_v51, %v317_v49  ;;  %v296_v49 = vld [vmem:[%s4842_s1 + $0x858] sm:$0xff] }
  0x72   :  { %2763 = vmatprep.subr.bf16.mxu0 %v2762_v57  ;;  %v4012_v57 = vrot.slane %v624_v41, %v3301_v13  ;;  %v343_v41 = vld [vmem:[%s4842_s1 + $0x9d0] sm:$0xff] }
  0x73   :  { %2793 = vmatpush3.bf16.msra.mxu1 %v2792_v56  ;;  %v336_v56 = vld [vmem:[%s4842_s1 + $0x998] sm:$0xff] }
  0x74   :  { %2795 = vmatprep.subr.bf16.mxu1 %v2794_v60  ;;  %v287_v60 = vld [vmem:[%s4842_s1 + $0x810] sm:$0xff]  ;;  %v2846_v63 = vpack.c.bf16 %v336_v56, %v335_v55  ;;  %v640_v6 = vcombine.high %v4012_v57, %v4012_v57  ;;  %v314_v55 = vld [vmem:[%s4842_s1 + $0x8e8] sm:$0xff]  ;;  %v345_v56 = vld [vmem:[%s4842_s1 + $0x9e0] sm:$0xff] }
  0x75   :  { %2765 = vmatpush3.bf16.msra.mxu0 %v2764_v2  ;;  %v306_v2 = vld [vmem:[%s4842_s1 + $0x8a8] sm:$0xff]  ;;  %v2816_v7 = vpack.c.bf16 %v288_v61, %v287_v60  ;;  %v2834_v60 = vpack.c.bf16 %v314_v55, %v313_v33  ;;  %v297_v61 = vld [vmem:[%s4842_s1 + $0x860] sm:$0xff] }
  0x76   :  { %2767 = vmatprep.subr.bf16.mxu0 %v2766_v4  ;;  %v337_v4 = vld [vmem:[%s4842_s1 + $0x9a0] sm:$0xff]  ;;  %v2818_v9 = vpack.c.bf16 %v306_v2, %v305_v1  ;;  %v330_v1 = vld [vmem:[%s4842_s1 + $0x968] sm:$0xff]  ;;  %v315_v2 = vld [vmem:[%s4842_s1 + $0x8f0] sm:$0xff] }
  0x77   :  { %2797 = vmatpush3.bf16.msra.mxu1 %v2796_v3  ;;  %v639_v3 = vcombine.high %v4003_v54, %v4003_v54  ;;  %v2850_v14 = vpack.c.bf16 %v338_v5, %v337_v4  ;;  %v347_v4 = vld [vmem:[%s4842_s1 + $0x9f0] sm:$0xff]  ;;  %v348_v5 = vld [vmem:[%s4842_s1 + $0x9f8] sm:$0xff]  ;;  %v354_v33 = vld [vmem:[%s4842_s1 + $0xa28] sm:$0xff] }
  0x78   :  { %2799 = vmatprep.subr.bf16.mxu1 %v2798_v8  ;;  %v2848_v8 = vpack.c.bf16 %v320_v0, %v319_v62  ;;  %v298_v62 = vld [vmem:[%s4842_s1 + $0x868] sm:$0xff]  ;;  %v385_v55 = vld [vmem:[%s4842_s1 + $0xb20] sm:$0xff] }
  0x79   :  { %2769 = vmatpush3.bf16.msra.mxu0 %v2768_v17  ;;  %v308_v17 = vld [vmem:[%s4842_s1 + $0x8b8] sm:$0xff] }
  0x7a   :  { %2771 = vmatprep.subr.bf16.mxu0 %v2770_v19  ;;  %v340_v19 = vld [vmem:[%s4842_s1 + $0x9b8] sm:$0xff]  ;;  %v2822_v22 = vpack.c.bf16 %v308_v17, %v307_v16  ;;  %v365_v16 = vld [vmem:[%s4842_s1 + $0xa80] sm:$0xff]  ;;  %v366_v17 = vld [vmem:[%s4842_s1 + $0xa88] sm:$0xff] }
  0x7b   :  { %2801 = vmatpush3.bf16.msra.mxu1 %v2800_v18  ;;  %v339_v18 = vld [vmem:[%s4842_s1 + $0x9b0] sm:$0xff] }
  0x7c   :  { %2803 = vmatprep.subr.bf16.mxu1 %v2802_v23  ;;  %v291_v23 = vld [vmem:[%s4842_s1 + $0x830] sm:$0xff]  ;;  %v2854_v26 = vpack.c.bf16 %v340_v19, %v339_v18  ;;  %v397_v18 = vld [vmem:[%s4842_s1 + $0xb80] sm:$0xff]  ;;  %v398_v19 = vld [vmem:[%s4842_s1 + $0xb88] sm:$0xff] }
  0x7d   :  { %2773 = vmatpush3.bf16.msra.mxu0 %v2772_v29  ;;  %v310_v29 = vld [vmem:[%s4842_s1 + $0x8c8] sm:$0xff]  ;;  %v2906_v27 = vpack.c.bf16 %v398_v19, %v397_v18 }
  0x7e   :  { %2775 = vmatprep.subr.bf16.mxu0 %v2774_v32  ;;  %v2824_v32 = vpack.c.bf16 %v292_v24, %v291_v23  ;;  %v2826_v34 = vpack.c.bf16 %v310_v29, %v309_v28  ;;  %v2874_v23 = vpack.c.bf16 %v366_v17, %v365_v16  ;;  %v349_v24 = vld [vmem:[%s4842_s1 + $0xa00] sm:$0xff]  ;;  %v382_v28 = vld [vmem:[%s4842_s1 + $0xb08] sm:$0xff]  ;;  %v367_v29 = vld [vmem:[%s4842_s1 + $0xa90] sm:$0xff] }
  0x7f   :  { %2805 = vmatpush3.bf16.msra.mxu1 %v2804_v31  ;;  %v342_v31 = vld [vmem:[%s4842_s1 + $0x9c8] sm:$0xff] }
  0x80   :  { %2807 = vmatprep.subr.bf16.mxu1 %v2806_v36  ;;  %v294_v36 = vld [vmem:[%s4842_s1 + $0x848] sm:$0xff]  ;;  %v2858_v37 = vpack.c.bf16 %v342_v31, %v341_v30  ;;  %v368_v30 = vld [vmem:[%s4842_s1 + $0xa98] sm:$0xff] }
  0x81   :  { %2777 = vmatpush3.bf16.msra.mxu0 %v2776_v43  ;;  %v344_v43 = vld [vmem:[%s4842_s1 + $0x9d8] sm:$0xff] }
  0x82   :  { %2811 = vmatprep.subr.bf16.mxu0 %v2810_v46  ;;  %v2860_v46 = vpack.c.bf16 %v326_v38, %v325_v52  ;;  %v2862_v51 = vpack.c.bf16 %v344_v43, %v343_v41  ;;  %v2878_v52 = vpack.c.bf16 %v368_v30, %v367_v29  ;;  %v352_v38 = vld [vmem:[%s4842_s1 + $0xa18] sm:$0xff]  ;;  %v369_v43 = vld [vmem:[%s4842_s1 + $0xaa0] sm:$0xff] }
  0x83   :  { %2809 = vmatpush3.bf16.msra.mxu1 %v2808_v44  ;;  %v2828_v44 = vpack.c.bf16 %v294_v36, %v293_v35  ;;  %v2876_v35 = vpack.c.bf16 %v350_v25, %v349_v24  ;;  %v384_v41 = vld [vmem:[%s4842_s1 + $0xb18] sm:$0xff] }
  0x84   :  { %2843 = vmatprep.subr.bf16.mxu1 %v2842_v50  ;;  %1209 = vmatmul.mubr.f32.vlgmr.msra.gmra.mrb[6].mxu0 %v3796_v11  ;;  %v289_v11 = vld [vmem:[%s4842_s1 + $0x820] sm:$0xff]  ;;  %v327_v50 = vld [vmem:[%s4842_s1 + $0x950] sm:$0xff] }
  0x85   :  { %2813 = vmatpush3.bf16.msra.mxu0 %v2812_v45  ;;  %1348 = vmatprep.mubr.f32.mxu0 %v639_v3  ;;  %v2820_v20 = vpack.c.bf16 %v290_v10, %v289_v11  ;;  %v346_v45 = vld [vmem:[%s4842_s1 + $0x9e8] sm:$0xff]  ;;  %v316_v3 = vld [vmem:[%s4842_s1 + $0x8f8] sm:$0xff]  ;;  %v299_v11 = vld [vmem:[%s4842_s1 + $0x870] sm:$0xff] }
  0x86   :  { %1279 = vmatmul.mubr.f32.vlgmr.msra.gmra.mrb[6].mxu1 %v3805_v15  ;;  %2815 = vmatprep.subr.bf16.mxu0 %v2814_v59  ;;  %v322_v15 = vld [vmem:[%s4842_s1 + $0x928] sm:$0xff]  ;;  %v2864_v59 = vpack.c.bf16 %v328_v53, %v327_v50  ;;  %v2866_v0 = vpack.c.bf16 %v346_v45, %v345_v56  ;;  %v300_v10 = vld [vmem:[%s4842_s1 + $0x878] sm:$0xff]  ;;  %v371_v45 = vld [vmem:[%s4842_s1 + $0xab0] sm:$0xff] }
  0x87   :  { %2845 = vmatpush3.bf16.msra.mxu1 %v2844_v58  ;;  %1418 = vmatprep.mubr.f32.mxu1 %v640_v6  ;;  %v2852_v21 = vpack.c.bf16 %v322_v15, %v321_v12  ;;  %v2832_v58 = vpack.c.bf16 %v296_v49, %v295_v48  ;;  %v2836_v6 = vpack.c.bf16 %v298_v62, %v297_v61  ;;  %v331_v12 = vld [vmem:[%s4842_s1 + $0x970] sm:$0xff]  ;;  %v332_v15 = vld [vmem:[%s4842_s1 + $0x978] sm:$0xff]  ;;  %v402_v48 = vld [vmem:[%s4842_s1 + $0xba8] sm:$0xff] }
  0x88   :  { %2847 = vmatprep.subr.bf16.mxu1 %v2846_v63  ;;  %v329_v63 = vld [vmem:[%s4842_s1 + $0x960] sm:$0xff] }
  0x89   :  { %2817 = vmatpush3.bf16.msra.mxu0 %v2816_v7  ;;  %v26_v7 = vld [vmem:[%s4841_s0 + $0x28] sm:$0xff] }
  0x8a   :  { %2819 = vmatprep.subr.bf16.mxu0 %v2818_v9  ;;  %v2838_v9 = vpack.c.bf16 %v316_v3, %v315_v2  ;;  %v4210_v31 = vrot.slane %v26_v7, %v3301_v13  ;;  %v387_v2 = vld [vmem:[%s4842_s1 + $0xb30] sm:$0xff] }
  0x8b   :  { %2849 = vmatpush3.bf16.msra.mxu1 %v2848_v8  ;;  %v2868_v8 = vpack.c.bf16 %v330_v1, %v329_v63  ;;  %v356_v1 = vld [vmem:[%s4842_s1 + $0xa38] sm:$0xff] }
  0x8c   :  { %2851 = vmatprep.subr.bf16.mxu1 %v2850_v14  ;;  %v2870_v14 = vpack.c.bf16 %v348_v5, %v347_v4  ;;  %v388_v4 = vld [vmem:[%s4842_s1 + $0xb38] sm:$0xff]  ;;  %v373_v5 = vld [vmem:[%s4842_s1 + $0xac0] sm:$0xff] }
  0x8d   :  { %2821 = vmatpush3.bf16.msra.mxu0 %v2820_v20  ;;  %v641_v20 = vcombine.high %v26_v7, %v26_v7  ;;  %v405_v7 = vld [vmem:[%s4842_s1 + $0xbc0] sm:$0xff] }
  0x8e   :  { %2823 = vmatprep.subr.bf16.mxu0 %v2822_v22  ;;  %v2872_v22 = vpack.c.bf16 %v332_v15, %v331_v12  ;;  %v389_v15 = vld [vmem:[%s4842_s1 + $0xb40] sm:$0xff] }
  0x8f   :  { %2853 = vmatpush3.bf16.msra.mxu1 %v2852_v21  ;;  %v2840_v21 = vpack.c.bf16 %v300_v10, %v299_v11  ;;  %v357_v11 = vld [vmem:[%s4842_s1 + $0xa40] sm:$0xff]  ;;  %v2920_v10 = vpack.c.bf16 %v388_v4, %v387_v2 }
  0x90   :  { %2855 = vmatprep.subr.bf16.mxu1 %v2854_v26  ;;  %v381_v26 = vld [vmem:[%s4842_s1 + $0xb00] sm:$0xff] }
  0x91   :  { %2825 = vmatpush3.bf16.msra.mxu0 %v2824_v32  ;;  %v399_v32 = vld [vmem:[%s4842_s1 + $0xb90] sm:$0xff]  ;;  %v2908_v36 = vpack.c.bf16 %v382_v28, %v381_v26 }
  0x92   :  { %2827 = vmatprep.subr.bf16.mxu0 %v2826_v34  ;;  %v4219_v34 = vrot.slane %v641_v20, %v3301_v13 }
  0x93   :  { %2857 = vmatpush3.bf16.msra.mxu1 %v2856_v42  ;;  %v400_v42 = vld [vmem:[%s4842_s1 + $0xb98] sm:$0xff] }
  0x94   :  { %2859 = vmatprep.subr.bf16.mxu1 %v2858_v37  ;;  %v351_v37 = vld [vmem:[%s4842_s1 + $0xa10] sm:$0xff]  ;;  %v2910_v40 = vpack.c.bf16 %v400_v42, %v399_v32  ;;  %v657_v49 = vcombine.high %v4219_v34, %v4219_v34 }
  0x95   :  { %2829 = vmatpush3.bf16.msra.mxu0 %v2828_v44  ;;  %v370_v44 = vld [vmem:[%s4842_s1 + $0xaa8] sm:$0xff]  ;;  %v2880_v50 = vpack.c.bf16 %v352_v38, %v351_v37 }
  0x96   :  { %2831 = vmatprep.subr.bf16.mxu0 %v2830_v47  ;;  %v401_v47 = vld [vmem:[%s4842_s1 + $0xba0] sm:$0xff]  ;;  %v2882_v53 = vpack.c.bf16 %v370_v44, %v369_v43 }
  0x97   :  { %2861 = vmatpush3.bf16.msra.mxu1 %v2860_v46  ;;  %v656_v46 = vcombine.high %v4210_v31, %v4210_v31  ;;  %v2914_v56 = vpack.c.bf16 %v402_v48, %v401_v47 }
  0x98   :  { %2863 = vmatprep.subr.bf16.mxu1 %v2862_v51  ;;  %v2912_v51 = vpack.c.bf16 %v384_v41, %v383_v39 }
  0x99   :  { %2833 = vmatpush3.bf16.msra.mxu0 %v2832_v58  ;;  %v372_v58 = vld [vmem:[%s4842_s1 + $0xab8] sm:$0xff] }
  0x9a   :  { %2835 = vmatprep.subr.bf16.mxu0 %v2834_v60  ;;  %v404_v60 = vld [vmem:[%s4842_s1 + $0xbb8] sm:$0xff]  ;;  %v2886_v63 = vpack.c.bf16 %v372_v58, %v371_v45 }
  0x9b   :  { %2865 = vmatpush3.bf16.msra.mxu1 %v2864_v59  ;;  %v403_v59 = vld [vmem:[%s4842_s1 + $0xbb0] sm:$0xff] }
  0x9c   :  { %2867 = vmatprep.subr.bf16.mxu1 %v2866_v0  ;;  %v355_v0 = vld [vmem:[%s4842_s1 + $0xa30] sm:$0xff]  ;;  %v2918_v3 = vpack.c.bf16 %v404_v60, %v403_v59 }
  0x9d   :  { %2837 = vmatpush3.bf16.msra.mxu0 %v2836_v6  ;;  %v374_v6 = vld [vmem:[%s4842_s1 + $0xac8] sm:$0xff] }
  0x9e   :  { %2839 = vmatprep.subr.bf16.mxu0 %v2838_v9  ;;  %v2888_v9 = vpack.c.bf16 %v356_v1, %v355_v0  ;;  %v2890_v12 = vpack.c.bf16 %v374_v6, %v373_v5 }
  0x9f   :  { %2869 = vmatpush3.bf16.msra.mxu1 %v2868_v8  ;;  %v406_v8 = vld [vmem:[%s4842_s1 + $0xbc8] sm:$0xff] }
  0xa0   :  { %2871 = vmatprep.subr.bf16.mxu1 %v2870_v14  ;;  %v358_v14 = vld [vmem:[%s4842_s1 + $0xa48] sm:$0xff] }
  0xa1   :  { %2841 = vmatpush3.bf16.msra.mxu0 %v2840_v21 }
  0xa2   :  { %2875 = vmatprep.subr.bf16.mxu0 %v2874_v23 }
  0xa3   :  { %2873 = vmatpush3.bf16.msra.mxu1 %v2872_v22 }
  0xa4   :  { %2907 = vmatprep.subr.bf16.mxu1 %v2906_v27  ;;  %1349 = vmatmul.mubr.f32.vlgmr.msra.gmra.mrb[8].mxu0 %v4003_v54  ;;  %v353_v54 = vld [vmem:[%s4842_s1 + $0xa20] sm:$0xff] }
  0xa5   :  { %2877 = vmatpush3.bf16.msra.mxu0 %v2876_v35  ;;  %1488 = vmatprep.mubr.f32.mxu0 %v656_v46  ;;  %v2884_v61 = vpack.c.bf16 %v354_v33, %v353_v54 }
  0xa6   :  { %1419 = vmatmul.mubr.f32.vlgmr.msra.gmra.mrb[8].mxu1 %v4012_v57  ;;  %2879 = vmatprep.subr.bf16.mxu0 %v2878_v52  ;;  %v386_v57 = vld [vmem:[%s4842_s1 + $0xb28] sm:$0xff] }
  0xa7   :  { %2909 = vmatpush3.bf16.msra.mxu1 %v2908_v36  ;;  %1558 = vmatprep.mubr.f32.mxu1 %v657_v49  ;;  %v2916_v62 = vpack.c.bf16 %v386_v57, %v385_v55 }
  0xa8   :  { %2911 = vmatprep.subr.bf16.mxu1 %v2910_v40 }
  0xa9   :  { %2881 = vmatpush3.bf16.msra.mxu0 %v2880_v50 }
  0xaa   :  { %2883 = vmatprep.subr.bf16.mxu0 %v2882_v53 }
  0xab   :  { %2913 = vmatpush3.bf16.msra.mxu1 %v2912_v51 }
  0xac   :  { %2915 = vmatprep.subr.bf16.mxu1 %v2914_v56 }
  0xad   :  { %2885 = vmatpush3.bf16.msra.mxu0 %v2884_v61 }
  0xae   :  { %2887 = vmatprep.subr.bf16.mxu0 %v2886_v63 }
  0xaf   :  { %2917 = vmatpush3.bf16.msra.mxu1 %v2916_v62 }
  0xb0   :  { %10 = vsyncpa [#allocation3], 0  ;;  %2919 = vmatprep.subr.bf16.mxu1 %v2918_v3  ;;  %v2922_v16 = vpack.c.bf16 %v406_v8, %v405_v7  ;;  %v390_v17 = vld [vmem:[%s4842_s1 + $0xb48] sm:$0xff]  ;;  %v375_v18 = vld [vmem:[%s4842_s1 + $0xad0] sm:$0xff]  ;;  %v2892_v22 = vpack.c.bf16 %v358_v14, %v357_v11  ;;  %vm1863_vm0 = vcmask 1041408   ;;  %vm3119_vm1 = vmmov 0  }
  0xb1   :  { %v376_v19 = vld [vmem:[%s4842_s1 + $0xad8] sm:$0xff]  ;;  %v407_v20 = vld [vmem:[%s4842_s1 + $0xbd0] sm:$0xff]  ;;  %2889 = vmatpush3.bf16.msra.mxu0 %v2888_v9  ;;  %v2924_v23 = vpack.c.bf16 %v390_v17, %v389_v15  ;;  %v377_v30 = vld [vmem:[%s4842_s1 + $0xae0] sm:$0xff]  ;;  %vm1859_vm2 = vcmask 408576   ;;  %vm1937_vm3 = vcmask 74752   ;;  %s3120_s17 = smov [#allocation2]  }
  0xb2   :  { %v408_v21 = vld [vmem:[%s4842_s1 + $0xbd8] sm:$0xff]  ;;  %2891 = vmatprep.subr.bf16.mxu0 %v2890_v12  ;;  %v2894_v24 = vpack.c.bf16 %v376_v19, %v375_v18  ;;  %v359_v25 = vld [vmem:[%s4842_s1 + $0xa50] sm:$0xff]  ;;  %v378_v32 = vld [vmem:[%s4842_s1 + $0xae8] sm:$0xff] }
  0xb3   :  { %2921 = vmatpush3.bf16.msra.mxu1 %v2920_v10  ;;  %v360_v26 = vld [vmem:[%s4842_s1 + $0xa58] sm:$0xff]  ;;  %v391_v27 = vld [vmem:[%s4842_s1 + $0xb50] sm:$0xff]  ;;  %v2926_v28 = vpack.c.bf16 %v408_v21, %v407_v20  ;;  %v409_v42 = vld [vmem:[%s4842_s1 + $0xbe0] sm:$0xff]  ;;  %v2898_v37 = vpack.c.bf16 %v378_v32, %v377_v30 }
  0xb4   :  { %2923 = vmatprep.subr.bf16.mxu1 %v2922_v16  ;;  %v392_v29 = vld [vmem:[%s4842_s1 + $0xb58] sm:$0xff]  ;;  %v410_v35 = vld [vmem:[%s4842_s1 + $0xbe8] sm:$0xff]  ;;  %v2896_v36 = vpack.c.bf16 %v360_v26, %v359_v25  ;;  %v361_v38 = vld [vmem:[%s4842_s1 + $0xa60] sm:$0xff] }
  0xb5   :  { %2893 = vmatpush3.bf16.msra.mxu0 %v2892_v22  ;;  %v2928_v52 = vpack.c.bf16 %v392_v29, %v391_v27  ;;  %v362_v39 = vld [vmem:[%s4842_s1 + $0xa68] sm:$0xff]  ;;  %v393_v40 = vld [vmem:[%s4842_s1 + $0xb60] sm:$0xff]  ;;  %v2930_v41 = vpack.c.bf16 %v410_v35, %v409_v42  ;;  %v379_v44 = vld [vmem:[%s4842_s1 + $0xaf0] sm:$0xff] }
  0xb6   :  { %2895 = vmatprep.subr.bf16.mxu0 %v2894_v24  ;;  %v394_v43 = vld [vmem:[%s4842_s1 + $0xb68] sm:$0xff]  ;;  %v380_v46 = vld [vmem:[%s4842_s1 + $0xaf8] sm:$0xff]  ;;  %v411_v47 = vld [vmem:[%s4842_s1 + $0xbf0] sm:$0xff]  ;;  %v2900_v49 = vpack.c.bf16 %v362_v39, %v361_v38 }
  0xb7   :  { %2925 = vmatpush3.bf16.msra.mxu1 %v2924_v23  ;;  %v412_v48 = vld [vmem:[%s4842_s1 + $0xbf8] sm:$0xff]  ;;  %v27_v50 = vld [vmem:[%s4841_s0 + $0x30] sm:$0xff]  ;;  %v2932_v51 = vpack.c.bf16 %v394_v43, %v393_v40  ;;  %v2902_v53 = vpack.c.bf16 %v380_v46, %v379_v44  ;;  %v429_v45 = vld [vmem:[%s4842_s1 + $0xc80] sm:$0xff] }
  0xb8   :  { %2927 = vmatprep.subr.bf16.mxu1 %v2926_v28  ;;  %v363_v54 = vld [vmem:[%s4842_s1 + $0xa70] sm:$0xff]  ;;  %v364_v33 = vld [vmem:[%s4842_s1 + $0xa78] sm:$0xff]  ;;  %v2934_v56 = vpack.c.bf16 %v412_v48, %v411_v47  ;;  %v430_v58 = vld [vmem:[%s4842_s1 + $0xc88] sm:$0xff]  ;;  %v658_v61 = vcombine.high %v27_v50, %v27_v50  ;;  %v4417_v8 = vrot.slane %v27_v50, %v3301_v13 }
  0xb9   :  { %2897 = vmatpush3.bf16.msra.mxu0 %v2896_v36  ;;  %v395_v55 = vld [vmem:[%s4842_s1 + $0xb70] sm:$0xff]  ;;  %v396_v57 = vld [vmem:[%s4842_s1 + $0xb78] sm:$0xff]  ;;  %v461_v59 = vld [vmem:[%s4842_s1 + $0xd80] sm:$0xff]  ;;  %v2904_v62 = vpack.c.bf16 %v364_v33, %v363_v54  ;;  %v2938_v0 = vpack.c.bf16 %v430_v58, %v429_v45 }
  0xba   :  { %2899 = vmatprep.subr.bf16.mxu0 %v2898_v37  ;;  %v462_v60 = vld [vmem:[%s4842_s1 + $0xd88] sm:$0xff]  ;;  %v2936_v63 = vpack.c.bf16 %v396_v57, %v395_v55  ;;  %v413_v1 = vld [vmem:[%s4842_s1 + $0xc00] sm:$0xff]  ;;  %v431_v6 = vld [vmem:[%s4842_s1 + $0xc90] sm:$0xff]  ;;  %v4426_v10 = vrot.slane %v658_v61, %v3301_v13  ;;  %v673_v23 = vcombine.high %v4417_v8, %v4417_v8 }
  0xbb   :  { %2929 = vmatpush3.bf16.msra.mxu1 %v2928_v52  ;;  %v414_v2 = vld [vmem:[%s4842_s1 + $0xc08] sm:$0xff]  ;;  %v445_v3 = vld [vmem:[%s4842_s1 + $0xd00] sm:$0xff]  ;;  %v2970_v4 = vpack.c.bf16 %v462_v60, %v461_v59  ;;  %v432_v7 = vld [vmem:[%s4842_s1 + $0xc98] sm:$0xff] }
  0xbc   :  { %2931 = vmatprep.subr.bf16.mxu1 %v2930_v41  ;;  %v446_v5 = vld [vmem:[%s4842_s1 + $0xd08] sm:$0xff]  ;;  %v463_v9 = vld [vmem:[%s4842_s1 + $0xd90] sm:$0xff]  ;;  %v464_v11 = vld [vmem:[%s4842_s1 + $0xd98] sm:$0xff]  ;;  %v2940_v12 = vpack.c.bf16 %v414_v2, %v413_v1  ;;  %v2942_v15 = vpack.c.bf16 %v432_v7, %v431_v6  ;;  %v674_v26 = vcombine.high %v4426_v10, %v4426_v10 }
  0xbd   :  { %2901 = vmatpush3.bf16.msra.mxu0 %v2900_v49  ;;  %v2972_v14 = vpack.c.bf16 %v446_v5, %v445_v3  ;;  %v415_v16 = vld [vmem:[%s4842_s1 + $0xc10] sm:$0xff]  ;;  %v416_v17 = vld [vmem:[%s4842_s1 + $0xc18] sm:$0xff]  ;;  %v2974_v19 = vpack.c.bf16 %v464_v11, %v463_v9  ;;  %v433_v21 = vld [vmem:[%s4842_s1 + $0xca0] sm:$0xff] }
  0xbe   :  { %2903 = vmatprep.subr.bf16.mxu0 %v2902_v53  ;;  %v447_v18 = vld [vmem:[%s4842_s1 + $0xd10] sm:$0xff]  ;;  %v448_v20 = vld [vmem:[%s4842_s1 + $0xd18] sm:$0xff]  ;;  %v434_v22 = vld [vmem:[%s4842_s1 + $0xca8] sm:$0xff]  ;;  %v2944_v27 = vpack.c.bf16 %v416_v17, %v415_v16 }
  0xbf   :  { %2933 = vmatpush3.bf16.msra.mxu1 %v2932_v51  ;;  %v465_v24 = vld [vmem:[%s4842_s1 + $0xda0] sm:$0xff]  ;;  %v466_v25 = vld [vmem:[%s4842_s1 + $0xda8] sm:$0xff]  ;;  %v2976_v28 = vpack.c.bf16 %v448_v20, %v447_v18  ;;  %v2946_v29 = vpack.c.bf16 %v434_v22, %v433_v21  ;;  %v435_v35 = vld [vmem:[%s4842_s1 + $0xcb0] sm:$0xff] }
  0xc0   :  { %2935 = vmatprep.subr.bf16.mxu1 %v2934_v56  ;;  %v418_v30 = vld [vmem:[%s4842_s1 + $0xc28] sm:$0xff]  ;;  %v449_v32 = vld [vmem:[%s4842_s1 + $0xd20] sm:$0xff]  ;;  %v2978_v42 = vpack.c.bf16 %v466_v25, %v465_v24  ;;  %v436_v36 = vld [vmem:[%s4842_s1 + $0xcb8] sm:$0xff] }
  0xc1   :  { %2905 = vmatpush3.bf16.msra.mxu0 %v2904_v62  ;;  %v467_v52 = vld [vmem:[%s4842_s1 + $0xdb0] sm:$0xff]  ;;  %v468_v37 = vld [vmem:[%s4842_s1 + $0xdb8] sm:$0xff]  ;;  %v2950_v40 = vpack.c.bf16 %v436_v36, %v435_v35  ;;  %v437_v48 = vld [vmem:[%s4842_s1 + $0xcc0] sm:$0xff] }
  0xc2   :  { %2939 = vmatprep.subr.bf16.mxu0 %v2938_v0  ;;  %v419_v41 = vld [vmem:[%s4842_s1 + $0xc30] sm:$0xff]  ;;  %v420_v43 = vld [vmem:[%s4842_s1 + $0xc38] sm:$0xff]  ;;  %v2982_v46 = vpack.c.bf16 %v468_v37, %v467_v52  ;;  %v438_v49 = vld [vmem:[%s4842_s1 + $0xcc8] sm:$0xff] }
  0xc3   :  { %2937 = vmatpush3.bf16.msra.mxu1 %v2936_v63  ;;  %v451_v44 = vld [vmem:[%s4842_s1 + $0xd30] sm:$0xff]  ;;  %v452_v47 = vld [vmem:[%s4842_s1 + $0xd38] sm:$0xff]  ;;  %v469_v50 = vld [vmem:[%s4842_s1 + $0xdc0] sm:$0xff]  ;;  %v2952_v53 = vpack.c.bf16 %v420_v43, %v419_v41  ;;  %v2954_v33 = vpack.c.bf16 %v438_v49, %v437_v48 }
  0xc4   :  { %2971 = vmatprep.subr.bf16.mxu1 %v2970_v4  ;;  %1489 = vmatmul.mubr.f32.vlgmr.msra.gmra.mrb[10].mxu0 %v4210_v31  ;;  %v417_v31 = vld [vmem:[%s4842_s1 + $0xc20] sm:$0xff]  ;;  %v470_v51 = vld [vmem:[%s4842_s1 + $0xdc8] sm:$0xff]  ;;  %v2984_v54 = vpack.c.bf16 %v452_v47, %v451_v44  ;;  %v439_v59 = vld [vmem:[%s4842_s1 + $0xcd0] sm:$0xff] }
  0xc5   :  { %2941 = vmatpush3.bf16.msra.mxu0 %v2940_v12  ;;  %1628 = vmatprep.mubr.f32.mxu0 %v673_v23  ;;  %v2948_v38 = vpack.c.bf16 %v418_v30, %v417_v31  ;;  %v421_v55 = vld [vmem:[%s4842_s1 + $0xc40] sm:$0xff]  ;;  %v422_v56 = vld [vmem:[%s4842_s1 + $0xc48] sm:$0xff]  ;;  %v2986_v45 = vpack.c.bf16 %v470_v51, %v469_v50  ;;  %v440_v60 = vld [vmem:[%s4842_s1 + $0xcd8] sm:$0xff] }
  0xc6   :  { %1559 = vmatmul.mubr.f32.vlgmr.msra.gmra.mrb[10].mxu1 %v4219_v34  ;;  %2943 = vmatprep.subr.bf16.mxu0 %v2942_v15  ;;  %v450_v34 = vld [vmem:[%s4842_s1 + $0xd28] sm:$0xff]  ;;  %v453_v57 = vld [vmem:[%s4842_s1 + $0xd40] sm:$0xff]  ;;  %v471_v61 = vld [vmem:[%s4842_s1 + $0xdd0] sm:$0xff]  ;;  %v2956_v63 = vpack.c.bf16 %v422_v56, %v421_v55  ;;  %v2958_v1 = vpack.c.bf16 %v440_v60, %v439_v59 }
  0xc7   :  { %2973 = vmatpush3.bf16.msra.mxu1 %v2972_v14  ;;  %1698 = vmatprep.mubr.f32.mxu1 %v674_v26  ;;  %v2980_v39 = vpack.c.bf16 %v450_v34, %v449_v32  ;;  %v454_v58 = vld [vmem:[%s4842_s1 + $0xd48] sm:$0xff]  ;;  %v472_v62 = vld [vmem:[%s4842_s1 + $0xdd8] sm:$0xff]  ;;  %v423_v2 = vld [vmem:[%s4842_s1 + $0xc50] sm:$0xff] }
  0xc8   :  { %2975 = vmatprep.subr.bf16.mxu1 %v2974_v19  ;;  %v2988_v0 = vpack.c.bf16 %v454_v58, %v453_v57  ;;  %v424_v3 = vld [vmem:[%s4842_s1 + $0xc58] sm:$0xff]  ;;  %v455_v4 = vld [vmem:[%s4842_s1 + $0xd50] sm:$0xff]  ;;  %v2990_v5 = vpack.c.bf16 %v472_v62, %v471_v61  ;;  %v441_v7 = vld [vmem:[%s4842_s1 + $0xce0] sm:$0xff] }
  0xc9   :  { %2945 = vmatpush3.bf16.msra.mxu0 %v2944_v27  ;;  %v456_v6 = vld [vmem:[%s4842_s1 + $0xd58] sm:$0xff]  ;;  %v442_v9 = vld [vmem:[%s4842_s1 + $0xce8] sm:$0xff]  ;;  %v473_v11 = vld [vmem:[%s4842_s1 + $0xde0] sm:$0xff]  ;;  %v2960_v14 = vpack.c.bf16 %v424_v3, %v423_v2 }
  0xca   :  { %2947 = vmatprep.subr.bf16.mxu0 %v2946_v29  ;;  %v474_v12 = vld [vmem:[%s4842_s1 + $0xde8] sm:$0xff]  ;;  %v2992_v15 = vpack.c.bf16 %v456_v6, %v455_v4  ;;  %v2962_v16 = vpack.c.bf16 %v442_v9, %v441_v7  ;;  %v425_v17 = vld [vmem:[%s4842_s1 + $0xc60] sm:$0xff]  ;;  %v443_v22 = vld [vmem:[%s4842_s1 + $0xcf0] sm:$0xff] }
  0xcb   :  { %2977 = vmatpush3.bf16.msra.mxu1 %v2976_v28  ;;  %v426_v18 = vld [vmem:[%s4842_s1 + $0xc68] sm:$0xff]  ;;  %v457_v19 = vld [vmem:[%s4842_s1 + $0xd60] sm:$0xff]  ;;  %v2994_v20 = vpack.c.bf16 %v474_v12, %v473_v11  ;;  %v444_v23 = vld [vmem:[%s4842_s1 + $0xcf8] sm:$0xff] }
  0xcc   :  { %2979 = vmatprep.subr.bf16.mxu1 %v2978_v42  ;;  %v458_v21 = vld [vmem:[%s4842_s1 + $0xd68] sm:$0xff]  ;;  %v475_v24 = vld [vmem:[%s4842_s1 + $0xdf0] sm:$0xff]  ;;  %v476_v25 = vld [vmem:[%s4842_s1 + $0xdf8] sm:$0xff]  ;;  %v2964_v26 = vpack.c.bf16 %v426_v18, %v425_v17  ;;  %v2966_v29 = vpack.c.bf16 %v444_v23, %v443_v22 }
  0xcd   :  { %2949 = vmatpush3.bf16.msra.mxu0 %v2948_v38  ;;  %v28_v27 = vld [vmem:[%s4841_s0 + $0x38] sm:$0xff]  ;;  %v2996_v28 = vpack.c.bf16 %v458_v21, %v457_v19  ;;  %v427_v31 = vld [vmem:[%s4842_s1 + $0xc70] sm:$0xff]  ;;  %v2998_v42 = vpack.c.bf16 %v476_v25, %v475_v24  ;;  %v493_v35 = vld [vmem:[%s4842_s1 + $0xe80] sm:$0xff] }
  0xce   :  { %2951 = vmatprep.subr.bf16.mxu0 %v2950_v40  ;;  %v428_v30 = vld [vmem:[%s4842_s1 + $0xc78] sm:$0xff]  ;;  %v459_v32 = vld [vmem:[%s4842_s1 + $0xd70] sm:$0xff]  ;;  %v494_v36 = vld [vmem:[%s4842_s1 + $0xe88] sm:$0xff]  ;;  %v675_v38 = vcombine.high %v28_v27, %v28_v27  ;;  %v4624_v51 = vrot.slane %v28_v27, %v3301_v13 }
  0xcf   :  { %2981 = vmatpush3.bf16.msra.mxu1 %v2980_v39  ;;  %v460_v34 = vld [vmem:[%s4842_s1 + $0xd78] sm:$0xff]  ;;  %v525_v52 = vld [vmem:[%s4842_s1 + $0xf80] sm:$0xff]  ;;  %v526_v37 = vld [vmem:[%s4842_s1 + $0xf88] sm:$0xff]  ;;  %v2968_v39 = vpack.c.bf16 %v428_v30, %v427_v31  ;;  %v3002_v41 = vpack.c.bf16 %v494_v36, %v493_v35 }
  0xd0   :  { %2983 = vmatprep.subr.bf16.mxu1 %v2982_v46  ;;  %v3000_v40 = vpack.c.bf16 %v460_v34, %v459_v32  ;;  %v477_v43 = vld [vmem:[%s4842_s1 + $0xe00] sm:$0xff]  ;;  %v478_v44 = vld [vmem:[%s4842_s1 + $0xe08] sm:$0xff]  ;;  %v3034_v47 = vpack.c.bf16 %v526_v37, %v525_v52  ;;  %v495_v49 = vld [vmem:[%s4842_s1 + $0xe90] sm:$0xff] }
  0xd1   :  { %2953 = vmatpush3.bf16.msra.mxu0 %v2952_v53  ;;  %v509_v46 = vld [vmem:[%s4842_s1 + $0xf00] sm:$0xff]  ;;  %v510_v48 = vld [vmem:[%s4842_s1 + $0xf08] sm:$0xff]  ;;  %v496_v50 = vld [vmem:[%s4842_s1 + $0xe98] sm:$0xff]  ;;  %v3004_v55 = vpack.c.bf16 %v478_v44, %v477_v43 }
  0xd2   :  { %2955 = vmatprep.subr.bf16.mxu0 %v2954_v33  ;;  %v527_v53 = vld [vmem:[%s4842_s1 + $0xf90] sm:$0xff]  ;;  %v4633_v33 = vrot.slane %v675_v38, %v3301_v13  ;;  %v3036_v56 = vpack.c.bf16 %v510_v48, %v509_v46  ;;  %v3006_v57 = vpack.c.bf16 %v496_v50, %v495_v49  ;;  %v480_v58 = vld [vmem:[%s4842_s1 + $0xe18] sm:$0xff]  ;;  %v497_v61 = vld [vmem:[%s4842_s1 + $0xea0] sm:$0xff] }
  0xd3   :  { %2985 = vmatpush3.bf16.msra.mxu1 %v2984_v54  ;;  %v528_v54 = vld [vmem:[%s4842_s1 + $0xf98] sm:$0xff]  ;;  %v511_v59 = vld [vmem:[%s4842_s1 + $0xf10] sm:$0xff]  ;;  %v498_v62 = vld [vmem:[%s4842_s1 + $0xea8] sm:$0xff] }
  0xd4   :  { %2987 = vmatprep.subr.bf16.mxu1 %v2986_v45  ;;  %v479_v45 = vld [vmem:[%s4842_s1 + $0xe10] sm:$0xff]  ;;  %v3038_v13 = vpack.c.bf16 %v528_v54, %v527_v53  ;;  %v512_v60 = vld [vmem:[%s4842_s1 + $0xf18] sm:$0xff]  ;;  %v691_v2 = vcombine.high %v4633_v33, %v4633_v33  ;;  %v482_v6 = vld [vmem:[%s4842_s1 + $0xe28] sm:$0xff] }
  0xd5   :  { %2957 = vmatpush3.bf16.msra.mxu0 %v2956_v63  ;;  %v690_v63 = vcombine.high %v4624_v51, %v4624_v51  ;;  %v3008_v3 = vpack.c.bf16 %v480_v58, %v479_v45  ;;  %v3040_v4 = vpack.c.bf16 %v512_v60, %v511_v59  ;;  %v513_v7 = vld [vmem:[%s4842_s1 + $0xf20] sm:$0xff]  ;;  %v499_v11 = vld [vmem:[%s4842_s1 + $0xeb0] sm:$0xff]  ;;  %v500_v12 = vld [vmem:[%s4842_s1 + $0xeb8] sm:$0xff] }
  0xd6   :  { %2959 = vmatprep.subr.bf16.mxu0 %v2958_v1  ;;  %v530_v1 = vld [vmem:[%s4842_s1 + $0xfa8] sm:$0xff]  ;;  %v3014_v18 = vpack.c.bf16 %v500_v12, %v499_v11  ;;  %v483_v19 = vld [vmem:[%s4842_s1 + $0xe30] sm:$0xff]  ;;  %v516_v23 = vld [vmem:[%s4842_s1 + $0xf38] sm:$0xff] }
  0xd7   :  { %2989 = vmatpush3.bf16.msra.mxu1 %v2988_v0  ;;  %v529_v0 = vld [vmem:[%s4842_s1 + $0xfa0] sm:$0xff]  ;;  %v515_v21 = vld [vmem:[%s4842_s1 + $0xf30] sm:$0xff]  ;;  %v502_v25 = vld [vmem:[%s4842_s1 + $0xec8] sm:$0xff] }
  0xd8   :  { %2991 = vmatprep.subr.bf16.mxu1 %v2990_v5  ;;  %v3010_v5 = vpack.c.bf16 %v498_v62, %v497_v61  ;;  %v3042_v9 = vpack.c.bf16 %v530_v1, %v529_v0  ;;  %v501_v24 = vld [vmem:[%s4842_s1 + $0xec0] sm:$0xff]  ;;  %v534_v27 = vld [vmem:[%s4842_s1 + $0xfc8] sm:$0xff]  ;;  %v503_v36 = vld [vmem:[%s4842_s1 + $0xed0] sm:$0xff] }
  0xd9   :  { %2961 = vmatpush3.bf16.msra.mxu0 %v2960_v14  ;;  %v531_v14 = vld [vmem:[%s4842_s1 + $0xfb0] sm:$0xff]  ;;  %v3018_v31 = vpack.c.bf16 %v502_v25, %v501_v24  ;;  %v485_v30 = vld [vmem:[%s4842_s1 + $0xe40] sm:$0xff]  ;;  %v486_v32 = vld [vmem:[%s4842_s1 + $0xe48] sm:$0xff] }
  0xda   :  { %2963 = vmatprep.subr.bf16.mxu0 %v2962_v16  ;;  %v518_v35 = vld [vmem:[%s4842_s1 + $0xf48] sm:$0xff]  ;;  %v504_v52 = vld [vmem:[%s4842_s1 + $0xed8] sm:$0xff]  ;;  %v535_v37 = vld [vmem:[%s4842_s1 + $0xfd0] sm:$0xff] }
  0xdb   :  { %2993 = vmatpush3.bf16.msra.mxu1 %v2992_v15  ;;  %v532_v15 = vld [vmem:[%s4842_s1 + $0xfb8] sm:$0xff]  ;;  %v487_v43 = vld [vmem:[%s4842_s1 + $0xe50] sm:$0xff]  ;;  %v505_v49 = vld [vmem:[%s4842_s1 + $0xee0] sm:$0xff] }
  0xdc   :  { %2995 = vmatprep.subr.bf16.mxu1 %v2994_v20  ;;  %v484_v20 = vld [vmem:[%s4842_s1 + $0xe38] sm:$0xff]  ;;  %v3046_v22 = vpack.c.bf16 %v532_v15, %v531_v14  ;;  %v519_v46 = vld [vmem:[%s4842_s1 + $0xf50] sm:$0xff]  ;;  %v506_v50 = vld [vmem:[%s4842_s1 + $0xee8] sm:$0xff] }
  0xdd   :  { %2965 = vmatpush3.bf16.msra.mxu0 %v2964_v26  ;;  %v533_v26 = vld [vmem:[%s4842_s1 + $0xfc0] sm:$0xff]  ;;  %v536_v38 = vld [vmem:[%s4842_s1 + $0xfd8] sm:$0xff]  ;;  %v538_v54 = vld [vmem:[%s4842_s1 + $0xfe8] sm:$0xff] }
  0xde   :  { %2967 = vmatprep.subr.bf16.mxu0 %v2966_v29  ;;  %v3048_v29 = vpack.c.bf16 %v516_v23, %v515_v21  ;;  %v3050_v34 = vpack.c.bf16 %v534_v27, %v533_v26  ;;  %v488_v44 = vld [vmem:[%s4842_s1 + $0xe58] sm:$0xff]  ;;  %v537_v53 = vld [vmem:[%s4842_s1 + $0xfe0] sm:$0xff]  ;;  %v490_v58 = vld [vmem:[%s4842_s1 + $0xe68] sm:$0xff] }
  0xdf   :  { %2997 = vmatpush3.bf16.msra.mxu1 %v2996_v28  ;;  %v3016_v28 = vpack.c.bf16 %v484_v20, %v483_v19  ;;  %v520_v48 = vld [vmem:[%s4842_s1 + $0xf58] sm:$0xff]  ;;  %v489_v45 = vld [vmem:[%s4842_s1 + $0xe60] sm:$0xff]  ;;  %v3058_v60 = vpack.c.bf16 %v538_v54, %v537_v53  ;;  %v522_v61 = vld [vmem:[%s4842_s1 + $0xf68] sm:$0xff] }
  0xe0   :  { %2999 = vmatprep.subr.bf16.mxu1 %v2998_v42  ;;  %v517_v42 = vld [vmem:[%s4842_s1 + $0xf40] sm:$0xff]  ;;  %v507_v62 = vld [vmem:[%s4842_s1 + $0xef0] sm:$0xff]  ;;  %v492_v12 = vld [vmem:[%s4842_s1 + $0xe78] sm:$0xff] }
  0xe1   :  { %2969 = vmatpush3.bf16.msra.mxu0 %v2968_v39  ;;  %v3020_v39 = vpack.c.bf16 %v486_v32, %v485_v30  ;;  %v521_v59 = vld [vmem:[%s4842_s1 + $0xf60] sm:$0xff]  ;;  %v491_v11 = vld [vmem:[%s4842_s1 + $0xe70] sm:$0xff] }
  0xe2   :  { %3003 = vmatprep.subr.bf16.mxu0 %v3002_v41  ;;  %v3022_v41 = vpack.c.bf16 %v504_v52, %v503_v36  ;;  %v1965_v0 = vld [vmem:[%s4843_s2] ss:$0 sm:$0xff]  ;;  %v3032_v19 = vpack.c.bf16 %v492_v12, %v491_v11  ;;  %v3117_v52 = vmov 0.0|0.0  }
  0xe3   :  { %3001 = vmatpush3.bf16.msra.mxu1 %v3000_v40  ;;  %v3052_v40 = vpack.c.bf16 %v518_v35, %v517_v42 }
  0xe4   :  { %3035 = vmatprep.subr.bf16.mxu1 %v3034_v47  ;;  %1629 = vmatmul.mubr.f32.vlgmr.msra.gmra.mrb[12].mxu0 %v4417_v8  ;;  %v481_v8 = vld [vmem:[%s4842_s1 + $0xe20] sm:$0xff]  ;;  %v3054_v47 = vpack.c.bf16 %v536_v38, %v535_v37  ;;  %v1847_v38 = vld [vmem:[%s4844_s3 + $0x10] sm:$0xff] }
  0xe5   :  { %3005 = vmatpush3.bf16.msra.mxu0 %v3004_v55  ;;  %1768 = vmatprep.mubr.f32.mxu0 %v690_v63  ;;  %v3012_v16 = vpack.c.bf16 %v482_v6, %v481_v8  ;;  %v3024_v55 = vpack.c.bf16 %v488_v44, %v487_v43  ;;  %v508_v63 = vld [vmem:[%s4842_s1 + $0xef8] sm:$0xff]  ;;  %v3028_v6 = vpack.c.bf16 %v490_v58, %v489_v45 }
  0xe6   :  { %1699 = vmatmul.mubr.f32.vlgmr.msra.gmra.mrb[12].mxu1 %v4426_v10  ;;  %3007 = vmatprep.subr.bf16.mxu0 %v3006_v57  ;;  %v514_v10 = vld [vmem:[%s4842_s1 + $0xf28] sm:$0xff]  ;;  %v3026_v57 = vpack.c.bf16 %v506_v50, %v505_v49 }
  0xe7   :  { %3037 = vmatpush3.bf16.msra.mxu1 %v3036_v56  ;;  %1838 = vmatprep.mubr.f32.mxu1 %v691_v2  ;;  %v3044_v17 = vpack.c.bf16 %v514_v10, %v513_v7  ;;  %v3056_v56 = vpack.c.bf16 %v520_v48, %v519_v46  ;;  %v3030_v10 = vpack.c.bf16 %v508_v63, %v507_v62  ;;  %v1849_v48 = vld [vmem:[%s4844_s3 + $0x20] sm:$0xff]  ;;  %v1850_v49 = vld [vmem:[%s4844_s3 + $0x28] sm:$0xff] }
  0xe8   :  { %3039 = vmatprep.subr.bf16.mxu1 %v3038_v13  ;;  %v3073_v53 = vpack.c.bf16 %v1850_v49, %v1849_v48 }
  0xe9   :  { %3009 = vmatpush3.bf16.msra.mxu0 %v3008_v3  ;;  %v539_v3 = vld [vmem:[%s4842_s1 + $0xff0] sm:$0xff] }
  0xea   :  { %3011 = vmatprep.subr.bf16.mxu0 %v3010_v5 }
  0xeb   :  { %3041 = vmatpush3.bf16.msra.mxu1 %v3040_v4  ;;  %v540_v4 = vld [vmem:[%s4842_s1 + $0xff8] sm:$0xff] }
  0xec   :  { %3043 = vmatprep.subr.bf16.mxu1 %v3042_v9  ;;  %v3060_v9 = vpack.c.bf16 %v522_v61, %v521_v59  ;;  %v3062_v15 = vpack.c.bf16 %v540_v4, %v539_v3 }
  0xed   :  { %3013 = vmatpush3.bf16.msra.mxu0 %v3012_v16  ;;  %v523_v16 = vld [vmem:[%s4842_s1 + $0xf70] sm:$0xff] }
  0xee   :  { %3015 = vmatprep.subr.bf16.mxu0 %v3014_v18 }
  0xef   :  { %3045 = vmatpush3.bf16.msra.mxu1 %v3044_v17  ;;  %v524_v17 = vld [vmem:[%s4842_s1 + $0xf78] sm:$0xff] }
  0xf0   :  { %3047 = vmatprep.subr.bf16.mxu1 %v3046_v22  ;;  %v3064_v20 = vpack.c.bf16 %v524_v17, %v523_v16 }
  0xf1   :  { %3017 = vmatpush3.bf16.msra.mxu0 %v3016_v28 }
  0xf2   :  { %3019 = vmatprep.subr.bf16.mxu0 %v3018_v31 }
  0xf3   :  { %3049 = vmatpush3.bf16.msra.mxu1 %v3048_v29 }
  0xf4   :  { %3051 = vmatprep.subr.bf16.mxu1 %v3050_v34 }
  0xf5   :  { %3021 = vmatpush3.bf16.msra.mxu0 %v3020_v39  ;;  %v1848_v39 = vld [vmem:[%s4844_s3 + $0x18] sm:$0xff] }
  0xf6   :  { %3023 = vmatprep.subr.bf16.mxu0 %v3022_v41 }
  0xf7   :  { %3053 = vmatpush3.bf16.msra.mxu1 %v3052_v40  ;;  %v2001_v13 = vpop.f32.mrb[0].mxu0  ;;  %v3070_v40 = vpack.c.bf16 %v1848_v39, %v1847_v38 }
  0xf8   :  { %3055 = vmatprep.subr.bf16.mxu1 %v3054_v47  ;;  %v2002_v1 = vpop.f32.mrb[1].mxu0 }
  0xf9   :  { %v2036_v2 = vpop.f32.mrb[0].mxu1  ;;  %v2003_v5 = vadd.f32 %v2002_v1, %v2001_v13  ;;  %3025 = vmatpush3.bf16.msra.mxu0 %v3024_v55 }
  0xfa   :  { %v2037_v8 = vpop.f32.mrb[1].mxu1  ;;  %3027 = vmatprep.subr.bf16.mxu0 %v3026_v57  ;;  %v1851_v57 = vld [vmem:[%s4844_s3 + $0x30] sm:$0x3] }
  0xfb   :  { %v2038_v7 = vadd.f32 %v2037_v8, %v2036_v2  ;;  %3057 = vmatpush3.bf16.msra.mxu1 %v3056_v56  ;;  %v791_v14 = vadd.f32 %v2003_v5, %v1965_v0  ;;  %v3118_v56 = vmov 0.0  }
  0xfc   :  { %3059 = vmatprep.subr.bf16.mxu1 %v3058_v60 }
  0xfd   :  { %v861_v18 = vadd.f32 %v2038_v7, %v791_v14  ;;  %3029 = vmatpush3.bf16.msra.mxu0 %v3028_v6 }
  0xfe   :  { %3031 = vmatprep.subr.bf16.mxu0 %v3030_v10 }
  0xff   :  { %3061 = vmatpush3.bf16.msra.mxu1 %v3060_v9 }
 0x100   :  { %3063 = vmatprep.subr.bf16.mxu1 %v3062_v15 }
 0x101   :  { %3033 = vmatpush3.bf16.msra.mxu0 %v3032_v19 }
 0x102   :  { %3066 = vmatprep.subr.bf16.mxu0 %v3117_v52 }
 0x103   :  { %3065 = vmatpush3.bf16.msra.mxu1 %v3064_v20 }
 0x104   :  { %1769 = vmatmul.mubr.f32.vlgmr.msra.gmra.mrb[14].mxu0 %v4624_v51  ;;  %v1845_v51 = vld [vmem:[%s4844_s3] sm:$0xff] }
 0x105   :  { %2551 = vmatprep.mubr.msk.f32.mxu0 %vm3119_vm1, %v3118_v56 }
 0x106   :  { %1839 = vmatmul.mubr.f32.vlgmr.msra.gmra.mrb[14].mxu1 %v4633_v33  ;;  %v1846_v33 = vld [vmem:[%s4844_s3 + $0x8] sm:$0xff] }
 0x107   :  { %v3067_v37 = vpack.c.bf16 %v1846_v33, %v1845_v51 }
 0x109   :  { %3068 = vmatpush3.bf16.msra.mxu0 %v3067_v37 }
 0x10a   :  { %3069 = vmatprep.subr.bf16.mxu0 %v3117_v52 }
 0x10d   :  { %3071 = vmatpush3.bf16.msra.mxu0 %v3070_v40 }
 0x10e   :  { %3072 = vmatprep.subr.bf16.mxu0 %v3117_v52 }
 0x111   :  { %3074 = vmatpush3.bf16.msra.mxu0 %v3073_v53 }
 0x112   :  { %2549 = vmatprep.subr.mxu0 %v3118_v56 }
 0x115   :  { %2550 = vmatpush3.msk.msra.mxu0 %vm1863_vm0, %v1851_v57 }
 0x117   :  { %v2071_v21 = vpop.f32.mrb[2].mxu0 }
 0x118   :  { %v2072_v22 = vpop.f32.mrb[3].mxu0 }
 0x119   :  { %v2106_v23 = vpop.f32.mrb[2].mxu1  ;;  %v2073_v24 = vadd.f32 %v2072_v22, %v2071_v21 }
 0x11a   :  { %v2107_v25 = vpop.f32.mrb[3].mxu1 }
 0x11b   :  { %v2108_v26 = vadd.f32 %v2107_v25, %v2106_v23  ;;  %v931_v27 = vadd.f32 %v2073_v24, %v861_v18 }
 0x11d   :  { %v1001_v28 = vadd.f32 %v2108_v26, %v931_v27  ;;  %v1966_v26 = vld [vmem:[%s4845_s4] ss:$0 sm:$0xff]  ;;  %s1957_s4 = sshll.u32 %s3120_s17, 4  ;;  %s1958_s4 = int_to_ptr.vmem [resolvable:$true] %s1957_s4 }
 0x11e   :  { %s3092_s18 = scalar_lea.vmem %s1958_s4, 32  ;;  %p3097_p1 = scmp.lt.s32.totalorder %s1958_s4, %s1958_s4 }
 0x11f   :  { %p3093_p0 = scmp.ne.s32.totalorder %s1958_s4, %s3092_s18  ;;  %p3098_p2 = scmp.lt.s32.totalorder %s3092_s18, %s3092_s18 }
 0x121   :  { %p3099_p3 = por %p3098_p2, %p3097_p1 }
 0x123   :  { %p3100_p4 = pnand %p3099_p3, %p3093_p0 }
 0x137   :  { %v2141_v29 = vpop.f32.mrb[4].mxu0 }
 0x138   :  { %v2142_v31 = vpop.f32.mrb[5].mxu0 }
 0x139   :  { %v2176_v30 = vpop.f32.mrb[4].mxu1  ;;  %v2143_v32 = vadd.f32 %v2142_v31, %v2141_v29 }
 0x13a   :  { %v2177_v42 = vpop.f32.mrb[5].mxu1 }
 0x13b   :  { %v2178_v34 = vadd.f32 %v2177_v42, %v2176_v30  ;;  %v1071_v35 = vadd.f32 %v2143_v32, %v1001_v28 }
 0x13d   :  { %v1141_v36 = vadd.f32 %v2178_v34, %v1071_v35 }
 0x157   :  { %v2211_v41 = vpop.f32.mrb[6].mxu0 }
 0x158   :  { %v2212_v43 = vpop.f32.mrb[7].mxu0 }
 0x159   :  { %v2246_v44 = vpop.f32.mrb[6].mxu1  ;;  %v2213_v46 = vadd.f32 %v2212_v43, %v2211_v41 }
 0x15a   :  { %v2247_v47 = vpop.f32.mrb[7].mxu1 }
 0x15b   :  { %v2248_v50 = vadd.f32 %v2247_v47, %v2246_v44  ;;  %v1211_v54 = vadd.f32 %v2213_v46, %v1141_v36 }
 0x15d   :  { %v1281_v55 = vadd.f32 %v2248_v50, %v1211_v54 }
 0x177   :  { %v2281_v45 = vpop.f32.mrb[8].mxu0 }
 0x178   :  { %v2282_v58 = vpop.f32.mrb[9].mxu0 }
 0x179   :  { %v2316_v59 = vpop.f32.mrb[8].mxu1  ;;  %v2283_v13 = vadd.f32 %v2282_v58, %v2281_v45 }
 0x17a   :  { %v2317_v60 = vpop.f32.mrb[9].mxu1 }
 0x17b   :  { %v2318_v61 = vadd.f32 %v2317_v60, %v2316_v59  ;;  %v1351_v62 = vadd.f32 %v2283_v13, %v1281_v55 }
 0x17d   :  { %v1421_v63 = vadd.f32 %v2318_v61, %v1351_v62 }
 0x197   :  { %v2351_v0 = vpop.f32.mrb[10].mxu0 }
 0x198   :  { %v2352_v1 = vpop.f32.mrb[11].mxu0 }
 0x199   :  { %v2386_v2 = vpop.f32.mrb[10].mxu1  ;;  %v2353_v3 = vadd.f32 %v2352_v1, %v2351_v0 }
 0x19a   :  { %v2387_v4 = vpop.f32.mrb[11].mxu1 }
 0x19b   :  { %v2388_v5 = vadd.f32 %v2387_v4, %v2386_v2  ;;  %v1491_v8 = vadd.f32 %v2353_v3, %v1421_v63 }
 0x19d   :  { %v1561_v6 = vadd.f32 %v2388_v5, %v1491_v8 }
 0x1b7   :  { %v2421_v7 = vpop.f32.mrb[12].mxu0 }
 0x1b8   :  { %v2422_v9 = vpop.f32.mrb[13].mxu0 }
 0x1b9   :  { %v2456_v10 = vpop.f32.mrb[12].mxu1  ;;  %v2423_v11 = vadd.f32 %v2422_v9, %v2421_v7 }
 0x1ba   :  { %v2457_v12 = vpop.f32.mrb[13].mxu1 }
 0x1bb   :  { %v2458_v14 = vadd.f32 %v2457_v12, %v2456_v10  ;;  %v1631_v15 = vadd.f32 %v2423_v11, %v1561_v6 }
 0x1bd   :  { %v1701_v16 = vadd.f32 %v2458_v14, %v1631_v15 }
 0x1d7   :  { %v2491_v17 = vpop.f32.mrb[14].mxu0 }
 0x1d8   :  { %v2492_v18 = vpop.f32.mrb[15].mxu0 }
 0x1d9   :  { %v2526_v19 = vpop.f32.mrb[14].mxu1  ;;  %v2493_v20 = vadd.f32 %v2492_v18, %v2491_v17 }
 0x1da   :  { %v2527_v21 = vpop.f32.mrb[15].mxu1 }
 0x1db   :  { %v2528_v22 = vadd.f32 %v2527_v21, %v2526_v19  ;;  %v1771_v23 = vadd.f32 %v2493_v20, %v1701_v16 }
 0x1dd   :  { %v1841_v24 = vadd.f32 %v2528_v22, %v1771_v23 }
 0x1df   :  { %v1844_v25 = vmax.f32 %v1841_v24, 0.0 }
 0x1e1   :  { %2552 = vmatmul.mubr.msk.f32.vlgmr.msra.gmra.mrb[16].mxu0 %vm1859_vm2, %v1844_v25 }
 0x2b4   :  { %v1933_v27 = vpop.f32.mrb[16].mxu0 }
 0x2b5   :  { %v1934_v28 = vadd.f32 %v1966_v26, %v1933_v27  ;;  %v2553_v29 = vpop.f32.mrb[17].mxu0 }
 0x2b7   :  { %v1938_v31 = vsel %vm1937_vm3, %v1934_v28, -inf }
 0x2b8   :  { %1939 = vmax.xlane.f32.xlu0 %v1938_v31 }
 0x345   :  { %v1940_v30 = vpop.xlane.xlu0 %1939 }
 0x346   :  { %v1941_v32 = vsub.f32 %v1934_v28, %v1940_v30 }
 0x348   :  { %v1942_v42 = vmul.f32 1.442695, %v1941_v32 }
 0x34a   :  { %3088 = vpow2.f32 %v1942_v42 }
 0x354   :  { %v3089_v34 = vpop.eup %3088 }
 0x355   :  { %v1944_v35 = vsel %vm1937_vm3, %v3089_v34, 0.0 }
 0x356   :  { %1945 = vadd.xlane.f32.xlu0 %v1944_v35 }
 0x3e3   :  { %v1946_v36 = vpop.xlane.xlu0 %1945 }
 0x3e4   :  { %3090 = vlog2.f32 %v1946_v36 }
 0x3ee   :  { %v3091_v51 = vpop.eup %3090 }
 0x3ef   :  { %v1948_v33 = vmul.f32 0.6931472, %v3091_v51 }
 0x3f1   :  { %v1949_v52 = vsub.f32 %v1941_v32, %v1948_v33 }
 0x3f3   :  { %1950 = vst.msk [vmem:[#allocation2] sm:$0x3] %vm1937_vm3, %v1949_v52 }
 0x3f4   :  { %3103 = shalt.err (!%p3100_p4)
}
 0x3f5   :  { %s3104_s21 = scalar_lea.hbm %s4846_s5, 32 }
 0x3f6   :  { %p3105_p5 = scmp.ne.s32.totalorder %s4846_s5, %s3104_s21  ;;  %p3108_p6 = scmp.lt.u32.totalorder %s3104_s21, %s4846_s5 }
 0x3f8   :  { %p3110_p7 = pnand %p3108_p6, %p3105_p5 }
 0x3fa   :  { %3113 = shalt.err (!%p3110_p7)
}
 0x3fb   :  { %1960 = dma.vmem_to_hbm [thread:$0]  %s1958_s4, 32, %s4846_s5, [#allocation3]  }
 0x3fc   :  { %3114 = dma.done.wait [#allocation3], 32  }
 0x3fd   :  { %3115 = vsyncadd [#allocation3], 4294967264 }
 0x3fe   :  { %1964 = vsyncpa [#allocation3], 1 }

</bundles_post_ra>
